<compile_context>
chip_gen: v5e
topology: v5e:2x2
jax: 0.10.0
libtpu: 0.0.40
codegen_flags: <defaults>
</compile_context>

<pallas_src>
import functools
from typing import NamedTuple

import numpy as np
import jax
import jax.numpy as jnp
from jax import lax
from jax.experimental import pallas as pl
from jax.experimental.pallas import tpu as pltpu


# ----------------------------- parameter construction (mirrors the torch __init__) ---------
def get_window_fn(window):
    w = np.cos(2 * np.pi * np.arange(window) / window)
    w = 25 / 46 - 21 / 46 * w
    return w[np.newaxis, :]


def make_bases(segment_length, filter_length):
    fourier_basis = np.fft.fft(np.eye(filter_length))
    cutoff = filter_length // 2 + 1
    fourier_basis = np.vstack(
        [np.real(fourier_basis[:cutoff, :]), np.imag(fourier_basis[:cutoff, :])]
    )
    fourier_basis[:, segment_length:] = 0
    fourier_basis[:, :segment_length] *= get_window_fn(segment_length)
    fourier_basis /= np.sqrt(filter_length * segment_length)
    forward_basis = fourier_basis.astype(np.float32)                      # (2C, F)
    inverse_basis = np.linalg.pinv(fourier_basis).T.astype(np.float32)    # (2C, F)
    return forward_basis, inverse_basis


def _round_up(v, m):
    return ((v + m - 1) // m) * m


def _cdiv(a, b):
    return -(-a // b)


class _Plan(NamedTuple):
    T: int
    T_tile: int
    num_t: int
    W: int
    win_pad: int
    carry_len: int
    c_pad: int
    L_grand: int
    ns_out: int
    bf: jax.Array      # (F, 2*c_pad) bf16 forward basis (real|imag, lane padded)
    bi: jax.Array      # (2*c_pad, F) bf16 inverse basis
    invw: jax.Array    # (num_t, 1, W) f32 reciprocal overlap weights


@functools.lru_cache(maxsize=None)
def _stft_plan(segment_length, filter_length, hop_length, num_samples):
    F_len = filter_length
    hop = hop_length
    C = filter_length // 2 + 1
    c_pad = _round_up(C, 128)                    # 257 -> 384 (lane-aligned real/imag split)
    c2 = 2 * c_pad

    pad_amount = hop + filter_length - segment_length
    L_in = num_samples + pad_amount
    T = (L_in - filter_length) // hop + 1
    ns_out = (T - 1) * hop + segment_length

    # 8-row modulo OLA requires frames 8 apart to never overlap.
    assert 8 * hop >= filter_length, "OLA modulo scratch needs 8*hop >= filter_length"

    # T_tile: multiple of 8 (keeps the per-tile output span W = T_tile*hop 128-aligned for
    # hop=80), capped at 256 to fill the MXU M dimension; split so there are >= 2 t-steps.
    T_tile = min(256, _round_up(max(8, (T + 7) // 2), 8))
    num_t = max(2, _cdiv(T + 6, T_tile))         # guarantees num_t*T_tile*hop >= (T-1)*hop + F
    W = T_tile * hop                             # per-tile owned output span
    win = (T_tile - 1) * hop + F_len             # per-tile OLA window
    win_pad = _round_up(win, 128)
    carry_len = win_pad - W                      # spill into the next tile's owned block
    assert 0 < carry_len < W

    L_grand = max(num_samples, (num_t - 1) * W + win_pad)

    forward_basis, inverse_basis = make_bases(segment_length, filter_length)

    # concatenated, lane-padded bases as bf16 MXU operands (padded columns/rows are zero)
    bf_np = np.zeros((F_len, c2), np.float32)
    bf_np[:, :C] = forward_basis[:C].T                   # real rows
    bf_np[:, c_pad:c_pad + C] = forward_basis[C:].T      # imag rows
    bi_np = np.zeros((c2, F_len), np.float32)
    bi_np[:C, :] = inverse_basis[:C]
    bi_np[c_pad:c_pad + C, :] = inverse_basis[C:]
    bf = jnp.asarray(bf_np).astype(jnp.bfloat16)
    bi = jnp.asarray(bi_np).astype(jnp.bfloat16)

    # data-independent overlap-count normalization, as a reciprocal blocked per output tile
    l_norm = num_t * W
    w = np.zeros(l_norm + filter_length + 1, np.float64)
    starts = np.arange(T) * hop
    np.add.at(w, starts, 1.0)
    np.add.at(w, starts + segment_length, -1.0)
    w = np.cumsum(w)[:l_norm]
    w[w <= 1.0] = 1.0
    invw = jnp.asarray((1.0 / w).astype(np.float32).reshape(num_t, 1, W))

    return _Plan(T, T_tile, num_t, W, win_pad, carry_len, c_pad, L_grand, ns_out, bf, bi, invw)


# ----------------------------- fused Pallas kernel ------------------------------------------
def _stft_fused_kernel(x_ref, bf_ref, bi_ref, invw_ref, out_ref, ola_ref, carry_ref,
                       *, T, T_tile, F, hop, c_pad, eps, W, win_pad, carry_len):
    # x_ref:    (1, 1, 1, win_pad) f32 signal chunk for this (batch, t-tile)
    # bf_ref:   (F, 2*c_pad) bf16     bi_ref: (2*c_pad, F) bf16
    # invw_ref: (1, 1, W) f32         out_ref: (1, 1, 1, W) f32
    # ola_ref:  (8, win_pad) f32 scratch   carry_ref: (1, carry_len) f32 scratch
    t_idx = pl.program_id(1)

    # new batch row: reset the cross-tile overlap-add carry
    @pl.when(t_idx == 0)
    def _():
        carry_ref[...] = jnp.zeros_like(carry_ref)

    x_chunk = x_ref[...].reshape(1, win_pad)                                # (1, win_pad)

    # in-kernel im2col: T_tile overlapping frames at static offsets inside the chunk
    frames = jnp.concatenate(
        [x_chunk[:, j * hop:j * hop + F] for j in range(T_tile)], axis=0)   # (T_tile, F) f32

    # zero frames past the true frame count T (they only exist because of T-tile padding)
    g = t_idx * T_tile + lax.broadcasted_iota(jnp.int32, (T_tile, 1), 0)
    frames = (frames * (g < T).astype(frames.dtype)).astype(jnp.bfloat16)

    # forward transform: fused real|imag matmul on the MXU (bf16 in, f32 accumulate)
    y = jnp.dot(frames, bf_ref[...], preferred_element_type=jnp.float32)    # (T_tile, 2*c_pad)
    r = y[:, :c_pad]
    i = y[:, c_pad:]

    # clamp(|z|, eps) * {cos, sin}(atan2(i, r))  ==  {r, i} * max(1, eps / |z|)
    scale = jnp.maximum(1.0, eps * lax.rsqrt(jnp.maximum(r * r + i * i, 1e-30)))
    rec = jnp.concatenate([r * scale, i * scale], axis=1).astype(jnp.bfloat16)

    # inverse transform (conv_transpose weights as a matmul)
    contrib = jnp.dot(rec, bi_ref[...], preferred_element_type=jnp.float32)  # (T_tile, F)

    # overlap-add into an 8-row modulo scratch: same-row frames are 8*hop >= F apart,
    # so the per-frame stores are independent (no RMW chain), then one sublane reduce.
    ola_ref[...] = jnp.zeros_like(ola_ref)
    for j in range(T_tile):                                   # static unroll
        ola_ref[j % 8:j % 8 + 1, j * hop:j * hop + F] = contrib[j:j + 1, :]
    tile_sum = jnp.sum(ola_ref[...], axis=0, keepdims=True)                  # (1, win_pad)

    # this step's owned output block = its own OLA head + previous tile's spill (carry)
    head_lead = tile_sum[:, :carry_len] + carry_ref[...]
    if carry_len < W:
        head = jnp.concatenate([head_lead, tile_sum[:, carry_len:W]], axis=1)
    else:
        head = head_lead
    carry_ref[...] = tile_sum[:, W:W + carry_len]             # spill for the next t-step

    out_ref[...] = (head * invw_ref[...].reshape(1, W)).reshape(1, 1, 1, W)


# ----------------------------- wrapper -------------------------------------------------------
def _build_stft_call(plan, filter_length, hop_length, eps, B, single_buffer_consts):
    c2 = 2 * plan.c_pad

    def const_spec(shape):
        if single_buffer_consts:
            return pl.BlockSpec(shape, lambda b, t: (0, 0), pipeline_mode=pl.Buffered(1))
        return pl.BlockSpec(shape, lambda b, t: (0, 0))

    kernel = functools.partial(
        _stft_fused_kernel, T=plan.T, T_tile=plan.T_tile, F=filter_length, hop=hop_length,
        c_pad=plan.c_pad, eps=eps, W=plan.W, win_pad=plan.win_pad, carry_len=plan.carry_len)

    return pl.pallas_call(
        kernel,
        out_shape=jax.ShapeDtypeStruct((B, plan.num_t, 1, plan.W), jnp.float32),
        grid=(B, plan.num_t),
        in_specs=[
            pl.BlockSpec((1, 1, 1, plan.win_pad), lambda b, t: (b, t, 0, 0)),
            const_spec((filter_length, c2)),
            const_spec((c2, filter_length)),
            pl.BlockSpec((1, 1, plan.W), lambda b, t: (t, 0, 0)),
        ],
        out_specs=pl.BlockSpec((1, 1, 1, plan.W), lambda b, t: (b, t, 0, 0)),
        scratch_shapes=[
            pltpu.VMEM((8, plan.win_pad), jnp.float32),
            pltpu.VMEM((1, plan.carry_len), jnp.float32),
        ],
        compiler_params=pltpu.CompilerParams(
            dimension_semantics=("parallel", "arbitrary")),
    )


def stft_forward(x, segment_length=400, filter_length=512, hop_length=80, eps=1e-8):
    x = jnp.asarray(x, jnp.float32)
    B, num_samples = x.shape
    plan = _stft_plan(segment_length, filter_length, hop_length, num_samples)

    # host-side tile chunking: each t-step streams only the (overlapping) chunk it needs
    xp = jnp.pad(x, ((0, 0), (0, plan.L_grand - num_samples)))
    chunks = jnp.stack(
        [xp[:, t * plan.W:t * plan.W + plan.win_pad] for t in range(plan.num_t)],
        axis=1)[:, :, None, :]                                   # (B, num_t, 1, win_pad)

    try:
        call = _build_stft_call(plan, filter_length, hop_length, eps, B,
                                single_buffer_consts=True)
        out = call(chunks, plan.bf, plan.bi, plan.invw)
    except Exception:
        # pl.Buffered / pipeline_mode not available on this jax version: double-buffer consts
        call = _build_stft_call(plan, filter_length, hop_length, eps, B,
                                single_buffer_consts=False)
        out = call(chunks, plan.bf, plan.bi, plan.invw)

    return out.reshape(B, plan.num_t * plan.W)[:, :plan.ns_out]   # (B, ns_out)


# ----------------------------- numpy reference (float64 math, float32 params) ---------------
def stft_forward_reference(x, segment_length=400, filter_length=512, hop_length=80, eps=1e-8):
    forward_basis, inverse_basis = make_bases(segment_length, filter_length)
    fb = forward_basis.astype(np.float64)
    ib = inverse_basis.astype(np.float64)
    x = np.asarray(x, np.float64)
    B, num_samples = x.shape
    C = filter_length // 2 + 1
    pad_amount = hop_length + filter_length - segment_length
    xp = np.pad(x, ((0, 0), (0, pad_amount)))
    T = (xp.shape[1] - filter_length) // hop_length + 1
    frames = np.stack([xp[:, t * hop_length:t * hop_length + filter_length]
                       for t in range(T)], axis=1)                        # (B, T, F)
    ft = frames @ fb.T                                                    # (B, T, 2C)
    real, imag = ft[..., :C], ft[..., C:]
    mag = np.maximum(np.sqrt(real ** 2 + imag ** 2), eps)
    ph = np.arctan2(imag, real)
    rec = np.concatenate([mag * np.cos(ph), mag * np.sin(ph)], axis=-1)   # (B, T, 2C)
    contrib = rec @ ib                                                    # (B, T, F)
    l_out = (T - 1) * hop_length + filter_length
    out = np.zeros((B, l_out))
    w = np.zeros(l_out)
    for t in range(T):
        out[:, t * hop_length:t * hop_length + filter_length] += contrib[:, t]
        w[t * hop_length:t * hop_length + segment_length] += 1.0
    w[w <= 1] = 1.0
    out = out / w[None, :]
    ns = (T - 1) * hop_length + segment_length
    return out[:, :ns]


# ----------------------------- main ----------------------------------------------------------
if __name__ == "__main__":
    SEGMENT, FILTER, HOP, EPS = 400, 512, 80, 1e-8
    B, NUM_SAMPLES = 2, 800

    key = jax.random.PRNGKey(0)
    x = jax.random.normal(key, (B, NUM_SAMPLES), dtype=jnp.float32)

    recon = stft_forward(x, SEGMENT, FILTER, HOP, EPS)
    recon = jax.block_until_ready(recon)
    recon_np = np.asarray(recon)

    ref = stft_forward_reference(np.asarray(x), SEGMENT, FILTER, HOP, EPS)

    assert recon_np.shape == ref.shape, (recon_np.shape, ref.shape)
    assert np.isfinite(recon_np).all()
    rel_err = np.max(np.abs(recon_np - ref)) / (np.max(np.abs(ref)) + 1e-12)
    assert rel_err < 5e-2, f"relative error too large: {rel_err}"

    print("KERNEL_OK")
</pallas_src>

<mosaic_0001>
module attributes {stable_mosaic.version = 11 : i64} {
  func.func @_stft_fused_kernel(%arg0: i32, %arg1: i32, %arg2: memref<1x1x1x1152xf32, #tpu.memory_space<vmem>>, %arg3: memref<512x768xbf16, #tpu.memory_space<vmem>>, %arg4: memref<768x512xbf16, #tpu.memory_space<vmem>>, %arg5: memref<1x1x640xf32, #tpu.memory_space<vmem>>, %arg6: memref<1x1x1x640xf32, #tpu.memory_space<vmem>>, %arg7: memref<8x1152xf32, #tpu.memory_space<vmem>>, %arg8: memref<1x512xf32, #tpu.memory_space<vmem>>) attributes {dimension_semantics = [#tpu.dimension_semantics<parallel>, #tpu.dimension_semantics<arbitrary>], iteration_bounds = array<i64: 2, 2>, scalar_prefetch = 0 : i64, scratch_operands = 2 : i64, tpu.core_type = #tpu.core_type<tc>, window_params = [{transform_indices = @transform_0, window_bounds = array<i64: 1, 1, 1, 1152>}, {pipeline_mode = #tpu.pipeline_mode<synchronous>, transform_indices = @transform_1, window_bounds = array<i64: 512, 768>}, {pipeline_mode = #tpu.pipeline_mode<synchronous>, transform_indices = @transform_2, window_bounds = array<i64: 768, 512>}, {transform_indices = @transform_3, window_bounds = array<i64: 1, 1, 640>}, {transform_indices = @transform_4, window_bounds = array<i64: 1, 1, 1, 640>}]} {
    %c0_i32 = arith.constant 0 : i32
    %0 = arith.cmpi eq, %arg1, %c0_i32 : i32
    %1 = arith.extui %0 : i1 to i32
    %c0_i32_0 = arith.constant 0 : i32
    %2 = arith.cmpi ne, %1, %c0_i32_0 : i32
    scf.if %2 {
      %cst_31 = arith.constant 0.000000e+00 : f32
      %78 = vector.broadcast %cst_31 : f32 to vector<1x512xf32>
      %c0_32 = arith.constant 0 : index
      %c0_33 = arith.constant 0 : index
      %79 = vector.load %arg8[%c0_32, %c0_33] : memref<1x512xf32, #tpu.memory_space<vmem>>, vector<1x512xf32>
      tpu.vector_store %arg8[%c0_32, %c0_33], %78 {strides = array<i32>} : memref<1x512xf32, #tpu.memory_space<vmem>>, vector<1x512xf32>,
    } else {
    }
    %c0 = arith.constant 0 : index
    %c0_1 = arith.constant 0 : index
    %c0_2 = arith.constant 0 : index
    %c0_3 = arith.constant 0 : index
    %3 = vector.load %arg2[%c0, %c0_1, %c0_2, %c0_3] : memref<1x1x1x1152xf32, #tpu.memory_space<vmem>>, vector<1x1x1x1152xf32>
    %4 = vector.shape_cast %3 : vector<1x1x1x1152xf32> to vector<1x1152xf32>
    %5 = vector.extract_strided_slice %4 {offsets = [0, 0], sizes = [1, 512], strides = [1, 1]} : vector<1x1152xf32> to vector<1x512xf32>
    %6 = vector.extract_strided_slice %4 {offsets = [0, 80], sizes = [1, 512], strides = [1, 1]} : vector<1x1152xf32> to vector<1x512xf32>
    %7 = vector.extract_strided_slice %4 {offsets = [0, 160], sizes = [1, 512], strides = [1, 1]} : vector<1x1152xf32> to vector<1x512xf32>
    %8 = vector.extract_strided_slice %4 {offsets = [0, 240], sizes = [1, 512], strides = [1, 1]} : vector<1x1152xf32> to vector<1x512xf32>
    %9 = vector.extract_strided_slice %4 {offsets = [0, 320], sizes = [1, 512], strides = [1, 1]} : vector<1x1152xf32> to vector<1x512xf32>
    %10 = vector.extract_strided_slice %4 {offsets = [0, 400], sizes = [1, 512], strides = [1, 1]} : vector<1x1152xf32> to vector<1x512xf32>
    %11 = vector.extract_strided_slice %4 {offsets = [0, 480], sizes = [1, 512], strides = [1, 1]} : vector<1x1152xf32> to vector<1x512xf32>
    %12 = vector.extract_strided_slice %4 {offsets = [0, 560], sizes = [1, 512], strides = [1, 1]} : vector<1x1152xf32> to vector<1x512xf32>
    %13 = tpu.concatenate %5, %6, %7, %8, %9, %10, %11, %12 in 0 : vector<1x512xf32>, vector<1x512xf32>, vector<1x512xf32>, vector<1x512xf32>, vector<1x512xf32>, vector<1x512xf32>, vector<1x512xf32>, vector<1x512xf32> -> vector<8x512xf32>
    %c8_i32 = arith.constant 8 : i32
    %14 = arith.muli %arg1, %c8_i32 : i32
    %15 = tpu.iota {dimensions = array<i32: 0>} : vector<8x1xi32>
    %16 = vector.broadcast %14 : i32 to vector<8x1xi32>
    %17 = arith.addi %16, %15 : vector<8x1xi32>
    %c7_i32 = arith.constant 7 : i32
    %18 = vector.broadcast %c7_i32 : i32 to vector<8x1xi32>
    %19 = arith.cmpi slt, %17, %18 : vector<8x1xi32>
    %20 = arith.extui %19 : vector<8x1xi1> to vector<8x1xi32>
    %21 = arith.sitofp %20 : vector<8x1xi32> to vector<8x1xf32>
    %22 = vector.broadcast %21 : vector<8x1xf32> to vector<8x512xf32>
    %23 = arith.mulf %13, %22 : vector<8x512xf32>
    %24 = arith.truncf %23 : vector<8x512xf32> to vector<8x512xbf16>
    %c0_4 = arith.constant 0 : index
    %c0_5 = arith.constant 0 : index
    %25 = vector.load %arg3[%c0_4, %c0_5] : memref<512x768xbf16, #tpu.memory_space<vmem>>, vector<512x768xbf16>
    %cst = arith.constant dense<0.000000e+00> : vector<8x768xf32>
    %26 = tpu.matmul %24, %25, %cst {dimension_numbers = #tpu.dot_dimension_numbers<[1], [0], [0], [1], [0, 0, 1, 1], [], []>} : vector<8x512xbf16>, vector<512x768xbf16>, vector<8x768xf32> -> vector<8x768xf32>
    %27 = vector.extract_strided_slice %26 {offsets = [0, 0], sizes = [8, 384], strides = [1, 1]} : vector<8x768xf32> to vector<8x384xf32>
    %28 = vector.extract_strided_slice %26 {offsets = [0, 384], sizes = [8, 384], strides = [1, 1]} : vector<8x768xf32> to vector<8x384xf32>
    %29 = arith.mulf %27, %27 : vector<8x384xf32>
    %30 = arith.mulf %28, %28 : vector<8x384xf32>
    %31 = arith.addf %29, %30 : vector<8x384xf32>
    %cst_6 = arith.constant 1.000000e-30 : f32
    %32 = vector.broadcast %cst_6 : f32 to vector<8x384xf32>
    %33 = arith.maximumf %31, %32 : vector<8x384xf32>
    %34 = math.rsqrt %33 : vector<8x384xf32>
    %cst_7 = arith.constant 9.99999993E-9 : f32
    %35 = vector.broadcast %cst_7 : f32 to vector<8x384xf32>
    %36 = arith.mulf %35, %34 : vector<8x384xf32>
    %cst_8 = arith.constant 1.000000e+00 : f32
    %37 = vector.broadcast %cst_8 : f32 to vector<8x384xf32>
    %38 = arith.maximumf %37, %36 : vector<8x384xf32>
    %39 = arith.mulf %27, %38 : vector<8x384xf32>
    %40 = arith.mulf %28, %38 : vector<8x384xf32>
    %41 = tpu.concatenate %39, %40 in 1 : vector<8x384xf32>, vector<8x384xf32> -> vector<8x768xf32>
    %42 = arith.truncf %41 : vector<8x768xf32> to vector<8x768xbf16>
    %c0_9 = arith.constant 0 : index
    %c0_10 = arith.constant 0 : index
    %43 = vector.load %arg4[%c0_9, %c0_10] : memref<768x512xbf16, #tpu.memory_space<vmem>>, vector<768x512xbf16>
    %cst_11 = arith.constant dense<0.000000e+00> : vector<8x512xf32>
    %44 = tpu.matmul %42, %43, %cst_11 {dimension_numbers = #tpu.dot_dimension_numbers<[1], [0], [0], [1], [0, 0, 1, 1], [], []>} : vector<8x768xbf16>, vector<768x512xbf16>, vector<8x512xf32> -> vector<8x512xf32>
    %cst_12 = arith.constant 0.000000e+00 : f32
    %45 = vector.broadcast %cst_12 : f32 to vector<8x1152xf32>
    %c0_13 = arith.constant 0 : index
    %c0_14 = arith.constant 0 : index
    %46 = vector.load %arg7[%c0_13, %c0_14] : memref<8x1152xf32, #tpu.memory_space<vmem>>, vector<8x1152xf32>
    tpu.vector_store %arg7[%c0_13, %c0_14], %45 {strides = array<i32>} : memref<8x1152xf32, #tpu.memory_space<vmem>>, vector<8x1152xf32>,
    %47 = vector.extract_strided_slice %44 {offsets = [0, 0], sizes = [1, 512], strides = [1, 1]} : vector<8x512xf32> to vector<1x512xf32>
    %c0_15 = arith.constant 0 : index
    %c0_16 = arith.constant 0 : index
    %48 = vector.load %arg7[%c0_15, %c0_16] : memref<8x1152xf32, #tpu.memory_space<vmem>>, vector<1x512xf32>
    tpu.vector_store %arg7[%c0_15, %c0_16], %47 {strides = array<i32>} : memref<8x1152xf32, #tpu.memory_space<vmem>>, vector<1x512xf32>,
    %49 = vector.extract_strided_slice %44 {offsets = [1, 0], sizes = [1, 512], strides = [1, 1]} : vector<8x512xf32> to vector<1x512xf32>
    %c1 = arith.constant 1 : index
    %c80 = arith.constant 80 : index
    %50 = vector.load %arg7[%c1, %c80] : memref<8x1152xf32, #tpu.memory_space<vmem>>, vector<1x512xf32>
    tpu.vector_store %arg7[%c1, %c80], %49 {strides = array<i32>} : memref<8x1152xf32, #tpu.memory_space<vmem>>, vector<1x512xf32>,
    %51 = vector.extract_strided_slice %44 {offsets = [2, 0], sizes = [1, 512], strides = [1, 1]} : vector<8x512xf32> to vector<1x512xf32>
    %c2 = arith.constant 2 : index
    %c160 = arith.constant 160 : index
    %52 = vector.load %arg7[%c2, %c160] : memref<8x1152xf32, #tpu.memory_space<vmem>>, vector<1x512xf32>
    tpu.vector_store %arg7[%c2, %c160], %51 {strides = array<i32>} : memref<8x1152xf32, #tpu.memory_space<vmem>>, vector<1x512xf32>,
    %53 = vector.extract_strided_slice %44 {offsets = [3, 0], sizes = [1, 512], strides = [1, 1]} : vector<8x512xf32> to vector<1x512xf32>
    %c3 = arith.constant 3 : index
    %c240 = arith.constant 240 : index
    %54 = vector.load %arg7[%c3, %c240] : memref<8x1152xf32, #tpu.memory_space<vmem>>, vector<1x512xf32>
    tpu.vector_store %arg7[%c3, %c240], %53 {strides = array<i32>} : memref<8x1152xf32, #tpu.memory_space<vmem>>, vector<1x512xf32>,
    %55 = vector.extract_strided_slice %44 {offsets = [4, 0], sizes = [1, 512], strides = [1, 1]} : vector<8x512xf32> to vector<1x512xf32>
    %c4 = arith.constant 4 : index
    %c320 = arith.constant 320 : index
    %56 = vector.load %arg7[%c4, %c320] : memref<8x1152xf32, #tpu.memory_space<vmem>>, vector<1x512xf32>
    tpu.vector_store %arg7[%c4, %c320], %55 {strides = array<i32>} : memref<8x1152xf32, #tpu.memory_space<vmem>>, vector<1x512xf32>,
    %57 = vector.extract_strided_slice %44 {offsets = [5, 0], sizes = [1, 512], strides = [1, 1]} : vector<8x512xf32> to vector<1x512xf32>
    %c5 = arith.constant 5 : index
    %c400 = arith.constant 400 : index
    %58 = vector.load %arg7[%c5, %c400] : memref<8x1152xf32, #tpu.memory_space<vmem>>, vector<1x512xf32>
    tpu.vector_store %arg7[%c5, %c400], %57 {strides = array<i32>} : memref<8x1152xf32, #tpu.memory_space<vmem>>, vector<1x512xf32>,
    %59 = vector.extract_strided_slice %44 {offsets = [6, 0], sizes = [1, 512], strides = [1, 1]} : vector<8x512xf32> to vector<1x512xf32>
    %c6 = arith.constant 6 : index
    %c480 = arith.constant 480 : index
    %60 = vector.load %arg7[%c6, %c480] : memref<8x1152xf32, #tpu.memory_space<vmem>>, vector<1x512xf32>
    tpu.vector_store %arg7[%c6, %c480], %59 {strides = array<i32>} : memref<8x1152xf32, #tpu.memory_space<vmem>>, vector<1x512xf32>,
    %61 = vector.extract_strided_slice %44 {offsets = [7, 0], sizes = [1, 512], strides = [1, 1]} : vector<8x512xf32> to vector<1x512xf32>
    %c7 = arith.constant 7 : index
    %c560 = arith.constant 560 : index
    %62 = vector.load %arg7[%c7, %c560] : memref<8x1152xf32, #tpu.memory_space<vmem>>, vector<1x512xf32>
    tpu.vector_store %arg7[%c7, %c560], %61 {strides = array<i32>} : memref<8x1152xf32, #tpu.memory_space<vmem>>, vector<1x512xf32>,
    %c0_17 = arith.constant 0 : index
    %c0_18 = arith.constant 0 : index
    %63 = vector.load %arg7[%c0_17, %c0_18] : memref<8x1152xf32, #tpu.memory_space<vmem>>, vector<8x1152xf32>
    %cst_19 = arith.constant dense<0.000000e+00> : vector<1152xf32>
    %64 = vector.multi_reduction <add>, %63, %cst_19 [0] : vector<8x1152xf32> to vector<1152xf32>
    %65 = vector.shape_cast %64 : vector<1152xf32> to vector<1x1152xf32>
    %66 = vector.extract_strided_slice %65 {offsets = [0, 0], sizes = [1, 512], strides = [1, 1]} : vector<1x1152xf32> to vector<1x512xf32>
    %c0_20 = arith.constant 0 : index
    %c0_21 = arith.constant 0 : index
    %67 = vector.load %arg8[%c0_20, %c0_21] : memref<1x512xf32, #tpu.memory_space<vmem>>, vector<1x512xf32>
    %68 = arith.addf %66, %67 : vector<1x512xf32>
    %69 = vector.extract_strided_slice %65 {offsets = [0, 512], sizes = [1, 128], strides = [1, 1]} : vector<1x1152xf32> to vector<1x128xf32>
    %70 = tpu.concatenate %68, %69 in 1 : vector<1x512xf32>, vector<1x128xf32> -> vector<1x640xf32>
    %71 = vector.extract_strided_slice %65 {offsets = [0, 640], sizes = [1, 512], strides = [1, 1]} : vector<1x1152xf32> to vector<1x512xf32>
    %c0_22 = arith.constant 0 : index
    %c0_23 = arith.constant 0 : index
    %72 = vector.load %arg8[%c0_22, %c0_23] : memref<1x512xf32, #tpu.memory_space<vmem>>, vector<1x512xf32>
    tpu.vector_store %arg8[%c0_22, %c0_23], %71 {strides = array<i32>} : memref<1x512xf32, #tpu.memory_space<vmem>>, vector<1x512xf32>,
    %c0_24 = arith.constant 0 : index
    %c0_25 = arith.constant 0 : index
    %c0_26 = arith.constant 0 : index
    %73 = vector.load %arg5[%c0_24, %c0_25, %c0_26] : memref<1x1x640xf32, #tpu.memory_space<vmem>>, vector<1x1x640xf32>
    %74 = vector.shape_cast %73 : vector<1x1x640xf32> to vector<1x640xf32>
    %75 = arith.mulf %70, %74 : vector<1x640xf32>
    %76 = vector.shape_cast %75 : vector<1x640xf32> to vector<1x1x1x640xf32>
    %c0_27 = arith.constant 0 : index
    %c0_28 = arith.constant 0 : index
    %c0_29 = arith.constant 0 : index
    %c0_30 = arith.constant 0 : index
    %77 = vector.load %arg6[%c0_27, %c0_28, %c0_29, %c0_30] : memref<1x1x1x640xf32, #tpu.memory_space<vmem>>, vector<1x1x1x640xf32>
    tpu.vector_store %arg6[%c0_27, %c0_28, %c0_29, %c0_30], %76 {strides = array<i32>} : memref<1x1x1x640xf32, #tpu.memory_space<vmem>>, vector<1x1x1x640xf32>,
    return
  }
  func.func @transform_0(%arg0: i32, %arg1: i32) -> (i32, i32, i32, i32) {
    %c0_i32 = arith.constant 0 : i32
    %c0_i32_0 = arith.constant 0 : i32
    %c0_i32_1 = arith.constant 0 : i32
    return %arg0, %arg1, %c0_i32, %c0_i32_0 : i32, i32, i32, i32
  }
  func.func @transform_1(%arg0: i32, %arg1: i32) -> (i32, i32) {
    %c0_i32 = arith.constant 0 : i32
    %c0_i32_0 = arith.constant 0 : i32
    %c0_i32_1 = arith.constant 0 : i32
    return %c0_i32, %c0_i32_0 : i32, i32
  }
  func.func @transform_2(%arg0: i32, %arg1: i32) -> (i32, i32) {
    %c0_i32 = arith.constant 0 : i32
    %c0_i32_0 = arith.constant 0 : i32
    %c0_i32_1 = arith.constant 0 : i32
    return %c0_i32, %c0_i32_0 : i32, i32
  }
  func.func @transform_3(%arg0: i32, %arg1: i32) -> (i32, i32, i32) {
    %c0_i32 = arith.constant 0 : i32
    %c0_i32_0 = arith.constant 0 : i32
    %c0_i32_1 = arith.constant 0 : i32
    return %arg1, %c0_i32, %c0_i32_0 : i32, i32, i32
  }
  func.func @transform_4(%arg0: i32, %arg1: i32) -> (i32, i32, i32, i32) {
    %c0_i32 = arith.constant 0 : i32
    %c0_i32_0 = arith.constant 0 : i32
    %c0_i32_1 = arith.constant 0 : i32
    return %arg0, %arg1, %c0_i32, %c0_i32_0 : i32, i32, i32, i32
  }
}

module attributes {stable_mosaic.version = 11 : i64} {
  func.func @_stft_fused_kernel(%arg0: i32, %arg1: i32, %arg2: memref<1x1x1x1152xf32, #tpu.memory_space<vmem>>, %arg3: memref<512x768xbf16, #tpu.memory_space<vmem>>, %arg4: memref<768x512xbf16, #tpu.memory_space<vmem>>, %arg5: memref<1x1x640xf32, #tpu.memory_space<vmem>>, %arg6: memref<1x1x1x640xf32, #tpu.memory_space<vmem>>, %arg7: memref<8x1152xf32, #tpu.memory_space<vmem>>, %arg8: memref<1x512xf32, #tpu.memory_space<vmem>>) attributes {dimension_semantics = [#tpu.dimension_semantics<parallel>, #tpu.dimension_semantics<arbitrary>], iteration_bounds = array<i64: 2, 2>, scalar_prefetch = 0 : i64, scratch_operands = 2 : i64, tpu.core_type = #tpu.core_type<tc>, window_params = [{transform_indices = @transform_0, window_bounds = array<i64: 1, 1, 1, 1152>}, {pipeline_mode = #tpu.pipeline_mode<synchronous>, transform_indices = @transform_1, window_bounds = array<i64: 512, 768>}, {pipeline_mode = #tpu.pipeline_mode<synchronous>, transform_indices = @transform_2, window_bounds = array<i64: 768, 512>}, {transform_indices = @transform_3, window_bounds = array<i64: 1, 1, 640>}, {transform_indices = @transform_4, window_bounds = array<i64: 1, 1, 1, 640>}]} {
    %c0_i32 = arith.constant 0 : i32
    %0 = arith.cmpi eq, %arg1, %c0_i32 : i32
    %1 = arith.extui %0 : i1 to i32
    %c0_i32_0 = arith.constant 0 : i32
    %2 = arith.cmpi ne, %1, %c0_i32_0 : i32
    scf.if %2 {
      %cst_31 = arith.constant 0.000000e+00 : f32
      %78 = vector.broadcast %cst_31 : f32 to vector<1x512xf32>
      %c0_32 = arith.constant 0 : index
      %c0_33 = arith.constant 0 : index
      %79 = vector.load %arg8[%c0_32, %c0_33] : memref<1x512xf32, #tpu.memory_space<vmem>>, vector<1x512xf32>
      tpu.vector_store %arg8[%c0_32, %c0_33], %78 {strides = array<i32>} : memref<1x512xf32, #tpu.memory_space<vmem>>, vector<1x512xf32>,
    } else {
    }
    %c0 = arith.constant 0 : index
    %c0_1 = arith.constant 0 : index
    %c0_2 = arith.constant 0 : index
    %c0_3 = arith.constant 0 : index
    %3 = vector.load %arg2[%c0, %c0_1, %c0_2, %c0_3] : memref<1x1x1x1152xf32, #tpu.memory_space<vmem>>, vector<1x1x1x1152xf32>
    %4 = vector.shape_cast %3 : vector<1x1x1x1152xf32> to vector<1x1152xf32>
    %5 = vector.extract_strided_slice %4 {offsets = [0, 0], sizes = [1, 512], strides = [1, 1]} : vector<1x1152xf32> to vector<1x512xf32>
    %6 = vector.extract_strided_slice %4 {offsets = [0, 80], sizes = [1, 512], strides = [1, 1]} : vector<1x1152xf32> to vector<1x512xf32>
    %7 = vector.extract_strided_slice %4 {offsets = [0, 160], sizes = [1, 512], strides = [1, 1]} : vector<1x1152xf32> to vector<1x512xf32>
    %8 = vector.extract_strided_slice %4 {offsets = [0, 240], sizes = [1, 512], strides = [1, 1]} : vector<1x1152xf32> to vector<1x512xf32>
    %9 = vector.extract_strided_slice %4 {offsets = [0, 320], sizes = [1, 512], strides = [1, 1]} : vector<1x1152xf32> to vector<1x512xf32>
    %10 = vector.extract_strided_slice %4 {offsets = [0, 400], sizes = [1, 512], strides = [1, 1]} : vector<1x1152xf32> to vector<1x512xf32>
    %11 = vector.extract_strided_slice %4 {offsets = [0, 480], sizes = [1, 512], strides = [1, 1]} : vector<1x1152xf32> to vector<1x512xf32>
    %12 = vector.extract_strided_slice %4 {offsets = [0, 560], sizes = [1, 512], strides = [1, 1]} : vector<1x1152xf32> to vector<1x512xf32>
    %13 = tpu.concatenate %5, %6, %7, %8, %9, %10, %11, %12 in 0 : vector<1x512xf32>, vector<1x512xf32>, vector<1x512xf32>, vector<1x512xf32>, vector<1x512xf32>, vector<1x512xf32>, vector<1x512xf32>, vector<1x512xf32> -> vector<8x512xf32>
    %c8_i32 = arith.constant 8 : i32
    %14 = arith.muli %arg1, %c8_i32 : i32
    %15 = tpu.iota {dimensions = array<i32: 0>} : vector<8x1xi32>
    %16 = vector.broadcast %14 : i32 to vector<8x1xi32>
    %17 = arith.addi %16, %15 : vector<8x1xi32>
    %c7_i32 = arith.constant 7 : i32
    %18 = vector.broadcast %c7_i32 : i32 to vector<8x1xi32>
    %19 = arith.cmpi slt, %17, %18 : vector<8x1xi32>
    %20 = arith.extui %19 : vector<8x1xi1> to vector<8x1xi32>
    %21 = arith.sitofp %20 : vector<8x1xi32> to vector<8x1xf32>
    %22 = vector.broadcast %21 : vector<8x1xf32> to vector<8x512xf32>
    %23 = arith.mulf %13, %22 : vector<8x512xf32>
    %24 = arith.truncf %23 : vector<8x512xf32> to vector<8x512xbf16>
    %c0_4 = arith.constant 0 : index
    %c0_5 = arith.constant 0 : index
    %25 = vector.load %arg3[%c0_4, %c0_5] : memref<512x768xbf16, #tpu.memory_space<vmem>>, vector<512x768xbf16>
    %cst = arith.constant dense<0.000000e+00> : vector<8x768xf32>
    %26 = tpu.matmul %24, %25, %cst {dimension_numbers = #tpu.dot_dimension_numbers<[1], [0], [0], [1], [0, 0, 1, 1], [], []>} : vector<8x512xbf16>, vector<512x768xbf16>, vector<8x768xf32> -> vector<8x768xf32>
    %27 = vector.extract_strided_slice %26 {offsets = [0, 0], sizes = [8, 384], strides = [1, 1]} : vector<8x768xf32> to vector<8x384xf32>
    %28 = vector.extract_strided_slice %26 {offsets = [0, 384], sizes = [8, 384], strides = [1, 1]} : vector<8x768xf32> to vector<8x384xf32>
    %29 = arith.mulf %27, %27 : vector<8x384xf32>
    %30 = arith.mulf %28, %28 : vector<8x384xf32>
    %31 = arith.addf %29, %30 : vector<8x384xf32>
    %cst_6 = arith.constant 1.000000e-30 : f32
    %32 = vector.broadcast %cst_6 : f32 to vector<8x384xf32>
    %33 = arith.maximumf %31, %32 : vector<8x384xf32>
    %34 = math.rsqrt %33 : vector<8x384xf32>
    %cst_7 = arith.constant 9.99999993E-9 : f32
    %35 = vector.broadcast %cst_7 : f32 to vector<8x384xf32>
    %36 = arith.mulf %35, %34 : vector<8x384xf32>
    %cst_8 = arith.constant 1.000000e+00 : f32
    %37 = vector.broadcast %cst_8 : f32 to vector<8x384xf32>
    %38 = arith.maximumf %37, %36 : vector<8x384xf32>
    %39 = arith.mulf %27, %38 : vector<8x384xf32>
    %40 = arith.mulf %28, %38 : vector<8x384xf32>
    %41 = tpu.concatenate %39, %40 in 1 : vector<8x384xf32>, vector<8x384xf32> -> vector<8x768xf32>
    %42 = arith.truncf %41 : vector<8x768xf32> to vector<8x768xbf16>
    %c0_9 = arith.constant 0 : index
    %c0_10 = arith.constant 0 : index
    %43 = vector.load %arg4[%c0_9, %c0_10] : memref<768x512xbf16, #tpu.memory_space<vmem>>, vector<768x512xbf16>
    %cst_11 = arith.constant dense<0.000000e+00> : vector<8x512xf32>
    %44 = tpu.matmul %42, %43, %cst_11 {dimension_numbers = #tpu.dot_dimension_numbers<[1], [0], [0], [1], [0, 0, 1, 1], [], []>} : vector<8x768xbf16>, vector<768x512xbf16>, vector<8x512xf32> -> vector<8x512xf32>
    %cst_12 = arith.constant 0.000000e+00 : f32
    %45 = vector.broadcast %cst_12 : f32 to vector<8x1152xf32>
    %c0_13 = arith.constant 0 : index
    %c0_14 = arith.constant 0 : index
    %46 = vector.load %arg7[%c0_13, %c0_14] : memref<8x1152xf32, #tpu.memory_space<vmem>>, vector<8x1152xf32>
    tpu.vector_store %arg7[%c0_13, %c0_14], %45 {strides = array<i32>} : memref<8x1152xf32, #tpu.memory_space<vmem>>, vector<8x1152xf32>,
    %47 = vector.extract_strided_slice %44 {offsets = [0, 0], sizes = [1, 512], strides = [1, 1]} : vector<8x512xf32> to vector<1x512xf32>
    %c0_15 = arith.constant 0 : index
    %c0_16 = arith.constant 0 : index
    %48 = vector.load %arg7[%c0_15, %c0_16] : memref<8x1152xf32, #tpu.memory_space<vmem>>, vector<1x512xf32>
    tpu.vector_store %arg7[%c0_15, %c0_16], %47 {strides = array<i32>} : memref<8x1152xf32, #tpu.memory_space<vmem>>, vector<1x512xf32>,
    %49 = vector.extract_strided_slice %44 {offsets = [1, 0], sizes = [1, 512], strides = [1, 1]} : vector<8x512xf32> to vector<1x512xf32>
    %c1 = arith.constant 1 : index
    %c80 = arith.constant 80 : index
    %50 = vector.load %arg7[%c1, %c80] : memref<8x1152xf32, #tpu.memory_space<vmem>>, vector<1x512xf32>
    tpu.vector_store %arg7[%c1, %c80], %49 {strides = array<i32>} : memref<8x1152xf32, #tpu.memory_space<vmem>>, vector<1x512xf32>,
    %51 = vector.extract_strided_slice %44 {offsets = [2, 0], sizes = [1, 512], strides = [1, 1]} : vector<8x512xf32> to vector<1x512xf32>
    %c2 = arith.constant 2 : index
    %c160 = arith.constant 160 : index
    %52 = vector.load %arg7[%c2, %c160] : memref<8x1152xf32, #tpu.memory_space<vmem>>, vector<1x512xf32>
    tpu.vector_store %arg7[%c2, %c160], %51 {strides = array<i32>} : memref<8x1152xf32, #tpu.memory_space<vmem>>, vector<1x512xf32>,
    %53 = vector.extract_strided_slice %44 {offsets = [3, 0], sizes = [1, 512], strides = [1, 1]} : vector<8x512xf32> to vector<1x512xf32>
    %c3 = arith.constant 3 : index
    %c240 = arith.constant 240 : index
    %54 = vector.load %arg7[%c3, %c240] : memref<8x1152xf32, #tpu.memory_space<vmem>>, vector<1x512xf32>
    tpu.vector_store %arg7[%c3, %c240], %53 {strides = array<i32>} : memref<8x1152xf32, #tpu.memory_space<vmem>>, vector<1x512xf32>,
    %55 = vector.extract_strided_slice %44 {offsets = [4, 0], sizes = [1, 512], strides = [1, 1]} : vector<8x512xf32> to vector<1x512xf32>
    %c4 = arith.constant 4 : index
    %c320 = arith.constant 320 : index
    %56 = vector.load %arg7[%c4, %c320] : memref<8x1152xf32, #tpu.memory_space<vmem>>, vector<1x512xf32>
    tpu.vector_store %arg7[%c4, %c320], %55 {strides = array<i32>} : memref<8x1152xf32, #tpu.memory_space<vmem>>, vector<1x512xf32>,
    %57 = vector.extract_strided_slice %44 {offsets = [5, 0], sizes = [1, 512], strides = [1, 1]} : vector<8x512xf32> to vector<1x512xf32>
    %c5 = arith.constant 5 : index
    %c400 = arith.constant 400 : index
    %58 = vector.load %arg7[%c5, %c400] : memref<8x1152xf32, #tpu.memory_space<vmem>>, vector<1x512xf32>
    tpu.vector_store %arg7[%c5, %c400], %57 {strides = array<i32>} : memref<8x1152xf32, #tpu.memory_space<vmem>>, vector<1x512xf32>,
    %59 = vector.extract_strided_slice %44 {offsets = [6, 0], sizes = [1, 512], strides = [1, 1]} : vector<8x512xf32> to vector<1x512xf32>
    %c6 = arith.constant 6 : index
    %c480 = arith.constant 480 : index
    %60 = vector.load %arg7[%c6, %c480] : memref<8x1152xf32, #tpu.memory_space<vmem>>, vector<1x512xf32>
    tpu.vector_store %arg7[%c6, %c480], %59 {strides = array<i32>} : memref<8x1152xf32, #tpu.memory_space<vmem>>, vector<1x512xf32>,
    %61 = vector.extract_strided_slice %44 {offsets = [7, 0], sizes = [1, 512], strides = [1, 1]} : vector<8x512xf32> to vector<1x512xf32>
    %c7 = arith.constant 7 : index
    %c560 = arith.constant 560 : index
    %62 = vector.load %arg7[%c7, %c560] : memref<8x1152xf32, #tpu.memory_space<vmem>>, vector<1x512xf32>
    tpu.vector_store %arg7[%c7, %c560], %61 {strides = array<i32>} : memref<8x1152xf32, #tpu.memory_space<vmem>>, vector<1x512xf32>,
    %c0_17 = arith.constant 0 : index
    %c0_18 = arith.constant 0 : index
    %63 = vector.load %arg7[%c0_17, %c0_18] : memref<8x1152xf32, #tpu.memory_space<vmem>>, vector<8x1152xf32>
    %cst_19 = arith.constant dense<0.000000e+00> : vector<1152xf32>
    %64 = vector.multi_reduction <add>, %63, %cst_19 [0] : vector<8x1152xf32> to vector<1152xf32>
    %65 = vector.shape_cast %64 : vector<1152xf32> to vector<1x1152xf32>
    %66 = vector.extract_strided_slice %65 {offsets = [0, 0], sizes = [1, 512], strides = [1, 1]} : vector<1x1152xf32> to vector<1x512xf32>
    %c0_20 = arith.constant 0 : index
    %c0_21 = arith.constant 0 : index
    %67 = vector.load %arg8[%c0_20, %c0_21] : memref<1x512xf32, #tpu.memory_space<vmem>>, vector<1x512xf32>
    %68 = arith.addf %66, %67 : vector<1x512xf32>
    %69 = vector.extract_strided_slice %65 {offsets = [0, 512], sizes = [1, 128], strides = [1, 1]} : vector<1x1152xf32> to vector<1x128xf32>
    %70 = tpu.concatenate %68, %69 in 1 : vector<1x512xf32>, vector<1x128xf32> -> vector<1x640xf32>
    %71 = vector.extract_strided_slice %65 {offsets = [0, 640], sizes = [1, 512], strides = [1, 1]} : vector<1x1152xf32> to vector<1x512xf32>
    %c0_22 = arith.constant 0 : index
    %c0_23 = arith.constant 0 : index
    %72 = vector.load %arg8[%c0_22, %c0_23] : memref<1x512xf32, #tpu.memory_space<vmem>>, vector<1x512xf32>
    tpu.vector_store %arg8[%c0_22, %c0_23], %71 {strides = array<i32>} : memref<1x512xf32, #tpu.memory_space<vmem>>, vector<1x512xf32>,
    %c0_24 = arith.constant 0 : index
    %c0_25 = arith.constant 0 : index
    %c0_26 = arith.constant 0 : index
    %73 = vector.load %arg5[%c0_24, %c0_25, %c0_26] : memref<1x1x640xf32, #tpu.memory_space<vmem>>, vector<1x1x640xf32>
    %74 = vector.shape_cast %73 : vector<1x1x640xf32> to vector<1x640xf32>
    %75 = arith.mulf %70, %74 : vector<1x640xf32>
    %76 = vector.shape_cast %75 : vector<1x640xf32> to vector<1x1x1x640xf32>
    %c0_27 = arith.constant 0 : index
    %c0_28 = arith.constant 0 : index
    %c0_29 = arith.constant 0 : index
    %c0_30 = arith.constant 0 : index
    %77 = vector.load %arg6[%c0_27, %c0_28, %c0_29, %c0_30] : memref<1x1x1x640xf32, #tpu.memory_space<vmem>>, vector<1x1x1x640xf32>
    tpu.vector_store %arg6[%c0_27, %c0_28, %c0_29, %c0_30], %76 {strides = array<i32>} : memref<1x1x1x640xf32, #tpu.memory_space<vmem>>, vector<1x1x1x640xf32>,
    return
  }
  func.func @transform_0(%arg0: i32, %arg1: i32) -> (i32, i32, i32, i32) {
    %c0_i32 = arith.constant 0 : i32
    %c0_i32_0 = arith.constant 0 : i32
    %c0_i32_1 = arith.constant 0 : i32
    return %arg0, %arg1, %c0_i32, %c0_i32_0 : i32, i32, i32, i32
  }
  func.func @transform_1(%arg0: i32, %arg1: i32) -> (i32, i32) {
    %c0_i32 = arith.constant 0 : i32
    %c0_i32_0 = arith.constant 0 : i32
    %c0_i32_1 = arith.constant 0 : i32
    return %c0_i32, %c0_i32_0 : i32, i32
  }
  func.func @transform_2(%arg0: i32, %arg1: i32) -> (i32, i32) {
    %c0_i32 = arith.constant 0 : i32
    %c0_i32_0 = arith.constant 0 : i32
    %c0_i32_1 = arith.constant 0 : i32
    return %c0_i32, %c0_i32_0 : i32, i32
  }
  func.func @transform_3(%arg0: i32, %arg1: i32) -> (i32, i32, i32) {
    %c0_i32 = arith.constant 0 : i32
    %c0_i32_0 = arith.constant 0 : i32
    %c0_i32_1 = arith.constant 0 : i32
    return %arg1, %c0_i32, %c0_i32_0 : i32, i32, i32
  }
  func.func @transform_4(%arg0: i32, %arg1: i32) -> (i32, i32, i32, i32) {
    %c0_i32 = arith.constant 0 : i32
    %c0_i32_0 = arith.constant 0 : i32
    %c0_i32_1 = arith.constant 0 : i32
    return %arg0, %arg1, %c0_i32, %c0_i32_0 : i32, i32, i32, i32
  }
}

</mosaic_0001>

<bundles_post_ra>
// kernel: tpu_custom_call.1
= control target key start
LH: loop header
LB: loop body
LE: loop exit
PB: predicated region body
PF: predicated region fallthrough
CT: control target
= control target key end

     0   :  { %s7020_s0 = inlined_call_operand.hbm [shape: f32[2,2,1,1152], index: 0, kind: input, shape index: {}]   ;;  %s7021_s1 = inlined_call_operand.hbm [shape: bf16[512,768], index: 1, kind: input, shape index: {}]   ;;  %s7022_s2 = inlined_call_operand.hbm [shape: bf16[768,512], index: 2, kind: input, shape index: {}]   ;;  %s7023_s3 = inlined_call_operand.hbm [shape: f32[2,1,640], index: 3, kind: input, shape index: {}]   ;;  %s7024_s4 = inlined_call_operand.hbm [shape: f32[2,2,1,640], index: 4, kind: output, shape index: {}]  }
   0x1   :  { %7035 = sst [smem:[#allocation24_spill]] %s7021_s1 }
   0x2   :  { %7036 = sst [smem:[#allocation25_spill]] %s7022_s2 }
   0x3   :  { %9 = vsyncpa [#allocation5], 0 }
   0x4   :  { %11 = vsyncpa [#allocation5 + $0x1], 0 }
   0x5   :  { %12 = vsyncpa [#allocation8], 0 }
   0x6   :  { %13 = vsyncpa [#allocation11], 0 }
   0x7   :  { %15 = vsyncpa [#allocation11 + $0x1], 0 }
   0x8   :  { %16 = vsyncpa [#allocation6], 0 }
   0x9   :  { %18 = vsyncpa [#allocation6 + $0x1], 0  ;;  %s6302_s15 = smov 0   ;;  %s6304_s16 = smov 0  }
   0xa   :  { %s6306_s17 = smov 0   ;;  %s6308_s18 = smov 0  }
   0xb   :  { %s6310_s19 = smov 0   ;;  %s6312_s20 = smov 0  }
   0xc   :  { %s6314_s21 = smov 0   ;;  %s6316_s22 = smov 0  }
   0xd   :  { %s6318_s23 = smov 0   ;;  %s6320_s24 = smov 0  }
   0xe   :  { %s6322_s25 = smov 0  }
   0xf LB: > { %7037 = sst [smem:[#allocation17_spill]] %s6232_s18  ;;  %s3918_s26 = sadd.s32 4294967295, %s6260_s25   ;;  %s6260_s25 = sphi %s6322_s25, %s24_s25   ;;  %s6256_s24 = sphi %s6320_s24, %s7077_s24   ;;  %s6252_s23 = sphi %s6318_s23, %s7084_s23   ;;  %s6248_s22 = sphi %s6316_s22, %s7075_s22   ;;  %s6244_s21 = sphi %s6314_s21, %s7083_s21   ;;  %s6240_s20 = sphi %s6312_s20, %s7074_s20   ;;  %s6236_s19 = sphi %s6310_s19, %s7082_s19   ;;  %s6232_s18 = sphi %s6308_s18, %s7081_s18   ;;  %s6228_s17 = sphi %s6306_s17, %s7080_s17   ;;  %s6224_s16 = sphi %s6304_s16, %s7079_s16   ;;  %s6220_s15 = sphi %s6302_s15, %s7078_s15  }
  0x10   : > { %7038 = sst [smem:[#allocation18_spill]] %s6240_s20  ;;  %p3920_p0 = scmp.ge.s32.totalorder %s6260_s25, 1 }
  0x11   : > { %7039 = sst [smem:[#allocation19_spill]] %s6256_s24  ;;  %p6361_p1 = scmp.eq.s32.totalorder %s3918_s26, 0 }
  0x12   : > { %p165_p2 = scmp.lt.s32.totalorder %s6260_s25, 5  ;;  %s7041_s1 = sld [smem:[#allocation24_spill]] }
  0x13   : > { %s6262_s6 = smov [#allocation7]   ;;  %s7043_s2 = sld [smem:[#allocation25_spill]] }
  0x14   : > { %p6369_p3 = pnand %p3920_p0, %p165_p2  ;;  %s178_s7 = sshll.u32 %s6262_s6, 4  ;;  %s179_s7 = int_to_ptr.vmem [resolvable:$true] %s178_s7 }
  0x15   : > { %s6263_s11 = smov 384   ;;  %s6264_s12 = smov 24  }
  0x16   : > { %p5876_p4 = pneg %p6369_p3  ;;  %s6265_s13 = smov [#allocation9]  }
  0x17   : > { %s192_s14 = sshll.u32 %s6265_s13, 4  ;;  %s6266_s28 = smov 256   ;;  %s193_s14 = int_to_ptr.vmem [resolvable:$true] %s192_s14 }
  0x18   : > { %s176_s30 = sshll.u32 %s7041_s1, 4  ;;  %p5877_p5 = pnand %p5876_p4, %p6361_p1  ;;  %s177_s30 = int_to_ptr.hbm [resolvable:$true] %s176_s30 }
  0x19   : > { %s190_s10 = sshll.u32 %s7043_s2, 4  ;;  %s6267_s29 = smov 16   ;;  %s191_s10 = int_to_ptr.hbm [resolvable:$true] %s190_s10 }
  0x1a   : > { %5879 = dma.hbm_to_vmem [thread:$0]  (!%p5877_p5), %s177_s30, 24576, %s179_s7, [#allocation8], %s6263_s11, %s6263_s11, %s6264_s12  }
  0x1b   : > { %5882 = dma.hbm_to_vmem [thread:$0]  (!%p5877_p5), %s191_s10, 24576, %s193_s14, [#allocation8], %s6266_s28, %s6266_s28, %s6267_s29  }
  0x1c   : > { %s3919_s6 = sadd.s32 4294967294, %s6260_s25   ;;  %s33_s8 = sadd.s32 1, %s6252_s23 }
  0x1d   : > { %p34_p6 = scmp.ge.s32.totalorder %s33_s8, 2  ;;  %s36_s9 = sadd.s32 1, %s6256_s24 }
  0x1e   : > { %s45_s30 = sadd.s32 1, %s6240_s20  ;;  %p52_p7 = scmp.ne.s32.totalorder %s6240_s20, %s6236_s19 }
  0x1f   : > { %s7086_s8 = smov (%p34_p6, %s33_s8), 0  ;;  %s7088_s9 = smov (!%p34_p6, %s36_s9), %s6256_s24 }
  0x20   : > { %7044 = sst [smem:[#allocation20_spill]] %s7086_s8  ;;  %s6391_s7 = ssub.s32 %s6252_s23, %s7086_s8 }
  0x21   : > { %p53_p8 = scmp.eq.s32.totalorder %s6260_s25, 0  ;;  %p38_p9 = scmp.ge.s32.totalorder %s7088_s9, 2 }
  0x22   : > { %p58_p10 = scmp.ne.s32.totalorder %s6236_s19, %s6232_s18  ;;  %p111_p12 = scmp.eq.s32.totalorder %s6391_s7, 0 }
  0x23   : > { %p6401_p11 = por %p53_p8, %p52_p7  ;;  %s7090_s9 = smov (%p38_p9, %s7088_s9), 0 }
  0x24   : > { %7046 = sst [smem:[#allocation21_spill]] %s7090_s9  ;;  %p6410_p13 = por %p6361_p1, %p58_p10 }
  0x25   : > { %p152_p0 = scmp.eq.s32.totalorder %s3918_s26, 3  ;;  %s40_s12 = ssub.s32 %s6256_s24, %s7090_s9 }
  0x26   : > { %p158_p2 = scmp.eq.s32.totalorder %s3919_s6, 3  ;;  %s42_s13 = sor.u32 %s6391_s7, %s40_s12 }
  0x27   : > { %p6422_p4 = por %p152_p0, %p52_p7  ;;  %p43_p5 = scmp.eq.s32.totalorder %s42_s13, 0 }
  0x28   : > { %p6426_p6 = por %p158_p2, %p58_p10  ;;  %p5896_p9 = scmp.lt.s32.totalorder %s6260_s25, 4 }
  0x29   : > { %s206_s29 = sand.u32 1, %s6240_s20   ;;  %s5853_s6 = smul.u32 9, %s6252_s23 }
  0x2a   : > { %s7049_s28 = scalar_select %p6426_p6, 1, 0 }
  0x2b   : > { %s6433_s1 = scalar_select %p43_p5, %s6240_s20, %s45_s30  }
  0x2c   : > { %7050 = sst [smem:[#allocation22_spill]] %s7049_s28  ;;  %s5852_s26 = smul.u32 9, %s206_s29 }
  0x2d   : > { %7051 = sst [smem:[#allocation23_spill]] %s6433_s1  ;;  %p5884_p7 = pnand %p5896_p9, %p6401_p11 }
  0x2e   : > { %s5854_s12 = smul.u32 18, %s6256_s24  ;;  %s210_s13 = scalar_lea.vmem [#allocation4], %s5852_s26 }
  0x2f   : > { %s220_s2 = sshll.u32 %s210_s13, 4  ;;  %s207_s28 = scalar_lea.sflag [#allocation5], %s206_s29  ;;  %s221_s2 = int_to_ptr.vmem [resolvable:$true] %s220_s2 }
  0x30   : > { %s215_s9 = sadd.s32 %s5854_s12, %s5853_s6  ;;  %s113_s10 = sadd.s32 1, %s6228_s17 }
  0x31   : > { %s216_s1 = scalar_lea.hbm %s7020_s0, %s215_s9  ;;  %p120_p10 = scmp.ne.s32.totalorder %s6228_s17, %s6224_s16 }
  0x32   : > { %s218_s20 = sshll.u32 %s216_s1, 4  ;;  %p126_p11 = scmp.ne.s32.totalorder %s6224_s16, %s6220_s15  ;;  %s219_s20 = int_to_ptr.hbm [resolvable:$true] %s218_s20 }
  0x33   : > { %5886 = dma.hbm_to_vmem [thread:$0]  (!%p5884_p7), %s219_s20, 144, %s221_s2, %s207_s28  }
  0x34   : > { %s6448_s18 = scalar_select %p111_p12, %s6228_s17, %s113_s10  }
  0x35   : > { %s227_s26 = sand.u32 1, %s6228_s17   ;;  %s5856_s24 = smul.u32 5, %s6252_s23 }
  0x36   : > { %p122_p0 = por %p120_p10, %p53_p8  ;;  %p6460_p2 = por %p126_p11, %p6361_p1 }
  0x37   : > { %s5855_s8 = smul.u32 5, %s227_s26  ;;  %s235_s2 = scalar_lea.hbm %s7023_s3, %s5856_s24 }
  0x38   : > { %p5887_p5 = pnand %p5896_p9, %p122_p0  ;;  %s237_s20 = sshll.u32 %s235_s2, 4  ;;  %s238_s20 = int_to_ptr.hbm [resolvable:$true] %s237_s20 }
  0x39   : > { %s231_s7 = scalar_lea.vmem [#allocation10], %s5855_s8  ;;  %s228_s28 = scalar_lea.sflag [#allocation11], %s227_s26 }
  0x3a   : > { %s239_s15 = sshll.u32 %s231_s7, 4  ;;  %248 = sbr.rel (%p6369_p3) target bundleno = 1065 (0x429), region = 36  ;;  %s240_s15 = int_to_ptr.vmem [resolvable:$true] %s239_s15 }
  0x3b   : > { %5889 = dma.hbm_to_vmem [thread:$0]  (!%p5887_p5), %s238_s20, 80, %s240_s15, %s228_s28  }
  0x3c   : > { %s6472_s29 = sand.u32 (!%p6369_p3), 1, %s6236_s19  }
  0x3d   : > { %s5857_s12 = smul.u32 (!%p6369_p3), 9, %s6472_s29  ;;  %s251_s24 = scalar_lea.sflag (!%p6369_p3), [#allocation5], %s6472_s29 }
  0x3f   : > { %s6476_s13 = scalar_lea.vmem [#allocation4], %s5857_s12 }
  0x40   : > { %6203 = dma.done.wait (%p6410_p13), %s251_s24, 144  }
  0x41   : > { %6205 = vsyncadd (%p6410_p13), %s251_s24, 4294967152 }
  0x42   : > { %6207 = dma.done.wait (%p6361_p1), [#allocation8], 49152  }
  0x43   : > { %6209 = vsyncadd (%p6361_p1), [#allocation8], 4294918144  ;;  %s270_s5 = sand.u32 1, %s6224_s16  }
  0x44   : > { %s6487_s30 = smul.u32 5, %s270_s5  ;;  %s271_s10 = scalar_lea.sflag [#allocation11], %s270_s5 }
  0x46   : > { %s274_s26 = scalar_lea.vmem [#allocation10], %s6487_s30 }
  0x47   : > { %6211 = dma.done.wait (%p6460_p2), %s271_s10, 80  }
  0x48   : > { %6213 = vsyncadd (%p6460_p2), %s271_s10, 4294967216  ;;  %s5859_s11 = smul.u32 5, %s6472_s29  ;;  %p3927_p3 = scmp.ne.s32.totalorder %s6244_s21, 0 }
  0x4a   : > { %s6495_s8 = scalar_lea.vmem [#allocation12], %s5859_s11  ;;  %308 = sbr.rel (%p3927_p3) target bundleno = 83 (0x53), region = 56 }
  0x4f   : > { %v309_v0 = vlaneseq  ;;  %v6268_v1 = vmov 0.0  }
  0x51   : > { %vm311_vm0 = vcmp.lt.s32.totalorder %v309_v0, 512 }
  0x52   : > { %313 = vst.msk [vmem:[#allocation3] sm:$0xf] %vm311_vm0, %v6268_v1 }
  0x53 PF: > { %v6499_v2 = vld [vmem:[%s6476_s13] sm:$0xff]  ;;  %s6269_s27 = smov 48   ;;  %s6270_s6 = smov 96   ;;  %v6003_v11 = vld [vmem:[%s6476_s13 + $0x8] ss:$0 sm:$0xff]  ;;  %vm336_vm1 = vcmask 392192  }
  0x54   : > { %v325_v3 = vperm.slane %v6499_v2, 4  ;;  %v6503_v4 = vperm.slane %v6499_v2, 3  ;;  %v6506_v5 = vperm.slane %v6499_v2, 2  ;;  %s6271_s1 = smov 16   ;;  %v345_v6 = vperm.slane %v6499_v2, 5  ;;  %s6272_s9 = smov 64  }
  0x55   : > { %v6523_v7 = vperm.slane %v6499_v2, 1  ;;  %v317_v8 = vperm.slane %v6499_v2, 0  ;;  %v384_v9 = vperm.slane %v6499_v2, 6  ;;  %s6273_s2 = smov 112   ;;  %s6274_s20 = smov 32   ;;  %v404_v10 = vperm.slane %v6499_v2, 7 }
  0x56   : > { %334 = vrot.lane.b32.xlu2 %v325_v3, %s6269_s27  ;;  %350 = vrot.lane.b32.xlu1 %v6503_v4, %s6270_s6  ;;  %s6275_s7 = smov 80   ;;  %v4484_v12 = vld [vmem:[#allocation7 + $0x450] sm:$0xf]  ;;  %v5609_v13 = vld [vmem:[#allocation7 + $0x464] sm:$0xf0]  ;;  %vm7034_vm2 = vcmask 1040384  }
  0x57   : > { %330 = vrot.lane.b32.xlu0 %v6506_v5, %s6269_s27  ;;  %v4485_v14 = vor.u32 %v5609_v13, %v4484_v12  ;;  %v4460_v15 = vld [vmem:[#allocation7 + $0x420] sm:$0xf]  ;;  %v5603_v16 = vld [vmem:[#allocation7 + $0x434] sm:$0xf0]  ;;  %v4436_v19 = vld [vmem:[#allocation7 + $0x3f0] sm:$0xf] }
  0x58   : > { %v4461_v18 = vor.u32 %v5603_v16, %v4460_v15  ;;  %v5597_v20 = vld [vmem:[#allocation7 + $0x404] sm:$0xf0]  ;;  %v4412_v22 = vld [vmem:[#allocation7 + $0x3c0] sm:$0xf]  ;;  %v5591_v23 = vld [vmem:[#allocation7 + $0x3d4] sm:$0xf0] }
  0x59   : > { %1693 = vmatpush.bf16.msra.mxu2 %v4485_v14  ;;  %v4437_v21 = vor.u32 %v5597_v20, %v4436_v19  ;;  %v4413_v24 = vor.u32 %v5591_v23, %v4412_v22  ;;  %v4388_v26 = vld [vmem:[#allocation7 + $0x390] sm:$0xf]  ;;  %v5585_v27 = vld [vmem:[#allocation7 + $0x3a4] sm:$0xf0]  ;;  %v4364_v32 = vld [vmem:[#allocation7 + $0x360] sm:$0xf] }
  0x5a   : > { %v4676_v28 = vld [vmem:[#allocation7 + $0x5d0] sm:$0xf]  ;;  %v4389_v29 = vor.u32 %v5585_v27, %v4388_v26  ;;  %v5657_v30 = vld [vmem:[#allocation7 + $0x5e4] sm:$0xf0]  ;;  %v5579_v33 = vld [vmem:[#allocation7 + $0x374] sm:$0xf0] }
  0x5b   : > { %v4677_v31 = vor.u32 %v5657_v30, %v4676_v28  ;;  %v4652_v34 = vld [vmem:[#allocation7 + $0x5a0] sm:$0xf]  ;;  %v4365_v36 = vor.u32 %v5579_v33, %v4364_v32  ;;  %v5651_v37 = vld [vmem:[#allocation7 + $0x5b4] sm:$0xf0]  ;;  %v4100_v40 = vld [vmem:[#allocation7 + $0x150] sm:$0xf] }
  0x5c   : > { %v4653_v39 = vor.u32 %v5651_v37, %v4652_v34  ;;  %v5513_v41 = vld [vmem:[#allocation7 + $0x164] sm:$0xf0]  ;;  %v4292_v42 = vld [vmem:[#allocation7 + $0x2d0] sm:$0xf]  ;;  %v4076_v53 = vld [vmem:[#allocation7 + $0x120] sm:$0xf] }
  0x5d   : > { %1694 = vmatpush.bf16.msra.mxu2 %v4461_v18  ;;  %1706 = vmatpush.bf16.msra.mxu3 %v4677_v31  ;;  %v4101_v44 = vor.u32 %v5513_v41, %v4100_v40  ;;  %v5561_v45 = vld [vmem:[#allocation7 + $0x2e4] sm:$0xf0]  ;;  %v4340_v46 = vld [vmem:[#allocation7 + $0x330] sm:$0xf]  ;;  %v5507_v54 = vld [vmem:[#allocation7 + $0x134] sm:$0xf0] }
  0x5e   : > { %369 = vrot.lane.b32.xlu2 %v6503_v4, %s6271_s1  ;;  %352 = vrot.lane.b32.xlu1 %v325_v3, %s6270_s6  ;;  %v5573_v47 = vld [vmem:[#allocation7 + $0x344] sm:$0xf0]  ;;  %v4293_v48 = vor.u32 %v5561_v45, %v4292_v42  ;;  %v4628_v50 = vld [vmem:[#allocation7 + $0x570] sm:$0xf]  ;;  %v4268_v55 = vld [vmem:[#allocation7 + $0x2a0] sm:$0xf]  ;;  %v4077_v57 = vor.u32 %v5507_v54, %v4076_v53 }
  0x5f   : > { %332 = vrot.lane.b32.xlu0 %v6503_v4, %s6269_s27  ;;  %v4341_v49 = vor.u32 %v5573_v47, %v4340_v46  ;;  %v5645_v51 = vld [vmem:[#allocation7 + $0x584] sm:$0xf0]  ;;  %1667 = vmatpush.bf16.msra.mxu0 %v4101_v44  ;;  %v5555_v58 = vld [vmem:[#allocation7 + $0x2b4] sm:$0xf0]  ;;  %v4316_v59 = vld [vmem:[#allocation7 + $0x300] sm:$0xf] }
  0x60   : > { %v4629_v52 = vor.u32 %v5645_v51, %v4628_v50  ;;  %1680 = vmatpush.bf16.msra.mxu1 %v4293_v48  ;;  %v5567_v60 = vld [vmem:[#allocation7 + $0x314] sm:$0xf0]  ;;  %v4269_v62 = vor.u32 %v5555_v58, %v4268_v55  ;;  %v4604_v0 = vld [vmem:[#allocation7 + $0x540] sm:$0xf]  ;;  %v4052_v12 = vld [vmem:[#allocation7 + $0xf0] sm:$0xf] }
  0x61   : > { %1695 = vmatpush.bf16.msra.mxu2 %v4437_v21  ;;  %1707 = vmatpush.bf16.msra.mxu3 %v4653_v39  ;;  %v4317_v63 = vor.u32 %v5567_v60, %v4316_v59  ;;  %v5639_v1 = vld [vmem:[#allocation7 + $0x554] sm:$0xf0]  ;;  %v5501_v13 = vld [vmem:[#allocation7 + $0x104] sm:$0xf0]  ;;  %v4244_v14 = vld [vmem:[#allocation7 + $0x270] sm:$0xf] }
  0x62   : > { %v4053_v15 = vor.u32 %v5501_v13, %v4052_v12  ;;  %v5549_v16 = vld [vmem:[#allocation7 + $0x284] sm:$0xf0]  ;;  %v4580_v18 = vld [vmem:[#allocation7 + $0x510] sm:$0xf]  ;;  %v5600_v22 = vld [vmem:[#allocation7 + $0x424] sm:$0xf] }
  0x63   : > { %1668 = vmatpush.bf16.msra.mxu0 %v4077_v57  ;;  %v5633_v19 = vld [vmem:[#allocation7 + $0x524] sm:$0xf0]  ;;  %v4245_v20 = vor.u32 %v5549_v16, %v4244_v14  ;;  %v4462_v23 = vld [vmem:[#allocation7 + $0x438] sm:$0xf0]  ;;  %vm356_vm3 = vcmask 785408   ;;  %vm7032_vm4 = vcmask 1041408  }
  0x64   : > { %1681 = vmatpush.bf16.msra.mxu1 %v4269_v62  ;;  %v4581_v21 = vor.u32 %v5633_v19, %v4580_v18  ;;  %v4028_v26 = vld [vmem:[#allocation7 + $0xc0] sm:$0xf]  ;;  %v5495_v27 = vld [vmem:[#allocation7 + $0xd4] sm:$0xf0]  ;;  %v5594_v40 = vld [vmem:[#allocation7 + $0x3f4] sm:$0xf] }
  0x65   : > { %1696 = vmatpush.bf16.msra.mxu2 %v4413_v24  ;;  %1708 = vmatpush.bf16.msra.mxu3 %v4629_v52  ;;  %v4465_v24 = vor.u32 %v5600_v22, %v4462_v23  ;;  %v4220_v28 = vld [vmem:[#allocation7 + $0x240] sm:$0xf]  ;;  %v4029_v30 = vor.u32 %v5495_v27, %v4028_v26  ;;  %v5543_v31 = vld [vmem:[#allocation7 + $0x254] sm:$0xf0]  ;;  %v4438_v41 = vld [vmem:[#allocation7 + $0x408] sm:$0xf0] }
  0x66   : > { %389 = vrot.lane.b32.xlu2 %v325_v3, %s6272_s9  ;;  %354 = vrot.lane.b32.xlu1 %v345_v6, %s6270_s6  ;;  %v4556_v32 = vld [vmem:[#allocation7 + $0x4e0] sm:$0xf]  ;;  %v5627_v33 = vld [vmem:[#allocation7 + $0x4f4] sm:$0xf0]  ;;  %v4221_v39 = vor.u32 %v5543_v31, %v4220_v28  ;;  %v4441_v45 = vor.u32 %v5594_v40, %v4438_v41  ;;  %v4004_v46 = vld [vmem:[#allocation7 + $0x90] sm:$0xf] }
  0x67   : > { %371 = vrot.lane.b32.xlu0 %v325_v3, %s6271_s1  ;;  %1669 = vmatpush.bf16.msra.mxu0 %v4053_v15  ;;  %v4557_v44 = vor.u32 %v5627_v33, %v4556_v32  ;;  %v5489_v47 = vld [vmem:[#allocation7 + $0xa4] sm:$0xf0]  ;;  %v4532_v50 = vld [vmem:[#allocation7 + $0x4b0] sm:$0xf]  ;;  %v5588_v54 = vld [vmem:[#allocation7 + $0x3c4] sm:$0xf] }
  0x68   : > { %1682 = vmatpush.bf16.msra.mxu1 %v4245_v20  ;;  %v4005_v48 = vor.u32 %v5489_v47, %v4004_v46  ;;  %v5621_v51 = vld [vmem:[#allocation7 + $0x4c4] sm:$0xf0]  ;;  %v4414_v55 = vld [vmem:[#allocation7 + $0x3d8] sm:$0xf0]  ;;  %v3980_v58 = vld [vmem:[#allocation7 + $0x60] sm:$0xf] }
  0x69   : > { %1697 = vmatpush.bf16.msra.mxu2 %v4389_v29  ;;  %v4533_v53 = vor.u32 %v5621_v51, %v4532_v50  ;;  %v4417_v57 = vor.u32 %v5588_v54, %v4414_v55  ;;  %v5483_v59 = vld [vmem:[#allocation7 + $0x74] sm:$0xf0]  ;;  %v4172_v60 = vld [vmem:[#allocation7 + $0x1e0] sm:$0xf]  ;;  %v5582_v12 = vld [vmem:[#allocation7 + $0x394] sm:$0xf] }
  0x6a   : > { %v4390_v13 = vld [vmem:[#allocation7 + $0x3a8] sm:$0xf0]  ;;  %v5654_v14 = vld [vmem:[#allocation7 + $0x5d4] sm:$0xf]  ;;  %v3956_v19 = vld [vmem:[#allocation7 + $0x30] sm:$0xf] }
  0x6b   : > { %1670 = vmatpush.bf16.msra.mxu0 %v4029_v30  ;;  %v4393_v15 = vor.u32 %v5582_v12, %v4390_v13  ;;  %v4678_v16 = vld [vmem:[#allocation7 + $0x5e8] sm:$0xf0]  ;;  %v5477_v20 = vld [vmem:[#allocation7 + $0x44] sm:$0xf0]  ;;  %v4366_v26 = vld [vmem:[#allocation7 + $0x378] sm:$0xf0] }
  0x6c   : > { %1683 = vmatpush.bf16.msra.mxu1 %v4221_v39  ;;  %v4681_v18 = vor.u32 %v5654_v14, %v4678_v16  ;;  %v3957_v22 = vor.u32 %v5477_v20, %v3956_v19  ;;  %v5525_v23 = vld [vmem:[#allocation7 + $0x1c4] sm:$0xf0]  ;;  %v4654_v30 = vld [vmem:[#allocation7 + $0x5b8] sm:$0xf0]  ;;  %v3932_v32 = vld [vmem:[#allocation7] sm:$0xf] }
  0x6d   : > { %1698 = vmatpush.bf16.msra.mxu2 %v4365_v36  ;;  %v5471_v33 = vld [vmem:[#allocation7 + $0x14] sm:$0xf0]  ;;  %v4124_v40 = vld [vmem:[#allocation7 + $0x180] sm:$0xf]  ;;  %v5510_v46 = vld [vmem:[#allocation7 + $0x154] sm:$0xf] }
  0x6e   : > { %328 = vrot.lane.b32.xlu2 %v6523_v7, %s6269_s27  ;;  %326 = vrot.lane.b32.xlu1 %v317_v8, %s6269_s27  ;;  %v3933_v39 = vor.u32 %v5471_v33, %v3932_v32  ;;  %v5519_v41 = vld [vmem:[#allocation7 + $0x194] sm:$0xf0]  ;;  %v4102_v47 = vld [vmem:[#allocation7 + $0x168] sm:$0xf0]  ;;  %v5642_v55 = vld [vmem:[#allocation7 + $0x574] sm:$0xf] }
  0x6f   : > { %391 = vrot.lane.b32.xlu0 %v345_v6, %s6272_s9  ;;  %1671 = vmatpush.bf16.msra.mxu0 %v4005_v48  ;;  %v4105_v48 = vor.u32 %v5510_v46, %v4102_v47  ;;  %v4294_v50 = vld [vmem:[#allocation7 + $0x2e8] sm:$0xf0]  ;;  %v4318_v12 = vld [vmem:[#allocation7 + $0x318] sm:$0xf0]  ;;  %v5492_v33 = vld [vmem:[#allocation7 + $0xc4] sm:$0xf] }
  0x70   : > { %v4606_v16 = vld [vmem:[#allocation7 + $0x558] sm:$0xf0]  ;;  %v5624_v46 = vld [vmem:[#allocation7 + $0x4e4] sm:$0xf]  ;;  %s3928_s15 = sshll.u32 %s6244_s21, 3  ;;  %vm375_vm5 = vcmask 130048  }
  0x71   : > { %1699 = vmatpush.bf16.msra.mxu2 %v4341_v49  ;;  %v5537_v49 = vld [vmem:[#allocation7 + $0x224] sm:$0xf0]  ;;  %v4558_v47 = vld [vmem:[#allocation7 + $0x4f8] sm:$0xf0]  ;;  %vm7031_vm6 = vcmask 1042432   ;;  %vm395_vm7 = vcmask 523264  }
  0x72   : > { %vm415_vm8 = vcmask 916480   ;;  %vm479_vm9 = vcmask 1043456   ;;  %vm484_vm10 = vcmask 1044480   ;;  %vm434_vm11 = vcmask 261120   ;;  %v4660_v2 = vld [vmem:[#allocation7 + $0x5a8] sm:$0xf] }
  0x73   : > { %vm489_vm12 = vcmask 1045504   ;;  %vm455_vm14 = vcmask 654336   ;;  %vm494_vm15 = vcmask 1046528   ;;  %s5860_s28 = smul.u32 5, %s6244_s21  ;;  %s3788_s5 = sshll.u32 %s6495_s8, 4  ;;  %s3789_s5 = int_to_ptr.vmem [resolvable:$true] %s3788_s5 }
  0x74   : > { %s5861_s12 = smul.u32 10, %s6248_s22  ;;  %s3774_s10 = scalar_lea.sflag [#allocation6], %s6472_s29 }
  0x75   : > { %1700 = vmatpush.bf16.msra.mxu2 %v4317_v63 }
  0x76   : > { %411 = vrot.lane.b32.xlu2 %v384_v9, %s6273_s2  ;;  %409 = vrot.lane.b32.xlu1 %v345_v6, %s6273_s2  ;;  %s3785_s21 = sadd.s32 %s5861_s12, %s5860_s28 }
  0x77   : > { %373 = vrot.lane.b32.xlu0 %v345_v6, %s6271_s1  ;;  %s3786_s13 = scalar_lea.hbm %s7024_s4, %s3785_s21 }
  0x78   : > { %s3790_s30 = sshll.u32 %s3786_s13, 4  ;;  %s3791_s30 = int_to_ptr.hbm [resolvable:$true] %s3790_s30 }
  0x7e   : > { %393 = vrot.lane.b32.xlu2 %v384_v9, %s6272_s9  ;;  %348 = vrot.lane.b32.xlu1 %v6506_v5, %s6270_s6 }
  0x7f   : > { %346 = vrot.lane.b32.xlu0 %v6523_v7, %s6270_s6 }
  0x86   : > { %365 = vrot.lane.b32.xlu2 %v6523_v7, %s6271_s1  ;;  %430 = vrot.lane.b32.xlu1 %v384_v9, %s6274_s20 }
  0x87   : > { %428 = vrot.lane.b32.xlu0 %v345_v6, %s6274_s20 }
  0x8e   : > { %449 = vrot.lane.b32.xlu2 %v384_v9, %s6275_s7  ;;  %413 = vrot.lane.b32.xlu1 %v404_v10, %s6273_s2  ;;  %v4605_v9 = vor.u32 %v5639_v1, %v4604_v0  ;;  %v3981_v0 = vor.u32 %v5483_v59, %v3980_v58  ;;  %v5531_v1 = vld [vmem:[#allocation7 + $0x1f4] sm:$0xf0]  ;;  %v5504_v59 = vld [vmem:[#allocation7 + $0x124] sm:$0xf] }
  0x8f   : > { %367 = vrot.lane.b32.xlu0 %v6506_v5, %s6271_s1 }
  0x90   : > { %1709 = vmatpush.bf16.msra.mxu3 %v4605_v9  ;;  %1672 = vmatpush.bf16.msra.mxu0 %v3981_v0 }
  0x94   : > { %1710 = vmatpush.bf16.msra.mxu3 %v4581_v21  ;;  %v4148_v21 = vld [vmem:[#allocation7 + $0x1b0] sm:$0xf]  ;;  %1673 = vmatpush.bf16.msra.mxu0 %v3957_v22  ;;  %v5498_v22 = vld [vmem:[#allocation7 + $0xf4] sm:$0xf] }
  0x95   : > { %v4149_v27 = vor.u32 %v5525_v23, %v4148_v21 }
  0x96   : > { %387 = vrot.lane.b32.xlu2 %v6503_v4, %s6272_s9  ;;  %385 = vrot.lane.b32.xlu1 %v6506_v5, %s6272_s9 }
  0x97   : > { %451 = vrot.lane.b32.xlu0 %v404_v10, %s6275_s7 }
  0x98   : > { %1711 = vmatpush.bf16.msra.mxu3 %v4557_v44  ;;  %1674 = vmatpush.bf16.msra.mxu0 %v3933_v39  ;;  %v4030_v39 = vld [vmem:[#allocation7 + $0xd8] sm:$0xf0] }
  0x9c   : > { %1712 = vmatpush.bf16.msra.mxu3 %v4533_v53  ;;  %v4342_v53 = vld [vmem:[#allocation7 + $0x348] sm:$0xf0]  ;;  %1719 = vmatpush.bf16.msrb.mxu0 %v4105_v48 }
  0x9e   : > { %407 = vrot.lane.b32.xlu2 %v325_v3, %s6273_s2  ;;  %405 = vrot.lane.b32.xlu1 %v6503_v4, %s6273_s2 }
  0x9f   : > { %432 = vrot.lane.b32.xlu0 %v404_v10, %s6274_s20  ;;  %v4486_v10 = vld [vmem:[#allocation7 + $0x468] sm:$0xf0] }
  0xa6   : > { %426 = vrot.lane.b32.xlu2 %v325_v3, %s6274_s20  ;;  %424 = vrot.lane.b32.xlu1 %v6503_v4, %s6274_s20 }
  0xa7   : > { %453 = vrot.lane.b32.xlu0 %v6003_v11, %s6275_s7 }
  0xae   : > { %447 = vrot.lane.b32.xlu1 %v345_v6, %s6275_s7 }
  0xaf   : > { %445 = vrot.lane.b32.xlu0 %v325_v3, %s6275_s7  ;;  %v5606_v3 = vld [vmem:[#allocation7 + $0x454] sm:$0xf] }
  0xb0   : > { %v6566_v17 = vpop.permute.xlu2 %334  ;;  %v4489_v11 = vor.u32 %v5606_v3, %v4486_v10  ;;  %v4508_v3 = vld [vmem:[#allocation7 + $0x480] sm:$0xf]  ;;  %v4173_v10 = vor.u32 %v5531_v1, %v4172_v60  ;;  %v4078_v60 = vld [vmem:[#allocation7 + $0x138] sm:$0xf0] }
  0xb1   : > { %v4081_v1 = vor.u32 %v5504_v59, %v4078_v60  ;;  %v5618_v59 = vld [vmem:[#allocation7 + $0x4b4] sm:$0xf]  ;;  %v4534_v60 = vld [vmem:[#allocation7 + $0x4c8] sm:$0xf0] }
  0xb2   : > { %1745 = vmatpush.bf16.msrb.mxu2 %v4489_v11 }
  0xb3   : > { %1720 = vmatpush.bf16.msrb.mxu0 %v4081_v1  ;;  %v4537_v1 = vor.u32 %v5618_v59, %v4534_v60 }
  0xb6   : > { %1746 = vmatpush.bf16.msrb.mxu2 %v4465_v24  ;;  %v5576_v24 = vld [vmem:[#allocation7 + $0x364] sm:$0xf] }
  0xb7   : > { %v4369_v28 = vor.u32 %v5576_v24, %v4366_v26  ;;  %v4054_v24 = vld [vmem:[#allocation7 + $0x108] sm:$0xf0]  ;;  %v5546_v26 = vld [vmem:[#allocation7 + $0x274] sm:$0xf] }
  0xb8   : > { %v6568_v25 = vpop.permute.xlu2 %369 }
  0xba   : > { %1747 = vmatpush.bf16.msrb.mxu2 %v4441_v45  ;;  %v4125_v45 = vor.u32 %v5519_v41, %v4124_v40  ;;  %v5540_v40 = vld [vmem:[#allocation7 + $0x244] sm:$0xf]  ;;  %v4033_v41 = vor.u32 %v5492_v33, %v4030_v39  ;;  %v4150_v39 = vld [vmem:[#allocation7 + $0x1c8] sm:$0xf0] }
  0xbe   : > { %1748 = vmatpush.bf16.msrb.mxu2 %v4417_v57  ;;  %v4630_v57 = vld [vmem:[#allocation7 + $0x588] sm:$0xf0] }
  0xbf   : > { %v4633_v58 = vor.u32 %v5642_v55, %v4630_v57  ;;  %v5534_v55 = vld [vmem:[#allocation7 + $0x214] sm:$0xf] }
  0xc0   : > { %v6574_v43 = vpop.permute.xlu2 %389 }
  0xc2   : > { %1749 = vmatpush.bf16.msrb.mxu2 %v4393_v15  ;;  %v5636_v15 = vld [vmem:[#allocation7 + $0x544] sm:$0xf] }
  0xc3   : > { %v4609_v21 = vor.u32 %v5636_v15, %v4606_v16  ;;  %v4174_v15 = vld [vmem:[#allocation7 + $0x1f8] sm:$0xf0]  ;;  %v5612_v16 = vld [vmem:[#allocation7 + $0x484] sm:$0xf] }
  0xc6   : > { %1750 = vmatpush.bf16.msrb.mxu2 %v4369_v28  ;;  %v4057_v28 = vor.u32 %v5498_v22, %v4054_v24 }
  0xc8   : > { %v6570_v35 = vpop.permute.xlu1 %350  ;;  %1721 = vmatpush.bf16.msrb.mxu0 %v4057_v28 }
  0xc9   : > { %v6572_v38 = vpop.permute.xlu0 %330 }
  0xcc   : > { %1722 = vmatpush.bf16.msrb.mxu0 %v4033_v41 }
  0xd0   : > { %v6576_v56 = vpop.permute.xlu1 %352 }
  0xd1   : > { %v6578_v61 = vpop.permute.xlu0 %332 }
  0xd2   : > { %v340_v6 = vsel %vm336_vm1, %v6578_v61, %v6566_v17  ;;  %v6583_v17 = vpop.permute.xlu2 %328 }
  0xd3   : > { %v468_v34 = vsel %vm7034_vm2, %v6503_v4, %v340_v6  ;;  %v4196_v4 = vld [vmem:[#allocation7 + $0x210] sm:$0xf]  ;;  %v5615_v6 = vld [vmem:[#allocation7 + $0x494] sm:$0xf0]  ;;  %v338_v0 = vsel %vm336_vm1, %v6583_v17, %v6572_v38 }
  0xd4   : > { %v4197_v52 = vor.u32 %v5537_v49, %v4196_v4  ;;  %v4509_v11 = vor.u32 %v5615_v6, %v4508_v3  ;;  %v5558_v49 = vld [vmem:[#allocation7 + $0x2d4] sm:$0xf]  ;;  %v5552_v3 = vld [vmem:[#allocation7 + $0x2a4] sm:$0xf]  ;;  %v4270_v6 = vld [vmem:[#allocation7 + $0x2b8] sm:$0xf0] }
  0xd5   : > { %v4297_v51 = vor.u32 %v5558_v49, %v4294_v50  ;;  %v4561_v49 = vor.u32 %v5624_v46, %v4558_v47  ;;  %v5516_v46 = vld [vmem:[#allocation7 + $0x184] sm:$0xf] }
  0xd6   : > { %1684 = vmatpush.bf16.msra.mxu1 %v4197_v52  ;;  %1713 = vmatpush.bf16.msra.mxu3 %v4509_v11  ;;  %v5570_v52 = vld [vmem:[#allocation7 + $0x334] sm:$0xf]  ;;  %v5564_v11 = vld [vmem:[#allocation7 + $0x304] sm:$0xf] }
  0xd7   : > { %v4345_v54 = vor.u32 %v5570_v52, %v4342_v53  ;;  %v4321_v14 = vor.u32 %v5564_v11, %v4318_v12  ;;  %v5486_v53 = vld [vmem:[#allocation7 + $0x94] sm:$0xf]  ;;  %v5528_v11 = vld [vmem:[#allocation7 + $0x1e4] sm:$0xf] }
  0xd8   : > { %v355_v29 = vpop.permute.xlu1 %354  ;;  %v4177_v22 = vor.u32 %v5528_v11, %v4174_v15 }
  0xd9   : > { %v360_v36 = vsel %vm356_vm3, %v6576_v56, %v355_v29  ;;  %v6589_v37 = vpop.permute.xlu0 %371  ;;  %v5648_v29 = vld [vmem:[#allocation7 + $0x5a4] sm:$0xf]  ;;  %1751 = vmatpush.bf16.msrb.mxu2 %v4345_v54  ;;  %v4006_v54 = vld [vmem:[#allocation7 + $0xa8] sm:$0xf0] }
  0xda   : > { %v6592_v42 = vsel %vm7032_vm4, %v468_v34, %v360_v36  ;;  %v6594_v62 = vpop.permute.xlu2 %411  ;;  %1685 = vmatpush.bf16.msra.mxu1 %v4173_v10  ;;  %1758 = vmatpush.bf16.msrb.mxu3 %v4681_v18  ;;  %v4657_v31 = vor.u32 %v5648_v29, %v4654_v30  ;;  %v6276_v36 = vmov 0.0   ;;  %v4273_v10 = vor.u32 %v5552_v3, %v4270_v6  ;;  %v4582_v30 = vld [vmem:[#allocation7 + $0x528] sm:$0xf0]  ;;  %v5480_v6 = vld [vmem:[#allocation7 + $0x64] sm:$0xf] }
  0xdb   : > { %3503 = vst [vmem:[#allocation2] sm:$0xff] %v6276_v36  ;;  %v466_v18 = vsel %vm7034_vm2, %v6523_v7, %v338_v0  ;;  %v5630_v7 = vld [vmem:[#allocation7 + $0x514] sm:$0xf]  ;;  %v4009_v57 = vor.u32 %v5486_v53, %v4006_v54 }
  0xdc   : > { %3504 = vst [vmem:[#allocation2 + $0x8] sm:$0xff] %v6276_v36  ;;  %v4585_v32 = vor.u32 %v5630_v7, %v4582_v30  ;;  %v3958_v7 = vld [vmem:[#allocation7 + $0x48] sm:$0xf0] }
  0xdd   : > { %3505 = vst [vmem:[#allocation2 + $0x10] sm:$0xff] %v6276_v36  ;;  %1752 = vmatpush.bf16.msrb.mxu2 %v4321_v14  ;;  %1723 = vmatpush.bf16.msrb.mxu0 %v4009_v57 }
  0xde   : > { %1686 = vmatpush.bf16.msra.mxu1 %v4149_v27  ;;  %1759 = vmatpush.bf16.msrb.mxu3 %v4657_v31  ;;  %3506 = vst [vmem:[#allocation2 + $0x18] sm:$0xff] %v6276_v36  ;;  %v4246_v27 = vld [vmem:[#allocation7 + $0x288] sm:$0xf0] }
  0xdf   : > { %3507 = vst [vmem:[#allocation2 + $0x20] sm:$0xff] %v6276_v36  ;;  %v4249_v29 = vor.u32 %v5546_v26, %v4246_v27  ;;  %v359_v27 = vsel %vm356_vm3, %v6570_v35, %v6576_v56 }
  0xe0   : > { %v6596_v63 = vpop.permute.xlu1 %326  ;;  %3508 = vst [vmem:[#allocation2 + $0x28] sm:$0xff] %v6276_v36 }
  0xe1   : > { %v6598_v9 = vpop.permute.xlu0 %391  ;;  %3509 = vst [vmem:[#allocation2 + $0x30] sm:$0xff] %v6276_v36 }
  0xe2   : > { %v6606_v4 = vpop.permute.xlu2 %393  ;;  %1687 = vmatpush.bf16.msra.mxu1 %v4125_v45  ;;  %3510 = vst [vmem:[#allocation2 + $0x38] sm:$0xff] %v6276_v36  ;;  %1760 = vmatpush.bf16.msrb.mxu3 %v4633_v58  ;;  %v4222_v45 = vld [vmem:[#allocation7 + $0x258] sm:$0xf0]  ;;  %v4198_v58 = vld [vmem:[#allocation7 + $0x228] sm:$0xf0]  ;;  %v398_v41 = vsel %vm395_vm7, %v6574_v43, %v6598_v9 }
  0xe3   : > { %3511 = vst [vmem:[#allocation2 + $0x40] sm:$0xff] %v6276_v36  ;;  %v4225_v48 = vor.u32 %v5540_v40, %v4222_v45  ;;  %v4201_v0 = vor.u32 %v5534_v55, %v4198_v58  ;;  %v378_v40 = vsel %vm375_vm5, %v6568_v25, %v6589_v37  ;;  %v5468_v45 = vld [vmem:[#allocation7 + $0x4] sm:$0xf] }
  0xe6   : > { %1732 = vmatpush.bf16.msrb.mxu1 %v4297_v51  ;;  %1761 = vmatpush.bf16.msrb.mxu3 %v4609_v21  ;;  %v500_v51 = vlaneseq  ;;  %v502_v21 = vstv %s3928_s15 }
  0xe8   : > { %v6600_v34 = vpop.permute.xlu1 %409  ;;  %v501_v3 = vshrl.u32 %v500_v51, 7 }
  0xe9   : > { %v6603_v44 = vpop.permute.xlu0 %373  ;;  %v418_v47 = vsel %vm415_vm8, %v6600_v34, %v6594_v62 }
  0xea   : > { %1733 = vmatpush.bf16.msrb.mxu1 %v4273_v10  ;;  %v6630_v31 = vpop.permute.xlu2 %365  ;;  %1762 = vmatpush.bf16.msrb.mxu3 %v4585_v32  ;;  %v3982_v10 = vld [vmem:[#allocation7 + $0x78] sm:$0xf0]  ;;  %v503_v32 = vadd.s32 %v502_v21, %v501_v3 }
  0xeb   : > { %v3985_v14 = vor.u32 %v5480_v6, %v3982_v10  ;;  %v4492_v6 = vld [vmem:[#allocation7 + $0x458] sm:$0xf]  ;;  %v5610_v10 = vld [vmem:[#allocation7 + $0x46c] sm:$0xf0] }
  0xec   : > { %vm504_vm13 = vcmp.lt.s32.totalorder %v503_v32, 7  ;;  %v4493_v15 = vor.u32 %v5610_v10, %v4492_v6  ;;  %v4420_v32 = vld [vmem:[#allocation7 + $0x3c8] sm:$0xf] }
  0xed   : > { %1724 = vmatpush.bf16.msrb.mxu0 %v3985_v14  ;;  %v6676_v60 = vsel %vm504_vm13, 1.0, %v6276_v36  ;;  %v5604_v36 = vld [vmem:[#allocation7 + $0x43c] sm:$0xf0] }
  0xee   : > { %1734 = vmatpush.bf16.msrb.mxu1 %v4249_v29  ;;  %1763 = vmatpush.bf16.msrb.mxu3 %v4561_v49  ;;  %v5474_v29 = vld [vmem:[#allocation7 + $0x34] sm:$0xf] }
  0xef   : > { %v3961_v33 = vor.u32 %v5474_v29, %v3958_v7  ;;  %v4444_v29 = vld [vmem:[#allocation7 + $0x3f8] sm:$0xf]  ;;  %v5598_v7 = vld [vmem:[#allocation7 + $0x40c] sm:$0xf0] }
  0xf0   : > { %v6617_v13 = vpop.permute.xlu1 %348 }
  0xf1   : > { %v6622_v19 = vpop.permute.xlu0 %346  ;;  %v358_v20 = vsel %vm356_vm3, %v6617_v13, %v6570_v35  ;;  %1725 = vmatpush.bf16.msrb.mxu0 %v3961_v33  ;;  %v5592_v33 = vld [vmem:[#allocation7 + $0x3dc] sm:$0xf0] }
  0xf2   : > { %v6628_v23 = vsel %vm7032_vm4, %v466_v18, %v358_v20  ;;  %1735 = vmatpush.bf16.msrb.mxu1 %v4225_v48  ;;  %v6638_v12 = vpop.permute.xlu2 %449  ;;  %v4510_v18 = vld [vmem:[#allocation7 + $0x498] sm:$0xf0]  ;;  %v339_v20 = vsel %vm336_vm1, %v6572_v38, %v6578_v61  ;;  %1764 = vmatpush.bf16.msrb.mxu3 %v4537_v1  ;;  %v5522_v38 = vld [vmem:[#allocation7 + $0x1b4] sm:$0xf] }
  0xf3   : > { %v4513_v24 = vor.u32 %v5612_v16, %v4510_v18  ;;  %v467_v61 = vsel %vm7034_vm2, %v6506_v5, %v339_v20  ;;  %v4153_v56 = vor.u32 %v5522_v38, %v4150_v39  ;;  %v4126_v48 = vld [vmem:[#allocation7 + $0x198] sm:$0xf0]  ;;  %v4468_v18 = vld [vmem:[#allocation7 + $0x428] sm:$0xf]  ;;  %v399_v39 = vsel %vm395_vm7, %v6598_v9, %v6606_v4 }
  0xf4   : > { %v472_v5 = vsel %vm7032_vm4, %v467_v61, %v359_v27  ;;  %v4129_v54 = vor.u32 %v5516_v46, %v4126_v48  ;;  %v4445_v61 = vor.u32 %v5598_v7, %v4444_v29  ;;  %v5574_v29 = vld [vmem:[#allocation7 + $0x34c] sm:$0xf0] }
  0xf5   : > { %v477_v49 = vsel %vm7031_vm6, %v472_v5, %v378_v40  ;;  %v4396_v5 = vld [vmem:[#allocation7 + $0x398] sm:$0xf] }
  0xf6   : > { %1736 = vmatpush.bf16.msrb.mxu1 %v4201_v0  ;;  %1765 = vmatpush.bf16.msrb.mxu3 %v4513_v24  ;;  %v482_v55 = vsel %vm479_vm9, %v477_v49, %v398_v41  ;;  %v379_v24 = vsel %vm375_vm5, %v6589_v37, %v6603_v44  ;;  %v4372_v49 = vld [vmem:[#allocation7 + $0x368] sm:$0xf] }
  0xf7   : > { %v487_v59 = vsel %vm484_vm10, %v482_v55, %v418_v47  ;;  %v478_v38 = vsel %vm7031_vm6, %v6592_v42, %v379_v24  ;;  %v337_v42 = vsel %vm336_vm1, %v6596_v63, %v6583_v17  ;;  %v357_v17 = vsel %vm356_vm3, %v6622_v19, %v6617_v13  ;;  %v5652_v55 = vld [vmem:[#allocation7 + $0x5bc] sm:$0xf0]  ;;  %v5514_v24 = vld [vmem:[#allocation7 + $0x16c] sm:$0xf0] }
  0xf8   : > { %v6632_v50 = vpop.permute.xlu1 %430  ;;  %v483_v44 = vsel %vm479_vm9, %v478_v38, %v399_v39  ;;  %v4661_v6 = vor.u32 %v5652_v55, %v4660_v2  ;;  %v4228_v2 = vld [vmem:[#allocation7 + $0x248] sm:$0xf]  ;;  %v5544_v55 = vld [vmem:[#allocation7 + $0x25c] sm:$0xf0] }
  0xf9   : > { %v6634_v52 = vpop.permute.xlu0 %428 }
  0xfa   : > { %1737 = vmatpush.bf16.msrb.mxu1 %v4177_v22  ;;  %v437_v53 = vsel %vm434_vm11, %v6634_v52, %v6632_v50  ;;  %v388_v57 = vpop.permute.xlu2 %387  ;;  %v4469_v22 = vor.u32 %v5604_v36, %v4468_v18  ;;  %v4300_v18 = vld [vmem:[#allocation7 + $0x2d8] sm:$0xf]  ;;  %v5562_v36 = vld [vmem:[#allocation7 + $0x2ec] sm:$0xf0] }
  0xfb   : > { %v492_v1 = vsel %vm489_vm12, %v487_v59, %v437_v53  ;;  %v397_v41 = vsel %vm395_vm7, %v388_v57, %v6574_v43  ;;  %v465_v43 = vsel %vm7034_vm2, %v317_v8, %v337_v42  ;;  %v4276_v42 = vld [vmem:[#allocation7 + $0x2a8] sm:$0xf] }
  0xfc   : > { %v470_v8 = vsel %vm7032_vm4, %v465_v43, %v357_v17 }
  0xfe   : > { %1738 = vmatpush.bf16.msrb.mxu1 %v4153_v56 }
 0x100   : > { %v6643_v26 = vpop.permute.xlu1 %413 }
 0x101   : > { %v6648_v28 = vpop.permute.xlu0 %367 }
 0x102   : > { %v377_v30 = vsel %vm375_vm5, %v6648_v28, %v6568_v25  ;;  %1739 = vmatpush.bf16.msrb.mxu1 %v4129_v54  ;;  %v408_v27 = vpop.permute.xlu2 %407  ;;  %v376_v47 = vsel %vm375_vm5, %v6630_v31, %v6648_v28  ;;  %v5580_v54 = vld [vmem:[#allocation7 + $0x37c] sm:$0xf0] }
 0x103   : > { %v6657_v35 = vsel %vm7031_vm6, %v6628_v23, %v377_v30  ;;  %v3934_v23 = vld [vmem:[#allocation7 + $0x18] sm:$0xf0]  ;;  %v419_v30 = vsel %vm415_vm8, %v6594_v62, %v6643_v26  ;;  %v4421_v26 = vor.u32 %v5592_v33, %v4420_v32  ;;  %v417_v13 = vsel %vm415_vm8, %v408_v27, %v6600_v34  ;;  %v4084_v33 = vld [vmem:[#allocation7 + $0x128] sm:$0xf] }
 0x104   : > { %v3937_v25 = vor.u32 %v5468_v45, %v3934_v23  ;;  %v488_v40 = vsel %vm484_vm10, %v483_v44, %v419_v30  ;;  %v4684_v45 = vld [vmem:[#allocation7 + $0x5d8] sm:$0xf]  ;;  %v5658_v23 = vld [vmem:[#allocation7 + $0x5ec] sm:$0xf0]  ;;  %v481_v63 = vsel %vm479_vm9, %v6657_v35, %v397_v41  ;;  %v4301_v32 = vor.u32 %v5562_v36, %v4300_v18  ;;  %v5568_v41 = vld [vmem:[#allocation7 + $0x31c] sm:$0xf0] }
 0x105   : > { %v4685_v53 = vor.u32 %v5658_v23, %v4684_v45  ;;  %v486_v59 = vsel %vm484_vm10, %v481_v63, %v417_v13  ;;  %v5646_v30 = vld [vmem:[#allocation7 + $0x58c] sm:$0xf0]  ;;  %v4252_v63 = vld [vmem:[#allocation7 + $0x278] sm:$0xf] }
 0x106   : > { %1726 = vmatpush.bf16.msrb.mxu0 %v3937_v25  ;;  %v5634_v13 = vld [vmem:[#allocation7 + $0x52c] sm:$0xf0]  ;;  %v4540_v36 = vld [vmem:[#allocation7 + $0x4b8] sm:$0xf] }
 0x107   : > { %v5490_v18 = vld [vmem:[#allocation7 + $0xac] sm:$0xf0] }
 0x108   : > { %v386_v58 = vpop.permute.xlu1 %385 }
 0x109   : > { %v452_v0 = vpop.permute.xlu0 %451  ;;  %v396_v19 = vsel %vm395_vm7, %v386_v58, %v388_v57 }
 0x10a   : > { %v458_v3 = vsel %vm455_vm14, %v6638_v12, %v452_v0  ;;  %v427_v25 = vpop.permute.xlu2 %426 }
 0x10b   : > { %v497_v11 = vsel %vm494_vm15, %v492_v1, %v458_v3  ;;  %v436_v34 = vsel %vm434_vm11, %v427_v25, %v6634_v52  ;;  %v4373_v3 = vor.u32 %v5580_v54, %v4372_v49  ;;  %v4588_v49 = vld [vmem:[#allocation7 + $0x518] sm:$0xf] }
 0x10c   : > { %v509_v14 = vmul.f32 %v6676_v60, %v497_v11  ;;  %v491_v10 = vsel %vm489_vm12, %v486_v59, %v436_v34  ;;  %v4564_v34 = vld [vmem:[#allocation7 + $0x4e8] sm:$0xf] }
 0x10e   : > { %v6683_v16 = vpack.c.bf16 %v509_v14, %v509_v14 }
 0x110   : > { %1701 = vmatmul.bf16.vlgmr.msra.gmra.mxu2 %v6683_v16  ;;  %v406_v20 = vpop.permute.xlu1 %405 }
 0x111   : > { %1797 = vmatpush.bf16.msra.mxu2 %v4493_v15  ;;  %v433_v21 = vpop.permute.xlu0 %432  ;;  %v416_v31 = vsel %vm415_vm8, %v406_v20, %v408_v27  ;;  %v4108_v15 = vld [vmem:[#allocation7 + $0x158] sm:$0xf] }
 0x112   : > { %v438_v37 = vsel %vm434_vm11, %v6632_v50, %v433_v21  ;;  %v5586_v50 = vld [vmem:[#allocation7 + $0x3ac] sm:$0xf0]  ;;  %v4348_v27 = vld [vmem:[#allocation7 + $0x338] sm:$0xf] }
 0x113   : > { %v493_v9 = vsel %vm489_vm12, %v488_v40, %v438_v37  ;;  %v4397_v35 = vor.u32 %v5586_v50, %v4396_v5  ;;  %v4109_v37 = vor.u32 %v5514_v24, %v4108_v15  ;;  %v4349_v44 = vor.u32 %v5574_v29, %v4348_v27  ;;  %v5556_v40 = vld [vmem:[#allocation7 + $0x2bc] sm:$0xf0]  ;;  %v4324_v5 = vld [vmem:[#allocation7 + $0x308] sm:$0xf]  ;;  %v4494_v50 = vld [vmem:[#allocation7 + $0x470] sm:$0xf0] }
 0x114   : > { %v4277_v45 = vor.u32 %v5556_v40, %v4276_v42  ;;  %v4325_v17 = vor.u32 %v5568_v41, %v4324_v5  ;;  %v4012_v15 = vld [vmem:[#allocation7 + $0x98] sm:$0xf]  ;;  %v4180_v29 = vld [vmem:[#allocation7 + $0x1e8] sm:$0xf]  ;;  %v5655_v42 = vld [vmem:[#allocation7 + $0x5dc] sm:$0xf] }
 0x115   : > { %1798 = vmatpush.bf16.msra.mxu2 %v4469_v22  ;;  %v4013_v27 = vor.u32 %v5490_v18, %v4012_v15  ;;  %v4686_v40 = vld [vmem:[#allocation7 + $0x5f0] sm:$0xf0]  ;;  %v4156_v5 = vld [vmem:[#allocation7 + $0x1b8] sm:$0xf]  ;;  %v5526_v41 = vld [vmem:[#allocation7 + $0x1cc] sm:$0xf0] }
 0x116   : > { %v5565_v15 = vld [vmem:[#allocation7 + $0x30c] sm:$0xf]  ;;  %v4326_v18 = vld [vmem:[#allocation7 + $0x320] sm:$0xf0] }
 0x118   : > { %v425_v56 = vpop.permute.xlu1 %424 }
 0x119   : > { %1799 = vmatpush.bf16.msra.mxu2 %v4445_v61  ;;  %v454_v62 = vpop.permute.xlu0 %453  ;;  %v435_v57 = vsel %vm434_vm11, %v425_v56, %v427_v25  ;;  %v4636_v61 = vld [vmem:[#allocation7 + $0x578] sm:$0xf]  ;;  %v5508_v56 = vld [vmem:[#allocation7 + $0x13c] sm:$0xf0] }
 0x11a   : > { %v459_v4 = vsel %vm455_vm14, %v452_v0, %v454_v62  ;;  %v475_v0 = vsel %vm7031_vm6, %v470_v8, %v376_v47  ;;  %v4085_v23 = vor.u32 %v5508_v56, %v4084_v33  ;;  %v4060_v25 = vld [vmem:[#allocation7 + $0xf8] sm:$0xf]  ;;  %v4589_v8 = vor.u32 %v5634_v13, %v4588_v49  ;;  %v5616_v33 = vld [vmem:[#allocation7 + $0x49c] sm:$0xf0]  ;;  %v4132_v49 = vld [vmem:[#allocation7 + $0x188] sm:$0xf] }
 0x11b   : > { %v498_v46 = vsel %vm494_vm15, %v493_v9, %v459_v4  ;;  %v480_v58 = vsel %vm479_vm9, %v475_v0, %v396_v19  ;;  %v4612_v9 = vld [vmem:[#allocation7 + $0x548] sm:$0xf]  ;;  %v5607_v4 = vld [vmem:[#allocation7 + $0x45c] sm:$0xf]  ;;  %v5601_v19 = vld [vmem:[#allocation7 + $0x42c] sm:$0xf] }
 0x11c   : > { %v510_v48 = vmul.f32 %v6676_v60, %v498_v46  ;;  %v485_v11 = vsel %vm484_vm10, %v480_v58, %v416_v31  ;;  %v5550_v46 = vld [vmem:[#allocation7 + $0x28c] sm:$0xf0]  ;;  %v4497_v47 = vor.u32 %v5607_v4, %v4494_v50  ;;  %v4036_v31 = vld [vmem:[#allocation7 + $0xc8] sm:$0xf]  ;;  %v5496_v0 = vld [vmem:[#allocation7 + $0xdc] sm:$0xf0] }
 0x11d   : > { %1800 = vmatpush.bf16.msra.mxu2 %v4421_v26  ;;  %v490_v20 = vsel %vm489_vm12, %v485_v11, %v435_v57  ;;  %v4637_v26 = vor.u32 %v5646_v30, %v4636_v61  ;;  %v5628_v57 = vld [vmem:[#allocation7 + $0x4fc] sm:$0xf0]  ;;  %v5595_v58 = vld [vmem:[#allocation7 + $0x3fc] sm:$0xf]  ;;  %v5538_v11 = vld [vmem:[#allocation7 + $0x22c] sm:$0xf0] }
 0x11e   : > { %v6727_v28 = vpack.c.bf16 %v510_v48, %v510_v48  ;;  %v5502_v48 = vld [vmem:[#allocation7 + $0x10c] sm:$0xf0]  ;;  %v3988_v30 = vld [vmem:[#allocation7 + $0x68] sm:$0xf]  ;;  %v3964_v4 = vld [vmem:[#allocation7 + $0x38] sm:$0xf] }
 0x11f   : > { %v4061_v54 = vor.u32 %v5502_v48, %v4060_v25  ;;  %v5478_v50 = vld [vmem:[#allocation7 + $0x4c] sm:$0xf0]  ;;  %v5472_v48 = vld [vmem:[#allocation7 + $0x1c] sm:$0xf0]  ;;  %vm3593_vm6 = vcmp.lt.s32.totalorder %v500_v51, 576 }
 0x120   : > { %1714 = vmatmul.bf16.vlgmr.msra.gmra.mxu3 %v6727_v28  ;;  %1753 = vmatmul.bf16.vlgmr.msrb.gmra.mxu2 %v6683_v16  ;;  %v448_v1 = vpop.permute.xlu1 %447  ;;  %v3965_v25 = vor.u32 %v5478_v50, %v3964_v4  ;;  %v5520_v13 = vld [vmem:[#allocation7 + $0x19c] sm:$0xf0]  ;;  %v4038_v4 = vld [vmem:[#allocation7 + $0xe0] sm:$0xf0]  ;;  %v5625_v50 = vld [vmem:[#allocation7 + $0x4ec] sm:$0xf] }
 0x121   : > { %1801 = vmatpush.bf16.msra.mxu2 %v4397_v35  ;;  %1810 = vmatpush.bf16.msra.mxu3 %v4685_v53  ;;  %v446_v14 = vpop.permute.xlu0 %445  ;;  %v457_v52 = vsel %vm455_vm14, %v448_v1, %v6638_v12  ;;  %v4470_v35 = vld [vmem:[#allocation7 + $0x440] sm:$0xf0]  ;;  %v4253_v53 = vor.u32 %v5550_v46, %v4252_v63  ;;  %v4157_v63 = vor.u32 %v5526_v41, %v4156_v5  ;;  %v5649_v46 = vld [vmem:[#allocation7 + $0x5ac] sm:$0xf] }
 0x122   : > { %v456_v21 = vsel %vm455_vm14, %v446_v14, %v448_v1  ;;  %v496_v22 = vsel %vm494_vm15, %v491_v10, %v457_v52  ;;  %v4473_v59 = vor.u32 %v5601_v19, %v4470_v35  ;;  %v4446_v1 = vld [vmem:[#allocation7 + $0x410] sm:$0xf0]  ;;  %v4204_v10 = vld [vmem:[#allocation7 + $0x218] sm:$0xf]  ;;  %v4565_v14 = vor.u32 %v5628_v57, %v4564_v34  ;;  %v5511_v35 = vld [vmem:[#allocation7 + $0x15c] sm:$0xf] }
 0x123   : > { %v495_v7 = vsel %vm494_vm15, %v490_v20, %v456_v21  ;;  %v508_v38 = vmul.f32 %v6676_v60, %v496_v22  ;;  %v4449_v52 = vor.u32 %v5595_v58, %v4446_v1  ;;  %v5622_v20 = vld [vmem:[#allocation7 + $0x4cc] sm:$0xf0]  ;;  %v5589_v21 = vld [vmem:[#allocation7 + $0x3cc] sm:$0xf]  ;;  %v4422_v22 = vld [vmem:[#allocation7 + $0x3e0] sm:$0xf0]  ;;  %v4205_v24 = vor.u32 %v5538_v11, %v4204_v10 }
 0x124   : > { %v507_v12 = vmul.f32 %v6676_v60, %v495_v7  ;;  %v5640_v60 = vld [vmem:[#allocation7 + $0x55c] sm:$0xf0]  ;;  %v4425_v61 = vor.u32 %v5589_v21, %v4422_v22  ;;  %v4638_v34 = vld [vmem:[#allocation7 + $0x590] sm:$0xf0]  ;;  %v5505_v1 = vld [vmem:[#allocation7 + $0x12c] sm:$0xf] }
 0x125   : > { %v6746_v39 = vpack.c.bf16 %v508_v38, %v508_v38  ;;  %1802 = vmatpush.bf16.msra.mxu2 %v4373_v3  ;;  %1811 = vmatpush.bf16.msra.mxu3 %v4661_v6  ;;  %v4613_v43 = vor.u32 %v5640_v60, %v4612_v9  ;;  %v4229_v3 = vor.u32 %v5544_v55, %v4228_v2  ;;  %v5532_v7 = vld [vmem:[#allocation7 + $0x1fc] sm:$0xf0]  ;;  %v4110_v55 = vld [vmem:[#allocation7 + $0x170] sm:$0xf0]  ;;  %v4086_v10 = vld [vmem:[#allocation7 + $0x140] sm:$0xf0] }
 0x126   : > { %v6748_v62 = vpack.c.bf16 %v507_v12, %v507_v12  ;;  %v4037_v6 = vor.u32 %v5496_v0, %v4036_v31  ;;  %v4541_v38 = vor.u32 %v5622_v20, %v4540_v36  ;;  %v5484_v12 = vld [vmem:[#allocation7 + $0x7c] sm:$0xf0]  ;;  %v4181_v56 = vor.u32 %v5532_v7, %v4180_v29  ;;  %v5643_v0 = vld [vmem:[#allocation7 + $0x57c] sm:$0xf]  ;;  %v5553_v11 = vld [vmem:[#allocation7 + $0x2ac] sm:$0xf] }
 0x127   : > { %1688 = vmatmul.bf16.vlgmr.msra.gmra.mxu1 %v6746_v39  ;;  %v4133_v31 = vor.u32 %v5520_v13, %v4132_v49  ;;  %v5637_v36 = vld [vmem:[#allocation7 + $0x54c] sm:$0xf]  ;;  %v4614_v20 = vld [vmem:[#allocation7 + $0x560] sm:$0xf0]  ;;  %v4500_v21 = vld [vmem:[#allocation7 + $0x460] sm:$0xf]  ;;  %v4329_v29 = vor.u32 %v5565_v15, %v4326_v18 }
 0x128   : > { %1675 = vmatmul.bf16.vlgmr.msra.gmra.mxu0 %v6748_v62  ;;  %1784 = vmatpush.bf16.msra.mxu1 %v4301_v32  ;;  %v4516_v32 = vld [vmem:[#allocation7 + $0x488] sm:$0xf]  ;;  %v5611_v22 = vld [vmem:[#allocation7 + $0x474] sm:$0xf0]  ;;  %v5547_v7 = vld [vmem:[#allocation7 + $0x27c] sm:$0xf] }
 0x129   : > { %1771 = vmatpush.bf16.msra.mxu0 %v4109_v37  ;;  %1803 = vmatpush.bf16.msra.mxu2 %v4349_v44  ;;  %v5583_v37 = vld [vmem:[#allocation7 + $0x39c] sm:$0xf]  ;;  %v4398_v44 = vld [vmem:[#allocation7 + $0x3b0] sm:$0xf0]  ;;  %v4517_v9 = vor.u32 %v5616_v33, %v4516_v32  ;;  %v4230_v5 = vld [vmem:[#allocation7 + $0x260] sm:$0xf0] }
 0x12a   : > { %1812 = vmatpush.bf16.msra.mxu3 %v4637_v26  ;;  %v3989_v26 = vor.u32 %v5484_v12, %v3988_v30  ;;  %v4401_v60 = vor.u32 %v5583_v37, %v4398_v44  ;;  %v4501_v30 = vor.u32 %v5611_v22, %v4500_v21  ;;  %v5499_v12 = vld [vmem:[#allocation7 + $0xfc] sm:$0xf]  ;;  %v4062_v32 = vld [vmem:[#allocation7 + $0x110] sm:$0xf0]  ;;  %v4476_v44 = vld [vmem:[#allocation7 + $0x430] sm:$0xf] }
 0x12b   : > { %v5631_v33 = vld [vmem:[#allocation7 + $0x51c] sm:$0xf]  ;;  %v4590_v37 = vld [vmem:[#allocation7 + $0x530] sm:$0xf0] }
 0x12c   : > { %1785 = vmatpush.bf16.msra.mxu1 %v4277_v45  ;;  %v4689_v45 = vor.u32 %v5655_v42, %v4686_v40  ;;  %v4065_v40 = vor.u32 %v5499_v12, %v4062_v32  ;;  %v4593_v41 = vor.u32 %v5631_v33, %v4590_v37  ;;  %v5487_v49 = vld [vmem:[#allocation7 + $0x9c] sm:$0xf]  ;;  %v4014_v13 = vld [vmem:[#allocation7 + $0xb0] sm:$0xf0]  ;;  %v3942_v32 = vld [vmem:[#allocation7 + $0x20] sm:$0xf0] }
 0x12d   : > { %1772 = vmatpush.bf16.msra.mxu0 %v4085_v23  ;;  %1804 = vmatpush.bf16.msra.mxu2 %v4325_v17  ;;  %v5577_v23 = vld [vmem:[#allocation7 + $0x36c] sm:$0xf]  ;;  %v4374_v17 = vld [vmem:[#allocation7 + $0x380] sm:$0xf0]  ;;  %v5523_v15 = vld [vmem:[#allocation7 + $0x1bc] sm:$0xf] }
 0x12e   : > { %1813 = vmatpush.bf16.msra.mxu3 %v4613_v43  ;;  %v4662_v43 = vld [vmem:[#allocation7 + $0x5c0] sm:$0xf0]  ;;  %v4377_v19 = vor.u32 %v5577_v23, %v4374_v17  ;;  %v4452_v23 = vld [vmem:[#allocation7 + $0x400] sm:$0xf]  ;;  %v5599_v17 = vld [vmem:[#allocation7 + $0x414] sm:$0xf0] }
 0x12f   : > { %v4665_v2 = vor.u32 %v5649_v46, %v4662_v43  ;;  %v5535_v43 = vld [vmem:[#allocation7 + $0x21c] sm:$0xf]  ;;  %v4158_v18 = vld [vmem:[#allocation7 + $0x1d0] sm:$0xf0]  ;;  %v5517_v33 = vld [vmem:[#allocation7 + $0x18c] sm:$0xf] }
 0x130   : > { %1766 = vmatmul.bf16.vlgmr.msrb.gmra.mxu3 %v6727_v28  ;;  %1786 = vmatpush.bf16.msra.mxu1 %v4253_v53  ;;  %v5559_v53 = vld [vmem:[#allocation7 + $0x2dc] sm:$0xf]  ;;  %v3966_v22 = vld [vmem:[#allocation7 + $0x50] sm:$0xf0]  ;;  %v4134_v37 = vld [vmem:[#allocation7 + $0x1a0] sm:$0xf0] }
 0x131   : > { %1849 = vmatpush.bf16.msrb.mxu2 %v4497_v47  ;;  %1773 = vmatpush.bf16.msra.mxu0 %v4061_v54  ;;  %v3940_v47 = vld [vmem:[#allocation7 + $0x8] sm:$0xf]  ;;  %v4302_v54 = vld [vmem:[#allocation7 + $0x2f0] sm:$0xf0]  ;;  %v5475_v21 = vld [vmem:[#allocation7 + $0x3c] sm:$0xf] }
 0x132   : > { %1805 = vmatmul.bf16.vlgmr.msra.gmra.mxu2 %v6683_v16  ;;  %1814 = vmatpush.bf16.msra.mxu3 %v4589_v8  ;;  %v5571_v8 = vld [vmem:[#allocation7 + $0x33c] sm:$0xf]  ;;  %v3941_v57 = vor.u32 %v5472_v48, %v3940_v47  ;;  %v4305_v58 = vor.u32 %v5559_v53, %v4302_v54  ;;  %v4206_v47 = vld [vmem:[#allocation7 + $0x230] sm:$0xf0]  ;;  %v4453_v48 = vor.u32 %v5599_v17, %v4452_v23  ;;  %v4428_v53 = vld [vmem:[#allocation7 + $0x3d0] sm:$0xf] }
 0x133   : > { %v5593_v54 = vld [vmem:[#allocation7 + $0x3e4] sm:$0xf0]  ;;  %v3969_v12 = vor.u32 %v5475_v21, %v3966_v22  ;;  %v4092_v17 = vld [vmem:[#allocation7 + $0x130] sm:$0xf] }
 0x134   : > { %1787 = vmatpush.bf16.msra.mxu1 %v4229_v3  ;;  %v4113_v3 = vor.u32 %v5511_v35, %v4110_v55  ;;  %v4542_v35 = vld [vmem:[#allocation7 + $0x4d0] sm:$0xf0]  ;;  %v4017_v55 = vor.u32 %v5487_v49, %v4014_v13  ;;  %v4332_v49 = vld [vmem:[#allocation7 + $0x310] sm:$0xf]  ;;  %v5569_v13 = vld [vmem:[#allocation7 + $0x324] sm:$0xf0] }
 0x135   : > { %1850 = vmatpush.bf16.msrb.mxu2 %v4473_v59  ;;  %1774 = vmatpush.bf16.msra.mxu0 %v4037_v6  ;;  %v4350_v59 = vld [vmem:[#allocation7 + $0x350] sm:$0xf0]  ;;  %v5497_v21 = vld [vmem:[#allocation7 + $0xe4] sm:$0xf0]  ;;  %v4572_v22 = vld [vmem:[#allocation7 + $0x4f0] sm:$0xf] }
 0x136   : > { %1815 = vmatpush.bf16.msra.mxu3 %v4565_v14  ;;  %v4353_v6 = vor.u32 %v5571_v8, %v4350_v59  ;;  %v4278_v14 = vld [vmem:[#allocation7 + $0x2c0] sm:$0xf0]  ;;  %v5529_v8 = vld [vmem:[#allocation7 + $0x1ec] sm:$0xf] }
 0x137   : > { %1740 = vmatmul.bf16.vlgmr.msrb.gmra.mxu1 %v6746_v39  ;;  %v4182_v59 = vld [vmem:[#allocation7 + $0x200] sm:$0xf0] }
 0x138   : > { %1727 = vmatmul.bf16.vlgmr.msrb.gmra.mxu0 %v6748_v62  ;;  %1788 = vmatpush.bf16.msra.mxu1 %v4205_v24  ;;  %v4281_v24 = vor.u32 %v5553_v11, %v4278_v14  ;;  %v4692_v11 = vld [vmem:[#allocation7 + $0x5e0] sm:$0xf]  ;;  %v5659_v14 = vld [vmem:[#allocation7 + $0x5f4] sm:$0xf0] }
 0x139   : > { %1851 = vmatpush.bf16.msrb.mxu2 %v4449_v52  ;;  %1775 = vmatpush.bf16.msra.mxu0 %v4013_v27  ;;  %v4641_v52 = vor.u32 %v5643_v0, %v4638_v34  ;;  %v4089_v27 = vor.u32 %v5505_v1, %v4086_v10  ;;  %v4429_v0 = vor.u32 %v5593_v54, %v4428_v53  ;;  %v5481_v34 = vld [vmem:[#allocation7 + $0x6c] sm:$0xf]  ;;  %v4518_v1 = vld [vmem:[#allocation7 + $0x4a0] sm:$0xf0]  ;;  %v4502_v54 = vld [vmem:[#allocation7 + $0x478] sm:$0xf0] }
 0x13a   : > { %1816 = vmatpush.bf16.msra.mxu3 %v4541_v38  ;;  %v4254_v38 = vld [vmem:[#allocation7 + $0x290] sm:$0xf0]  ;;  %v4185_v10 = vor.u32 %v5529_v8, %v4182_v59  ;;  %v5608_v53 = vld [vmem:[#allocation7 + $0x464] sm:$0xf]  ;;  %v4333_v8 = vor.u32 %v5569_v13, %v4332_v49  ;;  %v4260_v59 = vld [vmem:[#allocation7 + $0x280] sm:$0xf] }
 0x13b   : > { %v4257_v42 = vor.u32 %v5547_v7, %v4254_v38  ;;  %v4161_v7 = vor.u32 %v5523_v15, %v4158_v18  ;;  %v4668_v38 = vld [vmem:[#allocation7 + $0x5b0] sm:$0xf]  ;;  %v5545_v15 = vld [vmem:[#allocation7 + $0x264] sm:$0xf0]  ;;  %v4164_v49 = vld [vmem:[#allocation7 + $0x1c0] sm:$0xf] }
 0x13c   : > { %1789 = vmatpush.bf16.msra.mxu1 %v4181_v56  ;;  %v5605_v56 = vld [vmem:[#allocation7 + $0x444] sm:$0xf0]  ;;  %v5527_v13 = vld [vmem:[#allocation7 + $0x1d4] sm:$0xf0] }
 0x13d   : > { %1852 = vmatpush.bf16.msrb.mxu2 %v4425_v61  ;;  %1776 = vmatpush.bf16.msra.mxu0 %v3989_v26  ;;  %v4617_v61 = vor.u32 %v5637_v36, %v4614_v20  ;;  %v5541_v26 = vld [vmem:[#allocation7 + $0x24c] sm:$0xf] }
 0x13e   : > { %1817 = vmatpush.bf16.msra.mxu3 %v4517_v9  ;;  %v4477_v9 = vor.u32 %v5605_v56, %v4476_v44  ;;  %v4116_v56 = vld [vmem:[#allocation7 + $0x160] sm:$0xf] }
 0x140   : > { %1790 = vmatpush.bf16.msra.mxu1 %v4157_v63  ;;  %v4233_v63 = vor.u32 %v5541_v26, %v4230_v5  ;;  %v5515_v5 = vld [vmem:[#allocation7 + $0x174] sm:$0xf0] }
 0x141   : > { %1853 = vmatpush.bf16.msrb.mxu2 %v4401_v60  ;;  %1777 = vmatpush.bf16.msra.mxu0 %v3965_v25  ;;  %v5493_v60 = vld [vmem:[#allocation7 + $0xcc] sm:$0xf] }
 0x142   : > { %1862 = vmatpush.bf16.msrb.mxu3 %v4689_v45  ;;  %v4566_v45 = vld [vmem:[#allocation7 + $0x500] sm:$0xf0]  ;;  %v4041_v46 = vor.u32 %v5493_v60, %v4038_v4  ;;  %v4137_v60 = vor.u32 %v5517_v33, %v4134_v37  ;;  %v4644_v4 = vld [vmem:[#allocation7 + $0x580] sm:$0xf]  ;;  %v5491_v37 = vld [vmem:[#allocation7 + $0xb4] sm:$0xf0] }
 0x143   : > { %1818 = vmatmul.bf16.vlgmr.msra.gmra.mxu3 %v6727_v28  ;;  %v4569_v25 = vor.u32 %v5625_v50, %v4566_v45  ;;  %v5647_v50 = vld [vmem:[#allocation7 + $0x594] sm:$0xf0]  ;;  %v4020_v33 = vld [vmem:[#allocation7 + $0xa0] sm:$0xf] }
 0x144   : > { %1791 = vmatpush.bf16.msra.mxu1 %v4133_v31 }
 0x145   : > { %1854 = vmatpush.bf16.msrb.mxu2 %v4377_v19  ;;  %1778 = vmatpush.bf16.msra.mxu0 %v3941_v57  ;;  %v5619_v19 = vld [vmem:[#allocation7 + $0x4bc] sm:$0xf]  ;;  %v3990_v57 = vld [vmem:[#allocation7 + $0x80] sm:$0xf0] }
 0x146   : > { %1863 = vmatpush.bf16.msrb.mxu3 %v4665_v2  ;;  %v4209_v2 = vor.u32 %v5535_v43, %v4206_v47  ;;  %v4545_v31 = vor.u32 %v5619_v19, %v4542_v35  ;;  %v5509_v43 = vld [vmem:[#allocation7 + $0x144] sm:$0xf0]  ;;  %v4284_v47 = vld [vmem:[#allocation7 + $0x2b0] sm:$0xf] }
 0x147   : > { %1792 = vmatmul.bf16.vlgmr.msra.gmra.mxu1 %v6746_v39  ;;  %v4620_v19 = vld [vmem:[#allocation7 + $0x550] sm:$0xf]  ;;  %v5641_v35 = vld [vmem:[#allocation7 + $0x564] sm:$0xf0] }
 0x148   : > { %1836 = vmatpush.bf16.msrb.mxu1 %v4305_v58  ;;  %1779 = vmatmul.bf16.vlgmr.msra.gmra.mxu0 %v6748_v62  ;;  %v5613_v58 = vld [vmem:[#allocation7 + $0x48c] sm:$0xf] }
 0x149   : > { %1823 = vmatpush.bf16.msrb.mxu0 %v4113_v3  ;;  %1855 = vmatpush.bf16.msrb.mxu2 %v4353_v6  ;;  %v4404_v3 = vld [vmem:[#allocation7 + $0x3a0] sm:$0xf]  ;;  %v5587_v6 = vld [vmem:[#allocation7 + $0x3b4] sm:$0xf0]  ;;  %v4521_v36 = vor.u32 %v5613_v58, %v4518_v1 }
 0x14a   : > { %1864 = vmatpush.bf16.msrb.mxu3 %v4641_v52  ;;  %v3993_v52 = vor.u32 %v5481_v34, %v3990_v57  ;;  %v4405_v20 = vor.u32 %v5587_v6, %v4404_v3  ;;  %v4505_v34 = vor.u32 %v5608_v53, %v4502_v54  ;;  %v4068_v57 = vld [vmem:[#allocation7 + $0x100] sm:$0xf]  ;;  %v5503_v58 = vld [vmem:[#allocation7 + $0x114] sm:$0xf0]  ;;  %v5602_v6 = vld [vmem:[#allocation7 + $0x434] sm:$0xf] }
 0x14b   : > { %v4596_v1 = vld [vmem:[#allocation7 + $0x520] sm:$0xf]  ;;  %v5635_v3 = vld [vmem:[#allocation7 + $0x534] sm:$0xf0] }
 0x14c   : > { %1837 = vmatpush.bf16.msrb.mxu1 %v4281_v24  ;;  %v4693_v24 = vor.u32 %v5659_v14, %v4692_v11  ;;  %v4069_v14 = vor.u32 %v5503_v58, %v4068_v57  ;;  %v4597_v18 = vor.u32 %v5635_v3, %v4596_v1  ;;  %v3972_v53 = vld [vmem:[#allocation7 + $0x40] sm:$0xf]  ;;  %v5479_v54 = vld [vmem:[#allocation7 + $0x54] sm:$0xf0]  ;;  %v5473_v58 = vld [vmem:[#allocation7 + $0x24] sm:$0xf0] }
 0x14d   : > { %1824 = vmatpush.bf16.msrb.mxu0 %v4089_v27  ;;  %1856 = vmatpush.bf16.msrb.mxu2 %v4329_v29  ;;  %v4380_v27 = vld [vmem:[#allocation7 + $0x370] sm:$0xf]  ;;  %v5581_v29 = vld [vmem:[#allocation7 + $0x384] sm:$0xf0]  ;;  %v3973_v57 = vor.u32 %v5479_v54, %v3972_v53  ;;  %v4214_v53 = vld [vmem:[#allocation7 + $0x238] sm:$0xf0] }
 0x14e   : > { %1865 = vmatpush.bf16.msrb.mxu3 %v4617_v61  ;;  %v5653_v61 = vld [vmem:[#allocation7 + $0x5c4] sm:$0xf0]  ;;  %v4381_v44 = vor.u32 %v5581_v29, %v4380_v27  ;;  %v5596_v27 = vld [vmem:[#allocation7 + $0x404] sm:$0xf]  ;;  %v4454_v29 = vld [vmem:[#allocation7 + $0x418] sm:$0xf0] }
 0x14f   : > { %v4669_v26 = vor.u32 %v5653_v61, %v4668_v38  ;;  %v4212_v61 = vld [vmem:[#allocation7 + $0x220] sm:$0xf]  ;;  %v4140_v1 = vld [vmem:[#allocation7 + $0x190] sm:$0xf]  ;;  %v5521_v3 = vld [vmem:[#allocation7 + $0x1a4] sm:$0xf0] }
 0x150   : > { %1857 = vmatmul.bf16.vlgmr.msrb.gmra.mxu2 %v6683_v16  ;;  %1838 = vmatpush.bf16.msrb.mxu1 %v4257_v42  ;;  %v4308_v42 = vld [vmem:[#allocation7 + $0x2e0] sm:$0xf] }
 0x151   : > { %1901 = vmatpush.bf16.msra.mxu2 %v4501_v30  ;;  %1825 = vmatpush.bf16.msrb.mxu0 %v4065_v40  ;;  %v5469_v30 = vld [vmem:[#allocation7 + $0xc] sm:$0xf]  ;;  %v5563_v40 = vld [vmem:[#allocation7 + $0x2f4] sm:$0xf0] }
 0x152   : > { %1866 = vmatpush.bf16.msrb.mxu3 %v4593_v41  ;;  %v4356_v41 = vld [vmem:[#allocation7 + $0x340] sm:$0xf]  ;;  %v3945_v45 = vor.u32 %v5469_v30, %v3942_v32  ;;  %v4309_v23 = vor.u32 %v5563_v40, %v4308_v42  ;;  %v5539_v30 = vld [vmem:[#allocation7 + $0x234] sm:$0xf0]  ;;  %v4457_v32 = vor.u32 %v5596_v27, %v4454_v29  ;;  %v5590_v42 = vld [vmem:[#allocation7 + $0x3d4] sm:$0xf] }
 0x153   : > { %v4430_v40 = vld [vmem:[#allocation7 + $0x3e8] sm:$0xf0] }
 0x154   : > { %1839 = vmatpush.bf16.msrb.mxu1 %v4233_v63  ;;  %v4117_v63 = vor.u32 %v5515_v5, %v4116_v56  ;;  %v5623_v56 = vld [vmem:[#allocation7 + $0x4d4] sm:$0xf0]  ;;  %v4021_v5 = vor.u32 %v5491_v37, %v4020_v33  ;;  %v5566_v33 = vld [vmem:[#allocation7 + $0x314] sm:$0xf]  ;;  %v4334_v37 = vld [vmem:[#allocation7 + $0x328] sm:$0xf0] }
 0x155   : > { %1902 = vmatpush.bf16.msra.mxu2 %v4477_v9  ;;  %1826 = vmatpush.bf16.msrb.mxu0 %v4041_v46  ;;  %v5575_v9 = vld [vmem:[#allocation7 + $0x354] sm:$0xf0] }
 0x156   : > { %1867 = vmatpush.bf16.msrb.mxu3 %v4569_v25  ;;  %v4357_v46 = vor.u32 %v5575_v9, %v4356_v41  ;;  %v5557_v25 = vld [vmem:[#allocation7 + $0x2c4] sm:$0xf0]  ;;  %v4188_v41 = vld [vmem:[#allocation7 + $0x1f0] sm:$0xf] }
 0x157   : > { %v5533_v9 = vld [vmem:[#allocation7 + $0x204] sm:$0xf0] }
 0x158   : > { %1840 = vmatpush.bf16.msrb.mxu1 %v4209_v2  ;;  %v4285_v2 = vor.u32 %v5557_v25, %v4284_v47  ;;  %v5656_v47 = vld [vmem:[#allocation7 + $0x5e4] sm:$0xf]  ;;  %v4694_v25 = vld [vmem:[#allocation7 + $0x5f8] sm:$0xf0] }
 0x159   : > { %1903 = vmatpush.bf16.msra.mxu2 %v4453_v48  ;;  %1827 = vmatpush.bf16.msrb.mxu0 %v4017_v55  ;;  %v4645_v48 = vor.u32 %v5647_v50, %v4644_v4  ;;  %v4093_v55 = vor.u32 %v5509_v43, %v4092_v17  ;;  %v4433_v4 = vor.u32 %v5590_v42, %v4430_v40  ;;  %v3996_v50 = vld [vmem:[#allocation7 + $0x70] sm:$0xf]  ;;  %v5617_v17 = vld [vmem:[#allocation7 + $0x4a4] sm:$0xf0] }
 0x15a   : > { %1868 = vmatpush.bf16.msrb.mxu3 %v4545_v31  ;;  %v5551_v31 = vld [vmem:[#allocation7 + $0x294] sm:$0xf0]  ;;  %v4189_v43 = vor.u32 %v5533_v9, %v4188_v41  ;;  %v4262_v41 = vld [vmem:[#allocation7 + $0x298] sm:$0xf0] }
 0x15b   : > { %v4261_v11 = vor.u32 %v5551_v31, %v4260_v59  ;;  %v4165_v59 = vor.u32 %v5527_v13, %v4164_v49  ;;  %v5650_v31 = vld [vmem:[#allocation7 + $0x5b4] sm:$0xf]  ;;  %v4574_v49 = vld [vmem:[#allocation7 + $0x508] sm:$0xf0] }
 0x15c   : > { %1841 = vmatpush.bf16.msrb.mxu1 %v4185_v10  ;;  %v4478_v10 = vld [vmem:[#allocation7 + $0x448] sm:$0xf0] }
 0x15d   : > { %1904 = vmatpush.bf16.msra.mxu2 %v4429_v0  ;;  %1828 = vmatpush.bf16.msrb.mxu0 %v3993_v52  ;;  %v4621_v0 = vor.u32 %v5641_v35, %v4620_v19  ;;  %v4236_v52 = vld [vmem:[#allocation7 + $0x250] sm:$0xf] }
 0x15e   : > { %1869 = vmatpush.bf16.msrb.mxu3 %v4521_v36  ;;  %v4481_v36 = vor.u32 %v5602_v6, %v4478_v10  ;;  %v5512_v10 = vld [vmem:[#allocation7 + $0x164] sm:$0xf] }
 0x160   : > { %1842 = vmatpush.bf16.msrb.mxu1 %v4161_v7  ;;  %v4237_v7 = vor.u32 %v5545_v15, %v4236_v52  ;;  %v4118_v15 = vld [vmem:[#allocation7 + $0x178] sm:$0xf0] }
 0x161   : > { %1905 = vmatpush.bf16.msra.mxu2 %v4405_v20  ;;  %1870 = vmatmul.bf16.vlgmr.msrb.gmra.mxu3 %v6727_v28  ;;  %v4044_v20 = vld [vmem:[#allocation7 + $0xd0] sm:$0xf]  ;;  %v4121_v29 = vor.u32 %v5512_v10, %v4118_v15 }
 0x162   : > { %1914 = vmatpush.bf16.msra.mxu3 %v4693_v24  ;;  %1829 = vmatpush.bf16.msrb.mxu0 %v3969_v12  ;;  %v5629_v24 = vld [vmem:[#allocation7 + $0x504] sm:$0xf0]  ;;  %v4045_v38 = vor.u32 %v5497_v21, %v4044_v20  ;;  %v4141_v20 = vor.u32 %v5521_v3, %v4140_v1  ;;  %v5644_v21 = vld [vmem:[#allocation7 + $0x584] sm:$0xf]  ;;  %v3998_v1 = vld [vmem:[#allocation7 + $0x88] sm:$0xf0] }
 0x163   : > { %v4573_v12 = vor.u32 %v5629_v24, %v4572_v22  ;;  %v4646_v22 = vld [vmem:[#allocation7 + $0x598] sm:$0xf0]  ;;  %v5614_v3 = vld [vmem:[#allocation7 + $0x494] sm:$0xf] }
 0x164   : > { %1843 = vmatpush.bf16.msrb.mxu1 %v4137_v60 }
 0x165   : > { %1906 = vmatpush.bf16.msra.mxu2 %v4381_v44  ;;  %v4548_v44 = vld [vmem:[#allocation7 + $0x4c0] sm:$0xf] }
 0x166   : > { %1915 = vmatpush.bf16.msra.mxu3 %v4669_v26  ;;  %1830 = vmatpush.bf16.msrb.mxu0 %v3945_v45  ;;  %v4213_v26 = vor.u32 %v5539_v30, %v4212_v61  ;;  %v4549_v60 = vor.u32 %v5623_v56, %v4548_v44  ;;  %v5485_v45 = vld [vmem:[#allocation7 + $0x84] sm:$0xf0]  ;;  %v5554_v61 = vld [vmem:[#allocation7 + $0x2b4] sm:$0xf]  ;;  %v4286_v30 = vld [vmem:[#allocation7 + $0x2c8] sm:$0xf0] }
 0x167   : > { %1844 = vmatmul.bf16.vlgmr.msrb.gmra.mxu1 %v6746_v39  ;;  %v5638_v44 = vld [vmem:[#allocation7 + $0x554] sm:$0xf]  ;;  %v4622_v56 = vld [vmem:[#allocation7 + $0x568] sm:$0xf0]  ;;  %v4289_v42 = vor.u32 %v5554_v61, %v4286_v30 }
 0x168   : > { %1888 = vmatpush.bf16.msra.mxu1 %v4309_v23  ;;  %v4524_v23 = vld [vmem:[#allocation7 + $0x490] sm:$0xf]  ;;  %v4625_v9 = vor.u32 %v5638_v44, %v4622_v56 }
 0x169   : > { %1907 = vmatpush.bf16.msra.mxu2 %v4357_v46  ;;  %1831 = vmatmul.bf16.vlgmr.msrb.gmra.mxu0 %v6748_v62  ;;  %v4406_v46 = vld [vmem:[#allocation7 + $0x3b8] sm:$0xf0]  ;;  %v4525_v19 = vor.u32 %v5617_v17, %v4524_v23 }
 0x16a   : > { %1875 = vmatpush.bf16.msra.mxu0 %v4117_v63  ;;  %1916 = vmatpush.bf16.msra.mxu3 %v4645_v48  ;;  %v5584_v63 = vld [vmem:[#allocation7 + $0x3a4] sm:$0xf]  ;;  %v3997_v48 = vor.u32 %v5485_v45, %v3996_v50  ;;  %v4598_v45 = vld [vmem:[#allocation7 + $0x538] sm:$0xf0] }
 0x16b   : > { %v4409_v35 = vor.u32 %v5584_v63, %v4406_v46  ;;  %v5632_v50 = vld [vmem:[#allocation7 + $0x524] sm:$0xf]  ;;  %v5542_v63 = vld [vmem:[#allocation7 + $0x254] sm:$0xf]  ;;  %v4238_v46 = vld [vmem:[#allocation7 + $0x268] sm:$0xf0] }
 0x16c   : > { %1889 = vmatpush.bf16.msra.mxu1 %v4285_v2  ;;  %v4697_v2 = vor.u32 %v5656_v47, %v4694_v25  ;;  %v5494_v47 = vld [vmem:[#allocation7 + $0xd4] sm:$0xf]  ;;  %v4046_v25 = vld [vmem:[#allocation7 + $0xe8] sm:$0xf0]  ;;  %v4241_v13 = vor.u32 %v5542_v63, %v4238_v46  ;;  %v5782_v63 = vld [vmem:[#allocation9 + $0x3cc] sm:$0xf0] }
 0x16d   : > { %1908 = vmatpush.bf16.msra.mxu2 %v4333_v8  ;;  %v4382_v8 = vld [vmem:[#allocation7 + $0x388] sm:$0xf0]  ;;  %v4780_v46 = vld [vmem:[#allocation9 + $0xa0] sm:$0xf] }
 0x16e   : > { %1876 = vmatpush.bf16.msra.mxu0 %v4093_v55  ;;  %1917 = vmatpush.bf16.msra.mxu3 %v4621_v0  ;;  %v5578_v55 = vld [vmem:[#allocation7 + $0x374] sm:$0xf]  ;;  %v4670_v0 = vld [vmem:[#allocation7 + $0x5c8] sm:$0xf0] }
 0x16f   : > { %v4385_v6 = vor.u32 %v5578_v55, %v4382_v8  ;;  %v4673_v52 = vor.u32 %v5650_v31, %v4670_v0  ;;  %v4022_v55 = vld [vmem:[#allocation7 + $0xb8] sm:$0xf0]  ;;  %v5620_v8 = vld [vmem:[#allocation7 + $0x4c4] sm:$0xf] }
 0x170   : > { %1909 = vmatmul.bf16.vlgmr.msra.gmra.mxu2 %v6683_v16  ;;  %1890 = vmatpush.bf16.msra.mxu1 %v4261_v11  ;;  %v5560_v11 = vld [vmem:[#allocation7 + $0x2e4] sm:$0xf] }
 0x171   : > { %1953 = vmatpush.bf16.msrb.mxu2 %v4505_v34  ;;  %v3948_v34 = vld [vmem:[#allocation7 + $0x10] sm:$0xf] }
 0x172   : > { %1877 = vmatpush.bf16.msra.mxu0 %v4069_v14  ;;  %1918 = vmatpush.bf16.msra.mxu3 %v4597_v18  ;;  %v4310_v14 = vld [vmem:[#allocation7 + $0x2f8] sm:$0xf0]  ;;  %v5572_v18 = vld [vmem:[#allocation7 + $0x344] sm:$0xf]  ;;  %v3949_v24 = vor.u32 %v5473_v58, %v3948_v34  ;;  %v5530_v34 = vld [vmem:[#allocation7 + $0x1f4] sm:$0xf] }
 0x173   : > { %v4313_v27 = vor.u32 %v5560_v11, %v4310_v14  ;;  %v5482_v58 = vld [vmem:[#allocation7 + $0x74] sm:$0xf]  ;;  %v5524_v14 = vld [vmem:[#allocation7 + $0x1c4] sm:$0xf] }
 0x174   : > { %1891 = vmatpush.bf16.msra.mxu1 %v4237_v7  ;;  %v4001_v11 = vor.u32 %v5482_v58, %v3998_v1 }
 0x175   : > { %1954 = vmatpush.bf16.msrb.mxu2 %v4481_v36  ;;  %v4358_v36 = vld [vmem:[#allocation7 + $0x358] sm:$0xf0] }
 0x176   : > { %1878 = vmatpush.bf16.msra.mxu0 %v4045_v38  ;;  %1919 = vmatpush.bf16.msra.mxu3 %v4573_v12  ;;  %v4361_v7 = vor.u32 %v5572_v18, %v4358_v36  ;;  %v5506_v38 = vld [vmem:[#allocation7 + $0x134] sm:$0xf]  ;;  %v4649_v12 = vor.u32 %v5644_v21, %v4646_v22  ;;  %v5476_v18 = vld [vmem:[#allocation7 + $0x44] sm:$0xf]  ;;  %v3974_v36 = vld [vmem:[#allocation7 + $0x58] sm:$0xf0] }
 0x177   : > { %v3977_v22 = vor.u32 %v5476_v18, %v3974_v36  ;;  %v4732_v36 = vld [vmem:[#allocation9 + $0x40] sm:$0xf] }
 0x178   : > { %1892 = vmatpush.bf16.msra.mxu1 %v4213_v26  ;;  %v4337_v26 = vor.u32 %v5566_v33, %v4334_v37 }
 0x179   : > { %1955 = vmatpush.bf16.msrb.mxu2 %v4457_v32  ;;  %v4094_v32 = vld [vmem:[#allocation7 + $0x148] sm:$0xf0] }
 0x17a   : > { %1879 = vmatpush.bf16.msra.mxu0 %v4021_v5  ;;  %1920 = vmatpush.bf16.msra.mxu3 %v4549_v60  ;;  %v4097_v40 = vor.u32 %v5506_v38, %v4094_v32  ;;  %v5548_v5 = vld [vmem:[#allocation7 + $0x284] sm:$0xf] }
 0x17b   : > { %v5500_v60 = vld [vmem:[#allocation7 + $0x104] sm:$0xf]  ;;  %v4265_v23 = vor.u32 %v5548_v5, %v4262_v41  ;;  %v4812_v41 = vld [vmem:[#allocation9 + $0xe0] sm:$0xf] }
 0x17c   : > { %1893 = vmatpush.bf16.msra.mxu1 %v4189_v43  ;;  %v4601_v43 = vor.u32 %v5632_v50, %v4598_v45  ;;  %v5786_v50 = vld [vmem:[#allocation9 + $0x3ec] sm:$0xf0] }
 0x17d   : > { %1956 = vmatpush.bf16.msrb.mxu2 %v4433_v4  ;;  %v4070_v4 = vld [vmem:[#allocation7 + $0x118] sm:$0xf0]  ;;  %v5686_v45 = vld [vmem:[#allocation9 + $0xcc] sm:$0xf0] }
 0x17e   : > { %1880 = vmatpush.bf16.msra.mxu0 %v3997_v48  ;;  %1921 = vmatpush.bf16.msra.mxu3 %v4525_v19  ;;  %v4073_v17 = vor.u32 %v5500_v60, %v4070_v4  ;;  %v5626_v48 = vld [vmem:[#allocation7 + $0x4f4] sm:$0xf]  ;;  %v4049_v19 = vor.u32 %v5494_v47, %v4046_v25  ;;  %v5196_v60 = vld [vmem:[#allocation9 + $0x3e0] sm:$0xf] }
 0x17f   : > { %v4577_v54 = vor.u32 %v5626_v48, %v4574_v49  ;;  %v5164_v25 = vld [vmem:[#allocation9 + $0x3a0] sm:$0xf]  ;;  %v5778_v48 = vld [vmem:[#allocation9 + $0x3ac] sm:$0xf0] }
 0x180   : > { %1894 = vmatpush.bf16.msra.mxu1 %v4165_v59  ;;  %v4550_v59 = vld [vmem:[#allocation7 + $0x4d8] sm:$0xf0] }
 0x181   : > { %1957 = vmatpush.bf16.msrb.mxu2 %v4409_v35  ;;  %1922 = vmatmul.bf16.vlgmr.msra.gmra.mxu3 %v6727_v28  ;;  %v5536_v35 = vld [vmem:[#allocation7 + $0x224] sm:$0xf] }
 0x182   : > { %1966 = vmatpush.bf16.msrb.mxu3 %v4697_v2  ;;  %1881 = vmatpush.bf16.msra.mxu0 %v3973_v57  ;;  %v5488_v2 = vld [vmem:[#allocation7 + $0xa4] sm:$0xf]  ;;  %v4217_v31 = vor.u32 %v5536_v35, %v4214_v53  ;;  %v4190_v57 = vld [vmem:[#allocation7 + $0x208] sm:$0xf0] }
 0x183   : > { %v4025_v0 = vor.u32 %v5488_v2, %v4022_v55  ;;  %v4193_v10 = vor.u32 %v5530_v34, %v4190_v57  ;;  %v5774_v34 = vld [vmem:[#allocation9 + $0x38c] sm:$0xf0]  ;;  %v4748_v57 = vld [vmem:[#allocation9 + $0x60] sm:$0xf] }
 0x184   : > { %1895 = vmatpush.bf16.msra.mxu1 %v4141_v20 }
 0x185   : > { %1958 = vmatpush.bf16.msrb.mxu2 %v4385_v6  ;;  %v4526_v6 = vld [vmem:[#allocation7 + $0x4a8] sm:$0xf0] }
 0x186   : > { %1967 = vmatpush.bf16.msrb.mxu3 %v4673_v52  ;;  %1882 = vmatpush.bf16.msra.mxu0 %v3949_v24  ;;  %v4166_v52 = vld [vmem:[#allocation7 + $0x1d8] sm:$0xf0]  ;;  %v4529_v15 = vor.u32 %v5614_v3, %v4526_v6  ;;  %v5518_v24 = vld [vmem:[#allocation7 + $0x194] sm:$0xf]  ;;  %v5132_v3 = vld [vmem:[#allocation9 + $0x360] sm:$0xf] }
 0x187   : > { %1896 = vmatmul.bf16.vlgmr.msra.gmra.mxu1 %v6746_v39  ;;  %v4169_v21 = vor.u32 %v5524_v14, %v4166_v52  ;;  %v5770_v6 = vld [vmem:[#allocation9 + $0x36c] sm:$0xf0] }
 0x188   : > { %1940 = vmatpush.bf16.msrb.mxu1 %v4313_v27  ;;  %v4142_v27 = vld [vmem:[#allocation7 + $0x1a8] sm:$0xf0]  ;;  %v5133_v18 = vor.u32 %v5770_v6, %v5132_v3 }
 0x189   : > { %1959 = vmatpush.bf16.msrb.mxu2 %v4361_v7  ;;  %1883 = vmatmul.bf16.vlgmr.msra.gmra.mxu0 %v6748_v62  ;;  %v3950_v7 = vld [vmem:[#allocation7 + $0x28] sm:$0xf0]  ;;  %v4145_v38 = vor.u32 %v5518_v24, %v4142_v27  ;;  %v5766_v24 = vld [vmem:[#allocation9 + $0x34c] sm:$0xf0] }
 0x18a   : > { %1927 = vmatpush.bf16.msrb.mxu0 %v4121_v29  ;;  %1968 = vmatpush.bf16.msrb.mxu3 %v4649_v12  ;;  %v5470_v29 = vld [vmem:[#allocation7 + $0x14] sm:$0xf] }
 0x18b   : > { %v3953_v61 = vor.u32 %v5470_v29, %v3950_v7 }
 0x18c   : > { %1941 = vmatpush.bf16.msrb.mxu1 %v4289_v42 }
 0x18d   : > { %1960 = vmatpush.bf16.msrb.mxu2 %v4337_v26 }
 0x18e   : > { %1928 = vmatpush.bf16.msrb.mxu0 %v4097_v40  ;;  %1969 = vmatpush.bf16.msrb.mxu3 %v4625_v9  ;;  %v5690_v9 = vld [vmem:[#allocation9 + $0xec] sm:$0xf0] }
 0x18f   : > { %v4813_v4 = vor.u32 %v5690_v9, %v4812_v41  ;;  %v5758_v9 = vld [vmem:[#allocation9 + $0x30c] sm:$0xf0] }
 0x190   : > { %1961 = vmatmul.bf16.vlgmr.msrb.gmra.mxu2 %v6683_v16  ;;  %1942 = vmatpush.bf16.msrb.mxu1 %v4265_v23  ;;  %v4553_v16 = vor.u32 %v5620_v8, %v4550_v59  ;;  %v5180_v23 = vld [vmem:[#allocation9 + $0x3c0] sm:$0xf]  ;;  %v5678_v59 = vld [vmem:[#allocation9 + $0x8c] sm:$0xf0] }
 0x191   : > { %v5181_v47 = vor.u32 %v5782_v63, %v5180_v23  ;;  %v4764_v8 = vld [vmem:[#allocation9 + $0x80] sm:$0xf]  ;;  %v5720_v23 = vld [vmem:[#allocation9 + $0x1e4] sm:$0xf] }
 0x192   : > { %1929 = vmatpush.bf16.msrb.mxu0 %v4073_v17  ;;  %1970 = vmatpush.bf16.msrb.mxu3 %v4601_v43  ;;  %v5682_v43 = vld [vmem:[#allocation9 + $0xac] sm:$0xf0] }
 0x193   : > { %v1702_v20 = vpop.f32.mrf.mxu2  ;;  %v4781_v35 = vor.u32 %v5682_v43, %v4780_v46  ;;  %v4942_v43 = vld [vmem:[#allocation9 + $0x1f0] sm:$0xf0] }
 0x194   : > { %1943 = vmatpush.bf16.msrb.mxu1 %v4241_v13 }
 0x196   : > { %1930 = vmatpush.bf16.msrb.mxu0 %v4049_v19  ;;  %1971 = vmatpush.bf16.msrb.mxu3 %v4577_v54  ;;  %v5165_v54 = vor.u32 %v5778_v48, %v5164_v25  ;;  %v4945_v25 = vor.u32 %v5720_v23, %v4942_v43  ;;  %v4924_v48 = vld [vmem:[#allocation9 + $0x1c0] sm:$0xf]  ;;  %v4846_v43 = vld [vmem:[#allocation9 + $0x130] sm:$0xf0] }
 0x198   : > { %1944 = vmatpush.bf16.msrb.mxu1 %v4217_v31  ;;  %v5148_v31 = vld [vmem:[#allocation9 + $0x380] sm:$0xf] }
 0x199   : > { %v5149_v1 = vor.u32 %v5774_v34, %v5148_v31  ;;  %v5714_v31 = vld [vmem:[#allocation9 + $0x1ac] sm:$0xf0] }
 0x19a   : > { %1931 = vmatpush.bf16.msrb.mxu0 %v4025_v0  ;;  %1972 = vmatpush.bf16.msrb.mxu3 %v4553_v16  ;;  %v4765_v0 = vor.u32 %v5678_v59, %v4764_v8  ;;  %v5674_v16 = vld [vmem:[#allocation9 + $0x6c] sm:$0xf0]  ;;  %v4908_v59 = vld [vmem:[#allocation9 + $0x1a0] sm:$0xf] }
 0x19b   : > { %v1704_v30 = vpop.f32.mrf.mxu2  ;;  %v4749_v52 = vor.u32 %v5674_v16, %v4748_v57  ;;  %v4909_v34 = vor.u32 %v5714_v31, %v4908_v59  ;;  %v5810_v57 = vld [vmem:[#allocation9 + $0x4ac] sm:$0xf0]  ;;  %v5712_v16 = vld [vmem:[#allocation9 + $0x1a4] sm:$0xf] }
 0x19c   : > { %1945 = vmatpush.bf16.msrb.mxu1 %v4193_v10  ;;  %v5666_v30 = vld [vmem:[#allocation9 + $0x2c] sm:$0xf0] }
 0x19e   : > { %1932 = vmatpush.bf16.msrb.mxu0 %v4001_v11  ;;  %1973 = vmatpush.bf16.msrb.mxu3 %v4529_v15 }
 0x1a0   : > { %1946 = vmatpush.bf16.msrb.mxu1 %v4169_v21  ;;  %v5116_v21 = vld [vmem:[#allocation9 + $0x340] sm:$0xf] }
 0x1a1   : > { %1974 = vmatmul.bf16.vlgmr.msrb.gmra.mxu3 %v6727_v28  ;;  %v5117_v27 = vor.u32 %v5766_v24, %v5116_v21  ;;  %v4876_v24 = vld [vmem:[#allocation9 + $0x160] sm:$0xf] }
 0x1a2   : > { %1933 = vmatpush.bf16.msrb.mxu0 %v3977_v22 }
 0x1a3   : > { %v1715_v12 = vpop.f32.mrf.mxu3  ;;  %v1754_v32 = vpop.f32.mrf.mxu2 }
 0x1a4   : > { %1947 = vmatpush.bf16.msrb.mxu1 %v4145_v38  ;;  %v1689_v33 = vpop.f32.mrf.mxu1 }
 0x1a5   : > { %v1676_v37 = vpop.f32.mrf.mxu0 }
 0x1a6   : > { %1934 = vmatpush.bf16.msrb.mxu0 %v3953_v61  ;;  %v1690_v44 = vadd.f32 %v1689_v33, %v1676_v37  ;;  %v4716_v61 = vld [vmem:[#allocation9 + $0x20] sm:$0xf]  ;;  %v5762_v37 = vld [vmem:[#allocation9 + $0x32c] sm:$0xf0] }
 0x1a7   : > { %1948 = vmatmul.bf16.vlgmr.msrb.gmra.mxu1 %v6746_v39  ;;  %v5197_v39 = vor.u32 %v5786_v50, %v5196_v60  ;;  %v4717_v33 = vor.u32 %v5666_v30, %v4716_v61  ;;  %v4940_v60 = vld [vmem:[#allocation9 + $0x1e0] sm:$0xf]  ;;  %v5704_v61 = vld [vmem:[#allocation9 + $0x164] sm:$0xf]  ;;  %v4878_v30 = vld [vmem:[#allocation9 + $0x170] sm:$0xf0] }
 0x1a8   : > { %v1703_v56 = vadd.f32 %v1702_v20, %v1690_v44  ;;  %v5670_v20 = vld [vmem:[#allocation9 + $0x4c] sm:$0xf0] }
 0x1a9   : > { %1935 = vmatmul.bf16.vlgmr.msrb.gmra.mxu0 %v6748_v62  ;;  %v4796_v62 = vld [vmem:[#allocation9 + $0xc0] sm:$0xf]  ;;  %3230 = vmatpush.bf16.msra.mxu3 %v5197_v39  ;;  %v4733_v22 = vor.u32 %v5670_v20, %v4732_v36  ;;  %v4894_v36 = vld [vmem:[#allocation9 + $0x190] sm:$0xf0] }
 0x1aa   : > { %v6771_v42 = vadd.f32 %v1715_v12, %v1703_v56  ;;  %3191 = vmatpush.bf16.msra.mxu0 %v4813_v4  ;;  %v4797_v17 = vor.u32 %v5686_v45, %v4796_v62  ;;  %v5100_v12 = vld [vmem:[#allocation9 + $0x320] sm:$0xf]  ;;  %v5722_v4 = vld [vmem:[#allocation9 + $0x1ec] sm:$0xf0] }
 0x1ab   : > { %v1717_v40 = vpop.f32.mrf.mxu3  ;;  %v1756_v26 = vpop.f32.mrf.mxu2  ;;  %v5101_v44 = vor.u32 %v5762_v37, %v5100_v12  ;;  %v4941_v39 = vor.u32 %v5722_v4, %v4940_v60  ;;  %v5324_v62 = vld [vmem:[#allocation9 + $0x4e0] sm:$0xf]  ;;  %v5818_v45 = vld [vmem:[#allocation9 + $0x4ec] sm:$0xf0] }
 0x1ac   : > { %v1691_v28 = vpop.f32.mrf.mxu1  ;;  %v4700_v40 = vld [vmem:[#allocation9] sm:$0xf]  ;;  %v5662_v26 = vld [vmem:[#allocation9 + $0xc] sm:$0xf0]  ;;  %v5325_v46 = vor.u32 %v5818_v45, %v5324_v62 }
 0x1ad   : > { %v1678_v5 = vpop.f32.mrf.mxu0  ;;  %3231 = vmatpush.bf16.msra.mxu3 %v5181_v47  ;;  %v5084_v28 = vld [vmem:[#allocation9 + $0x300] sm:$0xf]  ;;  %v4701_v41 = vor.u32 %v5662_v26, %v4700_v40  ;;  %3204 = vmatpush.bf16.msra.mxu1 %v4941_v39  ;;  %v5702_v37 = vld [vmem:[#allocation9 + $0x14c] sm:$0xf0]  ;;  %v5700_v26 = vld [vmem:[#allocation9 + $0x144] sm:$0xf] }
 0x1ae   : > { %3192 = vmatpush.bf16.msra.mxu0 %v4797_v17  ;;  %v5085_v50 = vor.u32 %v5758_v9, %v5084_v28  ;;  %v5798_v40 = vld [vmem:[#allocation9 + $0x44c] sm:$0xf0]  ;;  %v4862_v28 = vld [vmem:[#allocation9 + $0x150] sm:$0xf0]  ;;  %v4844_v39 = vld [vmem:[#allocation9 + $0x120] sm:$0xf] }
 0x1af   : > { %v4865_v9 = vor.u32 %v5700_v26, %v4862_v28  ;;  %v5698_v62 = vld [vmem:[#allocation9 + $0x12c] sm:$0xf0]  ;;  %v5228_v45 = vld [vmem:[#allocation9 + $0x420] sm:$0xf] }
 0x1b1   : > { %3232 = vmatpush.bf16.msra.mxu3 %v5165_v54  ;;  %v4926_v54 = vld [vmem:[#allocation9 + $0x1d0] sm:$0xf0] }
 0x1b2   : > { %3193 = vmatpush.bf16.msra.mxu0 %v4781_v35  ;;  %v5814_v35 = vld [vmem:[#allocation9 + $0x4cc] sm:$0xf0] }
 0x1b3   : > { %v1767_v49 = vpop.f32.mrf.mxu3 }
 0x1b4   : > { %v1741_v19 = vpop.f32.mrf.mxu1 }
 0x1b5   : > { %v1806_v13 = vpop.f32.mrf.mxu2  ;;  %v1728_v53 = vpop.f32.mrf.mxu0  ;;  %3233 = vmatpush.bf16.msra.mxu3 %v5149_v1  ;;  %v4910_v1 = vld [vmem:[#allocation9 + $0x1b0] sm:$0xf0] }
 0x1b6   : > { %v1742_v2 = vadd.f32 %v1741_v19, %v1728_v53  ;;  %3194 = vmatpush.bf16.msra.mxu0 %v4765_v0  ;;  %v5716_v53 = vld [vmem:[#allocation9 + $0x1c4] sm:$0xf]  ;;  %v5292_v0 = vld [vmem:[#allocation9 + $0x4a0] sm:$0xf]  ;;  %v4913_v6 = vor.u32 %v5712_v16, %v4910_v1 }
 0x1b7   : > { %v4929_v8 = vor.u32 %v5716_v53, %v4926_v54  ;;  %v5293_v3 = vor.u32 %v5810_v57, %v5292_v0  ;;  %v5790_v54 = vld [vmem:[#allocation9 + $0x40c] sm:$0xf0]  ;;  %v5068_v0 = vld [vmem:[#allocation9 + $0x2e0] sm:$0xf] }
 0x1b8   : > { %v1755_v55 = vadd.f32 %v1754_v32, %v1742_v2  ;;  %v5452_v57 = vld [vmem:[#allocation9 + $0x5e0] sm:$0xf] }
 0x1b9   : > { %3234 = vmatpush.bf16.msra.mxu3 %v5133_v18  ;;  %v5708_v18 = vld [vmem:[#allocation9 + $0x184] sm:$0xf] }
 0x1ba   : > { %v6773_v58 = vadd.f32 %v1767_v49, %v1755_v55  ;;  %3195 = vmatpush.bf16.msra.mxu0 %v4749_v52  ;;  %v5718_v49 = vld [vmem:[#allocation9 + $0x1cc] sm:$0xf0] }
 0x1bb   : > { %v1769_v10 = vpop.f32.mrf.mxu3  ;;  %v4925_v19 = vor.u32 %v5718_v49, %v4924_v48  ;;  %v4828_v49 = vld [vmem:[#allocation9 + $0x100] sm:$0xf] }
 0x1bc   : > { %v1743_v14 = vpop.f32.mrf.mxu1  ;;  %v4892_v10 = vld [vmem:[#allocation9 + $0x180] sm:$0xf] }
 0x1bd   : > { %v1808_v11 = vpop.f32.mrf.mxu2  ;;  %v1730_v15 = vpop.f32.mrf.mxu0  ;;  %3235 = vmatpush.bf16.msra.mxu3 %v5117_v27  ;;  %3205 = vmatpush.bf16.msra.mxu1 %v4925_v19  ;;  %v5276_v14 = vld [vmem:[#allocation9 + $0x480] sm:$0xf]  ;;  %v5706_v27 = vld [vmem:[#allocation9 + $0x16c] sm:$0xf0] }
 0x1be   : > { %3196 = vmatpush.bf16.msra.mxu0 %v4733_v22  ;;  %v5710_v11 = vld [vmem:[#allocation9 + $0x18c] sm:$0xf0]  ;;  %v4897_v22 = vor.u32 %v5708_v18, %v4894_v36  ;;  %v5212_v19 = vld [vmem:[#allocation9 + $0x400] sm:$0xf] }
 0x1bf   : > { %v4893_v52 = vor.u32 %v5710_v11, %v4892_v10  ;;  %v5806_v15 = vld [vmem:[#allocation9 + $0x48c] sm:$0xf0]  ;;  %v5213_v59 = vor.u32 %v5790_v54, %v5212_v19  ;;  %v5436_v36 = vld [vmem:[#allocation9 + $0x5c0] sm:$0xf] }
 0x1c0   : > { %v5277_v21 = vor.u32 %v5806_v15, %v5276_v14  ;;  %v5850_v10 = vld [vmem:[#allocation9 + $0x5ec] sm:$0xf0]  ;;  %v5052_v15 = vld [vmem:[#allocation9 + $0x2c0] sm:$0xf] }
 0x1c1   : > { %3236 = vmatpush.bf16.msra.mxu3 %v5101_v44  ;;  %3206 = vmatpush.bf16.msra.mxu1 %v4909_v34  ;;  %v5244_v44 = vld [vmem:[#allocation9 + $0x440] sm:$0xf]  ;;  %v5754_v34 = vld [vmem:[#allocation9 + $0x2ec] sm:$0xf0]  ;;  %v5453_v14 = vor.u32 %v5850_v10, %v5452_v57  ;;  %v5454_v10 = vld [vmem:[#allocation9 + $0x5f0] sm:$0xf0] }
 0x1c2   : > { %3197 = vmatpush.bf16.msra.mxu0 %v4717_v33  ;;  %v4860_v33 = vld [vmem:[#allocation9 + $0x140] sm:$0xf]  ;;  %v5750_v18 = vld [vmem:[#allocation9 + $0x2cc] sm:$0xf0] }
 0x1c3   : > { %v4972_v54 = vld [vmem:[#allocation9 + $0x220] sm:$0xf] }
 0x1c4   : > { %v1793_v7 = vpop.f32.mrf.mxu1 }
 0x1c5   : > { %v1780_v38 = vpop.f32.mrf.mxu0  ;;  %3237 = vmatpush.bf16.msra.mxu3 %v5085_v50  ;;  %3207 = vmatpush.bf16.msra.mxu1 %v4893_v52 }
 0x1c6   : > { %v1819_v29 = vpop.f32.mrf.mxu3  ;;  %v1794_v32 = vadd.f32 %v1793_v7, %v1780_v38  ;;  %3198 = vmatpush.bf16.msra.mxu0 %v4701_v41  ;;  %v4877_v7 = vor.u32 %v5706_v27, %v4876_v24  ;;  %v5802_v38 = vld [vmem:[#allocation9 + $0x46c] sm:$0xf0]  ;;  %v5245_v41 = vor.u32 %v5798_v40, %v5244_v44 }
 0x1c8   : > { %v1807_v56 = vadd.f32 %v1806_v13, %v1794_v32  ;;  %v5308_v13 = vld [vmem:[#allocation9 + $0x4c0] sm:$0xf]  ;;  %v4881_v32 = vor.u32 %v5704_v61, %v4878_v30  ;;  %v5842_v30 = vld [vmem:[#allocation9 + $0x5ac] sm:$0xf0] }
 0x1c9   : > { %3282 = vmatpush.bf16.msrb.mxu3 %v4945_v25  ;;  %v5309_v55 = vor.u32 %v5814_v35, %v5308_v13  ;;  %3208 = vmatpush.bf16.msra.mxu1 %v4877_v7  ;;  %v5694_v13 = vld [vmem:[#allocation9 + $0x10c] sm:$0xf0] }
 0x1ca   : > { %v6775_v5 = vadd.f32 %v1819_v29, %v1807_v56  ;;  %3243 = vmatpush.bf16.msrb.mxu0 %v5325_v46  ;;  %v5260_v29 = vld [vmem:[#allocation9 + $0x460] sm:$0xf]  ;;  %v4861_v56 = vor.u32 %v5702_v37, %v4860_v33  ;;  %v5696_v46 = vld [vmem:[#allocation9 + $0x124] sm:$0xf]  ;;  %v4829_v53 = vor.u32 %v5694_v13, %v4828_v49  ;;  %v5746_v7 = vld [vmem:[#allocation9 + $0x2ac] sm:$0xf0] }
 0x1cb   : > { %v5261_v12 = vor.u32 %v5802_v38, %v5260_v29  ;;  %v4849_v25 = vor.u32 %v5696_v46, %v4846_v43  ;;  %v5036_v29 = vld [vmem:[#allocation9 + $0x2a0] sm:$0xf]  ;;  %v5742_v33 = vld [vmem:[#allocation9 + $0x28c] sm:$0xf0] }
 0x1cc   : > { %v1795_v63 = vpop.f32.mrf.mxu1  ;;  %v5420_v38 = vld [vmem:[#allocation9 + $0x5a0] sm:$0xf]  ;;  %v5037_v61 = vor.u32 %v5746_v7, %v5036_v29 }
 0x1cd   : > { %v1782_v47 = vpop.f32.mrf.mxu0  ;;  %3283 = vmatpush.bf16.msrb.mxu3 %v4929_v8  ;;  %3209 = vmatpush.bf16.msra.mxu1 %v4861_v56  ;;  %v5794_v63 = vld [vmem:[#allocation9 + $0x42c] sm:$0xf0]  ;;  %v4830_v8 = vld [vmem:[#allocation9 + $0x110] sm:$0xf0]  ;;  %v5404_v37 = vld [vmem:[#allocation9 + $0x580] sm:$0xf] }
 0x1ce   : > { %v1821_v17 = vpop.f32.mrf.mxu3  ;;  %3244 = vmatpush.bf16.msrb.mxu0 %v5309_v55  ;;  %v5229_v47 = vor.u32 %v5794_v63, %v5228_v45  ;;  %v5692_v55 = vld [vmem:[#allocation9 + $0x104] sm:$0xf]  ;;  %v5838_v56 = vld [vmem:[#allocation9 + $0x58c] sm:$0xf0]  ;;  %v5372_v46 = vld [vmem:[#allocation9 + $0x540] sm:$0xf] }
 0x1cf   : > { %v4845_v17 = vor.u32 %v5698_v62, %v4844_v39  ;;  %v4833_v31 = vor.u32 %v5692_v55, %v4830_v8  ;;  %v5405_v28 = vor.u32 %v5838_v56, %v5404_v37  ;;  %v5388_v39 = vld [vmem:[#allocation9 + $0x560] sm:$0xf]  ;;  %v5834_v62 = vld [vmem:[#allocation9 + $0x56c] sm:$0xf0]  ;;  %v5844_v56 = vld [vmem:[#allocation9 + $0x5c4] sm:$0xf] }
 0x1d0   : > { %v5389_v45 = vor.u32 %v5834_v62, %v5388_v39  ;;  %v5734_v63 = vld [vmem:[#allocation9 + $0x24c] sm:$0xf0]  ;;  %v5356_v8 = vld [vmem:[#allocation9 + $0x520] sm:$0xf]  ;;  %v5684_v39 = vld [vmem:[#allocation9 + $0xc4] sm:$0xf] }
 0x1d1   : > { %3284 = vmatpush.bf16.msrb.mxu3 %v4913_v6  ;;  %3210 = vmatpush.bf16.msra.mxu1 %v4845_v17  ;;  %v5069_v6 = vor.u32 %v5754_v34, %v5068_v0  ;;  %v4988_v17 = vld [vmem:[#allocation9 + $0x240] sm:$0xf]  ;;  %v5730_v55 = vld [vmem:[#allocation9 + $0x22c] sm:$0xf0]  ;;  %v4798_v62 = vld [vmem:[#allocation9 + $0xd0] sm:$0xf0] }
 0x1d2   : > { %3245 = vmatpush.bf16.msrb.mxu0 %v5293_v3  ;;  %v4973_v0 = vor.u32 %v5730_v55, %v4972_v54  ;;  %v5826_v34 = vld [vmem:[#allocation9 + $0x52c] sm:$0xf0] }
 0x1d3   : > { %v6777_v2 = vpop.f32.mrf.mxu2  ;;  %3217 = vmatpush.bf16.msra.mxu2 %v5069_v6  ;;  %v5848_v6 = vld [vmem:[#allocation9 + $0x5e4] sm:$0xf] }
 0x1d5   : > { %3285 = vmatpush.bf16.msrb.mxu3 %v4897_v22  ;;  %3211 = vmatpush.bf16.msra.mxu1 %v4829_v53 }
 0x1d6   : > { %3246 = vmatpush.bf16.msrb.mxu0 %v5277_v21  ;;  %v5846_v21 = vld [vmem:[#allocation9 + $0x5cc] sm:$0xf0] }
 0x1d7   : > { %v5437_v27 = vor.u32 %v5846_v21, %v5436_v36  ;;  %v5340_v36 = vld [vmem:[#allocation9 + $0x500] sm:$0xf] }
 0x1d9   : > { %3286 = vmatpush.bf16.msrb.mxu3 %v4881_v32  ;;  %3256 = vmatpush.bf16.msrb.mxu1 %v5453_v14  ;;  %v5020_v32 = vld [vmem:[#allocation9 + $0x280] sm:$0xf] }
 0x1da   : > { %3247 = vmatpush.bf16.msrb.mxu0 %v5261_v12  ;;  %v5421_v12 = vor.u32 %v5842_v30, %v5420_v38  ;;  %v5021_v44 = vor.u32 %v5742_v33, %v5020_v32  ;;  %v4956_v14 = vld [vmem:[#allocation9 + $0x200] sm:$0xf]  ;;  %v5457_v30 = vor.u32 %v5848_v6, %v5454_v10  ;;  %v5688_v32 = vld [vmem:[#allocation9 + $0xe4] sm:$0xf]  ;;  %v4814_v33 = vld [vmem:[#allocation9 + $0xf0] sm:$0xf0] }
 0x1db   : > { %v1860_v20 = vpop.f32.mrf.mxu2  ;;  %v5732_v10 = vld [vmem:[#allocation9 + $0x244] sm:$0xf] }
 0x1dc   : > { %v5053_v20 = vor.u32 %v5750_v18, %v5052_v15 }
 0x1dd   : > { %3287 = vmatpush.bf16.msrb.mxu3 %v4865_v9  ;;  %3257 = vmatpush.bf16.msrb.mxu1 %v5437_v27  ;;  %v5004_v9 = vld [vmem:[#allocation9 + $0x260] sm:$0xf] }
 0x1de   : > { %3248 = vmatpush.bf16.msrb.mxu0 %v5245_v41  ;;  %3218 = vmatpush.bf16.msra.mxu2 %v5053_v20  ;;  %v5822_v20 = vld [vmem:[#allocation9 + $0x50c] sm:$0xf0] }
 0x1df   : > { %v5341_v27 = vor.u32 %v5822_v20, %v5340_v36  ;;  %v4750_v36 = vld [vmem:[#allocation9 + $0x70] sm:$0xf0] }
 0x1e1   : > { %3288 = vmatpush.bf16.msrb.mxu3 %v4849_v25  ;;  %3258 = vmatpush.bf16.msrb.mxu1 %v5421_v12  ;;  %v5830_v25 = vld [vmem:[#allocation9 + $0x54c] sm:$0xf0]  ;;  %v5748_v12 = vld [vmem:[#allocation9 + $0x2c4] sm:$0xf] }
 0x1e2   : > { %3249 = vmatpush.bf16.msrb.mxu0 %v5229_v47  ;;  %3219 = vmatpush.bf16.msra.mxu2 %v5037_v61  ;;  %v4989_v47 = vor.u32 %v5734_v63, %v4988_v17  ;;  %v5422_v17 = vld [vmem:[#allocation9 + $0x5b0] sm:$0xf0]  ;;  %v4801_v63 = vor.u32 %v5684_v39, %v4798_v62 }
 0x1e4   : > { %v1871_v60 = vpop.f32.mrf.mxu3  ;;  %v1845_v4 = vpop.f32.mrf.mxu1 }
 0x1e5   : > { %3289 = vmatpush.bf16.msrb.mxu3 %v4833_v31  ;;  %3259 = vmatpush.bf16.msrb.mxu1 %v5405_v28 }
 0x1e6   : > { %v1832_v50 = vpop.f32.mrf.mxu0  ;;  %3250 = vmatpush.bf16.msrb.mxu0 %v5213_v59  ;;  %3220 = vmatpush.bf16.msra.mxu2 %v5021_v44 }
 0x1e7   : > { %v1846_v23 = vadd.f32 %v1845_v4, %v1832_v50 }
 0x1e9   : > { %v1859_v48 = vadd.f32 %v6777_v2, %v1846_v23  ;;  %v1979_v2 = vmul.f32 %v6771_v42, %v6771_v42  ;;  %3260 = vmatpush.bf16.msrb.mxu1 %v5389_v45  ;;  %v5038_v45 = vld [vmem:[#allocation9 + $0x2b0] sm:$0xf0] }
 0x1eb   : > { %v6780_v35 = vadd.f32 %v1871_v60, %v1859_v48  ;;  %v5738_v60 = vld [vmem:[#allocation9 + $0x26c] sm:$0xf0]  ;;  %v5373_v48 = vor.u32 %v5830_v25, %v5372_v46  ;;  %v5680_v25 = vld [vmem:[#allocation9 + $0xa4] sm:$0xf] }
 0x1ec   : > { %v1873_v1 = vpop.f32.mrf.mxu3  ;;  %v1847_v3 = vpop.f32.mrf.mxu1  ;;  %v5005_v50 = vor.u32 %v5738_v60, %v5004_v9 }
 0x1ed   : > { %v1982_v16 = vmul.f32 %v6780_v35, %v6780_v35  ;;  %3261 = vmatpush.bf16.msrb.mxu1 %v5373_v48  ;;  %v5070_v3 = vld [vmem:[#allocation9 + $0x2f0] sm:$0xf0] }
 0x1ee   : > { %v1834_v11 = vpop.f32.mrf.mxu0  ;;  %3221 = vmatpush.bf16.msra.mxu2 %v5005_v50  ;;  %v4782_v48 = vld [vmem:[#allocation9 + $0xb0] sm:$0xf0] }
 0x1ef   : > { %v1985_v52 = vadd.f32 %v1982_v16, %v1979_v2  ;;  %v5752_v2 = vld [vmem:[#allocation9 + $0x2e4] sm:$0xf]  ;;  %v5357_v16 = vor.u32 %v5826_v34, %v5356_v8  ;;  %v4766_v34 = vld [vmem:[#allocation9 + $0x90] sm:$0xf0] }
 0x1f0   : > { %v5073_v61 = vor.u32 %v5752_v2, %v5070_v3  ;;  %v5006_v2 = vld [vmem:[#allocation9 + $0x270] sm:$0xf0] }
 0x1f1   : > { %v1988_v22 = vmax.f32 %v1985_v52, 1e-30  ;;  %v5726_v52 = vld [vmem:[#allocation9 + $0x20c] sm:$0xf0]  ;;  %3262 = vmatpush.bf16.msrb.mxu1 %v5357_v16  ;;  %v5832_v16 = vld [vmem:[#allocation9 + $0x564] sm:$0xf] }
 0x1f2   : > { %3222 = vmatpush.bf16.msra.mxu2 %v4989_v47  ;;  %v4957_v18 = vor.u32 %v5726_v52, %v4956_v14  ;;  %v5740_v47 = vld [vmem:[#allocation9 + $0x284] sm:$0xf]  ;;  %v4990_v52 = vld [vmem:[#allocation9 + $0x250] sm:$0xf0] }
 0x1f3   : > { %v1910_v24 = vpop.f32.mrf.mxu2  ;;  %6004 = vrsqrt.f32 %v1988_v22  ;;  %vm1997_vm9 = vweird.f32 %v1988_v22 }
 0x1f5   : > { %3263 = vmatpush.bf16.msrb.mxu1 %v5341_v27 }
 0x1f6   : > { %3223 = vmatpush.bf16.msra.mxu2 %v4973_v0  ;;  %v5676_v0 = vld [vmem:[#allocation9 + $0x84] sm:$0xf] }
 0x1f7   : > { %v4769_v3 = vor.u32 %v5676_v0, %v4766_v34 }
 0x1f9   : > { %v6005_v40 = vpop.eup %6004 }
 0x1fa   : > { %v1992_v41 = vmul.f32 %v6005_v40, %v1988_v22  ;;  %vm1998_vm0 = vweird.f32 %v6005_v40  ;;  %3224 = vmatpush.bf16.msra.mxu2 %v4957_v18  ;;  %v5672_v18 = vld [vmem:[#allocation9 + $0x64] sm:$0xf] }
 0x1fb   : > { %v1912_v26 = vpop.f32.mrf.mxu2  ;;  %vm1999_vm10 = vmor %vm1997_vm9, %vm1998_vm0  ;;  %v4753_v27 = vor.u32 %v5672_v18, %v4750_v36  ;;  %v4804_v18 = vld [vmem:[#allocation9 + $0xc8] sm:$0xf]  ;;  %v5687_v36 = vld [vmem:[#allocation9 + $0xd4] sm:$0xf0] }
 0x1fc   : > { %v1993_v4 = vmul.f32 %v6005_v40, %v1992_v41  ;;  %v4817_v26 = vor.u32 %v5688_v32, %v4814_v33  ;;  %v5744_v41 = vld [vmem:[#allocation9 + $0x2a4] sm:$0xf] }
 0x1fd   : > { %v5041_v46 = vor.u32 %v5744_v41, %v5038_v45 }
 0x1fe   : > { %v1994_v23 = vmul.f32 0.5, %v1993_v4  ;;  %3269 = vmatpush.bf16.msrb.mxu2 %v4817_v26 }
 0x200   : > { %v1995_v43 = vsub.f32 1.5, %v1994_v23  ;;  %v5840_v23 = vld [vmem:[#allocation9 + $0x5a4] sm:$0xf] }
 0x202   : > { %v1996_v49 = vmul.f32 %v6005_v40, %v1995_v43  ;;  %v5425_v43 = vor.u32 %v5840_v23, %v5422_v17  ;;  %3270 = vmatpush.bf16.msrb.mxu2 %v4801_v63  ;;  %v4718_v23 = vld [vmem:[#allocation9 + $0x30] sm:$0xf0]  ;;  %v5820_v63 = vld [vmem:[#allocation9 + $0x504] sm:$0xf] }
 0x204   : > { %v1923_v13 = vpop.f32.mrf.mxu3  ;;  %v1897_v19 = vpop.f32.mrf.mxu1  ;;  %v2000_v59 = vsel %vm1999_vm10, %v6005_v40, %v1996_v49  ;;  %v5438_v40 = vld [vmem:[#allocation9 + $0x5d0] sm:$0xf0] }
 0x205   : > { %v2021_v57 = vmul.f32 1e-08, %v2000_v59  ;;  %v5441_v50 = vor.u32 %v5844_v56, %v5438_v40  ;;  %v5022_v49 = vld [vmem:[#allocation9 + $0x290] sm:$0xf0] }
 0x206   : > { %v1884_v53 = vpop.f32.mrf.mxu0  ;;  %v5025_v8 = vor.u32 %v5740_v47, %v5022_v49  ;;  %v5358_v56 = vld [vmem:[#allocation9 + $0x530] sm:$0xf0]  ;;  %v5784_v49 = vld [vmem:[#allocation9 + $0x3e4] sm:$0xf] }
 0x207   : > { %v1898_v31 = vadd.f32 %v1897_v19, %v1884_v53  ;;  %v2024_v11 = vmax.f32 %v2021_v57, 1.0  ;;  %v5406_v19 = vld [vmem:[#allocation9 + $0x590] sm:$0xf0]  ;;  %v4785_v53 = vor.u32 %v5680_v25, %v4782_v48 }
 0x209   : > { %v1911_v1 = vadd.f32 %v1910_v24, %v1898_v31  ;;  %v2030_v21 = vmul.f32 %v2024_v11, %v6780_v35  ;;  %v2027_v22 = vmul.f32 %v2024_v11, %v6771_v42  ;;  %v1980_v24 = vmul.f32 %v6773_v58, %v6773_v58  ;;  %v5054_v42 = vld [vmem:[#allocation9 + $0x2d0] sm:$0xf0]  ;;  %v5736_v31 = vld [vmem:[#allocation9 + $0x264] sm:$0xf]  ;;  %3271 = vmatpush.bf16.msrb.mxu2 %v4785_v53 }
 0x20a   : > { %v5057_v4 = vor.u32 %v5748_v12, %v5054_v42  ;;  %v5009_v11 = vor.u32 %v5736_v31, %v5006_v2  ;;  %v5824_v42 = vld [vmem:[#allocation9 + $0x524] sm:$0xf]  ;;  %v1981_v31 = vmul.f32 %v6775_v5, %v6775_v5 }
 0x20b   : > { %v6786_v15 = vadd.f32 %v1923_v13, %v1911_v1  ;;  %v6794_v37 = vpack.c.bf16 %v2030_v21, %v2030_v21  ;;  %v6796_v35 = vpack.c.bf16 %v2027_v22, %v2027_v22  ;;  %v5836_v13 = vld [vmem:[#allocation9 + $0x584] sm:$0xf]  ;;  %v5390_v1 = vld [vmem:[#allocation9 + $0x570] sm:$0xf0]  ;;  %v5361_v45 = vor.u32 %v5824_v42, %v5358_v56 }
 0x20c   : > { %v1925_v7 = vpop.f32.mrf.mxu3  ;;  %v1899_v38 = vpop.f32.mrf.mxu1  ;;  %v5409_v59 = vor.u32 %v5836_v13, %v5406_v19  ;;  %v5393_v14 = vor.u32 %v5832_v16, %v5390_v1  ;;  %v5828_v21 = vld [vmem:[#allocation9 + $0x544] sm:$0xf]  ;;  %v5374_v22 = vld [vmem:[#allocation9 + $0x550] sm:$0xf0]  ;;  %v4820_v19 = vld [vmem:[#allocation9 + $0xe8] sm:$0xf] }
 0x20d   : > { %v1983_v29 = vmul.f32 %v6786_v15, %v6786_v15  ;;  %3199 = vmatmul.bf16.vlgmr.msra.gmra.mxu0 %v6796_v35  ;;  %3238 = vmatmul.bf16.vlgmr.msra.gmra.mxu3 %v6794_v37  ;;  %v5377_v7 = vor.u32 %v5828_v21, %v5374_v22  ;;  %v5728_v38 = vld [vmem:[#allocation9 + $0x224] sm:$0xf]  ;;  %v5198_v13 = vld [vmem:[#allocation9 + $0x3f0] sm:$0xf0]  ;;  %v5783_v21 = vld [vmem:[#allocation9 + $0x3d4] sm:$0xf0] }
 0x20e   : > { %v1886_v44 = vpop.f32.mrf.mxu0  ;;  %3295 = vmatpush.bf16.msra.mxu0 %v5073_v61  ;;  %3334 = vmatpush.bf16.msra.mxu3 %v5457_v30  ;;  %v5668_v61 = vld [vmem:[#allocation9 + $0x44] sm:$0xf]  ;;  %v4734_v30 = vld [vmem:[#allocation9 + $0x50] sm:$0xf0] }
 0x20f   : > { %v1986_v28 = vadd.f32 %v1983_v29, %v1980_v24  ;;  %3272 = vmatpush.bf16.msrb.mxu2 %v4769_v3  ;;  %v4993_v29 = vor.u32 %v5732_v10, %v4990_v52  ;;  %v4974_v44 = vld [vmem:[#allocation9 + $0x230] sm:$0xf0]  ;;  %v4737_v40 = vor.u32 %v5668_v61, %v4734_v30  ;;  %v5660_v2 = vld [vmem:[#allocation9 + $0x4] sm:$0xf]  ;;  %v4788_v30 = vld [vmem:[#allocation9 + $0xa8] sm:$0xf] }
 0x210   : > { %v4977_v62 = vor.u32 %v5728_v38, %v4974_v44  ;;  %v4702_v16 = vld [vmem:[#allocation9 + $0x10] sm:$0xf0]  ;;  %v5776_v38 = vld [vmem:[#allocation9 + $0x3a4] sm:$0xf] }
 0x211   : > { %v6800_v9 = vmax.f32 %v1986_v28, 1e-30  ;;  %v5182_v52 = vld [vmem:[#allocation9 + $0x3d0] sm:$0xf0]  ;;  %v4705_v22 = vor.u32 %v5660_v2, %v4702_v16  ;;  %v5760_v16 = vld [vmem:[#allocation9 + $0x324] sm:$0xf] }
 0x212   : > { %3296 = vmatpush.bf16.msra.mxu0 %v5057_v4  ;;  %3335 = vmatpush.bf16.msra.mxu3 %v5441_v50  ;;  %v5724_v4 = vld [vmem:[#allocation9 + $0x204] sm:$0xf]  ;;  %v4958_v50 = vld [vmem:[#allocation9 + $0x210] sm:$0xf0] }
 0x213   : > { %v6802_v60 = vpop.f32.mrf.mxu2  ;;  %6006 = vrsqrt.f32 %v6800_v9  ;;  %vm2007_vm13 = vweird.f32 %v6800_v9  ;;  %3273 = vmatpush.bf16.msrb.mxu2 %v4753_v27  ;;  %v4961_v48 = vor.u32 %v5724_v4, %v4958_v50  ;;  %v5166_v61 = vld [vmem:[#allocation9 + $0x3b0] sm:$0xf0]  ;;  %v5156_v4 = vld [vmem:[#allocation9 + $0x388] sm:$0xf]  ;;  %v5775_v50 = vld [vmem:[#allocation9 + $0x394] sm:$0xf0] }
 0x214   : > { %v5169_v44 = vor.u32 %v5776_v38, %v5166_v61  ;;  %v5663_v38 = vld [vmem:[#allocation9 + $0x14] sm:$0xf0]  ;;  %v5092_v61 = vld [vmem:[#allocation9 + $0x308] sm:$0xf] }
 0x216   : > { %3297 = vmatpush.bf16.msra.mxu0 %v5041_v46  ;;  %3336 = vmatpush.bf16.msra.mxu3 %v5425_v43  ;;  %v5342_v46 = vld [vmem:[#allocation9 + $0x510] sm:$0xf0] }
 0x217   : > { %3274 = vmatpush.bf16.msrb.mxu2 %v4737_v40  ;;  %v5772_v40 = vld [vmem:[#allocation9 + $0x384] sm:$0xf] }
 0x219   : > { %v6007_v54 = vpop.eup %6006 }
 0x21a   : > { %v2002_v57 = vmul.f32 %v6007_v54, %v6800_v9  ;;  %3298 = vmatpush.bf16.msra.mxu0 %v5025_v8  ;;  %3337 = vmatpush.bf16.msra.mxu3 %v5409_v59  ;;  %vm2008_vm12 = vweird.f32 %v6007_v54  ;;  %v5664_v9 = vld [vmem:[#allocation9 + $0x24] sm:$0xf]  ;;  %v5691_v8 = vld [vmem:[#allocation9 + $0xf4] sm:$0xf0] }
 0x21b   : > { %v1964_v55 = vpop.f32.mrf.mxu2  ;;  %vm2009_vm15 = vmor %vm2007_vm13, %vm2008_vm12  ;;  %v4721_v43 = vor.u32 %v5664_v9, %v4718_v23  ;;  %v5787_v59 = vld [vmem:[#allocation9 + $0x3f4] sm:$0xf0]  ;;  %v4821_v10 = vor.u32 %v5691_v8, %v4820_v19  ;;  %v5157_v23 = vor.u32 %v5775_v50, %v5156_v4  ;;  %v5118_v8 = vld [vmem:[#allocation9 + $0x350] sm:$0xf0]  ;;  %vm7033_vm12 = vcmask 1042434  }
 0x21c   : > { %v2003_v6 = vmul.f32 %v6007_v54, %v2002_v57  ;;  %vm6868_vm13 = vcmp.lt.s32.totalorder %v500_v51, 512 }
 0x21d   : > { %3275 = vmatpush.bf16.msrb.mxu2 %v4721_v43 }
 0x21e   : > { %v2004_v20 = vmul.f32 0.5, %v2003_v6  ;;  %3299 = vmatpush.bf16.msra.mxu0 %v5009_v11  ;;  %3338 = vmatpush.bf16.msra.mxu3 %v5393_v14  ;;  %v5780_v14 = vld [vmem:[#allocation9 + $0x3c4] sm:$0xf] }
 0x220   : > { %v2005_v24 = vsub.f32 1.5, %v2004_v20  ;;  %v5188_v20 = vld [vmem:[#allocation9 + $0x3c8] sm:$0xf] }
 0x221   : > { %3276 = vmatpush.bf16.msrb.mxu2 %v4705_v22  ;;  %v5086_v22 = vld [vmem:[#allocation9 + $0x310] sm:$0xf0] }
 0x222   : > { %v2006_v12 = vmul.f32 %v6007_v54, %v2005_v24  ;;  %3300 = vmatpush.bf16.msra.mxu0 %v4993_v29  ;;  %3339 = vmatpush.bf16.msra.mxu3 %v5377_v7  ;;  %v5185_v24 = vor.u32 %v5780_v14, %v5182_v52  ;;  %v4805_v29 = vor.u32 %v5687_v36, %v4804_v18  ;;  %v5667_v14 = vld [vmem:[#allocation9 + $0x34] sm:$0xf0]  ;;  %v5108_v52 = vld [vmem:[#allocation9 + $0x328] sm:$0xf] }
 0x223   : > { %v5189_v7 = vor.u32 %v5783_v21, %v5188_v20  ;;  %v5763_v18 = vld [vmem:[#allocation9 + $0x334] sm:$0xf0]  ;;  %v5756_v21 = vld [vmem:[#allocation9 + $0x304] sm:$0xf] }
 0x224   : > { %v1975_v32 = vpop.f32.mrf.mxu3  ;;  %v1949_v33 = vpop.f32.mrf.mxu1  ;;  %v2010_v28 = vsel %vm2009_vm15, %v6007_v54, %v2006_v12  ;;  %v5345_v54 = vor.u32 %v5820_v63, %v5342_v46  ;;  %v5683_v12 = vld [vmem:[#allocation9 + $0xb4] sm:$0xf0]  ;;  %v5134_v63 = vld [vmem:[#allocation9 + $0x370] sm:$0xf0]  ;;  %v4756_v46 = vld [vmem:[#allocation9 + $0x68] sm:$0xf] }
 0x225   : > { %v2022_v39 = vmul.f32 1e-08, %v2010_v28  ;;  %v4789_v42 = vor.u32 %v5683_v12, %v4788_v30  ;;  %v4772_v28 = vld [vmem:[#allocation9 + $0x88] sm:$0xf]  ;;  %v5759_v30 = vld [vmem:[#allocation9 + $0x314] sm:$0xf0] }
 0x226   : > { %v1936_v26 = vpop.f32.mrf.mxu0  ;;  %3301 = vmatpush.bf16.msra.mxu0 %v4977_v62  ;;  %3340 = vmatpush.bf16.msra.mxu3 %v5361_v45  ;;  %v5093_v50 = vor.u32 %v5759_v30, %v5092_v61  ;;  %v5707_v30 = vld [vmem:[#allocation9 + $0x174] sm:$0xf0]  ;;  %vm3541_vm15 = vcmp.ge.s32.totalorder %v500_v51, 80 }
 0x227   : > { %v1950_v41 = vadd.f32 %v1949_v33, %v1936_v26  ;;  %v2025_v47 = vmax.f32 %v2022_v39, 1.0  ;;  %v5779_v33 = vld [vmem:[#allocation9 + $0x3b4] sm:$0xf0]  ;;  %v5150_v26 = vld [vmem:[#allocation9 + $0x390] sm:$0xf0] }
 0x228   : > { %v5153_v45 = vor.u32 %v5772_v40, %v5150_v26  ;;  %v5723_v26 = vld [vmem:[#allocation9 + $0x1f4] sm:$0xf0] }
 0x229   : > { %v1963_v17 = vadd.f32 %v6802_v60, %v1950_v41  ;;  %v2031_v53 = vmul.f32 %v2025_v47, %v6786_v15  ;;  %v2028_v55 = vmul.f32 %v2025_v47, %v6773_v58  ;;  %v5204_v60 = vld [vmem:[#allocation9 + $0x3e8] sm:$0xf]  ;;  %v5201_v58 = vor.u32 %v5784_v49, %v5198_v13  ;;  %v5679_v41 = vld [vmem:[#allocation9 + $0x94] sm:$0xf0] }
 0x22a   : > { %v5205_v11 = vor.u32 %v5787_v59, %v5204_v60  ;;  %3302 = vmatpush.bf16.msra.mxu0 %v4961_v48  ;;  %3341 = vmatpush.bf16.msra.mxu3 %v5345_v54  ;;  %v4773_v9 = vor.u32 %v5679_v41, %v4772_v28  ;;  %v5675_v47 = vld [vmem:[#allocation9 + $0x74] sm:$0xf0]  ;;  %v5140_v48 = vld [vmem:[#allocation9 + $0x368] sm:$0xf] }
 0x22b   : > { %v6809_v25 = vadd.f32 %v1975_v32, %v1963_v17  ;;  %v6817_v15 = vpack.c.bf16 %v2031_v53, %v2031_v53  ;;  %v6819_v3 = vpack.c.bf16 %v2028_v55, %v2028_v55  ;;  %v5172_v32 = vld [vmem:[#allocation9 + $0x3a8] sm:$0xf]  ;;  %v5768_v17 = vld [vmem:[#allocation9 + $0x364] sm:$0xf]  ;;  %v5771_v49 = vld [vmem:[#allocation9 + $0x374] sm:$0xf0]  ;;  %v4757_v54 = vor.u32 %v5675_v47, %v4756_v46 }
 0x22c   : > { %v1977_v34 = vpop.f32.mrf.mxu3  ;;  %v1951_v57 = vpop.f32.mrf.mxu1  ;;  %v5173_v56 = vor.u32 %v5779_v33, %v5172_v32  ;;  %v5137_v19 = vor.u32 %v5768_v17, %v5134_v63  ;;  %v5764_v53 = vld [vmem:[#allocation9 + $0x344] sm:$0xf]  ;;  %v5141_v55 = vor.u32 %v5771_v49, %v5140_v48  ;;  %v4740_v60 = vld [vmem:[#allocation9 + $0x48] sm:$0xf]  ;;  %v5671_v59 = vld [vmem:[#allocation9 + $0x54] sm:$0xf0] }
 0x22d   : > { %v1984_v0 = vmul.f32 %v6809_v25, %v6809_v25  ;;  %3212 = vmatmul.bf16.vlgmr.msra.gmra.mxu1 %v6819_v3  ;;  %3251 = vmatmul.bf16.vlgmr.msrb.gmra.mxu0 %v6817_v15  ;;  %v5767_v34 = vld [vmem:[#allocation9 + $0x354] sm:$0xf0]  ;;  %v5121_v2 = vor.u32 %v5764_v53, %v5118_v8  ;;  %v5816_v33 = vld [vmem:[#allocation9 + $0x4e4] sm:$0xf]  ;;  %v5332_v28 = vld [vmem:[#allocation9 + $0x4e8] sm:$0xf] }
 0x22e   : > { %v1938_v1 = vpop.f32.mrf.mxu0  ;;  %3290 = vmatmul.bf16.vlgmr.msrb.gmra.mxu3 %v6819_v3  ;;  %3308 = vmatpush.bf16.msra.mxu1 %v5201_v58  ;;  %v5819_v41 = vld [vmem:[#allocation9 + $0x4f4] sm:$0xf0]  ;;  %v5310_v17 = vld [vmem:[#allocation9 + $0x4d0] sm:$0xf0]  ;;  %v4932_v63 = vld [vmem:[#allocation9 + $0x1c8] sm:$0xf] }
 0x22f   : > { %v1987_v6 = vadd.f32 %v1984_v0, %v1981_v31  ;;  %3347 = vmatpush.bf16.msrb.mxu0 %v4821_v10  ;;  %3386 = vmatpush.bf16.msrb.mxu3 %v5205_v11  ;;  %v5124_v0 = vld [vmem:[#allocation9 + $0x348] sm:$0xf]  ;;  %v4741_v1 = vor.u32 %v5671_v59, %v4740_v60  ;;  %v5815_v48 = vld [vmem:[#allocation9 + $0x4d4] sm:$0xf0]  ;;  %v5717_v49 = vld [vmem:[#allocation9 + $0x1cc] sm:$0xf] }
 0x230   : > { %v5125_v58 = vor.u32 %v5767_v34, %v5124_v0  ;;  %v4724_v10 = vld [vmem:[#allocation9 + $0x28] sm:$0xf]  ;;  %v5294_v8 = vld [vmem:[#allocation9 + $0x4b0] sm:$0xf0]  ;;  %v5811_v34 = vld [vmem:[#allocation9 + $0x4b4] sm:$0xf0] }
 0x231   : > { %v6821_v27 = vmax.f32 %v1987_v6, 1e-30  ;;  %v5102_v6 = vld [vmem:[#allocation9 + $0x330] sm:$0xf0]  ;;  %v5316_v47 = vld [vmem:[#allocation9 + $0x4c8] sm:$0xf] }
 0x232   : > { %3309 = vmatpush.bf16.msra.mxu1 %v5185_v24  ;;  %v5105_v20 = vor.u32 %v5760_v16, %v5102_v6  ;;  %v4725_v24 = vor.u32 %v5667_v14, %v4724_v10  ;;  %v4916_v60 = vld [vmem:[#allocation9 + $0x1a8] sm:$0xf]  ;;  %v5804_v6 = vld [vmem:[#allocation9 + $0x484] sm:$0xf]  ;;  %v5278_v10 = vld [vmem:[#allocation9 + $0x490] sm:$0xf0] }
 0x233   : > { %6008 = vrsqrt.f32 %v6821_v27  ;;  %3348 = vmatpush.bf16.msrb.mxu0 %v4805_v29  ;;  %3387 = vmatpush.bf16.msrb.mxu3 %v5189_v7  ;;  %vm2017_vm9 = vweird.f32 %v6821_v27  ;;  %v5109_v29 = vor.u32 %v5763_v18, %v5108_v52  ;;  %v4708_v7 = vld [vmem:[#allocation9 + $0x8] sm:$0xf]  ;;  %v5711_v52 = vld [vmem:[#allocation9 + $0x194] sm:$0xf0] }
 0x234   : > { %v4709_v40 = vor.u32 %v5663_v38, %v4708_v7  ;;  %v5300_v0 = vld [vmem:[#allocation9 + $0x4a8] sm:$0xf]  ;;  %v5262_v7 = vld [vmem:[#allocation9 + $0x470] sm:$0xf0] }
 0x235   : > { %v5284_v18 = vld [vmem:[#allocation9 + $0x488] sm:$0xf] }
 0x236   : > { %3310 = vmatpush.bf16.msra.mxu1 %v5169_v44  ;;  %v5326_v44 = vld [vmem:[#allocation9 + $0x4f0] sm:$0xf0]  ;;  %v4884_v38 = vld [vmem:[#allocation9 + $0x168] sm:$0xf] }
 0x237   : > { %3349 = vmatpush.bf16.msrb.mxu0 %v4789_v42  ;;  %3388 = vmatpush.bf16.msrb.mxu3 %v5173_v56  ;;  %v4948_v42 = vld [vmem:[#allocation9 + $0x1e8] sm:$0xf]  ;;  %v5089_v56 = vor.u32 %v5756_v21, %v5086_v22  ;;  %v4902_v21 = vld [vmem:[#allocation9 + $0x198] sm:$0xf0]  ;;  %v5281_v22 = vor.u32 %v5804_v6, %v5278_v10  ;;  %v5755_v10 = vld [vmem:[#allocation9 + $0x2f4] sm:$0xf0] }
 0x238   : > { %v5076_v6 = vld [vmem:[#allocation9 + $0x2e8] sm:$0xf] }
 0x239   : > { %v6009_v39 = vpop.eup %6008 }
 0x23a   : > { %v2012_v62 = vmul.f32 %v6009_v39, %v6821_v27  ;;  %3311 = vmatpush.bf16.msra.mxu1 %v5153_v45  ;;  %vm2018_vm0 = vweird.f32 %v6009_v39  ;;  %v5329_v45 = vor.u32 %v5816_v33, %v5326_v44  ;;  %v5705_v33 = vld [vmem:[#allocation9 + $0x16c] sm:$0xf]  ;;  %v4886_v44 = vld [vmem:[#allocation9 + $0x178] sm:$0xf0] }
 0x23b   : > { %3350 = vmatpush.bf16.msrb.mxu0 %v4773_v9  ;;  %3389 = vmatpush.bf16.msrb.mxu3 %v5157_v23  ;;  %vm2019_vm10 = vmor %vm2017_vm9, %vm2018_vm0  ;;  %v5333_v9 = vor.u32 %v5819_v41, %v5332_v28  ;;  %v5812_v23 = vld [vmem:[#allocation9 + $0x4c4] sm:$0xf]  ;;  %v5246_v28 = vld [vmem:[#allocation9 + $0x450] sm:$0xf0]  ;;  %vm3542_vm0 = vcmp.lt.s32.totalorder %v500_v51, 592 }
 0x23c   : > { %v2013_v43 = vmul.f32 %v6009_v39, %v2012_v62  ;;  %v5721_v62 = vld [vmem:[#allocation9 + $0x1ec] sm:$0xf]  ;;  %v4868_v41 = vld [vmem:[#allocation9 + $0x148] sm:$0xf]  ;;  %vm3543_vm9 = vmand %vm3541_vm15, %vm3542_vm0  ;;  %vm3576_vm0 = vcmp.lt.s32.totalorder %v500_v51, 624 }
 0x23e   : > { %v2014_v13 = vmul.f32 0.5, %v2013_v43  ;;  %3312 = vmatpush.bf16.msra.mxu1 %v5137_v19  ;;  %v5719_v43 = vld [vmem:[#allocation9 + $0x1d4] sm:$0xf0]  ;;  %v5313_v19 = vor.u32 %v5812_v23, %v5310_v17 }
 0x23f   : > { %3351 = vmatpush.bf16.msrb.mxu0 %v4757_v54  ;;  %3390 = vmatpush.bf16.msrb.mxu3 %v5141_v55  ;;  %v4933_v53 = vor.u32 %v5719_v43, %v4932_v63  ;;  %v5317_v54 = vor.u32 %v5815_v48, %v5316_v47  ;;  %v5808_v55 = vld [vmem:[#allocation9 + $0x4a4] sm:$0xf]  ;;  %v5230_v43 = vld [vmem:[#allocation9 + $0x430] sm:$0xf0]  ;;  %v4852_v47 = vld [vmem:[#allocation9 + $0x128] sm:$0xf] }
 0x240   : > { %v2015_v31 = vsub.f32 1.5, %v2014_v13  ;;  %v4934_v13 = vld [vmem:[#allocation9 + $0x1d8] sm:$0xf0]  ;;  %v5297_v16 = vor.u32 %v5808_v55, %v5294_v8  ;;  %v5788_v8 = vld [vmem:[#allocation9 + $0x404] sm:$0xf] }
 0x241   : > { %v4937_v59 = vor.u32 %v5717_v49, %v4934_v13  ;;  %v5699_v49 = vld [vmem:[#allocation9 + $0x134] sm:$0xf0]  ;;  %v5236_v13 = vld [vmem:[#allocation9 + $0x428] sm:$0xf] }
 0x242   : > { %v2016_v57 = vmul.f32 %v6009_v39, %v2015_v31  ;;  %3313 = vmatpush.bf16.msra.mxu1 %v5121_v2  ;;  %v5715_v31 = vld [vmem:[#allocation9 + $0x1b4] sm:$0xf0]  ;;  %v4918_v2 = vld [vmem:[#allocation9 + $0x1b8] sm:$0xf0] }
 0x243   : > { %3352 = vmatpush.bf16.msrb.mxu0 %v4741_v1  ;;  %3391 = vmatpush.bf16.msrb.mxu3 %v5125_v58  ;;  %v4917_v1 = vor.u32 %v5715_v31, %v4916_v60  ;;  %v5301_v58 = vor.u32 %v5811_v34, %v5300_v0  ;;  %v5214_v60 = vld [vmem:[#allocation9 + $0x410] sm:$0xf0]  ;;  %v4836_v0 = vld [vmem:[#allocation9 + $0x108] sm:$0xf]  ;;  %v5695_v34 = vld [vmem:[#allocation9 + $0x114] sm:$0xf0] }
 0x244   : > { %v2020_v11 = vsel %vm2019_vm10, %v6009_v39, %v2016_v57  ;;  %v5713_v57 = vld [vmem:[#allocation9 + $0x1ac] sm:$0xf]  ;;  %vm3592_vm10 = vcmp.ge.s32.totalorder %v500_v51, 64 }
 0x245   : > { %v2023_v36 = vmul.f32 1e-08, %v2020_v11  ;;  %v4900_v11 = vld [vmem:[#allocation9 + $0x188] sm:$0xf]  ;;  %v4921_v14 = vor.u32 %v5713_v57, %v4918_v2 }
 0x246   : > { %3314 = vmatpush.bf16.msra.mxu1 %v5105_v20  ;;  %v5709_v20 = vld [vmem:[#allocation9 + $0x18c] sm:$0xf]  ;;  %v5220_v57 = vld [vmem:[#allocation9 + $0x408] sm:$0xf] }
 0x247   : > { %v2026_v27 = vmax.f32 %v2023_v36, 1.0  ;;  %3353 = vmatpush.bf16.msrb.mxu0 %v4725_v24  ;;  %3392 = vmatpush.bf16.msrb.mxu3 %v5109_v29  ;;  %v5807_v36 = vld [vmem:[#allocation9 + $0x494] sm:$0xf0]  ;;  %v5800_v29 = vld [vmem:[#allocation9 + $0x464] sm:$0xf]  ;;  %v4905_v61 = vor.u32 %v5709_v20, %v4902_v21  ;;  %v4837_v20 = vor.u32 %v5695_v34, %v4836_v0 }
 0x248   : > { %v5285_v24 = vor.u32 %v5807_v36, %v5284_v18  ;;  %v5753_v18 = vld [vmem:[#allocation9 + $0x2ec] sm:$0xf]  ;;  %v5078_v36 = vld [vmem:[#allocation9 + $0x2f8] sm:$0xf0]  ;;  %v5012_v0 = vld [vmem:[#allocation9 + $0x268] sm:$0xf] }
 0x249   : > { %v2032_v12 = vmul.f32 %v2026_v27, %v6809_v25  ;;  %v2029_v32 = vmul.f32 %v2026_v27, %v6775_v5  ;;  %v4950_v25 = vld [vmem:[#allocation9 + $0x1f8] sm:$0xf0]  ;;  %v4949_v5 = vor.u32 %v5723_v26, %v4948_v42  ;;  %v4901_v27 = vor.u32 %v5711_v52, %v4900_v11  ;;  %v5796_v26 = vld [vmem:[#allocation9 + $0x444] sm:$0xf]  ;;  %v5460_v11 = vld [vmem:[#allocation9 + $0x5e8] sm:$0xf] }
 0x24a   : > { %3315 = vmatpush.bf16.msra.mxu1 %v5089_v56  ;;  %v4953_v46 = vor.u32 %v5721_v62, %v4950_v25  ;;  %v5265_v42 = vor.u32 %v5800_v29, %v5262_v7  ;;  %v4885_v56 = vor.u32 %v5707_v30, %v4884_v38  ;;  %v5703_v62 = vld [vmem:[#allocation9 + $0x154] sm:$0xf0]  ;;  %v5252_v25 = vld [vmem:[#allocation9 + $0x448] sm:$0xf]  ;;  %v5249_v23 = vor.u32 %v5796_v26, %v5246_v28 }
 0x24b   : > { %v6831_v4 = vpack.c.bf16 %v2032_v12, %v2032_v12  ;;  %v6833_v39 = vpack.c.bf16 %v2029_v32, %v2029_v32  ;;  %3354 = vmatpush.bf16.msrb.mxu0 %v4709_v40  ;;  %3393 = vmatpush.bf16.msrb.mxu3 %v5093_v50  ;;  %v5268_v12 = vld [vmem:[#allocation9 + $0x468] sm:$0xf]  ;;  %v5803_v32 = vld [vmem:[#allocation9 + $0x474] sm:$0xf0]  ;;  %v4889_v50 = vor.u32 %v5705_v33, %v4886_v44  ;;  %v5749_v44 = vld [vmem:[#allocation9 + $0x2cc] sm:$0xf] }
 0x24c   : > { %v5269_v40 = vor.u32 %v5803_v32, %v5268_v12  ;;  %v4869_v17 = vor.u32 %v5703_v62, %v4868_v41  ;;  %v5851_v52 = vld [vmem:[#allocation9 + $0x5f4] sm:$0xf0]  ;;  %v5077_v29 = vor.u32 %v5755_v10, %v5076_v6  ;;  %v5081_v38 = vor.u32 %v5753_v18, %v5078_v36  ;;  %v5444_v12 = vld [vmem:[#allocation9 + $0x5c8] sm:$0xf]  ;;  %v5833_v6 = vld [vmem:[#allocation9 + $0x56c] sm:$0xf] }
 0x24d   : > { %3225 = vmatmul.bf16.vlgmr.msra.gmra.mxu2 %v6833_v39  ;;  %3264 = vmatmul.bf16.vlgmr.msrb.gmra.mxu1 %v6831_v4  ;;  %v5461_v7 = vor.u32 %v5851_v52, %v5460_v11  ;;  %v5751_v30 = vld [vmem:[#allocation9 + $0x2d4] sm:$0xf0]  ;;  %v5398_v10 = vld [vmem:[#allocation9 + $0x578] sm:$0xf0]  ;;  %v4996_v18 = vld [vmem:[#allocation9 + $0x248] sm:$0xf] }
 0x24e   : > { %3303 = vmatmul.bf16.vlgmr.msra.gmra.mxu0 %v6833_v39  ;;  %3321 = vmatpush.bf16.msra.mxu2 %v5329_v45  ;;  %v5799_v45 = vld [vmem:[#allocation9 + $0x454] sm:$0xf0] }
 0x24f   : > { %3342 = vmatmul.bf16.vlgmr.msra.gmra.mxu3 %v6831_v4  ;;  %3360 = vmatpush.bf16.msrb.mxu1 %v4949_v5  ;;  %v5701_v5 = vld [vmem:[#allocation9 + $0x14c] sm:$0xf]  ;;  %v5253_v63 = vor.u32 %v5799_v45, %v5252_v25  ;;  %v5847_v33 = vld [vmem:[#allocation9 + $0x5d4] sm:$0xf0]  ;;  %v5428_v25 = vld [vmem:[#allocation9 + $0x5a8] sm:$0xf] }
 0x250   : > { %3399 = vmatpush.bf16.msra.mxu0 %v5333_v9  ;;  %3438 = vmatpush.bf16.msra.mxu3 %v4953_v46  ;;  %v4870_v9 = vld [vmem:[#allocation9 + $0x158] sm:$0xf0]  ;;  %v5792_v46 = vld [vmem:[#allocation9 + $0x424] sm:$0xf]  ;;  %v5445_v28 = vor.u32 %v5847_v33, %v5444_v12  ;;  %v5747_v62 = vld [vmem:[#allocation9 + $0x2b4] sm:$0xf0] }
 0x251   : > { %v4873_v48 = vor.u32 %v5701_v5, %v4870_v9  ;;  %v5233_v55 = vor.u32 %v5792_v46, %v5230_v43  ;;  %v5843_v5 = vld [vmem:[#allocation9 + $0x5b4] sm:$0xf0]  ;;  %v5745_v9 = vld [vmem:[#allocation9 + $0x2ac] sm:$0xf]  ;;  %v4980_v12 = vld [vmem:[#allocation9 + $0x228] sm:$0xf] }
 0x252   : > { %3322 = vmatpush.bf16.msra.mxu2 %v5313_v19  ;;  %v5795_v19 = vld [vmem:[#allocation9 + $0x434] sm:$0xf0]  ;;  %v5429_v43 = vor.u32 %v5843_v5, %v5428_v25  ;;  %v5364_v33 = vld [vmem:[#allocation9 + $0x528] sm:$0xf] }
 0x253   : > { %3361 = vmatpush.bf16.msrb.mxu1 %v4933_v53  ;;  %v5697_v53 = vld [vmem:[#allocation9 + $0x12c] sm:$0xf]  ;;  %v5237_v31 = vor.u32 %v5795_v19, %v5236_v13  ;;  %v5412_v13 = vld [vmem:[#allocation9 + $0x588] sm:$0xf]  ;;  %v5739_v34 = vld [vmem:[#allocation9 + $0x274] sm:$0xf0] }
 0x254   : > { %3400 = vmatpush.bf16.msra.mxu0 %v5317_v54  ;;  %3439 = vmatpush.bf16.msra.mxu3 %v4937_v59  ;;  %v4854_v54 = vld [vmem:[#allocation9 + $0x138] sm:$0xf0]  ;;  %v4853_v59 = vor.u32 %v5699_v49, %v4852_v47  ;;  %v5743_v49 = vld [vmem:[#allocation9 + $0x294] sm:$0xf0]  ;;  %v5013_v11 = vor.u32 %v5739_v34, %v5012_v0  ;;  %v5348_v5 = vld [vmem:[#allocation9 + $0x508] sm:$0xf] }
 0x255   : > { %v4857_v2 = vor.u32 %v5697_v53, %v4854_v54  ;;  %v5839_v53 = vld [vmem:[#allocation9 + $0x594] sm:$0xf0]  ;;  %v5741_v54 = vld [vmem:[#allocation9 + $0x28c] sm:$0xf]  ;;  %v5190_v0 = vld [vmem:[#allocation9 + $0x3d8] sm:$0xf0] }
 0x256   : > { %3323 = vmatpush.bf16.msra.mxu2 %v5297_v16  ;;  %v5791_v16 = vld [vmem:[#allocation9 + $0x414] sm:$0xf0] }
 0x257   : > { %3362 = vmatpush.bf16.msrb.mxu1 %v4917_v1  ;;  %v5693_v1 = vld [vmem:[#allocation9 + $0x10c] sm:$0xf]  ;;  %v5221_v21 = vor.u32 %v5791_v16, %v5220_v57  ;;  %v5396_v57 = vld [vmem:[#allocation9 + $0x568] sm:$0xf]  ;;  %v5835_v16 = vld [vmem:[#allocation9 + $0x574] sm:$0xf0] }
 0x258   : > { %3401 = vmatpush.bf16.msra.mxu0 %v5301_v58  ;;  %3440 = vmatpush.bf16.msra.mxu3 %v4921_v14  ;;  %v4838_v58 = vld [vmem:[#allocation9 + $0x118] sm:$0xf0]  ;;  %v5217_v14 = vor.u32 %v5788_v8, %v5214_v60  ;;  %v5837_v8 = vld [vmem:[#allocation9 + $0x58c] sm:$0xf]  ;;  %v5735_v36 = vld [vmem:[#allocation9 + $0x254] sm:$0xf0] }
 0x259   : > { %v5414_v60 = vld [vmem:[#allocation9 + $0x598] sm:$0xf0] }
 0x25a   : > { %3324 = vmatpush.bf16.msra.mxu2 %v5281_v22  ;;  %v5849_v22 = vld [vmem:[#allocation9 + $0x5ec] sm:$0xf] }
 0x25b   : > { %3363 = vmatpush.bf16.msrb.mxu1 %v4901_v27  ;;  %v5462_v27 = vld [vmem:[#allocation9 + $0x5f8] sm:$0xf0] }
 0x25c   : > { %3402 = vmatpush.bf16.msra.mxu0 %v5285_v24  ;;  %3441 = vmatpush.bf16.msra.mxu3 %v4905_v61  ;;  %v4841_v24 = vor.u32 %v5693_v1, %v4838_v58  ;;  %v5060_v61 = vld [vmem:[#allocation9 + $0x2c8] sm:$0xf]  ;;  %v5465_v32 = vor.u32 %v5849_v22, %v5462_v27  ;;  %v5737_v1 = vld [vmem:[#allocation9 + $0x26c] sm:$0xf]  ;;  %v5014_v58 = vld [vmem:[#allocation9 + $0x278] sm:$0xf0] }
 0x25d   : > { %3277 = vmatmul.bf16.vlgmr.msrb.gmra.mxu2 %v6796_v35  ;;  %3316 = vmatmul.bf16.vlgmr.msra.gmra.mxu1 %v6794_v37  ;;  %v5061_v26 = vor.u32 %v5751_v30, %v5060_v61  ;;  %v5017_v52 = vor.u32 %v5737_v1, %v5014_v58  ;;  %v5831_v22 = vld [vmem:[#allocation9 + $0x554] sm:$0xf0]  ;;  %v5733_v27 = vld [vmem:[#allocation9 + $0x24c] sm:$0xf]  ;;  %v5174_v58 = vld [vmem:[#allocation9 + $0x3b8] sm:$0xf0] }
 0x25e   : > { %3355 = vmatmul.bf16.vlgmr.msrb.gmra.mxu0 %v6796_v35  ;;  %3325 = vmatpush.bf16.msra.mxu2 %v5265_v42  ;;  %v5062_v42 = vld [vmem:[#allocation9 + $0x2d8] sm:$0xf0]  ;;  %v5777_v1 = vld [vmem:[#allocation9 + $0x3ac] sm:$0xf] }
 0x25f   : > { %3394 = vmatmul.bf16.vlgmr.msrb.gmra.mxu3 %v6794_v37  ;;  %3364 = vmatpush.bf16.msrb.mxu1 %v4885_v56  ;;  %v5845_v56 = vld [vmem:[#allocation9 + $0x5cc] sm:$0xf]  ;;  %v5065_v41 = vor.u32 %v5749_v44, %v5062_v42  ;;  %v5827_v42 = vld [vmem:[#allocation9 + $0x534] sm:$0xf0] }
 0x260   : > { %3403 = vmatpush.bf16.msra.mxu0 %v5269_v40  ;;  %3442 = vmatpush.bf16.msra.mxu3 %v4889_v50  ;;  %v5446_v40 = vld [vmem:[#allocation9 + $0x5d8] sm:$0xf0]  ;;  %v5044_v50 = vld [vmem:[#allocation9 + $0x2a8] sm:$0xf] }
 0x261   : > { %v5449_v45 = vor.u32 %v5845_v56, %v5446_v40  ;;  %v5045_v46 = vor.u32 %v5747_v62, %v5044_v50  ;;  %v5729_v56 = vld [vmem:[#allocation9 + $0x22c] sm:$0xf]  ;;  %v4982_v40 = vld [vmem:[#allocation9 + $0x238] sm:$0xf0]  ;;  %v4964_v50 = vld [vmem:[#allocation9 + $0x208] sm:$0xf]  ;;  %v5365_v62 = vor.u32 %v5827_v42, %v5364_v33 }
 0x262   : > { %3326 = vmatpush.bf16.msra.mxu2 %v5249_v23  ;;  %v5046_v23 = vld [vmem:[#allocation9 + $0x2b8] sm:$0xf0]  ;;  %v4985_v25 = vor.u32 %v5729_v56, %v4982_v40  ;;  %v5665_v42 = vld [vmem:[#allocation9 + $0x2c] sm:$0xf] }
 0x263   : > { %3365 = vmatpush.bf16.msrb.mxu1 %v4869_v17  ;;  %v5841_v17 = vld [vmem:[#allocation9 + $0x5ac] sm:$0xf]  ;;  %v5049_v47 = vor.u32 %v5745_v9, %v5046_v23  ;;  %v5823_v9 = vld [vmem:[#allocation9 + $0x514] sm:$0xf0]  ;;  %v4726_v56 = vld [vmem:[#allocation9 + $0x38] sm:$0xf0] }
 0x264   : > { %3404 = vmatpush.bf16.msra.mxu0 %v5253_v63  ;;  %3443 = vmatpush.bf16.msra.mxu3 %v4873_v48  ;;  %v5430_v63 = vld [vmem:[#allocation9 + $0x5b8] sm:$0xf0]  ;;  %v5028_v48 = vld [vmem:[#allocation9 + $0x288] sm:$0xf] }
 0x265   : > { %v5433_v19 = vor.u32 %v5841_v17, %v5430_v63  ;;  %v5725_v17 = vld [vmem:[#allocation9 + $0x20c] sm:$0xf]  ;;  %v4966_v63 = vld [vmem:[#allocation9 + $0x218] sm:$0xf0] }
 0x266   : > { %3327 = vmatpush.bf16.msra.mxu2 %v5233_v55  ;;  %v5030_v55 = vld [vmem:[#allocation9 + $0x298] sm:$0xf0] }
 0x267   : > { %3366 = vmatpush.bf16.msrb.mxu1 %v4853_v59  ;;  %v5029_v59 = vor.u32 %v5743_v49, %v5028_v48  ;;  %v4822_v48 = vld [vmem:[#allocation9 + $0xf8] sm:$0xf0] }
 0x268   : > { %3405 = vmatpush.bf16.msra.mxu0 %v5237_v31  ;;  %3444 = vmatpush.bf16.msra.mxu3 %v4857_v2  ;;  %v5033_v31 = vor.u32 %v5741_v54, %v5030_v55  ;;  %v5417_v2 = vor.u32 %v5837_v8, %v5414_v60  ;;  %v4969_v54 = vor.u32 %v5725_v17, %v4966_v63 }
 0x26a   : > { %3328 = vmatpush.bf16.msra.mxu2 %v5217_v14  ;;  %v5397_v14 = vor.u32 %v5835_v16, %v5396_v57  ;;  %v4790_v16 = vld [vmem:[#allocation9 + $0xb8] sm:$0xf0] }
 0x26b   : > { %3367 = vmatpush.bf16.msrb.mxu1 %v4837_v20  ;;  %v5380_v20 = vld [vmem:[#allocation9 + $0x548] sm:$0xf] }
 0x26c   : > { %3406 = vmatpush.bf16.msra.mxu0 %v5221_v21  ;;  %3445 = vmatpush.bf16.msra.mxu3 %v4841_v24  ;;  %v5401_v21 = vor.u32 %v5833_v6, %v5398_v10  ;;  %v4998_v24 = vld [vmem:[#allocation9 + $0x258] sm:$0xf0]  ;;  %v5381_v61 = vor.u32 %v5831_v22, %v5380_v20  ;;  %v5673_v22 = vld [vmem:[#allocation9 + $0x6c] sm:$0xf] }
 0x26d   : > { %3329 = vmatmul.bf16.vlgmr.msra.gmra.mxu2 %v6817_v15  ;;  %v5001_v30 = vor.u32 %v5733_v27, %v4998_v24  ;;  %v5769_v24 = vld [vmem:[#allocation9 + $0x36c] sm:$0xf] }
 0x26e   : > { %3373 = vmatpush.bf16.msrb.mxu2 %v5077_v29  ;;  %3368 = vmatmul.bf16.vlgmr.msrb.gmra.mxu1 %v6819_v3  ;;  %v5829_v29 = vld [vmem:[#allocation9 + $0x54c] sm:$0xf] }
 0x26f   : > { %3412 = vmatpush.bf16.msra.mxu1 %v5461_v7  ;;  %3407 = vmatmul.bf16.vlgmr.msra.gmra.mxu0 %v6817_v15  ;;  %v5382_v7 = vld [vmem:[#allocation9 + $0x558] sm:$0xf0] }
 0x270   : > { %3451 = vmatpush.bf16.msrb.mxu0 %v5081_v38  ;;  %3490 = vmatpush.bf16.msrb.mxu3 %v5465_v32  ;;  %v4997_v38 = vor.u32 %v5735_v36, %v4996_v18  ;;  %v5731_v32 = vld [vmem:[#allocation9 + $0x234] sm:$0xf0]  ;;  %v5385_v44 = vor.u32 %v5829_v29, %v5382_v7  ;;  %v5773_v18 = vld [vmem:[#allocation9 + $0x38c] sm:$0xf]  ;;  %v5158_v36 = vld [vmem:[#allocation9 + $0x398] sm:$0xf0] }
 0x271   : > { %3446 = vmatmul.bf16.vlgmr.msra.gmra.mxu3 %v6819_v3  ;;  %v5413_v3 = vor.u32 %v5839_v53, %v5412_v13  ;;  %v5785_v13 = vld [vmem:[#allocation9 + $0x3ec] sm:$0xf]  ;;  %v5349_v53 = vor.u32 %v5823_v9, %v5348_v5  ;;  %v5094_v5 = vld [vmem:[#allocation9 + $0x318] sm:$0xf0] }
 0x272   : > { %3374 = vmatpush.bf16.msrb.mxu2 %v5061_v26  ;;  %v5825_v26 = vld [vmem:[#allocation9 + $0x52c] sm:$0xf] }
 0x273   : > { %3413 = vmatpush.bf16.msra.mxu1 %v5445_v28  ;;  %v5366_v28 = vld [vmem:[#allocation9 + $0x538] sm:$0xf0]  ;;  %v5817_v9 = vld [vmem:[#allocation9 + $0x4ec] sm:$0xf] }
 0x274   : > { %3452 = vmatpush.bf16.msrb.mxu0 %v5065_v41  ;;  %3491 = vmatpush.bf16.msrb.mxu3 %v5449_v45  ;;  %v4981_v41 = vor.u32 %v5731_v32, %v4980_v12  ;;  %v5727_v45 = vld [vmem:[#allocation9 + $0x214] sm:$0xf0]  ;;  %v5369_v23 = vor.u32 %v5825_v26, %v5366_v28  ;;  %v5765_v12 = vld [vmem:[#allocation9 + $0x34c] sm:$0xf]  ;;  %v5126_v32 = vld [vmem:[#allocation9 + $0x358] sm:$0xf0] }
 0x275   : > { %v4965_v49 = vor.u32 %v5727_v45, %v4964_v50  ;;  %v5761_v26 = vld [vmem:[#allocation9 + $0x32c] sm:$0xf]  ;;  %v5110_v28 = vld [vmem:[#allocation9 + $0x338] sm:$0xf0] }
 0x276   : > { %3375 = vmatpush.bf16.msrb.mxu2 %v5045_v46  ;;  %v5821_v46 = vld [vmem:[#allocation9 + $0x50c] sm:$0xf]  ;;  %v5113_v50 = vor.u32 %v5761_v26, %v5110_v28 }
 0x277   : > { %3414 = vmatpush.bf16.msra.mxu1 %v5429_v43  ;;  %v5350_v43 = vld [vmem:[#allocation9 + $0x518] sm:$0xf0]  ;;  %v5757_v45 = vld [vmem:[#allocation9 + $0x30c] sm:$0xf] }
 0x278   : > { %3453 = vmatpush.bf16.msrb.mxu0 %v5049_v47  ;;  %3492 = vmatpush.bf16.msrb.mxu3 %v5433_v19  ;;  %v5689_v47 = vld [vmem:[#allocation9 + $0xec] sm:$0xf]  ;;  %v5206_v19 = vld [vmem:[#allocation9 + $0x3f8] sm:$0xf0]  ;;  %v5353_v55 = vor.u32 %v5821_v46, %v5350_v43  ;;  %v5097_v63 = vor.u32 %v5757_v45, %v5094_v5 }
 0x279   : > { %v4825_v8 = vor.u32 %v5689_v47, %v4822_v48  ;;  %v5209_v60 = vor.u32 %v5785_v13, %v5206_v19  ;;  %v5813_v43 = vld [vmem:[#allocation9 + $0x4cc] sm:$0xf]  ;;  %v5318_v47 = vld [vmem:[#allocation9 + $0x4d8] sm:$0xf0] }
 0x27a   : > { %3376 = vmatpush.bf16.msrb.mxu2 %v5029_v59  ;;  %v5685_v59 = vld [vmem:[#allocation9 + $0xcc] sm:$0xf]  ;;  %v5321_v48 = vor.u32 %v5813_v43, %v5318_v47  ;;  %v5302_v13 = vld [vmem:[#allocation9 + $0x4b8] sm:$0xf0] }
 0x27b   : > { %3415 = vmatpush.bf16.msra.mxu1 %v5413_v3  ;;  %v4806_v3 = vld [vmem:[#allocation9 + $0xd8] sm:$0xf0] }
 0x27c   : > { %3454 = vmatpush.bf16.msrb.mxu0 %v5033_v31  ;;  %3493 = vmatpush.bf16.msrb.mxu3 %v5417_v2  ;;  %v5781_v31 = vld [vmem:[#allocation9 + $0x3cc] sm:$0xf]  ;;  %v4809_v34 = vor.u32 %v5685_v59, %v4806_v3  ;;  %v5270_v3 = vld [vmem:[#allocation9 + $0x478] sm:$0xf0] }
 0x27d   : > { %v5193_v57 = vor.u32 %v5781_v31, %v5190_v0  ;;  %v5681_v2 = vld [vmem:[#allocation9 + $0xac] sm:$0xf] }
 0x27e   : > { %3377 = vmatpush.bf16.msrb.mxu2 %v5013_v11  ;;  %v4793_v6 = vor.u32 %v5681_v2, %v4790_v16  ;;  %v5177_v11 = vor.u32 %v5777_v1, %v5174_v58  ;;  %v5801_v59 = vld [vmem:[#allocation9 + $0x46c] sm:$0xf]  ;;  %v5254_v16 = vld [vmem:[#allocation9 + $0x458] sm:$0xf0] }
 0x27f   : > { %3416 = vmatpush.bf16.msra.mxu1 %v5397_v14  ;;  %v5677_v14 = vld [vmem:[#allocation9 + $0x8c] sm:$0xf]  ;;  %v5273_v0 = vor.u32 %v5801_v59, %v5270_v3  ;;  %v5238_v1 = vld [vmem:[#allocation9 + $0x438] sm:$0xf0] }
 0x280   : > { %3455 = vmatpush.bf16.msrb.mxu0 %v5017_v52  ;;  %3494 = vmatpush.bf16.msrb.mxu3 %v5401_v21  ;;  %v4774_v52 = vld [vmem:[#allocation9 + $0x98] sm:$0xf0]  ;;  %v5161_v21 = vor.u32 %v5773_v18, %v5158_v36  ;;  %v5797_v2 = vld [vmem:[#allocation9 + $0x44c] sm:$0xf] }
 0x281   : > { %v4777_v20 = vor.u32 %v5677_v14, %v4774_v52  ;;  %v5222_v14 = vld [vmem:[#allocation9 + $0x418] sm:$0xf0] }
 0x282   : > { %3378 = vmatpush.bf16.msrb.mxu2 %v4997_v38 }
 0x283   : > { %3417 = vmatpush.bf16.msra.mxu1 %v5381_v61  ;;  %v5669_v61 = vld [vmem:[#allocation9 + $0x4c] sm:$0xf] }
 0x284   : > { %3456 = vmatpush.bf16.msrb.mxu0 %v5001_v30  ;;  %3495 = vmatpush.bf16.msrb.mxu3 %v5385_v44  ;;  %v4742_v30 = vld [vmem:[#allocation9 + $0x58] sm:$0xf0]  ;;  %v5129_v44 = vor.u32 %v5765_v12, %v5126_v32 }
 0x285   : > { %v4745_v33 = vor.u32 %v5669_v61, %v4742_v30 }
 0x286   : > { %3379 = vmatpush.bf16.msrb.mxu2 %v4981_v41  ;;  %v4729_v41 = vor.u32 %v5665_v42, %v4726_v56 }
 0x287   : > { %3418 = vmatpush.bf16.msra.mxu1 %v5365_v62  ;;  %v5661_v62 = vld [vmem:[#allocation9 + $0xc] sm:$0xf] }
 0x288   : > { %3457 = vmatpush.bf16.msrb.mxu0 %v4985_v25  ;;  %3496 = vmatpush.bf16.msrb.mxu3 %v5369_v23  ;;  %v4710_v25 = vld [vmem:[#allocation9 + $0x18] sm:$0xf0] }
 0x289   : > { %v5334_v23 = vld [vmem:[#allocation9 + $0x4f8] sm:$0xf0]  ;;  %v4713_v17 = vor.u32 %v5661_v62, %v4710_v25 }
 0x28a   : > { %3380 = vmatpush.bf16.msrb.mxu2 %v4965_v49  ;;  %v6851_v10 = vpop.f32.mrf.mxu0  ;;  %v5337_v46 = vor.u32 %v5817_v9, %v5334_v23  ;;  %v5809_v49 = vld [vmem:[#allocation9 + $0x4ac] sm:$0xf] }
 0x28b   : > { %3419 = vmatpush.bf16.msra.mxu1 %v5349_v53  ;;  %v5305_v19 = vor.u32 %v5809_v49, %v5302_v13 }
 0x28c   : > { %3458 = vmatpush.bf16.msrb.mxu0 %v4969_v54  ;;  %3497 = vmatpush.bf16.msrb.mxu3 %v5353_v55  ;;  %v5805_v55 = vld [vmem:[#allocation9 + $0x48c] sm:$0xf] }
 0x28d   : > { %3381 = vmatmul.bf16.vlgmr.msrb.gmra.mxu2 %v6833_v39 }
 0x28e   : > { %3425 = vmatpush.bf16.msra.mxu2 %v4825_v8  ;;  %3420 = vmatmul.bf16.vlgmr.msra.gmra.mxu1 %v6831_v4  ;;  %v5286_v8 = vld [vmem:[#allocation9 + $0x498] sm:$0xf0] }
 0x28f   : > { %3464 = vmatpush.bf16.msrb.mxu1 %v5209_v60  ;;  %3459 = vmatmul.bf16.vlgmr.msrb.gmra.mxu0 %v6833_v39  ;;  %v4758_v39 = vld [vmem:[#allocation9 + $0x78] sm:$0xf0]  ;;  %v5289_v60 = vor.u32 %v5805_v55, %v5286_v8 }
 0x290   : > { %3498 = vmatmul.bf16.vlgmr.msrb.gmra.mxu3 %v6831_v4  ;;  %v6853_v27 = vpop.f32.mrf.mxu3  ;;  %v5142_v4 = vld [vmem:[#allocation9 + $0x378] sm:$0xf0]  ;;  %v4761_v29 = vor.u32 %v5673_v22, %v4758_v39 }
 0x291   : > { %v5145_v38 = vor.u32 %v5769_v24, %v5142_v4 }
 0x292   : > { %3426 = vmatpush.bf16.msra.mxu2 %v4809_v34  ;;  %v3202_v7 = vpop.f32.mrf.mxu0 }
 0x293   : > { %3465 = vmatpush.bf16.msrb.mxu1 %v5193_v57 }
 0x296   : > { %3427 = vmatpush.bf16.msra.mxu2 %v4793_v6 }
 0x297   : > { %3466 = vmatpush.bf16.msrb.mxu1 %v5177_v11  ;;  %v5789_v11 = vld [vmem:[#allocation9 + $0x40c] sm:$0xf] }
 0x298   : > { %v3241_v40 = vpop.f32.mrf.mxu3  ;;  %v5225_v52 = vor.u32 %v5789_v11, %v5222_v14 }
 0x29a   : > { %3428 = vmatpush.bf16.msra.mxu2 %v4777_v20 }
 0x29b   : > { %3467 = vmatpush.bf16.msrb.mxu1 %v5161_v21 }
 0x29e   : > { %3429 = vmatpush.bf16.msra.mxu2 %v4761_v29 }
 0x29f   : > { %3468 = vmatpush.bf16.msrb.mxu1 %v5145_v38 }
 0x2a2   : > { %3430 = vmatpush.bf16.msra.mxu2 %v4745_v33 }
 0x2a3   : > { %3469 = vmatpush.bf16.msrb.mxu1 %v5129_v44 }
 0x2a6   : > { %3431 = vmatpush.bf16.msra.mxu2 %v4729_v41 }
 0x2a7   : > { %3470 = vmatpush.bf16.msrb.mxu1 %v5113_v50 }
 0x2aa   : > { %3432 = vmatpush.bf16.msra.mxu2 %v4713_v17  ;;  %v3213_v53 = vpop.f32.mrf.mxu1  ;;  %v3252_v54 = vpop.f32.mrf.mxu0 }
 0x2ab   : > { %3471 = vmatpush.bf16.msrb.mxu1 %v5097_v63  ;;  %v3214_v20 = vadd.f32 %v3213_v53, %v6851_v10 }
 0x2ad   : > { %3433 = vmatmul.bf16.vlgmr.msra.gmra.mxu2 %v6796_v35  ;;  %v5257_v35 = vor.u32 %v5797_v2, %v5254_v16 }
 0x2ae   : > { %3477 = vmatpush.bf16.msrb.mxu2 %v5337_v46  ;;  %3472 = vmatmul.bf16.vlgmr.msrb.gmra.mxu1 %v6794_v37  ;;  %v5793_v37 = vld [vmem:[#allocation9 + $0x42c] sm:$0xf] }
 0x2af   : > { %v5241_v6 = vor.u32 %v5793_v37, %v5238_v1 }
 0x2b1   : > { %v3291_v31 = vpop.f32.mrf.mxu3 }
 0x2b2   : > { %3478 = vmatpush.bf16.msrb.mxu2 %v5321_v48  ;;  %v3215_v34 = vpop.f32.mrf.mxu1  ;;  %v3254_v57 = vpop.f32.mrf.mxu0 }
 0x2b6   : > { %3479 = vmatpush.bf16.msrb.mxu2 %v5305_v19 }
 0x2b9   : > { %v3293_v58 = vpop.f32.mrf.mxu3 }
 0x2ba   : > { %3480 = vmatpush.bf16.msrb.mxu2 %v5289_v60 }
 0x2be   : > { %3481 = vmatpush.bf16.msrb.mxu2 %v5273_v0 }
 0x2c2   : > { %3482 = vmatpush.bf16.msrb.mxu2 %v5257_v35 }
 0x2c6   : > { %3483 = vmatpush.bf16.msrb.mxu2 %v5241_v6 }
 0x2ca   : > { %3484 = vmatpush.bf16.msrb.mxu2 %v5225_v52  ;;  %v3265_v18 = vpop.f32.mrf.mxu1 }
 0x2cb   : > { %v3304_v36 = vpop.f32.mrf.mxu0 }
 0x2cd   : > { %3485 = vmatmul.bf16.vlgmr.msrb.gmra.mxu2 %v6817_v15 }
 0x2d0   : > { %v3226_v21 = vpop.f32.mrf.mxu2 }
 0x2d1   : > { %v3227_v22 = vadd.f32 %v3226_v21, %v3214_v20 }
 0x2d2   : > { %v3267_v39 = vpop.f32.mrf.mxu1  ;;  %v3343_v4 = vpop.f32.mrf.mxu3 }
 0x2d3   : > { %v3240_v24 = vadd.f32 %v6853_v27, %v3227_v22  ;;  %v3306_v29 = vpop.f32.mrf.mxu0 }
 0x2d5   : > { %v3253_v7 = vadd.f32 %v3252_v54, %v3240_v24 }
 0x2d7   : > { %v6860_v38 = vadd.f32 %v3265_v18, %v3253_v7 }
 0x2d8   : > { %v3228_v61 = vpop.f32.mrf.mxu2 }
 0x2d9   : > { %3530 = vst [vmem:[#allocation1] sm:$0xff] %v6860_v38 }
 0x2da   : > { %v3345_v30 = vpop.f32.mrf.mxu3  ;;  %v3317_v12 = vpop.f32.mrf.mxu1 }
 0x2db   : > { %v3356_v15 = vpop.f32.mrf.mxu0 }
 0x2e0   : > { %v3278_v32 = vpop.f32.mrf.mxu2 }
 0x2e1   : > { %v3292_v56 = vadd.f32 %v3291_v31, %v3278_v32 }
 0x2e2   : > { %v3395_v33 = vpop.f32.mrf.mxu3  ;;  %v3319_v44 = vpop.f32.mrf.mxu1 }
 0x2e3   : > { %v3358_v10 = vpop.f32.mrf.mxu0  ;;  %v3305_v26 = vadd.f32 %v3304_v36, %v3292_v56 }
 0x2e5   : > { %v3318_v41 = vadd.f32 %v3317_v12, %v3305_v26 }
 0x2e8   : > { %v3280_v42 = vpop.f32.mrf.mxu2 }
 0x2ea   : > { %v3397_v40 = vpop.f32.mrf.mxu3 }
 0x2eb   : > { %v3369_v27 = vpop.f32.mrf.mxu1 }
 0x2ec   : > { %v3408_v28 = vpop.f32.mrf.mxu0  ;;  %v3370_v43 = vadd.f32 %v3369_v27, %v3356_v15 }
 0x2f0   : > { %v3330_v50 = vpop.f32.mrf.mxu2 }
 0x2f1   : > { %v3331_v62 = vadd.f32 %v3330_v50, %v3318_v41 }
 0x2f3   : > { %v6863_v45 = vadd.f32 %v3343_v4, %v3331_v62  ;;  %v3371_v5 = vpop.f32.mrf.mxu1 }
 0x2f4   : > { %v3447_v25 = vpop.f32.mrf.mxu3  ;;  %v3410_v9 = vpop.f32.mrf.mxu0 }
 0x2f5   : > { %3531 = vst [vmem:[#allocation1 + $0x9] sm:$0xff] %v6863_v45  ;;  %v3516_v37 = vrot.slane %v6863_v45, 7 }
 0x2f7   : > { %v3519_v14 = vsel %vm7034_vm2, %v6860_v38, %v3516_v37  ;;  %vm3594_vm2 = vmand %vm3592_vm10, %vm3593_vm6  ;;  %vm6920_vm6 = vcmp.ge.s32.totalorder %v500_v51, 16  ;;  %vm7066_vm10 = vcmask 1042434  }
 0x2f8   : > { %v3332_v23 = vpop.f32.mrf.mxu2 }
 0x2fc   : > { %v3449_v17 = vpop.f32.mrf.mxu3 }
 0x30b   : > { %v3421_v63 = vpop.f32.mrf.mxu1 }
 0x30c   : > { %v3460_v46 = vpop.f32.mrf.mxu0 }
 0x310   : > { %v3382_v47 = vpop.f32.mrf.mxu2 }
 0x311   : > { %v3383_v48 = vadd.f32 %v3382_v47, %v3370_v43 }
 0x313   : > { %v3499_v49 = vpop.f32.mrf.mxu3  ;;  %v3396_v13 = vadd.f32 %v3395_v33, %v3383_v48  ;;  %v3423_v19 = vpop.f32.mrf.mxu1 }
 0x314   : > { %v3462_v53 = vpop.f32.mrf.mxu0 }
 0x315   : > { %v3409_v54 = vadd.f32 %v3408_v28, %v3396_v13 }
 0x317   : > { %v3422_v55 = vadd.f32 %v3421_v63, %v3409_v54 }
 0x318   : > { %v3384_v8 = vpop.f32.mrf.mxu2 }
 0x319   : > { %3532 = vst [vmem:[#allocation1 + $0x12] sm:$0xff] %v3422_v55  ;;  %v3517_v58 = vrot.slane %v3422_v55, 6 }
 0x31b   : > { %v3501_v60 = vpop.f32.mrf.mxu3 }
 0x32b   : > { %v3473_v59 = vpop.f32.mrf.mxu1 }
 0x330   : > { %v3434_v3 = vpop.f32.mrf.mxu2 }
 0x331   : > { %v3448_v34 = vadd.f32 %v3447_v25, %v3434_v3 }
 0x333   : > { %v3475_v31 = vpop.f32.mrf.mxu1  ;;  %v3461_v57 = vadd.f32 %v3460_v46, %v3448_v34 }
 0x335   : > { %v3474_v2 = vadd.f32 %v3473_v59, %v3461_v57 }
 0x338   : > { %v3436_v0 = vpop.f32.mrf.mxu2 }
 0x350   : > { %v3486_v16 = vpop.f32.mrf.mxu2 }
 0x351   : > { %v3487_v35 = vadd.f32 %v3486_v16, %v3474_v2 }
 0x353   : > { %v3500_v1 = vadd.f32 %v3499_v49, %v3487_v35  ;;  %v6948_v35 = vld [vmem:[#allocation3] sm:$0xf] }
 0x355   : > { %v3518_v6 = vrot.slane %v3500_v1, 5  ;;  %3533 = vst [vmem:[#allocation1 + $0x1b] sm:$0xff] %v3500_v1 }
 0x357   : > { %v3521_v52 = vsel %vm7033_vm12, %v3517_v58, %v3518_v6  ;;  %vm3559_vm12 = vcmp.lt.s32.totalorder %v500_v51, 544 }
 0x358   : > { %v3488_v18 = vpop.f32.mrf.mxu2  ;;  %v3522_v36 = vsel %vm7032_vm4, %v3519_v14, %v3521_v52  ;;  %vm3558_vm4 = vcmp.ge.s32.totalorder %v500_v51, 32 }
 0x359   : > { %3528 = vst.msk [vmem:[#allocation2] ss:$8 sm:$0xf] %vm6868_vm13, %v3522_v36  ;;  %vm3560_vm15 = vmand %vm3558_vm4, %vm3559_vm12  ;;  %vm6910_vm4 = vcmp.ge.s32.totalorder %v500_v51, 48  ;;  %vm3627_vm12 = vcmp.lt.s32.totalorder %v500_v51, 608  ;;  %v3714_v18 = vperm.slane %v6948_v35, 0 }
 0x35a   : > { %v3715_v36 = vperm.slane %v6948_v35, 1 }
 0x35c   : > { %v3535_v20 = vld [vmem:[#allocation1 + $0x1] ss:$9 sm:$0xff] }
 0x35d   : > { %3547 = vst [vmem:[#allocation1] sm:$0xff] %v6860_v38  ;;  %3536 = vrot.lane.b32.xlu2 %v3535_v20, %s6275_s7 }
 0x35e   : > { %3548 = vst [vmem:[#allocation1 + $0x9] sm:$0xff] %v6863_v45 }
 0x35f   : > { %3549 = vst [vmem:[#allocation1 + $0x12] sm:$0xff] %v3422_v55 }
 0x360   : > { %3550 = vst [vmem:[#allocation1 + $0x1b] sm:$0xff] %v3500_v1 }
 0x367   : > { %v3552_v21 = vld [vmem:[#allocation1 + $0x2] ss:$9 sm:$0xff] }
 0x368   : > { %3564 = vst [vmem:[#allocation1] sm:$0xff] %v6860_v38  ;;  %3553 = vrot.lane.b32.xlu0 %v3552_v21, %s6274_s20 }
 0x369   : > { %3565 = vst [vmem:[#allocation1 + $0x9] sm:$0xff] %v6863_v45 }
 0x36a   : > { %3566 = vst [vmem:[#allocation1 + $0x12] sm:$0xff] %v3422_v55 }
 0x36b   : > { %3567 = vst [vmem:[#allocation1 + $0x1b] sm:$0xff] %v3500_v1 }
 0x372   : > { %v3569_v22 = vld [vmem:[#allocation1 + $0x3] ss:$9 sm:$0xff] }
 0x373   : > { %3581 = vst [vmem:[#allocation1] sm:$0xff] %v6860_v38  ;;  %3570 = vrot.lane.b32.xlu1 %v3569_v22, %s6273_s2 }
 0x374   : > { %3582 = vst [vmem:[#allocation1 + $0x9] sm:$0xff] %v6863_v45 }
 0x375   : > { %3583 = vst [vmem:[#allocation1 + $0x12] sm:$0xff] %v3422_v55 }
 0x376   : > { %3584 = vst [vmem:[#allocation1 + $0x1b] sm:$0xff] %v3500_v1 }
 0x37d   : > { %v3586_v39 = vld [vmem:[#allocation1 + $0x4] ss:$9 sm:$0xff] }
 0x37e   : > { %3601 = vst [vmem:[#allocation1 + $0x1b] sm:$0xff] %v3500_v1  ;;  %3587 = vrot.lane.b32.xlu2 %v3586_v39, %s6272_s9 }
 0x37f   : > { %3598 = vst [vmem:[#allocation1] sm:$0xff] %v6860_v38 }
 0x380   : > { %3599 = vst [vmem:[#allocation1 + $0x9] sm:$0xff] %v6863_v45 }
 0x381   : > { %3600 = vst [vmem:[#allocation1 + $0x12] sm:$0xff] %v3422_v55 }
 0x388   : > { %v3603_v24 = vld [vmem:[#allocation1 + $0x5] ss:$9 sm:$0xff] }
 0x389   : > { %3604 = vrot.lane.b32.xlu0 %v3603_v24, %s6271_s1  ;;  %3615 = vst [vmem:[#allocation1] sm:$0xff] %v6860_v38  ;;  %s6150_s1 = scalar_lea.hbm %s7024_s4, 20 }
 0x38a   : > { %3616 = vst [vmem:[#allocation1 + $0x9] sm:$0xff] %v6863_v45 }
 0x38b   : > { %3617 = vst [vmem:[#allocation1 + $0x12] sm:$0xff] %v3422_v55 }
 0x38c   : > { %3618 = vst [vmem:[#allocation1 + $0x1b] sm:$0xff] %v3500_v1 }
 0x393   : > { %v3620_v4 = vld [vmem:[#allocation1 + $0x6] ss:$9 sm:$0xff] }
 0x394   : > { %3621 = vrot.lane.b32.xlu1 %v3620_v4, %s6270_s6  ;;  %3632 = vst [vmem:[#allocation1] sm:$0xff] %v6860_v38 }
 0x395   : > { %3633 = vst [vmem:[#allocation1 + $0x9] sm:$0xff] %v6863_v45 }
 0x396   : > { %3634 = vst [vmem:[#allocation1 + $0x12] sm:$0xff] %v3422_v55 }
 0x397   : > { %3635 = vst [vmem:[#allocation1 + $0x1b] sm:$0xff] %v3500_v1 }
 0x39e   : > { %v3637_v29 = vld [vmem:[#allocation1 + $0x7] ss:$9 sm:$0xff] }
 0x39f   : > { %3638 = vrot.lane.b32.xlu2 %v3637_v29, %s6269_s27 }
 0x3b7   : > { %v3537_v7 = vpop.permute.xlu2 %3536 }
 0x3b8   : > { %v3538_v61 = vrot.slane %v3537_v7, 7 }
 0x3ba   : > { %v3539_v30 = vsel %vm455_vm14, %v3538_v61, %v3537_v7  ;;  %vm3575_vm14 = vcmp.ge.s32.totalorder %v500_v51, 112 }
 0x3bb   : > { %3545 = vst.msk [vmem:[#allocation2 + $0x1] ss:$8 sm:$0xf] %vm3543_vm9, %v3539_v30 }
 0x3bc   : > { %3546 = vst.msk [vmem:[#allocation2 + $0x1] ss:$8 sm:$0x10] %vm3543_vm9, %v3539_v30  ;;  %vm3577_vm9 = vmand %vm3575_vm14, %vm3576_vm0  ;;  %v3716_v30 = vperm.slane %v6948_v35, 2  ;;  %vm3766_vm14 = vcmask 1043459   ;;  %vm7068_vm0 = vcmask 1041408  }
 0x3c2   : > { %v3649_v45 = vld [vmem:[#allocation2] sm:$0xff] }
 0x3c3   : > { %v3658_v46 = vrot.slane %v3649_v45, 4 }
 0x3c5   : > { %v3659_v48 = vadd.f32 %v3658_v46, %v3649_v45 }
 0x3c7   : > { %v3660_v55 = vrot.slane %v3659_v48, 2 }
 0x3c9   : > { %v3661_v0 = vadd.f32 %v3660_v55, %v3659_v48 }
 0x3cb   : > { %v3662_v16 = vrot.slane %v3661_v0, 1 }
 0x3cd   : > { %v3663_v22 = vadd.f32 %v3662_v16, %v3661_v0 }
 0x3cf   : > { %v3722_v46 = vadd.f32 %v3714_v18, %v3663_v22 }
 0x3d8   : > { %v3588_v38 = vpop.permute.xlu2 %3587 }
 0x3d9   : > { %v3589_v12 = vrot.slane %v3588_v38, 7 }
 0x3da   : > { %v3554_v15 = vpop.permute.xlu0 %3553 }
 0x3db   : > { %v3590_v32 = vsel %vm395_vm7, %v3589_v12, %v3588_v38  ;;  %v3555_v33 = vrot.slane %v3554_v15, 7  ;;  %vm6925_vm7 = vcmp.lt.s32.totalorder %v500_v51, 528  ;;  %v3738_v38 = vld [vmem:[%s274_s26] sm:$0x1f]  ;;  %s6144_s26 = sshra.s32 %s3791_s30, 4  ;;  %s6145_s26 = int_to_ptr.hbm [resolvable:$true] %s6144_s26 }
 0x3dc   : > { %3596 = vst.msk [vmem:[#allocation2 + $0x14] ss:$8 sm:$0xf] %vm3594_vm2, %v3590_v32  ;;  %v3740_v28 = vperm.slane %v3738_v38, 0  ;;  %v3744_v13 = vperm.slane %v3738_v38, 4  ;;  %s6146_s11 = scalar_lea.hbm %s6145_s26, 5  ;;  %p6151_p13 = scmp.lt.s32.totalorder %s6145_s26, %s7024_s4 }
 0x3dd   : > { %3597 = vst.msk [vmem:[#allocation2 + $0x14] ss:$8 sm:$0x10] %vm3594_vm2, %v3590_v32  ;;  %v3556_v44 = vsel %vm434_vm11, %v3555_v33, %v3554_v15  ;;  %vm6915_vm2 = vcmp.lt.s32.totalorder %v500_v51, 560  ;;  %vm3611_vm11 = vmand %vm6920_vm6, %vm6925_vm7  ;;  %p6147_p1 = scmp.ne.s32.totalorder %s6145_s26, %s6146_s11  ;;  %p6152_p9 = scmp.lt.s32.totalorder %s6150_s1, %s6146_s11 }
 0x3de   : > { %3562 = vst.msk [vmem:[#allocation2 + $0xa] ss:$8 sm:$0xf] %vm3560_vm15, %v3556_v44 }
 0x3df   : > { %3563 = vst.msk [vmem:[#allocation2 + $0xa] ss:$8 sm:$0x10] %vm3560_vm15, %v3556_v44  ;;  %p6148_p8 = pnand %p6147_p1, %p6422_p4  ;;  %p6153_p7 = por %p6152_p9, %p6151_p13 }
 0x3e1   : > { %p6149_p12 = pneg %p6148_p8 }
 0x3e3   : > { %p6154_p10 = pnand %p6153_p7, %p6149_p12 }
 0x3e5   : > { %v3571_v10 = vpop.permute.xlu1 %3570 }
 0x3e6   : > { %v3572_v42 = vrot.slane %v3571_v10, 7 }
 0x3e8   : > { %v3573_v56 = vsel %vm415_vm8, %v3572_v42, %v3571_v10  ;;  %vm3645_vm8 = vmand %vm6910_vm4, %vm6915_vm2  ;;  %vm7070_vm2 = vcmask 1042432  }
 0x3e9   : > { %3579 = vst.msk [vmem:[#allocation2 + $0xb] ss:$8 sm:$0xf] %vm3577_vm9, %v3573_v56  ;;  %vm7069_vm4 = vmmov %vm7068_vm0 }
 0x3ea   : > { %3580 = vst.msk [vmem:[#allocation2 + $0xb] ss:$8 sm:$0x10] %vm3577_vm9, %v3573_v56  ;;  %v3741_v56 = vperm.slane %v3738_v38, 1  ;;  %vm3770_vm9 = vcmp.lt.s32.totalorder %v500_v51, 640 }
 0x3f0   : > { %v3650_v62 = vld [vmem:[#allocation2 + $0x8] sm:$0xff]  ;;  %v3651_v23 = vld [vmem:[#allocation2 + $0x10] sm:$0xff] }
 0x3f1   : > { %v3664_v17 = vrot.slane %v3650_v62, 4  ;;  %v3670_v43 = vrot.slane %v3651_v23, 4 }
 0x3f3   : > { %v3665_v47 = vadd.f32 %v3664_v17, %v3650_v62  ;;  %v3671_v19 = vadd.f32 %v3670_v43, %v3651_v23 }
 0x3f5   : > { %v3666_v53 = vrot.slane %v3665_v47, 2  ;;  %v3672_v59 = vrot.slane %v3671_v19, 2 }
 0x3f7   : > { %v3667_v31 = vadd.f32 %v3666_v53, %v3665_v47  ;;  %v3673_v57 = vadd.f32 %v3672_v59, %v3671_v19  ;;  %v3743_v59 = vperm.slane %v3738_v38, 3 }
 0x3f9   : > { %v3639_v27 = vpop.permute.xlu2 %3638  ;;  %v3668_v2 = vrot.slane %v3667_v31, 1  ;;  %v3674_v1 = vrot.slane %v3673_v57, 1 }
 0x3fa   : > { %v3640_v50 = vrot.slane %v3639_v27, 7 }
 0x3fb   : > { %v3605_v25 = vpop.permute.xlu0 %3604  ;;  %v3669_v52 = vadd.f32 %v3668_v2, %v3667_v31  ;;  %v3675_v12 = vadd.f32 %v3674_v1, %v3673_v57  ;;  %v3750_v2 = vmul.f32 %v3740_v28, %v3722_v46 }
 0x3fc   : > { %v3641_v5 = vsel %vm336_vm1, %v3640_v50, %v3639_v27  ;;  %v3606_v9 = vrot.slane %v3605_v25, 7  ;;  %vm6940_vm1 = vcmp.ge.s32.totalorder %v500_v51, 96 }
 0x3fd   : > { %3648 = vst.msk [vmem:[#allocation2 + $0x27] ss:$8 sm:$0x10] %vm3645_vm8, %v3641_v5  ;;  %v3723_v42 = vadd.f32 %v3715_v36, %v3669_v52  ;;  %v3724_v23 = vadd.f32 %v3716_v30, %v3675_v12 }
 0x3fe   : > { %3647 = vst.msk [vmem:[#allocation2 + $0x27] ss:$8 sm:$0xf] %vm3645_vm8, %v3641_v5  ;;  %v3607_v63 = vsel %vm375_vm5, %v3606_v9, %v3605_v25  ;;  %vm3628_vm5 = vmand %vm6940_vm1, %vm3627_vm12  ;;  %v3742_v25 = vperm.slane %v3738_v38, 2 }
 0x3ff   : > { %3613 = vst.msk [vmem:[#allocation2 + $0x1d] ss:$8 sm:$0xf] %vm3611_vm11, %v3607_v63  ;;  %v3751_v43 = vmul.f32 %v3741_v56, %v3723_v42 }
 0x400   : > { %3614 = vst.msk [vmem:[#allocation2 + $0x1d] ss:$8 sm:$0x10] %vm3611_vm11, %v3607_v63 }
 0x404   : > { %v3657_v49 = vld [vmem:[#allocation2 + $0x40] sm:$0xff] }
 0x405   : > { %v3706_v8 = vrot.slane %v3657_v49, 4 }
 0x406   : > { %v3622_v54 = vpop.permute.xlu1 %3621 }
 0x407   : > { %v3623_v60 = vrot.slane %v3622_v54, 7  ;;  %v3707_v34 = vadd.f32 %v3706_v8, %v3657_v49  ;;  %v3717_v49 = vperm.slane %v6948_v35, 3 }
 0x409   : > { %v3624_v3 = vsel %vm356_vm3, %v3623_v60, %v3622_v54  ;;  %v3708_v37 = vrot.slane %v3707_v34, 2  ;;  %vm7065_vm3 = vcmask 1040384  }
 0x40a   : > { %3630 = vst.msk [vmem:[#allocation2 + $0x1e] ss:$8 sm:$0xf] %vm3628_vm5, %v3624_v3  ;;  %vm7067_vm15 = vmmov %vm7065_vm3 }
 0x40b   : > { %3631 = vst.msk [vmem:[#allocation2 + $0x1e] ss:$8 sm:$0x10] %vm3628_vm5, %v3624_v3  ;;  %v3709_v29 = vadd.f32 %v3708_v37, %v3707_v34  ;;  %v3752_v3 = vmul.f32 %v3742_v25, %v3724_v23  ;;  %v3760_v34 = vrot.slane %v3751_v43, 7 }
 0x40d   : > { %v3710_v62 = vrot.slane %v3709_v29, 1  ;;  %v3764_v36 = vsel %vm7067_vm15, %v3750_v2, %v3760_v34 }
 0x40f   : > { %v3711_v55 = vadd.f32 %v3710_v62, %v3709_v29 }
 0x411   : > { %v3652_v58 = vld [vmem:[#allocation2 + $0x18] sm:$0xff]  ;;  %v3653_v6 = vld [vmem:[#allocation2 + $0x20] sm:$0xff]  ;;  %v3654_v14 = vld [vmem:[#allocation2 + $0x28] sm:$0xff] }
 0x412   : > { %v3656_v20 = vld [vmem:[#allocation2 + $0x38] sm:$0xff]  ;;  %v3655_v21 = vld [vmem:[#allocation2 + $0x30] sm:$0xff]  ;;  %v3676_v39 = vrot.slane %v3652_v58, 4  ;;  %v3682_v24 = vrot.slane %v3653_v6, 4  ;;  %v3688_v4 = vrot.slane %v3654_v14, 4 }
 0x413   : > { %v3700_v7 = vrot.slane %v3656_v20, 4  ;;  %v3694_v61 = vrot.slane %v3655_v21, 4 }
 0x414   : > { %v3677_v15 = vadd.f32 %v3676_v39, %v3652_v58  ;;  %v3683_v32 = vadd.f32 %v3682_v24, %v3653_v6  ;;  %v3689_v33 = vadd.f32 %v3688_v4, %v3654_v14  ;;  %v3732_v58 = vrot.slane %v3711_v55, 5 }
 0x415   : > { %v3701_v44 = vadd.f32 %v3700_v7, %v3656_v20  ;;  %v3695_v10 = vadd.f32 %v3694_v61, %v3655_v21  ;;  %v3761_v14 = vrot.slane %v3752_v3, 6 }
 0x416   : > { %v3678_v40 = vrot.slane %v3677_v15, 2  ;;  %v3684_v26 = vrot.slane %v3683_v32, 2  ;;  %v3690_v27 = vrot.slane %v3689_v33, 2 }
 0x417   : > { %v3702_v41 = vrot.slane %v3701_v44, 2  ;;  %v3696_v50 = vrot.slane %v3695_v10, 2  ;;  %v3765_v39 = vsel %vm7069_vm4, %v3764_v36, %v3761_v14 }
 0x418   : > { %v3679_v45 = vadd.f32 %v3678_v40, %v3677_v15  ;;  %v3685_v5 = vadd.f32 %v3684_v26, %v3683_v32  ;;  %v3691_v9 = vadd.f32 %v3690_v27, %v3689_v33 }
 0x419   : > { %v3703_v17 = vadd.f32 %v3702_v41, %v3701_v44  ;;  %v3697_v63 = vadd.f32 %v3696_v50, %v3695_v10 }
 0x41a   : > { %v3680_v47 = vrot.slane %v3679_v45, 1  ;;  %v3686_v48 = vrot.slane %v3685_v5, 1  ;;  %v3692_v19 = vrot.slane %v3691_v9, 1 }
 0x41b   : > { %v3698_v53 = vrot.slane %v3697_v63, 1  ;;  %v3704_v54 = vrot.slane %v3703_v17, 1 }
 0x41c   : > { %v3681_v8 = vadd.f32 %v3680_v47, %v3679_v45  ;;  %v3687_v60 = vadd.f32 %v3686_v48, %v3685_v5  ;;  %v3693_v35 = vadd.f32 %v3692_v19, %v3691_v9 }
 0x41d   : > { %v3699_v31 = vadd.f32 %v3698_v53, %v3697_v63  ;;  %v3705_v0 = vadd.f32 %v3704_v54, %v3703_v17 }
 0x41e   : > { %v3725_v57 = vadd.f32 %v3717_v49, %v3681_v8  ;;  %v3754_v16 = vmul.f32 %v3744_v13, %v3687_v60 }
 0x41f   : > { %v3730_v37 = vrot.slane %v3699_v31, 7  ;;  %v3731_v1 = vrot.slane %v3705_v0, 6 }
 0x420   : > { %v3753_v6 = vmul.f32 %v3743_v59, %v3725_v57  ;;  %v3763_v22 = vrot.slane %v3754_v16, 4 }
 0x421   : > { %v3733_v52 = vsel %vm7065_vm3, %v3693_v35, %v3730_v37  ;;  %v3734_v18 = vsel %vm7066_vm10, %v3731_v1, %v3732_v58 }
 0x422   : > { %v3735_v20 = vsel %vm7068_vm0, %v3733_v52, %v3734_v18  ;;  %v3762_v21 = vrot.slane %v3753_v6, 5 }
 0x423   : > { %3737 = vst.msk [vmem:[#allocation3] sm:$0xf] %vm6868_vm13, %v3735_v20 }
 0x424   : > { %v3767_v24 = vsel %vm3766_vm14, %v3762_v21, %v3763_v22 }
 0x425   : > { %v3768_v4 = vsel %vm7070_vm2, %v3765_v39, %v3767_v24 }
 0x426   : > { %3772 = vst.msk [vmem:[%s6495_s8] sm:$0x1f] %vm3770_vm9, %v3768_v4 }
 0x427   : > { %6157 = shalt.err (!%p6154_p10)
}
 0x428   : > { %5874 = dma.vmem_to_hbm [thread:$0]  (%p6422_p4), %s3789_s5, 80, %s3791_s30, %s3774_s10  }
 0x429 PF: > { %s7071_s29 = sld [smem:[#allocation17_spill]]  ;;  %p5899_p11 = scmp.ge.s32.totalorder %s6260_s25, 2 }
 0x42b   : > { %p5891_p0 = pnand %p5899_p11, %p6426_p6 }
 0x42d   : > { %p5892_p2 = pneg %p5891_p0 }
 0x42f   : > { %s3802_s20 = sand.u32 1, %s7071_s29  }
 0x430   : > { %s3803_s7 = scalar_lea.sflag [#allocation6], %s3802_s20 }
 0x431   : > { %6215 = dma.done.wait (%p5892_p2), %s3803_s7, 80  }
 0x432   : > { %6217 = vsyncadd (%p5892_p2), %s3803_s7, 4294967216  ;;  %s24_s25 = sadd.s32 1, %s6260_s25   ;;  %s7073_s14 = sld [smem:[#allocation18_spill]] }
 0x433   : > { %p21_p5 = scmp.ge.s32.totalorder %s24_s25, 6   ;;  %s7074_s20 = sld [smem:[#allocation23_spill]] }
 0x434   : > { %s7075_s22 = sld [smem:[#allocation19_spill]]  ;;  %s7078_s15 = smov %s6224_s16 }
 0x435   : > { %s7076_s28 = sld [smem:[#allocation20_spill]]  ;;  %s7079_s16 = smov %s6228_s17 }
 0x436   : > { %s7077_s24 = sld [smem:[#allocation21_spill]]  ;;  %s7080_s17 = smov %s6448_s18 }
 0x437   : > { %s7081_s18 = smov %s6236_s19  ;;  %s7083_s21 = smov %s6252_s23 }
 0x438   : > { %s7082_s19 = smov %s7073_s14  ;;  %23 = sbr.rel (!%p21_p5) target bundleno = 15 (0xf), region = 120 }
 0x43b   : > { %s7084_s23 = smov %s7076_s28 }
 0x43d   :  { %3809 = vsyncpa [#allocation5], 1 }
 0x43e   :  { %3811 = vsyncpa [#allocation5 + $0x1], 1 }
 0x43f   :  { %3812 = vsyncpa [#allocation8], 1 }
 0x440   :  { %3813 = vsyncpa [#allocation11], 1 }
 0x441   :  { %3815 = vsyncpa [#allocation11 + $0x1], 1 }
 0x442   :  { %3816 = vsyncpa [#allocation6], 1 }
 0x443   :  { %3818 = vsyncpa [#allocation6 + $0x1], 1 }

// kernel: tpu_custom_call.1
= control target key start
LH: loop header
LB: loop body
LE: loop exit
PB: predicated region body
PF: predicated region fallthrough
CT: control target
= control target key end

     0   :  { %s7020_s0 = inlined_call_operand.hbm [shape: f32[2,2,1,1152], index: 0, kind: input, shape index: {}]   ;;  %s7021_s1 = inlined_call_operand.hbm [shape: bf16[512,768], index: 1, kind: input, shape index: {}]   ;;  %s7022_s2 = inlined_call_operand.hbm [shape: bf16[768,512], index: 2, kind: input, shape index: {}]   ;;  %s7023_s3 = inlined_call_operand.hbm [shape: f32[2,1,640], index: 3, kind: input, shape index: {}]   ;;  %s7024_s4 = inlined_call_operand.hbm [shape: f32[2,2,1,640], index: 4, kind: output, shape index: {}]  }
   0x1   :  { %7035 = sst [smem:[#allocation24_spill]] %s7021_s1 }
   0x2   :  { %7036 = sst [smem:[#allocation25_spill]] %s7022_s2 }
   0x3   :  { %9 = vsyncpa [#allocation5], 0 }
   0x4   :  { %11 = vsyncpa [#allocation5 + $0x1], 0 }
   0x5   :  { %12 = vsyncpa [#allocation8], 0 }
   0x6   :  { %13 = vsyncpa [#allocation11], 0 }
   0x7   :  { %15 = vsyncpa [#allocation11 + $0x1], 0 }
   0x8   :  { %16 = vsyncpa [#allocation6], 0 }
   0x9   :  { %18 = vsyncpa [#allocation6 + $0x1], 0  ;;  %s6302_s15 = smov 0   ;;  %s6304_s16 = smov 0  }
   0xa   :  { %s6306_s17 = smov 0   ;;  %s6308_s18 = smov 0  }
   0xb   :  { %s6310_s19 = smov 0   ;;  %s6312_s20 = smov 0  }
   0xc   :  { %s6314_s21 = smov 0   ;;  %s6316_s22 = smov 0  }
   0xd   :  { %s6318_s23 = smov 0   ;;  %s6320_s24 = smov 0  }
   0xe   :  { %s6322_s25 = smov 0  }
   0xf LB: > { %7037 = sst [smem:[#allocation17_spill]] %s6232_s18  ;;  %s3918_s26 = sadd.s32 4294967295, %s6260_s25   ;;  %s6260_s25 = sphi %s6322_s25, %s24_s25   ;;  %s6256_s24 = sphi %s6320_s24, %s7077_s24   ;;  %s6252_s23 = sphi %s6318_s23, %s7084_s23   ;;  %s6248_s22 = sphi %s6316_s22, %s7075_s22   ;;  %s6244_s21 = sphi %s6314_s21, %s7083_s21   ;;  %s6240_s20 = sphi %s6312_s20, %s7074_s20   ;;  %s6236_s19 = sphi %s6310_s19, %s7082_s19   ;;  %s6232_s18 = sphi %s6308_s18, %s7081_s18   ;;  %s6228_s17 = sphi %s6306_s17, %s7080_s17   ;;  %s6224_s16 = sphi %s6304_s16, %s7079_s16   ;;  %s6220_s15 = sphi %s6302_s15, %s7078_s15  }
  0x10   : > { %7038 = sst [smem:[#allocation18_spill]] %s6240_s20  ;;  %p3920_p0 = scmp.ge.s32.totalorder %s6260_s25, 1 }
  0x11   : > { %7039 = sst [smem:[#allocation19_spill]] %s6256_s24  ;;  %p6361_p1 = scmp.eq.s32.totalorder %s3918_s26, 0 }
  0x12   : > { %p165_p2 = scmp.lt.s32.totalorder %s6260_s25, 5  ;;  %s7041_s1 = sld [smem:[#allocation24_spill]] }
  0x13   : > { %s6262_s6 = smov [#allocation7]   ;;  %s7043_s2 = sld [smem:[#allocation25_spill]] }
  0x14   : > { %p6369_p3 = pnand %p3920_p0, %p165_p2  ;;  %s178_s7 = sshll.u32 %s6262_s6, 4  ;;  %s179_s7 = int_to_ptr.vmem [resolvable:$true] %s178_s7 }
  0x15   : > { %s6263_s11 = smov 384   ;;  %s6264_s12 = smov 24  }
  0x16   : > { %p5876_p4 = pneg %p6369_p3  ;;  %s6265_s13 = smov [#allocation9]  }
  0x17   : > { %s192_s14 = sshll.u32 %s6265_s13, 4  ;;  %s6266_s28 = smov 256   ;;  %s193_s14 = int_to_ptr.vmem [resolvable:$true] %s192_s14 }
  0x18   : > { %s176_s30 = sshll.u32 %s7041_s1, 4  ;;  %p5877_p5 = pnand %p5876_p4, %p6361_p1  ;;  %s177_s30 = int_to_ptr.hbm [resolvable:$true] %s176_s30 }
  0x19   : > { %s190_s10 = sshll.u32 %s7043_s2, 4  ;;  %s6267_s29 = smov 16   ;;  %s191_s10 = int_to_ptr.hbm [resolvable:$true] %s190_s10 }
  0x1a   : > { %5879 = dma.hbm_to_vmem [thread:$0]  (!%p5877_p5), %s177_s30, 24576, %s179_s7, [#allocation8], %s6263_s11, %s6263_s11, %s6264_s12  }
  0x1b   : > { %5882 = dma.hbm_to_vmem [thread:$0]  (!%p5877_p5), %s191_s10, 24576, %s193_s14, [#allocation8], %s6266_s28, %s6266_s28, %s6267_s29  }
  0x1c   : > { %s3919_s6 = sadd.s32 4294967294, %s6260_s25   ;;  %s33_s8 = sadd.s32 1, %s6252_s23 }
  0x1d   : > { %p34_p6 = scmp.ge.s32.totalorder %s33_s8, 2  ;;  %s36_s9 = sadd.s32 1, %s6256_s24 }
  0x1e   : > { %s45_s30 = sadd.s32 1, %s6240_s20  ;;  %p52_p7 = scmp.ne.s32.totalorder %s6240_s20, %s6236_s19 }
  0x1f   : > { %s7086_s8 = smov (%p34_p6, %s33_s8), 0  ;;  %s7088_s9 = smov (!%p34_p6, %s36_s9), %s6256_s24 }
  0x20   : > { %7044 = sst [smem:[#allocation20_spill]] %s7086_s8  ;;  %s6391_s7 = ssub.s32 %s6252_s23, %s7086_s8 }
  0x21   : > { %p53_p8 = scmp.eq.s32.totalorder %s6260_s25, 0  ;;  %p38_p9 = scmp.ge.s32.totalorder %s7088_s9, 2 }
  0x22   : > { %p58_p10 = scmp.ne.s32.totalorder %s6236_s19, %s6232_s18  ;;  %p111_p12 = scmp.eq.s32.totalorder %s6391_s7, 0 }
  0x23   : > { %p6401_p11 = por %p53_p8, %p52_p7  ;;  %s7090_s9 = smov (%p38_p9, %s7088_s9), 0 }
  0x24   : > { %7046 = sst [smem:[#allocation21_spill]] %s7090_s9  ;;  %p6410_p13 = por %p6361_p1, %p58_p10 }
  0x25   : > { %p152_p0 = scmp.eq.s32.totalorder %s3918_s26, 3  ;;  %s40_s12 = ssub.s32 %s6256_s24, %s7090_s9 }
  0x26   : > { %p158_p2 = scmp.eq.s32.totalorder %s3919_s6, 3  ;;  %s42_s13 = sor.u32 %s6391_s7, %s40_s12 }
  0x27   : > { %p6422_p4 = por %p152_p0, %p52_p7  ;;  %p43_p5 = scmp.eq.s32.totalorder %s42_s13, 0 }
  0x28   : > { %p6426_p6 = por %p158_p2, %p58_p10  ;;  %p5896_p9 = scmp.lt.s32.totalorder %s6260_s25, 4 }
  0x29   : > { %s206_s29 = sand.u32 1, %s6240_s20   ;;  %s5853_s6 = smul.u32 9, %s6252_s23 }
  0x2a   : > { %s7049_s28 = scalar_select %p6426_p6, 1, 0 }
  0x2b   : > { %s6433_s1 = scalar_select %p43_p5, %s6240_s20, %s45_s30  }
  0x2c   : > { %7050 = sst [smem:[#allocation22_spill]] %s7049_s28  ;;  %s5852_s26 = smul.u32 9, %s206_s29 }
  0x2d   : > { %7051 = sst [smem:[#allocation23_spill]] %s6433_s1  ;;  %p5884_p7 = pnand %p5896_p9, %p6401_p11 }
  0x2e   : > { %s5854_s12 = smul.u32 18, %s6256_s24  ;;  %s210_s13 = scalar_lea.vmem [#allocation4], %s5852_s26 }
  0x2f   : > { %s220_s2 = sshll.u32 %s210_s13, 4  ;;  %s207_s28 = scalar_lea.sflag [#allocation5], %s206_s29  ;;  %s221_s2 = int_to_ptr.vmem [resolvable:$true] %s220_s2 }
  0x30   : > { %s215_s9 = sadd.s32 %s5854_s12, %s5853_s6  ;;  %s113_s10 = sadd.s32 1, %s6228_s17 }
  0x31   : > { %s216_s1 = scalar_lea.hbm %s7020_s0, %s215_s9  ;;  %p120_p10 = scmp.ne.s32.totalorder %s6228_s17, %s6224_s16 }
  0x32   : > { %s218_s20 = sshll.u32 %s216_s1, 4  ;;  %p126_p11 = scmp.ne.s32.totalorder %s6224_s16, %s6220_s15  ;;  %s219_s20 = int_to_ptr.hbm [resolvable:$true] %s218_s20 }
  0x33   : > { %5886 = dma.hbm_to_vmem [thread:$0]  (!%p5884_p7), %s219_s20, 144, %s221_s2, %s207_s28  }
  0x34   : > { %s6448_s18 = scalar_select %p111_p12, %s6228_s17, %s113_s10  }
  0x35   : > { %s227_s26 = sand.u32 1, %s6228_s17   ;;  %s5856_s24 = smul.u32 5, %s6252_s23 }
  0x36   : > { %p122_p0 = por %p120_p10, %p53_p8  ;;  %p6460_p2 = por %p126_p11, %p6361_p1 }
  0x37   : > { %s5855_s8 = smul.u32 5, %s227_s26  ;;  %s235_s2 = scalar_lea.hbm %s7023_s3, %s5856_s24 }
  0x38   : > { %p5887_p5 = pnand %p5896_p9, %p122_p0  ;;  %s237_s20 = sshll.u32 %s235_s2, 4  ;;  %s238_s20 = int_to_ptr.hbm [resolvable:$true] %s237_s20 }
  0x39   : > { %s231_s7 = scalar_lea.vmem [#allocation10], %s5855_s8  ;;  %s228_s28 = scalar_lea.sflag [#allocation11], %s227_s26 }
  0x3a   : > { %s239_s15 = sshll.u32 %s231_s7, 4  ;;  %248 = sbr.rel (%p6369_p3) target bundleno = 1065 (0x429), region = 36  ;;  %s240_s15 = int_to_ptr.vmem [resolvable:$true] %s239_s15 }
  0x3b   : > { %5889 = dma.hbm_to_vmem [thread:$0]  (!%p5887_p5), %s238_s20, 80, %s240_s15, %s228_s28  }
  0x3c   : > { %s6472_s29 = sand.u32 (!%p6369_p3), 1, %s6236_s19  }
  0x3d   : > { %s5857_s12 = smul.u32 (!%p6369_p3), 9, %s6472_s29  ;;  %s251_s24 = scalar_lea.sflag (!%p6369_p3), [#allocation5], %s6472_s29 }
  0x3f   : > { %s6476_s13 = scalar_lea.vmem [#allocation4], %s5857_s12 }
  0x40   : > { %6203 = dma.done.wait (%p6410_p13), %s251_s24, 144  }
  0x41   : > { %6205 = vsyncadd (%p6410_p13), %s251_s24, 4294967152 }
  0x42   : > { %6207 = dma.done.wait (%p6361_p1), [#allocation8], 49152  }
  0x43   : > { %6209 = vsyncadd (%p6361_p1), [#allocation8], 4294918144  ;;  %s270_s5 = sand.u32 1, %s6224_s16  }
  0x44   : > { %s6487_s30 = smul.u32 5, %s270_s5  ;;  %s271_s10 = scalar_lea.sflag [#allocation11], %s270_s5 }
  0x46   : > { %s274_s26 = scalar_lea.vmem [#allocation10], %s6487_s30 }
  0x47   : > { %6211 = dma.done.wait (%p6460_p2), %s271_s10, 80  }
  0x48   : > { %6213 = vsyncadd (%p6460_p2), %s271_s10, 4294967216  ;;  %s5859_s11 = smul.u32 5, %s6472_s29  ;;  %p3927_p3 = scmp.ne.s32.totalorder %s6244_s21, 0 }
  0x4a   : > { %s6495_s8 = scalar_lea.vmem [#allocation12], %s5859_s11  ;;  %308 = sbr.rel (%p3927_p3) target bundleno = 83 (0x53), region = 56 }
  0x4f   : > { %v309_v0 = vlaneseq  ;;  %v6268_v1 = vmov 0.0  }
  0x51   : > { %vm311_vm0 = vcmp.lt.s32.totalorder %v309_v0, 512 }
  0x52   : > { %313 = vst.msk [vmem:[#allocation3] sm:$0xf] %vm311_vm0, %v6268_v1 }
  0x53 PF: > { %v6499_v2 = vld [vmem:[%s6476_s13] sm:$0xff]  ;;  %s6269_s27 = smov 48   ;;  %s6270_s6 = smov 96   ;;  %v6003_v11 = vld [vmem:[%s6476_s13 + $0x8] ss:$0 sm:$0xff]  ;;  %vm336_vm1 = vcmask 392192  }
  0x54   : > { %v325_v3 = vperm.slane %v6499_v2, 4  ;;  %v6503_v4 = vperm.slane %v6499_v2, 3  ;;  %v6506_v5 = vperm.slane %v6499_v2, 2  ;;  %s6271_s1 = smov 16   ;;  %v345_v6 = vperm.slane %v6499_v2, 5  ;;  %s6272_s9 = smov 64  }
  0x55   : > { %v6523_v7 = vperm.slane %v6499_v2, 1  ;;  %v317_v8 = vperm.slane %v6499_v2, 0  ;;  %v384_v9 = vperm.slane %v6499_v2, 6  ;;  %s6273_s2 = smov 112   ;;  %s6274_s20 = smov 32   ;;  %v404_v10 = vperm.slane %v6499_v2, 7 }
  0x56   : > { %334 = vrot.lane.b32.xlu2 %v325_v3, %s6269_s27  ;;  %350 = vrot.lane.b32.xlu1 %v6503_v4, %s6270_s6  ;;  %s6275_s7 = smov 80   ;;  %v4484_v12 = vld [vmem:[#allocation7 + $0x450] sm:$0xf]  ;;  %v5609_v13 = vld [vmem:[#allocation7 + $0x464] sm:$0xf0]  ;;  %vm7034_vm2 = vcmask 1040384  }
  0x57   : > { %330 = vrot.lane.b32.xlu0 %v6506_v5, %s6269_s27  ;;  %v4485_v14 = vor.u32 %v5609_v13, %v4484_v12  ;;  %v4460_v15 = vld [vmem:[#allocation7 + $0x420] sm:$0xf]  ;;  %v5603_v16 = vld [vmem:[#allocation7 + $0x434] sm:$0xf0]  ;;  %v4436_v19 = vld [vmem:[#allocation7 + $0x3f0] sm:$0xf] }
  0x58   : > { %v4461_v18 = vor.u32 %v5603_v16, %v4460_v15  ;;  %v5597_v20 = vld [vmem:[#allocation7 + $0x404] sm:$0xf0]  ;;  %v4412_v22 = vld [vmem:[#allocation7 + $0x3c0] sm:$0xf]  ;;  %v5591_v23 = vld [vmem:[#allocation7 + $0x3d4] sm:$0xf0] }
  0x59   : > { %1693 = vmatpush.bf16.msra.mxu2 %v4485_v14  ;;  %v4437_v21 = vor.u32 %v5597_v20, %v4436_v19  ;;  %v4413_v24 = vor.u32 %v5591_v23, %v4412_v22  ;;  %v4388_v26 = vld [vmem:[#allocation7 + $0x390] sm:$0xf]  ;;  %v5585_v27 = vld [vmem:[#allocation7 + $0x3a4] sm:$0xf0]  ;;  %v4364_v32 = vld [vmem:[#allocation7 + $0x360] sm:$0xf] }
  0x5a   : > { %v4676_v28 = vld [vmem:[#allocation7 + $0x5d0] sm:$0xf]  ;;  %v4389_v29 = vor.u32 %v5585_v27, %v4388_v26  ;;  %v5657_v30 = vld [vmem:[#allocation7 + $0x5e4] sm:$0xf0]  ;;  %v5579_v33 = vld [vmem:[#allocation7 + $0x374] sm:$0xf0] }
  0x5b   : > { %v4677_v31 = vor.u32 %v5657_v30, %v4676_v28  ;;  %v4652_v34 = vld [vmem:[#allocation7 + $0x5a0] sm:$0xf]  ;;  %v4365_v36 = vor.u32 %v5579_v33, %v4364_v32  ;;  %v5651_v37 = vld [vmem:[#allocation7 + $0x5b4] sm:$0xf0]  ;;  %v4100_v40 = vld [vmem:[#allocation7 + $0x150] sm:$0xf] }
  0x5c   : > { %v4653_v39 = vor.u32 %v5651_v37, %v4652_v34  ;;  %v5513_v41 = vld [vmem:[#allocation7 + $0x164] sm:$0xf0]  ;;  %v4292_v42 = vld [vmem:[#allocation7 + $0x2d0] sm:$0xf]  ;;  %v4076_v53 = vld [vmem:[#allocation7 + $0x120] sm:$0xf] }
  0x5d   : > { %1694 = vmatpush.bf16.msra.mxu2 %v4461_v18  ;;  %1706 = vmatpush.bf16.msra.mxu3 %v4677_v31  ;;  %v4101_v44 = vor.u32 %v5513_v41, %v4100_v40  ;;  %v5561_v45 = vld [vmem:[#allocation7 + $0x2e4] sm:$0xf0]  ;;  %v4340_v46 = vld [vmem:[#allocation7 + $0x330] sm:$0xf]  ;;  %v5507_v54 = vld [vmem:[#allocation7 + $0x134] sm:$0xf0] }
  0x5e   : > { %369 = vrot.lane.b32.xlu2 %v6503_v4, %s6271_s1  ;;  %352 = vrot.lane.b32.xlu1 %v325_v3, %s6270_s6  ;;  %v5573_v47 = vld [vmem:[#allocation7 + $0x344] sm:$0xf0]  ;;  %v4293_v48 = vor.u32 %v5561_v45, %v4292_v42  ;;  %v4628_v50 = vld [vmem:[#allocation7 + $0x570] sm:$0xf]  ;;  %v4268_v55 = vld [vmem:[#allocation7 + $0x2a0] sm:$0xf]  ;;  %v4077_v57 = vor.u32 %v5507_v54, %v4076_v53 }
  0x5f   : > { %332 = vrot.lane.b32.xlu0 %v6503_v4, %s6269_s27  ;;  %v4341_v49 = vor.u32 %v5573_v47, %v4340_v46  ;;  %v5645_v51 = vld [vmem:[#allocation7 + $0x584] sm:$0xf0]  ;;  %1667 = vmatpush.bf16.msra.mxu0 %v4101_v44  ;;  %v5555_v58 = vld [vmem:[#allocation7 + $0x2b4] sm:$0xf0]  ;;  %v4316_v59 = vld [vmem:[#allocation7 + $0x300] sm:$0xf] }
  0x60   : > { %v4629_v52 = vor.u32 %v5645_v51, %v4628_v50  ;;  %1680 = vmatpush.bf16.msra.mxu1 %v4293_v48  ;;  %v5567_v60 = vld [vmem:[#allocation7 + $0x314] sm:$0xf0]  ;;  %v4269_v62 = vor.u32 %v5555_v58, %v4268_v55  ;;  %v4604_v0 = vld [vmem:[#allocation7 + $0x540] sm:$0xf]  ;;  %v4052_v12 = vld [vmem:[#allocation7 + $0xf0] sm:$0xf] }
  0x61   : > { %1695 = vmatpush.bf16.msra.mxu2 %v4437_v21  ;;  %1707 = vmatpush.bf16.msra.mxu3 %v4653_v39  ;;  %v4317_v63 = vor.u32 %v5567_v60, %v4316_v59  ;;  %v5639_v1 = vld [vmem:[#allocation7 + $0x554] sm:$0xf0]  ;;  %v5501_v13 = vld [vmem:[#allocation7 + $0x104] sm:$0xf0]  ;;  %v4244_v14 = vld [vmem:[#allocation7 + $0x270] sm:$0xf] }
  0x62   : > { %v4053_v15 = vor.u32 %v5501_v13, %v4052_v12  ;;  %v5549_v16 = vld [vmem:[#allocation7 + $0x284] sm:$0xf0]  ;;  %v4580_v18 = vld [vmem:[#allocation7 + $0x510] sm:$0xf]  ;;  %v5600_v22 = vld [vmem:[#allocation7 + $0x424] sm:$0xf] }
  0x63   : > { %1668 = vmatpush.bf16.msra.mxu0 %v4077_v57  ;;  %v5633_v19 = vld [vmem:[#allocation7 + $0x524] sm:$0xf0]  ;;  %v4245_v20 = vor.u32 %v5549_v16, %v4244_v14  ;;  %v4462_v23 = vld [vmem:[#allocation7 + $0x438] sm:$0xf0]  ;;  %vm356_vm3 = vcmask 785408   ;;  %vm7032_vm4 = vcmask 1041408  }
  0x64   : > { %1681 = vmatpush.bf16.msra.mxu1 %v4269_v62  ;;  %v4581_v21 = vor.u32 %v5633_v19, %v4580_v18  ;;  %v4028_v26 = vld [vmem:[#allocation7 + $0xc0] sm:$0xf]  ;;  %v5495_v27 = vld [vmem:[#allocation7 + $0xd4] sm:$0xf0]  ;;  %v5594_v40 = vld [vmem:[#allocation7 + $0x3f4] sm:$0xf] }
  0x65   : > { %1696 = vmatpush.bf16.msra.mxu2 %v4413_v24  ;;  %1708 = vmatpush.bf16.msra.mxu3 %v4629_v52  ;;  %v4465_v24 = vor.u32 %v5600_v22, %v4462_v23  ;;  %v4220_v28 = vld [vmem:[#allocation7 + $0x240] sm:$0xf]  ;;  %v4029_v30 = vor.u32 %v5495_v27, %v4028_v26  ;;  %v5543_v31 = vld [vmem:[#allocation7 + $0x254] sm:$0xf0]  ;;  %v4438_v41 = vld [vmem:[#allocation7 + $0x408] sm:$0xf0] }
  0x66   : > { %389 = vrot.lane.b32.xlu2 %v325_v3, %s6272_s9  ;;  %354 = vrot.lane.b32.xlu1 %v345_v6, %s6270_s6  ;;  %v4556_v32 = vld [vmem:[#allocation7 + $0x4e0] sm:$0xf]  ;;  %v5627_v33 = vld [vmem:[#allocation7 + $0x4f4] sm:$0xf0]  ;;  %v4221_v39 = vor.u32 %v5543_v31, %v4220_v28  ;;  %v4441_v45 = vor.u32 %v5594_v40, %v4438_v41  ;;  %v4004_v46 = vld [vmem:[#allocation7 + $0x90] sm:$0xf] }
  0x67   : > { %371 = vrot.lane.b32.xlu0 %v325_v3, %s6271_s1  ;;  %1669 = vmatpush.bf16.msra.mxu0 %v4053_v15  ;;  %v4557_v44 = vor.u32 %v5627_v33, %v4556_v32  ;;  %v5489_v47 = vld [vmem:[#allocation7 + $0xa4] sm:$0xf0]  ;;  %v4532_v50 = vld [vmem:[#allocation7 + $0x4b0] sm:$0xf]  ;;  %v5588_v54 = vld [vmem:[#allocation7 + $0x3c4] sm:$0xf] }
  0x68   : > { %1682 = vmatpush.bf16.msra.mxu1 %v4245_v20  ;;  %v4005_v48 = vor.u32 %v5489_v47, %v4004_v46  ;;  %v5621_v51 = vld [vmem:[#allocation7 + $0x4c4] sm:$0xf0]  ;;  %v4414_v55 = vld [vmem:[#allocation7 + $0x3d8] sm:$0xf0]  ;;  %v3980_v58 = vld [vmem:[#allocation7 + $0x60] sm:$0xf] }
  0x69   : > { %1697 = vmatpush.bf16.msra.mxu2 %v4389_v29  ;;  %v4533_v53 = vor.u32 %v5621_v51, %v4532_v50  ;;  %v4417_v57 = vor.u32 %v5588_v54, %v4414_v55  ;;  %v5483_v59 = vld [vmem:[#allocation7 + $0x74] sm:$0xf0]  ;;  %v4172_v60 = vld [vmem:[#allocation7 + $0x1e0] sm:$0xf]  ;;  %v5582_v12 = vld [vmem:[#allocation7 + $0x394] sm:$0xf] }
  0x6a   : > { %v4390_v13 = vld [vmem:[#allocation7 + $0x3a8] sm:$0xf0]  ;;  %v5654_v14 = vld [vmem:[#allocation7 + $0x5d4] sm:$0xf]  ;;  %v3956_v19 = vld [vmem:[#allocation7 + $0x30] sm:$0xf] }
  0x6b   : > { %1670 = vmatpush.bf16.msra.mxu0 %v4029_v30  ;;  %v4393_v15 = vor.u32 %v5582_v12, %v4390_v13  ;;  %v4678_v16 = vld [vmem:[#allocation7 + $0x5e8] sm:$0xf0]  ;;  %v5477_v20 = vld [vmem:[#allocation7 + $0x44] sm:$0xf0]  ;;  %v4366_v26 = vld [vmem:[#allocation7 + $0x378] sm:$0xf0] }
  0x6c   : > { %1683 = vmatpush.bf16.msra.mxu1 %v4221_v39  ;;  %v4681_v18 = vor.u32 %v5654_v14, %v4678_v16  ;;  %v3957_v22 = vor.u32 %v5477_v20, %v3956_v19  ;;  %v5525_v23 = vld [vmem:[#allocation7 + $0x1c4] sm:$0xf0]  ;;  %v4654_v30 = vld [vmem:[#allocation7 + $0x5b8] sm:$0xf0]  ;;  %v3932_v32 = vld [vmem:[#allocation7] sm:$0xf] }
  0x6d   : > { %1698 = vmatpush.bf16.msra.mxu2 %v4365_v36  ;;  %v5471_v33 = vld [vmem:[#allocation7 + $0x14] sm:$0xf0]  ;;  %v4124_v40 = vld [vmem:[#allocation7 + $0x180] sm:$0xf]  ;;  %v5510_v46 = vld [vmem:[#allocation7 + $0x154] sm:$0xf] }
  0x6e   : > { %328 = vrot.lane.b32.xlu2 %v6523_v7, %s6269_s27  ;;  %326 = vrot.lane.b32.xlu1 %v317_v8, %s6269_s27  ;;  %v3933_v39 = vor.u32 %v5471_v33, %v3932_v32  ;;  %v5519_v41 = vld [vmem:[#allocation7 + $0x194] sm:$0xf0]  ;;  %v4102_v47 = vld [vmem:[#allocation7 + $0x168] sm:$0xf0]  ;;  %v5642_v55 = vld [vmem:[#allocation7 + $0x574] sm:$0xf] }
  0x6f   : > { %391 = vrot.lane.b32.xlu0 %v345_v6, %s6272_s9  ;;  %1671 = vmatpush.bf16.msra.mxu0 %v4005_v48  ;;  %v4105_v48 = vor.u32 %v5510_v46, %v4102_v47  ;;  %v4294_v50 = vld [vmem:[#allocation7 + $0x2e8] sm:$0xf0]  ;;  %v4318_v12 = vld [vmem:[#allocation7 + $0x318] sm:$0xf0]  ;;  %v5492_v33 = vld [vmem:[#allocation7 + $0xc4] sm:$0xf] }
  0x70   : > { %v4606_v16 = vld [vmem:[#allocation7 + $0x558] sm:$0xf0]  ;;  %v5624_v46 = vld [vmem:[#allocation7 + $0x4e4] sm:$0xf]  ;;  %s3928_s15 = sshll.u32 %s6244_s21, 3  ;;  %vm375_vm5 = vcmask 130048  }
  0x71   : > { %1699 = vmatpush.bf16.msra.mxu2 %v4341_v49  ;;  %v5537_v49 = vld [vmem:[#allocation7 + $0x224] sm:$0xf0]  ;;  %v4558_v47 = vld [vmem:[#allocation7 + $0x4f8] sm:$0xf0]  ;;  %vm7031_vm6 = vcmask 1042432   ;;  %vm395_vm7 = vcmask 523264  }
  0x72   : > { %vm415_vm8 = vcmask 916480   ;;  %vm479_vm9 = vcmask 1043456   ;;  %vm484_vm10 = vcmask 1044480   ;;  %vm434_vm11 = vcmask 261120   ;;  %v4660_v2 = vld [vmem:[#allocation7 + $0x5a8] sm:$0xf] }
  0x73   : > { %vm489_vm12 = vcmask 1045504   ;;  %vm455_vm14 = vcmask 654336   ;;  %vm494_vm15 = vcmask 1046528   ;;  %s5860_s28 = smul.u32 5, %s6244_s21  ;;  %s3788_s5 = sshll.u32 %s6495_s8, 4  ;;  %s3789_s5 = int_to_ptr.vmem [resolvable:$true] %s3788_s5 }
  0x74   : > { %s5861_s12 = smul.u32 10, %s6248_s22  ;;  %s3774_s10 = scalar_lea.sflag [#allocation6], %s6472_s29 }
  0x75   : > { %1700 = vmatpush.bf16.msra.mxu2 %v4317_v63 }
  0x76   : > { %411 = vrot.lane.b32.xlu2 %v384_v9, %s6273_s2  ;;  %409 = vrot.lane.b32.xlu1 %v345_v6, %s6273_s2  ;;  %s3785_s21 = sadd.s32 %s5861_s12, %s5860_s28 }
  0x77   : > { %373 = vrot.lane.b32.xlu0 %v345_v6, %s6271_s1  ;;  %s3786_s13 = scalar_lea.hbm %s7024_s4, %s3785_s21 }
  0x78   : > { %s3790_s30 = sshll.u32 %s3786_s13, 4  ;;  %s3791_s30 = int_to_ptr.hbm [resolvable:$true] %s3790_s30 }
  0x7e   : > { %393 = vrot.lane.b32.xlu2 %v384_v9, %s6272_s9  ;;  %348 = vrot.lane.b32.xlu1 %v6506_v5, %s6270_s6 }
  0x7f   : > { %346 = vrot.lane.b32.xlu0 %v6523_v7, %s6270_s6 }
  0x86   : > { %365 = vrot.lane.b32.xlu2 %v6523_v7, %s6271_s1  ;;  %430 = vrot.lane.b32.xlu1 %v384_v9, %s6274_s20 }
  0x87   : > { %428 = vrot.lane.b32.xlu0 %v345_v6, %s6274_s20 }
  0x8e   : > { %449 = vrot.lane.b32.xlu2 %v384_v9, %s6275_s7  ;;  %413 = vrot.lane.b32.xlu1 %v404_v10, %s6273_s2  ;;  %v4605_v9 = vor.u32 %v5639_v1, %v4604_v0  ;;  %v3981_v0 = vor.u32 %v5483_v59, %v3980_v58  ;;  %v5531_v1 = vld [vmem:[#allocation7 + $0x1f4] sm:$0xf0]  ;;  %v5504_v59 = vld [vmem:[#allocation7 + $0x124] sm:$0xf] }
  0x8f   : > { %367 = vrot.lane.b32.xlu0 %v6506_v5, %s6271_s1 }
  0x90   : > { %1709 = vmatpush.bf16.msra.mxu3 %v4605_v9  ;;  %1672 = vmatpush.bf16.msra.mxu0 %v3981_v0 }
  0x94   : > { %1710 = vmatpush.bf16.msra.mxu3 %v4581_v21  ;;  %v4148_v21 = vld [vmem:[#allocation7 + $0x1b0] sm:$0xf]  ;;  %1673 = vmatpush.bf16.msra.mxu0 %v3957_v22  ;;  %v5498_v22 = vld [vmem:[#allocation7 + $0xf4] sm:$0xf] }
  0x95   : > { %v4149_v27 = vor.u32 %v5525_v23, %v4148_v21 }
  0x96   : > { %387 = vrot.lane.b32.xlu2 %v6503_v4, %s6272_s9  ;;  %385 = vrot.lane.b32.xlu1 %v6506_v5, %s6272_s9 }
  0x97   : > { %451 = vrot.lane.b32.xlu0 %v404_v10, %s6275_s7 }
  0x98   : > { %1711 = vmatpush.bf16.msra.mxu3 %v4557_v44  ;;  %1674 = vmatpush.bf16.msra.mxu0 %v3933_v39  ;;  %v4030_v39 = vld [vmem:[#allocation7 + $0xd8] sm:$0xf0] }
  0x9c   : > { %1712 = vmatpush.bf16.msra.mxu3 %v4533_v53  ;;  %v4342_v53 = vld [vmem:[#allocation7 + $0x348] sm:$0xf0]  ;;  %1719 = vmatpush.bf16.msrb.mxu0 %v4105_v48 }
  0x9e   : > { %407 = vrot.lane.b32.xlu2 %v325_v3, %s6273_s2  ;;  %405 = vrot.lane.b32.xlu1 %v6503_v4, %s6273_s2 }
  0x9f   : > { %432 = vrot.lane.b32.xlu0 %v404_v10, %s6274_s20  ;;  %v4486_v10 = vld [vmem:[#allocation7 + $0x468] sm:$0xf0] }
  0xa6   : > { %426 = vrot.lane.b32.xlu2 %v325_v3, %s6274_s20  ;;  %424 = vrot.lane.b32.xlu1 %v6503_v4, %s6274_s20 }
  0xa7   : > { %453 = vrot.lane.b32.xlu0 %v6003_v11, %s6275_s7 }
  0xae   : > { %447 = vrot.lane.b32.xlu1 %v345_v6, %s6275_s7 }
  0xaf   : > { %445 = vrot.lane.b32.xlu0 %v325_v3, %s6275_s7  ;;  %v5606_v3 = vld [vmem:[#allocation7 + $0x454] sm:$0xf] }
  0xb0   : > { %v6566_v17 = vpop.permute.xlu2 %334  ;;  %v4489_v11 = vor.u32 %v5606_v3, %v4486_v10  ;;  %v4508_v3 = vld [vmem:[#allocation7 + $0x480] sm:$0xf]  ;;  %v4173_v10 = vor.u32 %v5531_v1, %v4172_v60  ;;  %v4078_v60 = vld [vmem:[#allocation7 + $0x138] sm:$0xf0] }
  0xb1   : > { %v4081_v1 = vor.u32 %v5504_v59, %v4078_v60  ;;  %v5618_v59 = vld [vmem:[#allocation7 + $0x4b4] sm:$0xf]  ;;  %v4534_v60 = vld [vmem:[#allocation7 + $0x4c8] sm:$0xf0] }
  0xb2   : > { %1745 = vmatpush.bf16.msrb.mxu2 %v4489_v11 }
  0xb3   : > { %1720 = vmatpush.bf16.msrb.mxu0 %v4081_v1  ;;  %v4537_v1 = vor.u32 %v5618_v59, %v4534_v60 }
  0xb6   : > { %1746 = vmatpush.bf16.msrb.mxu2 %v4465_v24  ;;  %v5576_v24 = vld [vmem:[#allocation7 + $0x364] sm:$0xf] }
  0xb7   : > { %v4369_v28 = vor.u32 %v5576_v24, %v4366_v26  ;;  %v4054_v24 = vld [vmem:[#allocation7 + $0x108] sm:$0xf0]  ;;  %v5546_v26 = vld [vmem:[#allocation7 + $0x274] sm:$0xf] }
  0xb8   : > { %v6568_v25 = vpop.permute.xlu2 %369 }
  0xba   : > { %1747 = vmatpush.bf16.msrb.mxu2 %v4441_v45  ;;  %v4125_v45 = vor.u32 %v5519_v41, %v4124_v40  ;;  %v5540_v40 = vld [vmem:[#allocation7 + $0x244] sm:$0xf]  ;;  %v4033_v41 = vor.u32 %v5492_v33, %v4030_v39  ;;  %v4150_v39 = vld [vmem:[#allocation7 + $0x1c8] sm:$0xf0] }
  0xbe   : > { %1748 = vmatpush.bf16.msrb.mxu2 %v4417_v57  ;;  %v4630_v57 = vld [vmem:[#allocation7 + $0x588] sm:$0xf0] }
  0xbf   : > { %v4633_v58 = vor.u32 %v5642_v55, %v4630_v57  ;;  %v5534_v55 = vld [vmem:[#allocation7 + $0x214] sm:$0xf] }
  0xc0   : > { %v6574_v43 = vpop.permute.xlu2 %389 }
  0xc2   : > { %1749 = vmatpush.bf16.msrb.mxu2 %v4393_v15  ;;  %v5636_v15 = vld [vmem:[#allocation7 + $0x544] sm:$0xf] }
  0xc3   : > { %v4609_v21 = vor.u32 %v5636_v15, %v4606_v16  ;;  %v4174_v15 = vld [vmem:[#allocation7 + $0x1f8] sm:$0xf0]  ;;  %v5612_v16 = vld [vmem:[#allocation7 + $0x484] sm:$0xf] }
  0xc6   : > { %1750 = vmatpush.bf16.msrb.mxu2 %v4369_v28  ;;  %v4057_v28 = vor.u32 %v5498_v22, %v4054_v24 }
  0xc8   : > { %v6570_v35 = vpop.permute.xlu1 %350  ;;  %1721 = vmatpush.bf16.msrb.mxu0 %v4057_v28 }
  0xc9   : > { %v6572_v38 = vpop.permute.xlu0 %330 }
  0xcc   : > { %1722 = vmatpush.bf16.msrb.mxu0 %v4033_v41 }
  0xd0   : > { %v6576_v56 = vpop.permute.xlu1 %352 }
  0xd1   : > { %v6578_v61 = vpop.permute.xlu0 %332 }
  0xd2   : > { %v340_v6 = vsel %vm336_vm1, %v6578_v61, %v6566_v17  ;;  %v6583_v17 = vpop.permute.xlu2 %328 }
  0xd3   : > { %v468_v34 = vsel %vm7034_vm2, %v6503_v4, %v340_v6  ;;  %v4196_v4 = vld [vmem:[#allocation7 + $0x210] sm:$0xf]  ;;  %v5615_v6 = vld [vmem:[#allocation7 + $0x494] sm:$0xf0]  ;;  %v338_v0 = vsel %vm336_vm1, %v6583_v17, %v6572_v38 }
  0xd4   : > { %v4197_v52 = vor.u32 %v5537_v49, %v4196_v4  ;;  %v4509_v11 = vor.u32 %v5615_v6, %v4508_v3  ;;  %v5558_v49 = vld [vmem:[#allocation7 + $0x2d4] sm:$0xf]  ;;  %v5552_v3 = vld [vmem:[#allocation7 + $0x2a4] sm:$0xf]  ;;  %v4270_v6 = vld [vmem:[#allocation7 + $0x2b8] sm:$0xf0] }
  0xd5   : > { %v4297_v51 = vor.u32 %v5558_v49, %v4294_v50  ;;  %v4561_v49 = vor.u32 %v5624_v46, %v4558_v47  ;;  %v5516_v46 = vld [vmem:[#allocation7 + $0x184] sm:$0xf] }
  0xd6   : > { %1684 = vmatpush.bf16.msra.mxu1 %v4197_v52  ;;  %1713 = vmatpush.bf16.msra.mxu3 %v4509_v11  ;;  %v5570_v52 = vld [vmem:[#allocation7 + $0x334] sm:$0xf]  ;;  %v5564_v11 = vld [vmem:[#allocation7 + $0x304] sm:$0xf] }
  0xd7   : > { %v4345_v54 = vor.u32 %v5570_v52, %v4342_v53  ;;  %v4321_v14 = vor.u32 %v5564_v11, %v4318_v12  ;;  %v5486_v53 = vld [vmem:[#allocation7 + $0x94] sm:$0xf]  ;;  %v5528_v11 = vld [vmem:[#allocation7 + $0x1e4] sm:$0xf] }
  0xd8   : > { %v355_v29 = vpop.permute.xlu1 %354  ;;  %v4177_v22 = vor.u32 %v5528_v11, %v4174_v15 }
  0xd9   : > { %v360_v36 = vsel %vm356_vm3, %v6576_v56, %v355_v29  ;;  %v6589_v37 = vpop.permute.xlu0 %371  ;;  %v5648_v29 = vld [vmem:[#allocation7 + $0x5a4] sm:$0xf]  ;;  %1751 = vmatpush.bf16.msrb.mxu2 %v4345_v54  ;;  %v4006_v54 = vld [vmem:[#allocation7 + $0xa8] sm:$0xf0] }
  0xda   : > { %v6592_v42 = vsel %vm7032_vm4, %v468_v34, %v360_v36  ;;  %v6594_v62 = vpop.permute.xlu2 %411  ;;  %1685 = vmatpush.bf16.msra.mxu1 %v4173_v10  ;;  %1758 = vmatpush.bf16.msrb.mxu3 %v4681_v18  ;;  %v4657_v31 = vor.u32 %v5648_v29, %v4654_v30  ;;  %v6276_v36 = vmov 0.0   ;;  %v4273_v10 = vor.u32 %v5552_v3, %v4270_v6  ;;  %v4582_v30 = vld [vmem:[#allocation7 + $0x528] sm:$0xf0]  ;;  %v5480_v6 = vld [vmem:[#allocation7 + $0x64] sm:$0xf] }
  0xdb   : > { %3503 = vst [vmem:[#allocation2] sm:$0xff] %v6276_v36  ;;  %v466_v18 = vsel %vm7034_vm2, %v6523_v7, %v338_v0  ;;  %v5630_v7 = vld [vmem:[#allocation7 + $0x514] sm:$0xf]  ;;  %v4009_v57 = vor.u32 %v5486_v53, %v4006_v54 }
  0xdc   : > { %3504 = vst [vmem:[#allocation2 + $0x8] sm:$0xff] %v6276_v36  ;;  %v4585_v32 = vor.u32 %v5630_v7, %v4582_v30  ;;  %v3958_v7 = vld [vmem:[#allocation7 + $0x48] sm:$0xf0] }
  0xdd   : > { %3505 = vst [vmem:[#allocation2 + $0x10] sm:$0xff] %v6276_v36  ;;  %1752 = vmatpush.bf16.msrb.mxu2 %v4321_v14  ;;  %1723 = vmatpush.bf16.msrb.mxu0 %v4009_v57 }
  0xde   : > { %1686 = vmatpush.bf16.msra.mxu1 %v4149_v27  ;;  %1759 = vmatpush.bf16.msrb.mxu3 %v4657_v31  ;;  %3506 = vst [vmem:[#allocation2 + $0x18] sm:$0xff] %v6276_v36  ;;  %v4246_v27 = vld [vmem:[#allocation7 + $0x288] sm:$0xf0] }
  0xdf   : > { %3507 = vst [vmem:[#allocation2 + $0x20] sm:$0xff] %v6276_v36  ;;  %v4249_v29 = vor.u32 %v5546_v26, %v4246_v27  ;;  %v359_v27 = vsel %vm356_vm3, %v6570_v35, %v6576_v56 }
  0xe0   : > { %v6596_v63 = vpop.permute.xlu1 %326  ;;  %3508 = vst [vmem:[#allocation2 + $0x28] sm:$0xff] %v6276_v36 }
  0xe1   : > { %v6598_v9 = vpop.permute.xlu0 %391  ;;  %3509 = vst [vmem:[#allocation2 + $0x30] sm:$0xff] %v6276_v36 }
  0xe2   : > { %v6606_v4 = vpop.permute.xlu2 %393  ;;  %1687 = vmatpush.bf16.msra.mxu1 %v4125_v45  ;;  %3510 = vst [vmem:[#allocation2 + $0x38] sm:$0xff] %v6276_v36  ;;  %1760 = vmatpush.bf16.msrb.mxu3 %v4633_v58  ;;  %v4222_v45 = vld [vmem:[#allocation7 + $0x258] sm:$0xf0]  ;;  %v4198_v58 = vld [vmem:[#allocation7 + $0x228] sm:$0xf0]  ;;  %v398_v41 = vsel %vm395_vm7, %v6574_v43, %v6598_v9 }
  0xe3   : > { %3511 = vst [vmem:[#allocation2 + $0x40] sm:$0xff] %v6276_v36  ;;  %v4225_v48 = vor.u32 %v5540_v40, %v4222_v45  ;;  %v4201_v0 = vor.u32 %v5534_v55, %v4198_v58  ;;  %v378_v40 = vsel %vm375_vm5, %v6568_v25, %v6589_v37  ;;  %v5468_v45 = vld [vmem:[#allocation7 + $0x4] sm:$0xf] }
  0xe6   : > { %1732 = vmatpush.bf16.msrb.mxu1 %v4297_v51  ;;  %1761 = vmatpush.bf16.msrb.mxu3 %v4609_v21  ;;  %v500_v51 = vlaneseq  ;;  %v502_v21 = vstv %s3928_s15 }
  0xe8   : > { %v6600_v34 = vpop.permute.xlu1 %409  ;;  %v501_v3 = vshrl.u32 %v500_v51, 7 }
  0xe9   : > { %v6603_v44 = vpop.permute.xlu0 %373  ;;  %v418_v47 = vsel %vm415_vm8, %v6600_v34, %v6594_v62 }
  0xea   : > { %1733 = vmatpush.bf16.msrb.mxu1 %v4273_v10  ;;  %v6630_v31 = vpop.permute.xlu2 %365  ;;  %1762 = vmatpush.bf16.msrb.mxu3 %v4585_v32  ;;  %v3982_v10 = vld [vmem:[#allocation7 + $0x78] sm:$0xf0]  ;;  %v503_v32 = vadd.s32 %v502_v21, %v501_v3 }
  0xeb   : > { %v3985_v14 = vor.u32 %v5480_v6, %v3982_v10  ;;  %v4492_v6 = vld [vmem:[#allocation7 + $0x458] sm:$0xf]  ;;  %v5610_v10 = vld [vmem:[#allocation7 + $0x46c] sm:$0xf0] }
  0xec   : > { %vm504_vm13 = vcmp.lt.s32.totalorder %v503_v32, 7  ;;  %v4493_v15 = vor.u32 %v5610_v10, %v4492_v6  ;;  %v4420_v32 = vld [vmem:[#allocation7 + $0x3c8] sm:$0xf] }
  0xed   : > { %1724 = vmatpush.bf16.msrb.mxu0 %v3985_v14  ;;  %v6676_v60 = vsel %vm504_vm13, 1.0, %v6276_v36  ;;  %v5604_v36 = vld [vmem:[#allocation7 + $0x43c] sm:$0xf0] }
  0xee   : > { %1734 = vmatpush.bf16.msrb.mxu1 %v4249_v29  ;;  %1763 = vmatpush.bf16.msrb.mxu3 %v4561_v49  ;;  %v5474_v29 = vld [vmem:[#allocation7 + $0x34] sm:$0xf] }
  0xef   : > { %v3961_v33 = vor.u32 %v5474_v29, %v3958_v7  ;;  %v4444_v29 = vld [vmem:[#allocation7 + $0x3f8] sm:$0xf]  ;;  %v5598_v7 = vld [vmem:[#allocation7 + $0x40c] sm:$0xf0] }
  0xf0   : > { %v6617_v13 = vpop.permute.xlu1 %348 }
  0xf1   : > { %v6622_v19 = vpop.permute.xlu0 %346  ;;  %v358_v20 = vsel %vm356_vm3, %v6617_v13, %v6570_v35  ;;  %1725 = vmatpush.bf16.msrb.mxu0 %v3961_v33  ;;  %v5592_v33 = vld [vmem:[#allocation7 + $0x3dc] sm:$0xf0] }
  0xf2   : > { %v6628_v23 = vsel %vm7032_vm4, %v466_v18, %v358_v20  ;;  %1735 = vmatpush.bf16.msrb.mxu1 %v4225_v48  ;;  %v6638_v12 = vpop.permute.xlu2 %449  ;;  %v4510_v18 = vld [vmem:[#allocation7 + $0x498] sm:$0xf0]  ;;  %v339_v20 = vsel %vm336_vm1, %v6572_v38, %v6578_v61  ;;  %1764 = vmatpush.bf16.msrb.mxu3 %v4537_v1  ;;  %v5522_v38 = vld [vmem:[#allocation7 + $0x1b4] sm:$0xf] }
  0xf3   : > { %v4513_v24 = vor.u32 %v5612_v16, %v4510_v18  ;;  %v467_v61 = vsel %vm7034_vm2, %v6506_v5, %v339_v20  ;;  %v4153_v56 = vor.u32 %v5522_v38, %v4150_v39  ;;  %v4126_v48 = vld [vmem:[#allocation7 + $0x198] sm:$0xf0]  ;;  %v4468_v18 = vld [vmem:[#allocation7 + $0x428] sm:$0xf]  ;;  %v399_v39 = vsel %vm395_vm7, %v6598_v9, %v6606_v4 }
  0xf4   : > { %v472_v5 = vsel %vm7032_vm4, %v467_v61, %v359_v27  ;;  %v4129_v54 = vor.u32 %v5516_v46, %v4126_v48  ;;  %v4445_v61 = vor.u32 %v5598_v7, %v4444_v29  ;;  %v5574_v29 = vld [vmem:[#allocation7 + $0x34c] sm:$0xf0] }
  0xf5   : > { %v477_v49 = vsel %vm7031_vm6, %v472_v5, %v378_v40  ;;  %v4396_v5 = vld [vmem:[#allocation7 + $0x398] sm:$0xf] }
  0xf6   : > { %1736 = vmatpush.bf16.msrb.mxu1 %v4201_v0  ;;  %1765 = vmatpush.bf16.msrb.mxu3 %v4513_v24  ;;  %v482_v55 = vsel %vm479_vm9, %v477_v49, %v398_v41  ;;  %v379_v24 = vsel %vm375_vm5, %v6589_v37, %v6603_v44  ;;  %v4372_v49 = vld [vmem:[#allocation7 + $0x368] sm:$0xf] }
  0xf7   : > { %v487_v59 = vsel %vm484_vm10, %v482_v55, %v418_v47  ;;  %v478_v38 = vsel %vm7031_vm6, %v6592_v42, %v379_v24  ;;  %v337_v42 = vsel %vm336_vm1, %v6596_v63, %v6583_v17  ;;  %v357_v17 = vsel %vm356_vm3, %v6622_v19, %v6617_v13  ;;  %v5652_v55 = vld [vmem:[#allocation7 + $0x5bc] sm:$0xf0]  ;;  %v5514_v24 = vld [vmem:[#allocation7 + $0x16c] sm:$0xf0] }
  0xf8   : > { %v6632_v50 = vpop.permute.xlu1 %430  ;;  %v483_v44 = vsel %vm479_vm9, %v478_v38, %v399_v39  ;;  %v4661_v6 = vor.u32 %v5652_v55, %v4660_v2  ;;  %v4228_v2 = vld [vmem:[#allocation7 + $0x248] sm:$0xf]  ;;  %v5544_v55 = vld [vmem:[#allocation7 + $0x25c] sm:$0xf0] }
  0xf9   : > { %v6634_v52 = vpop.permute.xlu0 %428 }
  0xfa   : > { %1737 = vmatpush.bf16.msrb.mxu1 %v4177_v22  ;;  %v437_v53 = vsel %vm434_vm11, %v6634_v52, %v6632_v50  ;;  %v388_v57 = vpop.permute.xlu2 %387  ;;  %v4469_v22 = vor.u32 %v5604_v36, %v4468_v18  ;;  %v4300_v18 = vld [vmem:[#allocation7 + $0x2d8] sm:$0xf]  ;;  %v5562_v36 = vld [vmem:[#allocation7 + $0x2ec] sm:$0xf0] }
  0xfb   : > { %v492_v1 = vsel %vm489_vm12, %v487_v59, %v437_v53  ;;  %v397_v41 = vsel %vm395_vm7, %v388_v57, %v6574_v43  ;;  %v465_v43 = vsel %vm7034_vm2, %v317_v8, %v337_v42  ;;  %v4276_v42 = vld [vmem:[#allocation7 + $0x2a8] sm:$0xf] }
  0xfc   : > { %v470_v8 = vsel %vm7032_vm4, %v465_v43, %v357_v17 }
  0xfe   : > { %1738 = vmatpush.bf16.msrb.mxu1 %v4153_v56 }
 0x100   : > { %v6643_v26 = vpop.permute.xlu1 %413 }
 0x101   : > { %v6648_v28 = vpop.permute.xlu0 %367 }
 0x102   : > { %v377_v30 = vsel %vm375_vm5, %v6648_v28, %v6568_v25  ;;  %1739 = vmatpush.bf16.msrb.mxu1 %v4129_v54  ;;  %v408_v27 = vpop.permute.xlu2 %407  ;;  %v376_v47 = vsel %vm375_vm5, %v6630_v31, %v6648_v28  ;;  %v5580_v54 = vld [vmem:[#allocation7 + $0x37c] sm:$0xf0] }
 0x103   : > { %v6657_v35 = vsel %vm7031_vm6, %v6628_v23, %v377_v30  ;;  %v3934_v23 = vld [vmem:[#allocation7 + $0x18] sm:$0xf0]  ;;  %v419_v30 = vsel %vm415_vm8, %v6594_v62, %v6643_v26  ;;  %v4421_v26 = vor.u32 %v5592_v33, %v4420_v32  ;;  %v417_v13 = vsel %vm415_vm8, %v408_v27, %v6600_v34  ;;  %v4084_v33 = vld [vmem:[#allocation7 + $0x128] sm:$0xf] }
 0x104   : > { %v3937_v25 = vor.u32 %v5468_v45, %v3934_v23  ;;  %v488_v40 = vsel %vm484_vm10, %v483_v44, %v419_v30  ;;  %v4684_v45 = vld [vmem:[#allocation7 + $0x5d8] sm:$0xf]  ;;  %v5658_v23 = vld [vmem:[#allocation7 + $0x5ec] sm:$0xf0]  ;;  %v481_v63 = vsel %vm479_vm9, %v6657_v35, %v397_v41  ;;  %v4301_v32 = vor.u32 %v5562_v36, %v4300_v18  ;;  %v5568_v41 = vld [vmem:[#allocation7 + $0x31c] sm:$0xf0] }
 0x105   : > { %v4685_v53 = vor.u32 %v5658_v23, %v4684_v45  ;;  %v486_v59 = vsel %vm484_vm10, %v481_v63, %v417_v13  ;;  %v5646_v30 = vld [vmem:[#allocation7 + $0x58c] sm:$0xf0]  ;;  %v4252_v63 = vld [vmem:[#allocation7 + $0x278] sm:$0xf] }
 0x106   : > { %1726 = vmatpush.bf16.msrb.mxu0 %v3937_v25  ;;  %v5634_v13 = vld [vmem:[#allocation7 + $0x52c] sm:$0xf0]  ;;  %v4540_v36 = vld [vmem:[#allocation7 + $0x4b8] sm:$0xf] }
 0x107   : > { %v5490_v18 = vld [vmem:[#allocation7 + $0xac] sm:$0xf0] }
 0x108   : > { %v386_v58 = vpop.permute.xlu1 %385 }
 0x109   : > { %v452_v0 = vpop.permute.xlu0 %451  ;;  %v396_v19 = vsel %vm395_vm7, %v386_v58, %v388_v57 }
 0x10a   : > { %v458_v3 = vsel %vm455_vm14, %v6638_v12, %v452_v0  ;;  %v427_v25 = vpop.permute.xlu2 %426 }
 0x10b   : > { %v497_v11 = vsel %vm494_vm15, %v492_v1, %v458_v3  ;;  %v436_v34 = vsel %vm434_vm11, %v427_v25, %v6634_v52  ;;  %v4373_v3 = vor.u32 %v5580_v54, %v4372_v49  ;;  %v4588_v49 = vld [vmem:[#allocation7 + $0x518] sm:$0xf] }
 0x10c   : > { %v509_v14 = vmul.f32 %v6676_v60, %v497_v11  ;;  %v491_v10 = vsel %vm489_vm12, %v486_v59, %v436_v34  ;;  %v4564_v34 = vld [vmem:[#allocation7 + $0x4e8] sm:$0xf] }
 0x10e   : > { %v6683_v16 = vpack.c.bf16 %v509_v14, %v509_v14 }
 0x110   : > { %1701 = vmatmul.bf16.vlgmr.msra.gmra.mxu2 %v6683_v16  ;;  %v406_v20 = vpop.permute.xlu1 %405 }
 0x111   : > { %1797 = vmatpush.bf16.msra.mxu2 %v4493_v15  ;;  %v433_v21 = vpop.permute.xlu0 %432  ;;  %v416_v31 = vsel %vm415_vm8, %v406_v20, %v408_v27  ;;  %v4108_v15 = vld [vmem:[#allocation7 + $0x158] sm:$0xf] }
 0x112   : > { %v438_v37 = vsel %vm434_vm11, %v6632_v50, %v433_v21  ;;  %v5586_v50 = vld [vmem:[#allocation7 + $0x3ac] sm:$0xf0]  ;;  %v4348_v27 = vld [vmem:[#allocation7 + $0x338] sm:$0xf] }
 0x113   : > { %v493_v9 = vsel %vm489_vm12, %v488_v40, %v438_v37  ;;  %v4397_v35 = vor.u32 %v5586_v50, %v4396_v5  ;;  %v4109_v37 = vor.u32 %v5514_v24, %v4108_v15  ;;  %v4349_v44 = vor.u32 %v5574_v29, %v4348_v27  ;;  %v5556_v40 = vld [vmem:[#allocation7 + $0x2bc] sm:$0xf0]  ;;  %v4324_v5 = vld [vmem:[#allocation7 + $0x308] sm:$0xf]  ;;  %v4494_v50 = vld [vmem:[#allocation7 + $0x470] sm:$0xf0] }
 0x114   : > { %v4277_v45 = vor.u32 %v5556_v40, %v4276_v42  ;;  %v4325_v17 = vor.u32 %v5568_v41, %v4324_v5  ;;  %v4012_v15 = vld [vmem:[#allocation7 + $0x98] sm:$0xf]  ;;  %v4180_v29 = vld [vmem:[#allocation7 + $0x1e8] sm:$0xf]  ;;  %v5655_v42 = vld [vmem:[#allocation7 + $0x5dc] sm:$0xf] }
 0x115   : > { %1798 = vmatpush.bf16.msra.mxu2 %v4469_v22  ;;  %v4013_v27 = vor.u32 %v5490_v18, %v4012_v15  ;;  %v4686_v40 = vld [vmem:[#allocation7 + $0x5f0] sm:$0xf0]  ;;  %v4156_v5 = vld [vmem:[#allocation7 + $0x1b8] sm:$0xf]  ;;  %v5526_v41 = vld [vmem:[#allocation7 + $0x1cc] sm:$0xf0] }
 0x116   : > { %v5565_v15 = vld [vmem:[#allocation7 + $0x30c] sm:$0xf]  ;;  %v4326_v18 = vld [vmem:[#allocation7 + $0x320] sm:$0xf0] }
 0x118   : > { %v425_v56 = vpop.permute.xlu1 %424 }
 0x119   : > { %1799 = vmatpush.bf16.msra.mxu2 %v4445_v61  ;;  %v454_v62 = vpop.permute.xlu0 %453  ;;  %v435_v57 = vsel %vm434_vm11, %v425_v56, %v427_v25  ;;  %v4636_v61 = vld [vmem:[#allocation7 + $0x578] sm:$0xf]  ;;  %v5508_v56 = vld [vmem:[#allocation7 + $0x13c] sm:$0xf0] }
 0x11a   : > { %v459_v4 = vsel %vm455_vm14, %v452_v0, %v454_v62  ;;  %v475_v0 = vsel %vm7031_vm6, %v470_v8, %v376_v47  ;;  %v4085_v23 = vor.u32 %v5508_v56, %v4084_v33  ;;  %v4060_v25 = vld [vmem:[#allocation7 + $0xf8] sm:$0xf]  ;;  %v4589_v8 = vor.u32 %v5634_v13, %v4588_v49  ;;  %v5616_v33 = vld [vmem:[#allocation7 + $0x49c] sm:$0xf0]  ;;  %v4132_v49 = vld [vmem:[#allocation7 + $0x188] sm:$0xf] }
 0x11b   : > { %v498_v46 = vsel %vm494_vm15, %v493_v9, %v459_v4  ;;  %v480_v58 = vsel %vm479_vm9, %v475_v0, %v396_v19  ;;  %v4612_v9 = vld [vmem:[#allocation7 + $0x548] sm:$0xf]  ;;  %v5607_v4 = vld [vmem:[#allocation7 + $0x45c] sm:$0xf]  ;;  %v5601_v19 = vld [vmem:[#allocation7 + $0x42c] sm:$0xf] }
 0x11c   : > { %v510_v48 = vmul.f32 %v6676_v60, %v498_v46  ;;  %v485_v11 = vsel %vm484_vm10, %v480_v58, %v416_v31  ;;  %v5550_v46 = vld [vmem:[#allocation7 + $0x28c] sm:$0xf0]  ;;  %v4497_v47 = vor.u32 %v5607_v4, %v4494_v50  ;;  %v4036_v31 = vld [vmem:[#allocation7 + $0xc8] sm:$0xf]  ;;  %v5496_v0 = vld [vmem:[#allocation7 + $0xdc] sm:$0xf0] }
 0x11d   : > { %1800 = vmatpush.bf16.msra.mxu2 %v4421_v26  ;;  %v490_v20 = vsel %vm489_vm12, %v485_v11, %v435_v57  ;;  %v4637_v26 = vor.u32 %v5646_v30, %v4636_v61  ;;  %v5628_v57 = vld [vmem:[#allocation7 + $0x4fc] sm:$0xf0]  ;;  %v5595_v58 = vld [vmem:[#allocation7 + $0x3fc] sm:$0xf]  ;;  %v5538_v11 = vld [vmem:[#allocation7 + $0x22c] sm:$0xf0] }
 0x11e   : > { %v6727_v28 = vpack.c.bf16 %v510_v48, %v510_v48  ;;  %v5502_v48 = vld [vmem:[#allocation7 + $0x10c] sm:$0xf0]  ;;  %v3988_v30 = vld [vmem:[#allocation7 + $0x68] sm:$0xf]  ;;  %v3964_v4 = vld [vmem:[#allocation7 + $0x38] sm:$0xf] }
 0x11f   : > { %v4061_v54 = vor.u32 %v5502_v48, %v4060_v25  ;;  %v5478_v50 = vld [vmem:[#allocation7 + $0x4c] sm:$0xf0]  ;;  %v5472_v48 = vld [vmem:[#allocation7 + $0x1c] sm:$0xf0]  ;;  %vm3593_vm6 = vcmp.lt.s32.totalorder %v500_v51, 576 }
 0x120   : > { %1714 = vmatmul.bf16.vlgmr.msra.gmra.mxu3 %v6727_v28  ;;  %1753 = vmatmul.bf16.vlgmr.msrb.gmra.mxu2 %v6683_v16  ;;  %v448_v1 = vpop.permute.xlu1 %447  ;;  %v3965_v25 = vor.u32 %v5478_v50, %v3964_v4  ;;  %v5520_v13 = vld [vmem:[#allocation7 + $0x19c] sm:$0xf0]  ;;  %v4038_v4 = vld [vmem:[#allocation7 + $0xe0] sm:$0xf0]  ;;  %v5625_v50 = vld [vmem:[#allocation7 + $0x4ec] sm:$0xf] }
 0x121   : > { %1801 = vmatpush.bf16.msra.mxu2 %v4397_v35  ;;  %1810 = vmatpush.bf16.msra.mxu3 %v4685_v53  ;;  %v446_v14 = vpop.permute.xlu0 %445  ;;  %v457_v52 = vsel %vm455_vm14, %v448_v1, %v6638_v12  ;;  %v4470_v35 = vld [vmem:[#allocation7 + $0x440] sm:$0xf0]  ;;  %v4253_v53 = vor.u32 %v5550_v46, %v4252_v63  ;;  %v4157_v63 = vor.u32 %v5526_v41, %v4156_v5  ;;  %v5649_v46 = vld [vmem:[#allocation7 + $0x5ac] sm:$0xf] }
 0x122   : > { %v456_v21 = vsel %vm455_vm14, %v446_v14, %v448_v1  ;;  %v496_v22 = vsel %vm494_vm15, %v491_v10, %v457_v52  ;;  %v4473_v59 = vor.u32 %v5601_v19, %v4470_v35  ;;  %v4446_v1 = vld [vmem:[#allocation7 + $0x410] sm:$0xf0]  ;;  %v4204_v10 = vld [vmem:[#allocation7 + $0x218] sm:$0xf]  ;;  %v4565_v14 = vor.u32 %v5628_v57, %v4564_v34  ;;  %v5511_v35 = vld [vmem:[#allocation7 + $0x15c] sm:$0xf] }
 0x123   : > { %v495_v7 = vsel %vm494_vm15, %v490_v20, %v456_v21  ;;  %v508_v38 = vmul.f32 %v6676_v60, %v496_v22  ;;  %v4449_v52 = vor.u32 %v5595_v58, %v4446_v1  ;;  %v5622_v20 = vld [vmem:[#allocation7 + $0x4cc] sm:$0xf0]  ;;  %v5589_v21 = vld [vmem:[#allocation7 + $0x3cc] sm:$0xf]  ;;  %v4422_v22 = vld [vmem:[#allocation7 + $0x3e0] sm:$0xf0]  ;;  %v4205_v24 = vor.u32 %v5538_v11, %v4204_v10 }
 0x124   : > { %v507_v12 = vmul.f32 %v6676_v60, %v495_v7  ;;  %v5640_v60 = vld [vmem:[#allocation7 + $0x55c] sm:$0xf0]  ;;  %v4425_v61 = vor.u32 %v5589_v21, %v4422_v22  ;;  %v4638_v34 = vld [vmem:[#allocation7 + $0x590] sm:$0xf0]  ;;  %v5505_v1 = vld [vmem:[#allocation7 + $0x12c] sm:$0xf] }
 0x125   : > { %v6746_v39 = vpack.c.bf16 %v508_v38, %v508_v38  ;;  %1802 = vmatpush.bf16.msra.mxu2 %v4373_v3  ;;  %1811 = vmatpush.bf16.msra.mxu3 %v4661_v6  ;;  %v4613_v43 = vor.u32 %v5640_v60, %v4612_v9  ;;  %v4229_v3 = vor.u32 %v5544_v55, %v4228_v2  ;;  %v5532_v7 = vld [vmem:[#allocation7 + $0x1fc] sm:$0xf0]  ;;  %v4110_v55 = vld [vmem:[#allocation7 + $0x170] sm:$0xf0]  ;;  %v4086_v10 = vld [vmem:[#allocation7 + $0x140] sm:$0xf0] }
 0x126   : > { %v6748_v62 = vpack.c.bf16 %v507_v12, %v507_v12  ;;  %v4037_v6 = vor.u32 %v5496_v0, %v4036_v31  ;;  %v4541_v38 = vor.u32 %v5622_v20, %v4540_v36  ;;  %v5484_v12 = vld [vmem:[#allocation7 + $0x7c] sm:$0xf0]  ;;  %v4181_v56 = vor.u32 %v5532_v7, %v4180_v29  ;;  %v5643_v0 = vld [vmem:[#allocation7 + $0x57c] sm:$0xf]  ;;  %v5553_v11 = vld [vmem:[#allocation7 + $0x2ac] sm:$0xf] }
 0x127   : > { %1688 = vmatmul.bf16.vlgmr.msra.gmra.mxu1 %v6746_v39  ;;  %v4133_v31 = vor.u32 %v5520_v13, %v4132_v49  ;;  %v5637_v36 = vld [vmem:[#allocation7 + $0x54c] sm:$0xf]  ;;  %v4614_v20 = vld [vmem:[#allocation7 + $0x560] sm:$0xf0]  ;;  %v4500_v21 = vld [vmem:[#allocation7 + $0x460] sm:$0xf]  ;;  %v4329_v29 = vor.u32 %v5565_v15, %v4326_v18 }
 0x128   : > { %1675 = vmatmul.bf16.vlgmr.msra.gmra.mxu0 %v6748_v62  ;;  %1784 = vmatpush.bf16.msra.mxu1 %v4301_v32  ;;  %v4516_v32 = vld [vmem:[#allocation7 + $0x488] sm:$0xf]  ;;  %v5611_v22 = vld [vmem:[#allocation7 + $0x474] sm:$0xf0]  ;;  %v5547_v7 = vld [vmem:[#allocation7 + $0x27c] sm:$0xf] }
 0x129   : > { %1771 = vmatpush.bf16.msra.mxu0 %v4109_v37  ;;  %1803 = vmatpush.bf16.msra.mxu2 %v4349_v44  ;;  %v5583_v37 = vld [vmem:[#allocation7 + $0x39c] sm:$0xf]  ;;  %v4398_v44 = vld [vmem:[#allocation7 + $0x3b0] sm:$0xf0]  ;;  %v4517_v9 = vor.u32 %v5616_v33, %v4516_v32  ;;  %v4230_v5 = vld [vmem:[#allocation7 + $0x260] sm:$0xf0] }
 0x12a   : > { %1812 = vmatpush.bf16.msra.mxu3 %v4637_v26  ;;  %v3989_v26 = vor.u32 %v5484_v12, %v3988_v30  ;;  %v4401_v60 = vor.u32 %v5583_v37, %v4398_v44  ;;  %v4501_v30 = vor.u32 %v5611_v22, %v4500_v21  ;;  %v5499_v12 = vld [vmem:[#allocation7 + $0xfc] sm:$0xf]  ;;  %v4062_v32 = vld [vmem:[#allocation7 + $0x110] sm:$0xf0]  ;;  %v4476_v44 = vld [vmem:[#allocation7 + $0x430] sm:$0xf] }
 0x12b   : > { %v5631_v33 = vld [vmem:[#allocation7 + $0x51c] sm:$0xf]  ;;  %v4590_v37 = vld [vmem:[#allocation7 + $0x530] sm:$0xf0] }
 0x12c   : > { %1785 = vmatpush.bf16.msra.mxu1 %v4277_v45  ;;  %v4689_v45 = vor.u32 %v5655_v42, %v4686_v40  ;;  %v4065_v40 = vor.u32 %v5499_v12, %v4062_v32  ;;  %v4593_v41 = vor.u32 %v5631_v33, %v4590_v37  ;;  %v5487_v49 = vld [vmem:[#allocation7 + $0x9c] sm:$0xf]  ;;  %v4014_v13 = vld [vmem:[#allocation7 + $0xb0] sm:$0xf0]  ;;  %v3942_v32 = vld [vmem:[#allocation7 + $0x20] sm:$0xf0] }
 0x12d   : > { %1772 = vmatpush.bf16.msra.mxu0 %v4085_v23  ;;  %1804 = vmatpush.bf16.msra.mxu2 %v4325_v17  ;;  %v5577_v23 = vld [vmem:[#allocation7 + $0x36c] sm:$0xf]  ;;  %v4374_v17 = vld [vmem:[#allocation7 + $0x380] sm:$0xf0]  ;;  %v5523_v15 = vld [vmem:[#allocation7 + $0x1bc] sm:$0xf] }
 0x12e   : > { %1813 = vmatpush.bf16.msra.mxu3 %v4613_v43  ;;  %v4662_v43 = vld [vmem:[#allocation7 + $0x5c0] sm:$0xf0]  ;;  %v4377_v19 = vor.u32 %v5577_v23, %v4374_v17  ;;  %v4452_v23 = vld [vmem:[#allocation7 + $0x400] sm:$0xf]  ;;  %v5599_v17 = vld [vmem:[#allocation7 + $0x414] sm:$0xf0] }
 0x12f   : > { %v4665_v2 = vor.u32 %v5649_v46, %v4662_v43  ;;  %v5535_v43 = vld [vmem:[#allocation7 + $0x21c] sm:$0xf]  ;;  %v4158_v18 = vld [vmem:[#allocation7 + $0x1d0] sm:$0xf0]  ;;  %v5517_v33 = vld [vmem:[#allocation7 + $0x18c] sm:$0xf] }
 0x130   : > { %1766 = vmatmul.bf16.vlgmr.msrb.gmra.mxu3 %v6727_v28  ;;  %1786 = vmatpush.bf16.msra.mxu1 %v4253_v53  ;;  %v5559_v53 = vld [vmem:[#allocation7 + $0x2dc] sm:$0xf]  ;;  %v3966_v22 = vld [vmem:[#allocation7 + $0x50] sm:$0xf0]  ;;  %v4134_v37 = vld [vmem:[#allocation7 + $0x1a0] sm:$0xf0] }
 0x131   : > { %1849 = vmatpush.bf16.msrb.mxu2 %v4497_v47  ;;  %1773 = vmatpush.bf16.msra.mxu0 %v4061_v54  ;;  %v3940_v47 = vld [vmem:[#allocation7 + $0x8] sm:$0xf]  ;;  %v4302_v54 = vld [vmem:[#allocation7 + $0x2f0] sm:$0xf0]  ;;  %v5475_v21 = vld [vmem:[#allocation7 + $0x3c] sm:$0xf] }
 0x132   : > { %1805 = vmatmul.bf16.vlgmr.msra.gmra.mxu2 %v6683_v16  ;;  %1814 = vmatpush.bf16.msra.mxu3 %v4589_v8  ;;  %v5571_v8 = vld [vmem:[#allocation7 + $0x33c] sm:$0xf]  ;;  %v3941_v57 = vor.u32 %v5472_v48, %v3940_v47  ;;  %v4305_v58 = vor.u32 %v5559_v53, %v4302_v54  ;;  %v4206_v47 = vld [vmem:[#allocation7 + $0x230] sm:$0xf0]  ;;  %v4453_v48 = vor.u32 %v5599_v17, %v4452_v23  ;;  %v4428_v53 = vld [vmem:[#allocation7 + $0x3d0] sm:$0xf] }
 0x133   : > { %v5593_v54 = vld [vmem:[#allocation7 + $0x3e4] sm:$0xf0]  ;;  %v3969_v12 = vor.u32 %v5475_v21, %v3966_v22  ;;  %v4092_v17 = vld [vmem:[#allocation7 + $0x130] sm:$0xf] }
 0x134   : > { %1787 = vmatpush.bf16.msra.mxu1 %v4229_v3  ;;  %v4113_v3 = vor.u32 %v5511_v35, %v4110_v55  ;;  %v4542_v35 = vld [vmem:[#allocation7 + $0x4d0] sm:$0xf0]  ;;  %v4017_v55 = vor.u32 %v5487_v49, %v4014_v13  ;;  %v4332_v49 = vld [vmem:[#allocation7 + $0x310] sm:$0xf]  ;;  %v5569_v13 = vld [vmem:[#allocation7 + $0x324] sm:$0xf0] }
 0x135   : > { %1850 = vmatpush.bf16.msrb.mxu2 %v4473_v59  ;;  %1774 = vmatpush.bf16.msra.mxu0 %v4037_v6  ;;  %v4350_v59 = vld [vmem:[#allocation7 + $0x350] sm:$0xf0]  ;;  %v5497_v21 = vld [vmem:[#allocation7 + $0xe4] sm:$0xf0]  ;;  %v4572_v22 = vld [vmem:[#allocation7 + $0x4f0] sm:$0xf] }
 0x136   : > { %1815 = vmatpush.bf16.msra.mxu3 %v4565_v14  ;;  %v4353_v6 = vor.u32 %v5571_v8, %v4350_v59  ;;  %v4278_v14 = vld [vmem:[#allocation7 + $0x2c0] sm:$0xf0]  ;;  %v5529_v8 = vld [vmem:[#allocation7 + $0x1ec] sm:$0xf] }
 0x137   : > { %1740 = vmatmul.bf16.vlgmr.msrb.gmra.mxu1 %v6746_v39  ;;  %v4182_v59 = vld [vmem:[#allocation7 + $0x200] sm:$0xf0] }
 0x138   : > { %1727 = vmatmul.bf16.vlgmr.msrb.gmra.mxu0 %v6748_v62  ;;  %1788 = vmatpush.bf16.msra.mxu1 %v4205_v24  ;;  %v4281_v24 = vor.u32 %v5553_v11, %v4278_v14  ;;  %v4692_v11 = vld [vmem:[#allocation7 + $0x5e0] sm:$0xf]  ;;  %v5659_v14 = vld [vmem:[#allocation7 + $0x5f4] sm:$0xf0] }
 0x139   : > { %1851 = vmatpush.bf16.msrb.mxu2 %v4449_v52  ;;  %1775 = vmatpush.bf16.msra.mxu0 %v4013_v27  ;;  %v4641_v52 = vor.u32 %v5643_v0, %v4638_v34  ;;  %v4089_v27 = vor.u32 %v5505_v1, %v4086_v10  ;;  %v4429_v0 = vor.u32 %v5593_v54, %v4428_v53  ;;  %v5481_v34 = vld [vmem:[#allocation7 + $0x6c] sm:$0xf]  ;;  %v4518_v1 = vld [vmem:[#allocation7 + $0x4a0] sm:$0xf0]  ;;  %v4502_v54 = vld [vmem:[#allocation7 + $0x478] sm:$0xf0] }
 0x13a   : > { %1816 = vmatpush.bf16.msra.mxu3 %v4541_v38  ;;  %v4254_v38 = vld [vmem:[#allocation7 + $0x290] sm:$0xf0]  ;;  %v4185_v10 = vor.u32 %v5529_v8, %v4182_v59  ;;  %v5608_v53 = vld [vmem:[#allocation7 + $0x464] sm:$0xf]  ;;  %v4333_v8 = vor.u32 %v5569_v13, %v4332_v49  ;;  %v4260_v59 = vld [vmem:[#allocation7 + $0x280] sm:$0xf] }
 0x13b   : > { %v4257_v42 = vor.u32 %v5547_v7, %v4254_v38  ;;  %v4161_v7 = vor.u32 %v5523_v15, %v4158_v18  ;;  %v4668_v38 = vld [vmem:[#allocation7 + $0x5b0] sm:$0xf]  ;;  %v5545_v15 = vld [vmem:[#allocation7 + $0x264] sm:$0xf0]  ;;  %v4164_v49 = vld [vmem:[#allocation7 + $0x1c0] sm:$0xf] }
 0x13c   : > { %1789 = vmatpush.bf16.msra.mxu1 %v4181_v56  ;;  %v5605_v56 = vld [vmem:[#allocation7 + $0x444] sm:$0xf0]  ;;  %v5527_v13 = vld [vmem:[#allocation7 + $0x1d4] sm:$0xf0] }
 0x13d   : > { %1852 = vmatpush.bf16.msrb.mxu2 %v4425_v61  ;;  %1776 = vmatpush.bf16.msra.mxu0 %v3989_v26  ;;  %v4617_v61 = vor.u32 %v5637_v36, %v4614_v20  ;;  %v5541_v26 = vld [vmem:[#allocation7 + $0x24c] sm:$0xf] }
 0x13e   : > { %1817 = vmatpush.bf16.msra.mxu3 %v4517_v9  ;;  %v4477_v9 = vor.u32 %v5605_v56, %v4476_v44  ;;  %v4116_v56 = vld [vmem:[#allocation7 + $0x160] sm:$0xf] }
 0x140   : > { %1790 = vmatpush.bf16.msra.mxu1 %v4157_v63  ;;  %v4233_v63 = vor.u32 %v5541_v26, %v4230_v5  ;;  %v5515_v5 = vld [vmem:[#allocation7 + $0x174] sm:$0xf0] }
 0x141   : > { %1853 = vmatpush.bf16.msrb.mxu2 %v4401_v60  ;;  %1777 = vmatpush.bf16.msra.mxu0 %v3965_v25  ;;  %v5493_v60 = vld [vmem:[#allocation7 + $0xcc] sm:$0xf] }
 0x142   : > { %1862 = vmatpush.bf16.msrb.mxu3 %v4689_v45  ;;  %v4566_v45 = vld [vmem:[#allocation7 + $0x500] sm:$0xf0]  ;;  %v4041_v46 = vor.u32 %v5493_v60, %v4038_v4  ;;  %v4137_v60 = vor.u32 %v5517_v33, %v4134_v37  ;;  %v4644_v4 = vld [vmem:[#allocation7 + $0x580] sm:$0xf]  ;;  %v5491_v37 = vld [vmem:[#allocation7 + $0xb4] sm:$0xf0] }
 0x143   : > { %1818 = vmatmul.bf16.vlgmr.msra.gmra.mxu3 %v6727_v28  ;;  %v4569_v25 = vor.u32 %v5625_v50, %v4566_v45  ;;  %v5647_v50 = vld [vmem:[#allocation7 + $0x594] sm:$0xf0]  ;;  %v4020_v33 = vld [vmem:[#allocation7 + $0xa0] sm:$0xf] }
 0x144   : > { %1791 = vmatpush.bf16.msra.mxu1 %v4133_v31 }
 0x145   : > { %1854 = vmatpush.bf16.msrb.mxu2 %v4377_v19  ;;  %1778 = vmatpush.bf16.msra.mxu0 %v3941_v57  ;;  %v5619_v19 = vld [vmem:[#allocation7 + $0x4bc] sm:$0xf]  ;;  %v3990_v57 = vld [vmem:[#allocation7 + $0x80] sm:$0xf0] }
 0x146   : > { %1863 = vmatpush.bf16.msrb.mxu3 %v4665_v2  ;;  %v4209_v2 = vor.u32 %v5535_v43, %v4206_v47  ;;  %v4545_v31 = vor.u32 %v5619_v19, %v4542_v35  ;;  %v5509_v43 = vld [vmem:[#allocation7 + $0x144] sm:$0xf0]  ;;  %v4284_v47 = vld [vmem:[#allocation7 + $0x2b0] sm:$0xf] }
 0x147   : > { %1792 = vmatmul.bf16.vlgmr.msra.gmra.mxu1 %v6746_v39  ;;  %v4620_v19 = vld [vmem:[#allocation7 + $0x550] sm:$0xf]  ;;  %v5641_v35 = vld [vmem:[#allocation7 + $0x564] sm:$0xf0] }
 0x148   : > { %1836 = vmatpush.bf16.msrb.mxu1 %v4305_v58  ;;  %1779 = vmatmul.bf16.vlgmr.msra.gmra.mxu0 %v6748_v62  ;;  %v5613_v58 = vld [vmem:[#allocation7 + $0x48c] sm:$0xf] }
 0x149   : > { %1823 = vmatpush.bf16.msrb.mxu0 %v4113_v3  ;;  %1855 = vmatpush.bf16.msrb.mxu2 %v4353_v6  ;;  %v4404_v3 = vld [vmem:[#allocation7 + $0x3a0] sm:$0xf]  ;;  %v5587_v6 = vld [vmem:[#allocation7 + $0x3b4] sm:$0xf0]  ;;  %v4521_v36 = vor.u32 %v5613_v58, %v4518_v1 }
 0x14a   : > { %1864 = vmatpush.bf16.msrb.mxu3 %v4641_v52  ;;  %v3993_v52 = vor.u32 %v5481_v34, %v3990_v57  ;;  %v4405_v20 = vor.u32 %v5587_v6, %v4404_v3  ;;  %v4505_v34 = vor.u32 %v5608_v53, %v4502_v54  ;;  %v4068_v57 = vld [vmem:[#allocation7 + $0x100] sm:$0xf]  ;;  %v5503_v58 = vld [vmem:[#allocation7 + $0x114] sm:$0xf0]  ;;  %v5602_v6 = vld [vmem:[#allocation7 + $0x434] sm:$0xf] }
 0x14b   : > { %v4596_v1 = vld [vmem:[#allocation7 + $0x520] sm:$0xf]  ;;  %v5635_v3 = vld [vmem:[#allocation7 + $0x534] sm:$0xf0] }
 0x14c   : > { %1837 = vmatpush.bf16.msrb.mxu1 %v4281_v24  ;;  %v4693_v24 = vor.u32 %v5659_v14, %v4692_v11  ;;  %v4069_v14 = vor.u32 %v5503_v58, %v4068_v57  ;;  %v4597_v18 = vor.u32 %v5635_v3, %v4596_v1  ;;  %v3972_v53 = vld [vmem:[#allocation7 + $0x40] sm:$0xf]  ;;  %v5479_v54 = vld [vmem:[#allocation7 + $0x54] sm:$0xf0]  ;;  %v5473_v58 = vld [vmem:[#allocation7 + $0x24] sm:$0xf0] }
 0x14d   : > { %1824 = vmatpush.bf16.msrb.mxu0 %v4089_v27  ;;  %1856 = vmatpush.bf16.msrb.mxu2 %v4329_v29  ;;  %v4380_v27 = vld [vmem:[#allocation7 + $0x370] sm:$0xf]  ;;  %v5581_v29 = vld [vmem:[#allocation7 + $0x384] sm:$0xf0]  ;;  %v3973_v57 = vor.u32 %v5479_v54, %v3972_v53  ;;  %v4214_v53 = vld [vmem:[#allocation7 + $0x238] sm:$0xf0] }
 0x14e   : > { %1865 = vmatpush.bf16.msrb.mxu3 %v4617_v61  ;;  %v5653_v61 = vld [vmem:[#allocation7 + $0x5c4] sm:$0xf0]  ;;  %v4381_v44 = vor.u32 %v5581_v29, %v4380_v27  ;;  %v5596_v27 = vld [vmem:[#allocation7 + $0x404] sm:$0xf]  ;;  %v4454_v29 = vld [vmem:[#allocation7 + $0x418] sm:$0xf0] }
 0x14f   : > { %v4669_v26 = vor.u32 %v5653_v61, %v4668_v38  ;;  %v4212_v61 = vld [vmem:[#allocation7 + $0x220] sm:$0xf]  ;;  %v4140_v1 = vld [vmem:[#allocation7 + $0x190] sm:$0xf]  ;;  %v5521_v3 = vld [vmem:[#allocation7 + $0x1a4] sm:$0xf0] }
 0x150   : > { %1857 = vmatmul.bf16.vlgmr.msrb.gmra.mxu2 %v6683_v16  ;;  %1838 = vmatpush.bf16.msrb.mxu1 %v4257_v42  ;;  %v4308_v42 = vld [vmem:[#allocation7 + $0x2e0] sm:$0xf] }
 0x151   : > { %1901 = vmatpush.bf16.msra.mxu2 %v4501_v30  ;;  %1825 = vmatpush.bf16.msrb.mxu0 %v4065_v40  ;;  %v5469_v30 = vld [vmem:[#allocation7 + $0xc] sm:$0xf]  ;;  %v5563_v40 = vld [vmem:[#allocation7 + $0x2f4] sm:$0xf0] }
 0x152   : > { %1866 = vmatpush.bf16.msrb.mxu3 %v4593_v41  ;;  %v4356_v41 = vld [vmem:[#allocation7 + $0x340] sm:$0xf]  ;;  %v3945_v45 = vor.u32 %v5469_v30, %v3942_v32  ;;  %v4309_v23 = vor.u32 %v5563_v40, %v4308_v42  ;;  %v5539_v30 = vld [vmem:[#allocation7 + $0x234] sm:$0xf0]  ;;  %v4457_v32 = vor.u32 %v5596_v27, %v4454_v29  ;;  %v5590_v42 = vld [vmem:[#allocation7 + $0x3d4] sm:$0xf] }
 0x153   : > { %v4430_v40 = vld [vmem:[#allocation7 + $0x3e8] sm:$0xf0] }
 0x154   : > { %1839 = vmatpush.bf16.msrb.mxu1 %v4233_v63  ;;  %v4117_v63 = vor.u32 %v5515_v5, %v4116_v56  ;;  %v5623_v56 = vld [vmem:[#allocation7 + $0x4d4] sm:$0xf0]  ;;  %v4021_v5 = vor.u32 %v5491_v37, %v4020_v33  ;;  %v5566_v33 = vld [vmem:[#allocation7 + $0x314] sm:$0xf]  ;;  %v4334_v37 = vld [vmem:[#allocation7 + $0x328] sm:$0xf0] }
 0x155   : > { %1902 = vmatpush.bf16.msra.mxu2 %v4477_v9  ;;  %1826 = vmatpush.bf16.msrb.mxu0 %v4041_v46  ;;  %v5575_v9 = vld [vmem:[#allocation7 + $0x354] sm:$0xf0] }
 0x156   : > { %1867 = vmatpush.bf16.msrb.mxu3 %v4569_v25  ;;  %v4357_v46 = vor.u32 %v5575_v9, %v4356_v41  ;;  %v5557_v25 = vld [vmem:[#allocation7 + $0x2c4] sm:$0xf0]  ;;  %v4188_v41 = vld [vmem:[#allocation7 + $0x1f0] sm:$0xf] }
 0x157   : > { %v5533_v9 = vld [vmem:[#allocation7 + $0x204] sm:$0xf0] }
 0x158   : > { %1840 = vmatpush.bf16.msrb.mxu1 %v4209_v2  ;;  %v4285_v2 = vor.u32 %v5557_v25, %v4284_v47  ;;  %v5656_v47 = vld [vmem:[#allocation7 + $0x5e4] sm:$0xf]  ;;  %v4694_v25 = vld [vmem:[#allocation7 + $0x5f8] sm:$0xf0] }
 0x159   : > { %1903 = vmatpush.bf16.msra.mxu2 %v4453_v48  ;;  %1827 = vmatpush.bf16.msrb.mxu0 %v4017_v55  ;;  %v4645_v48 = vor.u32 %v5647_v50, %v4644_v4  ;;  %v4093_v55 = vor.u32 %v5509_v43, %v4092_v17  ;;  %v4433_v4 = vor.u32 %v5590_v42, %v4430_v40  ;;  %v3996_v50 = vld [vmem:[#allocation7 + $0x70] sm:$0xf]  ;;  %v5617_v17 = vld [vmem:[#allocation7 + $0x4a4] sm:$0xf0] }
 0x15a   : > { %1868 = vmatpush.bf16.msrb.mxu3 %v4545_v31  ;;  %v5551_v31 = vld [vmem:[#allocation7 + $0x294] sm:$0xf0]  ;;  %v4189_v43 = vor.u32 %v5533_v9, %v4188_v41  ;;  %v4262_v41 = vld [vmem:[#allocation7 + $0x298] sm:$0xf0] }
 0x15b   : > { %v4261_v11 = vor.u32 %v5551_v31, %v4260_v59  ;;  %v4165_v59 = vor.u32 %v5527_v13, %v4164_v49  ;;  %v5650_v31 = vld [vmem:[#allocation7 + $0x5b4] sm:$0xf]  ;;  %v4574_v49 = vld [vmem:[#allocation7 + $0x508] sm:$0xf0] }
 0x15c   : > { %1841 = vmatpush.bf16.msrb.mxu1 %v4185_v10  ;;  %v4478_v10 = vld [vmem:[#allocation7 + $0x448] sm:$0xf0] }
 0x15d   : > { %1904 = vmatpush.bf16.msra.mxu2 %v4429_v0  ;;  %1828 = vmatpush.bf16.msrb.mxu0 %v3993_v52  ;;  %v4621_v0 = vor.u32 %v5641_v35, %v4620_v19  ;;  %v4236_v52 = vld [vmem:[#allocation7 + $0x250] sm:$0xf] }
 0x15e   : > { %1869 = vmatpush.bf16.msrb.mxu3 %v4521_v36  ;;  %v4481_v36 = vor.u32 %v5602_v6, %v4478_v10  ;;  %v5512_v10 = vld [vmem:[#allocation7 + $0x164] sm:$0xf] }
 0x160   : > { %1842 = vmatpush.bf16.msrb.mxu1 %v4161_v7  ;;  %v4237_v7 = vor.u32 %v5545_v15, %v4236_v52  ;;  %v4118_v15 = vld [vmem:[#allocation7 + $0x178] sm:$0xf0] }
 0x161   : > { %1905 = vmatpush.bf16.msra.mxu2 %v4405_v20  ;;  %1870 = vmatmul.bf16.vlgmr.msrb.gmra.mxu3 %v6727_v28  ;;  %v4044_v20 = vld [vmem:[#allocation7 + $0xd0] sm:$0xf]  ;;  %v4121_v29 = vor.u32 %v5512_v10, %v4118_v15 }
 0x162   : > { %1914 = vmatpush.bf16.msra.mxu3 %v4693_v24  ;;  %1829 = vmatpush.bf16.msrb.mxu0 %v3969_v12  ;;  %v5629_v24 = vld [vmem:[#allocation7 + $0x504] sm:$0xf0]  ;;  %v4045_v38 = vor.u32 %v5497_v21, %v4044_v20  ;;  %v4141_v20 = vor.u32 %v5521_v3, %v4140_v1  ;;  %v5644_v21 = vld [vmem:[#allocation7 + $0x584] sm:$0xf]  ;;  %v3998_v1 = vld [vmem:[#allocation7 + $0x88] sm:$0xf0] }
 0x163   : > { %v4573_v12 = vor.u32 %v5629_v24, %v4572_v22  ;;  %v4646_v22 = vld [vmem:[#allocation7 + $0x598] sm:$0xf0]  ;;  %v5614_v3 = vld [vmem:[#allocation7 + $0x494] sm:$0xf] }
 0x164   : > { %1843 = vmatpush.bf16.msrb.mxu1 %v4137_v60 }
 0x165   : > { %1906 = vmatpush.bf16.msra.mxu2 %v4381_v44  ;;  %v4548_v44 = vld [vmem:[#allocation7 + $0x4c0] sm:$0xf] }
 0x166   : > { %1915 = vmatpush.bf16.msra.mxu3 %v4669_v26  ;;  %1830 = vmatpush.bf16.msrb.mxu0 %v3945_v45  ;;  %v4213_v26 = vor.u32 %v5539_v30, %v4212_v61  ;;  %v4549_v60 = vor.u32 %v5623_v56, %v4548_v44  ;;  %v5485_v45 = vld [vmem:[#allocation7 + $0x84] sm:$0xf0]  ;;  %v5554_v61 = vld [vmem:[#allocation7 + $0x2b4] sm:$0xf]  ;;  %v4286_v30 = vld [vmem:[#allocation7 + $0x2c8] sm:$0xf0] }
 0x167   : > { %1844 = vmatmul.bf16.vlgmr.msrb.gmra.mxu1 %v6746_v39  ;;  %v5638_v44 = vld [vmem:[#allocation7 + $0x554] sm:$0xf]  ;;  %v4622_v56 = vld [vmem:[#allocation7 + $0x568] sm:$0xf0]  ;;  %v4289_v42 = vor.u32 %v5554_v61, %v4286_v30 }
 0x168   : > { %1888 = vmatpush.bf16.msra.mxu1 %v4309_v23  ;;  %v4524_v23 = vld [vmem:[#allocation7 + $0x490] sm:$0xf]  ;;  %v4625_v9 = vor.u32 %v5638_v44, %v4622_v56 }
 0x169   : > { %1907 = vmatpush.bf16.msra.mxu2 %v4357_v46  ;;  %1831 = vmatmul.bf16.vlgmr.msrb.gmra.mxu0 %v6748_v62  ;;  %v4406_v46 = vld [vmem:[#allocation7 + $0x3b8] sm:$0xf0]  ;;  %v4525_v19 = vor.u32 %v5617_v17, %v4524_v23 }
 0x16a   : > { %1875 = vmatpush.bf16.msra.mxu0 %v4117_v63  ;;  %1916 = vmatpush.bf16.msra.mxu3 %v4645_v48  ;;  %v5584_v63 = vld [vmem:[#allocation7 + $0x3a4] sm:$0xf]  ;;  %v3997_v48 = vor.u32 %v5485_v45, %v3996_v50  ;;  %v4598_v45 = vld [vmem:[#allocation7 + $0x538] sm:$0xf0] }
 0x16b   : > { %v4409_v35 = vor.u32 %v5584_v63, %v4406_v46  ;;  %v5632_v50 = vld [vmem:[#allocation7 + $0x524] sm:$0xf]  ;;  %v5542_v63 = vld [vmem:[#allocation7 + $0x254] sm:$0xf]  ;;  %v4238_v46 = vld [vmem:[#allocation7 + $0x268] sm:$0xf0] }
 0x16c   : > { %1889 = vmatpush.bf16.msra.mxu1 %v4285_v2  ;;  %v4697_v2 = vor.u32 %v5656_v47, %v4694_v25  ;;  %v5494_v47 = vld [vmem:[#allocation7 + $0xd4] sm:$0xf]  ;;  %v4046_v25 = vld [vmem:[#allocation7 + $0xe8] sm:$0xf0]  ;;  %v4241_v13 = vor.u32 %v5542_v63, %v4238_v46  ;;  %v5782_v63 = vld [vmem:[#allocation9 + $0x3cc] sm:$0xf0] }
 0x16d   : > { %1908 = vmatpush.bf16.msra.mxu2 %v4333_v8  ;;  %v4382_v8 = vld [vmem:[#allocation7 + $0x388] sm:$0xf0]  ;;  %v4780_v46 = vld [vmem:[#allocation9 + $0xa0] sm:$0xf] }
 0x16e   : > { %1876 = vmatpush.bf16.msra.mxu0 %v4093_v55  ;;  %1917 = vmatpush.bf16.msra.mxu3 %v4621_v0  ;;  %v5578_v55 = vld [vmem:[#allocation7 + $0x374] sm:$0xf]  ;;  %v4670_v0 = vld [vmem:[#allocation7 + $0x5c8] sm:$0xf0] }
 0x16f   : > { %v4385_v6 = vor.u32 %v5578_v55, %v4382_v8  ;;  %v4673_v52 = vor.u32 %v5650_v31, %v4670_v0  ;;  %v4022_v55 = vld [vmem:[#allocation7 + $0xb8] sm:$0xf0]  ;;  %v5620_v8 = vld [vmem:[#allocation7 + $0x4c4] sm:$0xf] }
 0x170   : > { %1909 = vmatmul.bf16.vlgmr.msra.gmra.mxu2 %v6683_v16  ;;  %1890 = vmatpush.bf16.msra.mxu1 %v4261_v11  ;;  %v5560_v11 = vld [vmem:[#allocation7 + $0x2e4] sm:$0xf] }
 0x171   : > { %1953 = vmatpush.bf16.msrb.mxu2 %v4505_v34  ;;  %v3948_v34 = vld [vmem:[#allocation7 + $0x10] sm:$0xf] }
 0x172   : > { %1877 = vmatpush.bf16.msra.mxu0 %v4069_v14  ;;  %1918 = vmatpush.bf16.msra.mxu3 %v4597_v18  ;;  %v4310_v14 = vld [vmem:[#allocation7 + $0x2f8] sm:$0xf0]  ;;  %v5572_v18 = vld [vmem:[#allocation7 + $0x344] sm:$0xf]  ;;  %v3949_v24 = vor.u32 %v5473_v58, %v3948_v34  ;;  %v5530_v34 = vld [vmem:[#allocation7 + $0x1f4] sm:$0xf] }
 0x173   : > { %v4313_v27 = vor.u32 %v5560_v11, %v4310_v14  ;;  %v5482_v58 = vld [vmem:[#allocation7 + $0x74] sm:$0xf]  ;;  %v5524_v14 = vld [vmem:[#allocation7 + $0x1c4] sm:$0xf] }
 0x174   : > { %1891 = vmatpush.bf16.msra.mxu1 %v4237_v7  ;;  %v4001_v11 = vor.u32 %v5482_v58, %v3998_v1 }
 0x175   : > { %1954 = vmatpush.bf16.msrb.mxu2 %v4481_v36  ;;  %v4358_v36 = vld [vmem:[#allocation7 + $0x358] sm:$0xf0] }
 0x176   : > { %1878 = vmatpush.bf16.msra.mxu0 %v4045_v38  ;;  %1919 = vmatpush.bf16.msra.mxu3 %v4573_v12  ;;  %v4361_v7 = vor.u32 %v5572_v18, %v4358_v36  ;;  %v5506_v38 = vld [vmem:[#allocation7 + $0x134] sm:$0xf]  ;;  %v4649_v12 = vor.u32 %v5644_v21, %v4646_v22  ;;  %v5476_v18 = vld [vmem:[#allocation7 + $0x44] sm:$0xf]  ;;  %v3974_v36 = vld [vmem:[#allocation7 + $0x58] sm:$0xf0] }
 0x177   : > { %v3977_v22 = vor.u32 %v5476_v18, %v3974_v36  ;;  %v4732_v36 = vld [vmem:[#allocation9 + $0x40] sm:$0xf] }
 0x178   : > { %1892 = vmatpush.bf16.msra.mxu1 %v4213_v26  ;;  %v4337_v26 = vor.u32 %v5566_v33, %v4334_v37 }
 0x179   : > { %1955 = vmatpush.bf16.msrb.mxu2 %v4457_v32  ;;  %v4094_v32 = vld [vmem:[#allocation7 + $0x148] sm:$0xf0] }
 0x17a   : > { %1879 = vmatpush.bf16.msra.mxu0 %v4021_v5  ;;  %1920 = vmatpush.bf16.msra.mxu3 %v4549_v60  ;;  %v4097_v40 = vor.u32 %v5506_v38, %v4094_v32  ;;  %v5548_v5 = vld [vmem:[#allocation7 + $0x284] sm:$0xf] }
 0x17b   : > { %v5500_v60 = vld [vmem:[#allocation7 + $0x104] sm:$0xf]  ;;  %v4265_v23 = vor.u32 %v5548_v5, %v4262_v41  ;;  %v4812_v41 = vld [vmem:[#allocation9 + $0xe0] sm:$0xf] }
 0x17c   : > { %1893 = vmatpush.bf16.msra.mxu1 %v4189_v43  ;;  %v4601_v43 = vor.u32 %v5632_v50, %v4598_v45  ;;  %v5786_v50 = vld [vmem:[#allocation9 + $0x3ec] sm:$0xf0] }
 0x17d   : > { %1956 = vmatpush.bf16.msrb.mxu2 %v4433_v4  ;;  %v4070_v4 = vld [vmem:[#allocation7 + $0x118] sm:$0xf0]  ;;  %v5686_v45 = vld [vmem:[#allocation9 + $0xcc] sm:$0xf0] }
 0x17e   : > { %1880 = vmatpush.bf16.msra.mxu0 %v3997_v48  ;;  %1921 = vmatpush.bf16.msra.mxu3 %v4525_v19  ;;  %v4073_v17 = vor.u32 %v5500_v60, %v4070_v4  ;;  %v5626_v48 = vld [vmem:[#allocation7 + $0x4f4] sm:$0xf]  ;;  %v4049_v19 = vor.u32 %v5494_v47, %v4046_v25  ;;  %v5196_v60 = vld [vmem:[#allocation9 + $0x3e0] sm:$0xf] }
 0x17f   : > { %v4577_v54 = vor.u32 %v5626_v48, %v4574_v49  ;;  %v5164_v25 = vld [vmem:[#allocation9 + $0x3a0] sm:$0xf]  ;;  %v5778_v48 = vld [vmem:[#allocation9 + $0x3ac] sm:$0xf0] }
 0x180   : > { %1894 = vmatpush.bf16.msra.mxu1 %v4165_v59  ;;  %v4550_v59 = vld [vmem:[#allocation7 + $0x4d8] sm:$0xf0] }
 0x181   : > { %1957 = vmatpush.bf16.msrb.mxu2 %v4409_v35  ;;  %1922 = vmatmul.bf16.vlgmr.msra.gmra.mxu3 %v6727_v28  ;;  %v5536_v35 = vld [vmem:[#allocation7 + $0x224] sm:$0xf] }
 0x182   : > { %1966 = vmatpush.bf16.msrb.mxu3 %v4697_v2  ;;  %1881 = vmatpush.bf16.msra.mxu0 %v3973_v57  ;;  %v5488_v2 = vld [vmem:[#allocation7 + $0xa4] sm:$0xf]  ;;  %v4217_v31 = vor.u32 %v5536_v35, %v4214_v53  ;;  %v4190_v57 = vld [vmem:[#allocation7 + $0x208] sm:$0xf0] }
 0x183   : > { %v4025_v0 = vor.u32 %v5488_v2, %v4022_v55  ;;  %v4193_v10 = vor.u32 %v5530_v34, %v4190_v57  ;;  %v5774_v34 = vld [vmem:[#allocation9 + $0x38c] sm:$0xf0]  ;;  %v4748_v57 = vld [vmem:[#allocation9 + $0x60] sm:$0xf] }
 0x184   : > { %1895 = vmatpush.bf16.msra.mxu1 %v4141_v20 }
 0x185   : > { %1958 = vmatpush.bf16.msrb.mxu2 %v4385_v6  ;;  %v4526_v6 = vld [vmem:[#allocation7 + $0x4a8] sm:$0xf0] }
 0x186   : > { %1967 = vmatpush.bf16.msrb.mxu3 %v4673_v52  ;;  %1882 = vmatpush.bf16.msra.mxu0 %v3949_v24  ;;  %v4166_v52 = vld [vmem:[#allocation7 + $0x1d8] sm:$0xf0]  ;;  %v4529_v15 = vor.u32 %v5614_v3, %v4526_v6  ;;  %v5518_v24 = vld [vmem:[#allocation7 + $0x194] sm:$0xf]  ;;  %v5132_v3 = vld [vmem:[#allocation9 + $0x360] sm:$0xf] }
 0x187   : > { %1896 = vmatmul.bf16.vlgmr.msra.gmra.mxu1 %v6746_v39  ;;  %v4169_v21 = vor.u32 %v5524_v14, %v4166_v52  ;;  %v5770_v6 = vld [vmem:[#allocation9 + $0x36c] sm:$0xf0] }
 0x188   : > { %1940 = vmatpush.bf16.msrb.mxu1 %v4313_v27  ;;  %v4142_v27 = vld [vmem:[#allocation7 + $0x1a8] sm:$0xf0]  ;;  %v5133_v18 = vor.u32 %v5770_v6, %v5132_v3 }
 0x189   : > { %1959 = vmatpush.bf16.msrb.mxu2 %v4361_v7  ;;  %1883 = vmatmul.bf16.vlgmr.msra.gmra.mxu0 %v6748_v62  ;;  %v3950_v7 = vld [vmem:[#allocation7 + $0x28] sm:$0xf0]  ;;  %v4145_v38 = vor.u32 %v5518_v24, %v4142_v27  ;;  %v5766_v24 = vld [vmem:[#allocation9 + $0x34c] sm:$0xf0] }
 0x18a   : > { %1927 = vmatpush.bf16.msrb.mxu0 %v4121_v29  ;;  %1968 = vmatpush.bf16.msrb.mxu3 %v4649_v12  ;;  %v5470_v29 = vld [vmem:[#allocation7 + $0x14] sm:$0xf] }
 0x18b   : > { %v3953_v61 = vor.u32 %v5470_v29, %v3950_v7 }
 0x18c   : > { %1941 = vmatpush.bf16.msrb.mxu1 %v4289_v42 }
 0x18d   : > { %1960 = vmatpush.bf16.msrb.mxu2 %v4337_v26 }
 0x18e   : > { %1928 = vmatpush.bf16.msrb.mxu0 %v4097_v40  ;;  %1969 = vmatpush.bf16.msrb.mxu3 %v4625_v9  ;;  %v5690_v9 = vld [vmem:[#allocation9 + $0xec] sm:$0xf0] }
 0x18f   : > { %v4813_v4 = vor.u32 %v5690_v9, %v4812_v41  ;;  %v5758_v9 = vld [vmem:[#allocation9 + $0x30c] sm:$0xf0] }
 0x190   : > { %1961 = vmatmul.bf16.vlgmr.msrb.gmra.mxu2 %v6683_v16  ;;  %1942 = vmatpush.bf16.msrb.mxu1 %v4265_v23  ;;  %v4553_v16 = vor.u32 %v5620_v8, %v4550_v59  ;;  %v5180_v23 = vld [vmem:[#allocation9 + $0x3c0] sm:$0xf]  ;;  %v5678_v59 = vld [vmem:[#allocation9 + $0x8c] sm:$0xf0] }
 0x191   : > { %v5181_v47 = vor.u32 %v5782_v63, %v5180_v23  ;;  %v4764_v8 = vld [vmem:[#allocation9 + $0x80] sm:$0xf]  ;;  %v5720_v23 = vld [vmem:[#allocation9 + $0x1e4] sm:$0xf] }
 0x192   : > { %1929 = vmatpush.bf16.msrb.mxu0 %v4073_v17  ;;  %1970 = vmatpush.bf16.msrb.mxu3 %v4601_v43  ;;  %v5682_v43 = vld [vmem:[#allocation9 + $0xac] sm:$0xf0] }
 0x193   : > { %v1702_v20 = vpop.f32.mrf.mxu2  ;;  %v4781_v35 = vor.u32 %v5682_v43, %v4780_v46  ;;  %v4942_v43 = vld [vmem:[#allocation9 + $0x1f0] sm:$0xf0] }
 0x194   : > { %1943 = vmatpush.bf16.msrb.mxu1 %v4241_v13 }
 0x196   : > { %1930 = vmatpush.bf16.msrb.mxu0 %v4049_v19  ;;  %1971 = vmatpush.bf16.msrb.mxu3 %v4577_v54  ;;  %v5165_v54 = vor.u32 %v5778_v48, %v5164_v25  ;;  %v4945_v25 = vor.u32 %v5720_v23, %v4942_v43  ;;  %v4924_v48 = vld [vmem:[#allocation9 + $0x1c0] sm:$0xf]  ;;  %v4846_v43 = vld [vmem:[#allocation9 + $0x130] sm:$0xf0] }
 0x198   : > { %1944 = vmatpush.bf16.msrb.mxu1 %v4217_v31  ;;  %v5148_v31 = vld [vmem:[#allocation9 + $0x380] sm:$0xf] }
 0x199   : > { %v5149_v1 = vor.u32 %v5774_v34, %v5148_v31  ;;  %v5714_v31 = vld [vmem:[#allocation9 + $0x1ac] sm:$0xf0] }
 0x19a   : > { %1931 = vmatpush.bf16.msrb.mxu0 %v4025_v0  ;;  %1972 = vmatpush.bf16.msrb.mxu3 %v4553_v16  ;;  %v4765_v0 = vor.u32 %v5678_v59, %v4764_v8  ;;  %v5674_v16 = vld [vmem:[#allocation9 + $0x6c] sm:$0xf0]  ;;  %v4908_v59 = vld [vmem:[#allocation9 + $0x1a0] sm:$0xf] }
 0x19b   : > { %v1704_v30 = vpop.f32.mrf.mxu2  ;;  %v4749_v52 = vor.u32 %v5674_v16, %v4748_v57  ;;  %v4909_v34 = vor.u32 %v5714_v31, %v4908_v59  ;;  %v5810_v57 = vld [vmem:[#allocation9 + $0x4ac] sm:$0xf0]  ;;  %v5712_v16 = vld [vmem:[#allocation9 + $0x1a4] sm:$0xf] }
 0x19c   : > { %1945 = vmatpush.bf16.msrb.mxu1 %v4193_v10  ;;  %v5666_v30 = vld [vmem:[#allocation9 + $0x2c] sm:$0xf0] }
 0x19e   : > { %1932 = vmatpush.bf16.msrb.mxu0 %v4001_v11  ;;  %1973 = vmatpush.bf16.msrb.mxu3 %v4529_v15 }
 0x1a0   : > { %1946 = vmatpush.bf16.msrb.mxu1 %v4169_v21  ;;  %v5116_v21 = vld [vmem:[#allocation9 + $0x340] sm:$0xf] }
 0x1a1   : > { %1974 = vmatmul.bf16.vlgmr.msrb.gmra.mxu3 %v6727_v28  ;;  %v5117_v27 = vor.u32 %v5766_v24, %v5116_v21  ;;  %v4876_v24 = vld [vmem:[#allocation9 + $0x160] sm:$0xf] }
 0x1a2   : > { %1933 = vmatpush.bf16.msrb.mxu0 %v3977_v22 }
 0x1a3   : > { %v1715_v12 = vpop.f32.mrf.mxu3  ;;  %v1754_v32 = vpop.f32.mrf.mxu2 }
 0x1a4   : > { %1947 = vmatpush.bf16.msrb.mxu1 %v4145_v38  ;;  %v1689_v33 = vpop.f32.mrf.mxu1 }
 0x1a5   : > { %v1676_v37 = vpop.f32.mrf.mxu0 }
 0x1a6   : > { %1934 = vmatpush.bf16.msrb.mxu0 %v3953_v61  ;;  %v1690_v44 = vadd.f32 %v1689_v33, %v1676_v37  ;;  %v4716_v61 = vld [vmem:[#allocation9 + $0x20] sm:$0xf]  ;;  %v5762_v37 = vld [vmem:[#allocation9 + $0x32c] sm:$0xf0] }
 0x1a7   : > { %1948 = vmatmul.bf16.vlgmr.msrb.gmra.mxu1 %v6746_v39  ;;  %v5197_v39 = vor.u32 %v5786_v50, %v5196_v60  ;;  %v4717_v33 = vor.u32 %v5666_v30, %v4716_v61  ;;  %v4940_v60 = vld [vmem:[#allocation9 + $0x1e0] sm:$0xf]  ;;  %v5704_v61 = vld [vmem:[#allocation9 + $0x164] sm:$0xf]  ;;  %v4878_v30 = vld [vmem:[#allocation9 + $0x170] sm:$0xf0] }
 0x1a8   : > { %v1703_v56 = vadd.f32 %v1702_v20, %v1690_v44  ;;  %v5670_v20 = vld [vmem:[#allocation9 + $0x4c] sm:$0xf0] }
 0x1a9   : > { %1935 = vmatmul.bf16.vlgmr.msrb.gmra.mxu0 %v6748_v62  ;;  %v4796_v62 = vld [vmem:[#allocation9 + $0xc0] sm:$0xf]  ;;  %3230 = vmatpush.bf16.msra.mxu3 %v5197_v39  ;;  %v4733_v22 = vor.u32 %v5670_v20, %v4732_v36  ;;  %v4894_v36 = vld [vmem:[#allocation9 + $0x190] sm:$0xf0] }
 0x1aa   : > { %v6771_v42 = vadd.f32 %v1715_v12, %v1703_v56  ;;  %3191 = vmatpush.bf16.msra.mxu0 %v4813_v4  ;;  %v4797_v17 = vor.u32 %v5686_v45, %v4796_v62  ;;  %v5100_v12 = vld [vmem:[#allocation9 + $0x320] sm:$0xf]  ;;  %v5722_v4 = vld [vmem:[#allocation9 + $0x1ec] sm:$0xf0] }
 0x1ab   : > { %v1717_v40 = vpop.f32.mrf.mxu3  ;;  %v1756_v26 = vpop.f32.mrf.mxu2  ;;  %v5101_v44 = vor.u32 %v5762_v37, %v5100_v12  ;;  %v4941_v39 = vor.u32 %v5722_v4, %v4940_v60  ;;  %v5324_v62 = vld [vmem:[#allocation9 + $0x4e0] sm:$0xf]  ;;  %v5818_v45 = vld [vmem:[#allocation9 + $0x4ec] sm:$0xf0] }
 0x1ac   : > { %v1691_v28 = vpop.f32.mrf.mxu1  ;;  %v4700_v40 = vld [vmem:[#allocation9] sm:$0xf]  ;;  %v5662_v26 = vld [vmem:[#allocation9 + $0xc] sm:$0xf0]  ;;  %v5325_v46 = vor.u32 %v5818_v45, %v5324_v62 }
 0x1ad   : > { %v1678_v5 = vpop.f32.mrf.mxu0  ;;  %3231 = vmatpush.bf16.msra.mxu3 %v5181_v47  ;;  %v5084_v28 = vld [vmem:[#allocation9 + $0x300] sm:$0xf]  ;;  %v4701_v41 = vor.u32 %v5662_v26, %v4700_v40  ;;  %3204 = vmatpush.bf16.msra.mxu1 %v4941_v39  ;;  %v5702_v37 = vld [vmem:[#allocation9 + $0x14c] sm:$0xf0]  ;;  %v5700_v26 = vld [vmem:[#allocation9 + $0x144] sm:$0xf] }
 0x1ae   : > { %3192 = vmatpush.bf16.msra.mxu0 %v4797_v17  ;;  %v5085_v50 = vor.u32 %v5758_v9, %v5084_v28  ;;  %v5798_v40 = vld [vmem:[#allocation9 + $0x44c] sm:$0xf0]  ;;  %v4862_v28 = vld [vmem:[#allocation9 + $0x150] sm:$0xf0]  ;;  %v4844_v39 = vld [vmem:[#allocation9 + $0x120] sm:$0xf] }
 0x1af   : > { %v4865_v9 = vor.u32 %v5700_v26, %v4862_v28  ;;  %v5698_v62 = vld [vmem:[#allocation9 + $0x12c] sm:$0xf0]  ;;  %v5228_v45 = vld [vmem:[#allocation9 + $0x420] sm:$0xf] }
 0x1b1   : > { %3232 = vmatpush.bf16.msra.mxu3 %v5165_v54  ;;  %v4926_v54 = vld [vmem:[#allocation9 + $0x1d0] sm:$0xf0] }
 0x1b2   : > { %3193 = vmatpush.bf16.msra.mxu0 %v4781_v35  ;;  %v5814_v35 = vld [vmem:[#allocation9 + $0x4cc] sm:$0xf0] }
 0x1b3   : > { %v1767_v49 = vpop.f32.mrf.mxu3 }
 0x1b4   : > { %v1741_v19 = vpop.f32.mrf.mxu1 }
 0x1b5   : > { %v1806_v13 = vpop.f32.mrf.mxu2  ;;  %v1728_v53 = vpop.f32.mrf.mxu0  ;;  %3233 = vmatpush.bf16.msra.mxu3 %v5149_v1  ;;  %v4910_v1 = vld [vmem:[#allocation9 + $0x1b0] sm:$0xf0] }
 0x1b6   : > { %v1742_v2 = vadd.f32 %v1741_v19, %v1728_v53  ;;  %3194 = vmatpush.bf16.msra.mxu0 %v4765_v0  ;;  %v5716_v53 = vld [vmem:[#allocation9 + $0x1c4] sm:$0xf]  ;;  %v5292_v0 = vld [vmem:[#allocation9 + $0x4a0] sm:$0xf]  ;;  %v4913_v6 = vor.u32 %v5712_v16, %v4910_v1 }
 0x1b7   : > { %v4929_v8 = vor.u32 %v5716_v53, %v4926_v54  ;;  %v5293_v3 = vor.u32 %v5810_v57, %v5292_v0  ;;  %v5790_v54 = vld [vmem:[#allocation9 + $0x40c] sm:$0xf0]  ;;  %v5068_v0 = vld [vmem:[#allocation9 + $0x2e0] sm:$0xf] }
 0x1b8   : > { %v1755_v55 = vadd.f32 %v1754_v32, %v1742_v2  ;;  %v5452_v57 = vld [vmem:[#allocation9 + $0x5e0] sm:$0xf] }
 0x1b9   : > { %3234 = vmatpush.bf16.msra.mxu3 %v5133_v18  ;;  %v5708_v18 = vld [vmem:[#allocation9 + $0x184] sm:$0xf] }
 0x1ba   : > { %v6773_v58 = vadd.f32 %v1767_v49, %v1755_v55  ;;  %3195 = vmatpush.bf16.msra.mxu0 %v4749_v52  ;;  %v5718_v49 = vld [vmem:[#allocation9 + $0x1cc] sm:$0xf0] }
 0x1bb   : > { %v1769_v10 = vpop.f32.mrf.mxu3  ;;  %v4925_v19 = vor.u32 %v5718_v49, %v4924_v48  ;;  %v4828_v49 = vld [vmem:[#allocation9 + $0x100] sm:$0xf] }
 0x1bc   : > { %v1743_v14 = vpop.f32.mrf.mxu1  ;;  %v4892_v10 = vld [vmem:[#allocation9 + $0x180] sm:$0xf] }
 0x1bd   : > { %v1808_v11 = vpop.f32.mrf.mxu2  ;;  %v1730_v15 = vpop.f32.mrf.mxu0  ;;  %3235 = vmatpush.bf16.msra.mxu3 %v5117_v27  ;;  %3205 = vmatpush.bf16.msra.mxu1 %v4925_v19  ;;  %v5276_v14 = vld [vmem:[#allocation9 + $0x480] sm:$0xf]  ;;  %v5706_v27 = vld [vmem:[#allocation9 + $0x16c] sm:$0xf0] }
 0x1be   : > { %3196 = vmatpush.bf16.msra.mxu0 %v4733_v22  ;;  %v5710_v11 = vld [vmem:[#allocation9 + $0x18c] sm:$0xf0]  ;;  %v4897_v22 = vor.u32 %v5708_v18, %v4894_v36  ;;  %v5212_v19 = vld [vmem:[#allocation9 + $0x400] sm:$0xf] }
 0x1bf   : > { %v4893_v52 = vor.u32 %v5710_v11, %v4892_v10  ;;  %v5806_v15 = vld [vmem:[#allocation9 + $0x48c] sm:$0xf0]  ;;  %v5213_v59 = vor.u32 %v5790_v54, %v5212_v19  ;;  %v5436_v36 = vld [vmem:[#allocation9 + $0x5c0] sm:$0xf] }
 0x1c0   : > { %v5277_v21 = vor.u32 %v5806_v15, %v5276_v14  ;;  %v5850_v10 = vld [vmem:[#allocation9 + $0x5ec] sm:$0xf0]  ;;  %v5052_v15 = vld [vmem:[#allocation9 + $0x2c0] sm:$0xf] }
 0x1c1   : > { %3236 = vmatpush.bf16.msra.mxu3 %v5101_v44  ;;  %3206 = vmatpush.bf16.msra.mxu1 %v4909_v34  ;;  %v5244_v44 = vld [vmem:[#allocation9 + $0x440] sm:$0xf]  ;;  %v5754_v34 = vld [vmem:[#allocation9 + $0x2ec] sm:$0xf0]  ;;  %v5453_v14 = vor.u32 %v5850_v10, %v5452_v57  ;;  %v5454_v10 = vld [vmem:[#allocation9 + $0x5f0] sm:$0xf0] }
 0x1c2   : > { %3197 = vmatpush.bf16.msra.mxu0 %v4717_v33  ;;  %v4860_v33 = vld [vmem:[#allocation9 + $0x140] sm:$0xf]  ;;  %v5750_v18 = vld [vmem:[#allocation9 + $0x2cc] sm:$0xf0] }
 0x1c3   : > { %v4972_v54 = vld [vmem:[#allocation9 + $0x220] sm:$0xf] }
 0x1c4   : > { %v1793_v7 = vpop.f32.mrf.mxu1 }
 0x1c5   : > { %v1780_v38 = vpop.f32.mrf.mxu0  ;;  %3237 = vmatpush.bf16.msra.mxu3 %v5085_v50  ;;  %3207 = vmatpush.bf16.msra.mxu1 %v4893_v52 }
 0x1c6   : > { %v1819_v29 = vpop.f32.mrf.mxu3  ;;  %v1794_v32 = vadd.f32 %v1793_v7, %v1780_v38  ;;  %3198 = vmatpush.bf16.msra.mxu0 %v4701_v41  ;;  %v4877_v7 = vor.u32 %v5706_v27, %v4876_v24  ;;  %v5802_v38 = vld [vmem:[#allocation9 + $0x46c] sm:$0xf0]  ;;  %v5245_v41 = vor.u32 %v5798_v40, %v5244_v44 }
 0x1c8   : > { %v1807_v56 = vadd.f32 %v1806_v13, %v1794_v32  ;;  %v5308_v13 = vld [vmem:[#allocation9 + $0x4c0] sm:$0xf]  ;;  %v4881_v32 = vor.u32 %v5704_v61, %v4878_v30  ;;  %v5842_v30 = vld [vmem:[#allocation9 + $0x5ac] sm:$0xf0] }
 0x1c9   : > { %3282 = vmatpush.bf16.msrb.mxu3 %v4945_v25  ;;  %v5309_v55 = vor.u32 %v5814_v35, %v5308_v13  ;;  %3208 = vmatpush.bf16.msra.mxu1 %v4877_v7  ;;  %v5694_v13 = vld [vmem:[#allocation9 + $0x10c] sm:$0xf0] }
 0x1ca   : > { %v6775_v5 = vadd.f32 %v1819_v29, %v1807_v56  ;;  %3243 = vmatpush.bf16.msrb.mxu0 %v5325_v46  ;;  %v5260_v29 = vld [vmem:[#allocation9 + $0x460] sm:$0xf]  ;;  %v4861_v56 = vor.u32 %v5702_v37, %v4860_v33  ;;  %v5696_v46 = vld [vmem:[#allocation9 + $0x124] sm:$0xf]  ;;  %v4829_v53 = vor.u32 %v5694_v13, %v4828_v49  ;;  %v5746_v7 = vld [vmem:[#allocation9 + $0x2ac] sm:$0xf0] }
 0x1cb   : > { %v5261_v12 = vor.u32 %v5802_v38, %v5260_v29  ;;  %v4849_v25 = vor.u32 %v5696_v46, %v4846_v43  ;;  %v5036_v29 = vld [vmem:[#allocation9 + $0x2a0] sm:$0xf]  ;;  %v5742_v33 = vld [vmem:[#allocation9 + $0x28c] sm:$0xf0] }
 0x1cc   : > { %v1795_v63 = vpop.f32.mrf.mxu1  ;;  %v5420_v38 = vld [vmem:[#allocation9 + $0x5a0] sm:$0xf]  ;;  %v5037_v61 = vor.u32 %v5746_v7, %v5036_v29 }
 0x1cd   : > { %v1782_v47 = vpop.f32.mrf.mxu0  ;;  %3283 = vmatpush.bf16.msrb.mxu3 %v4929_v8  ;;  %3209 = vmatpush.bf16.msra.mxu1 %v4861_v56  ;;  %v5794_v63 = vld [vmem:[#allocation9 + $0x42c] sm:$0xf0]  ;;  %v4830_v8 = vld [vmem:[#allocation9 + $0x110] sm:$0xf0]  ;;  %v5404_v37 = vld [vmem:[#allocation9 + $0x580] sm:$0xf] }
 0x1ce   : > { %v1821_v17 = vpop.f32.mrf.mxu3  ;;  %3244 = vmatpush.bf16.msrb.mxu0 %v5309_v55  ;;  %v5229_v47 = vor.u32 %v5794_v63, %v5228_v45  ;;  %v5692_v55 = vld [vmem:[#allocation9 + $0x104] sm:$0xf]  ;;  %v5838_v56 = vld [vmem:[#allocation9 + $0x58c] sm:$0xf0]  ;;  %v5372_v46 = vld [vmem:[#allocation9 + $0x540] sm:$0xf] }
 0x1cf   : > { %v4845_v17 = vor.u32 %v5698_v62, %v4844_v39  ;;  %v4833_v31 = vor.u32 %v5692_v55, %v4830_v8  ;;  %v5405_v28 = vor.u32 %v5838_v56, %v5404_v37  ;;  %v5388_v39 = vld [vmem:[#allocation9 + $0x560] sm:$0xf]  ;;  %v5834_v62 = vld [vmem:[#allocation9 + $0x56c] sm:$0xf0]  ;;  %v5844_v56 = vld [vmem:[#allocation9 + $0x5c4] sm:$0xf] }
 0x1d0   : > { %v5389_v45 = vor.u32 %v5834_v62, %v5388_v39  ;;  %v5734_v63 = vld [vmem:[#allocation9 + $0x24c] sm:$0xf0]  ;;  %v5356_v8 = vld [vmem:[#allocation9 + $0x520] sm:$0xf]  ;;  %v5684_v39 = vld [vmem:[#allocation9 + $0xc4] sm:$0xf] }
 0x1d1   : > { %3284 = vmatpush.bf16.msrb.mxu3 %v4913_v6  ;;  %3210 = vmatpush.bf16.msra.mxu1 %v4845_v17  ;;  %v5069_v6 = vor.u32 %v5754_v34, %v5068_v0  ;;  %v4988_v17 = vld [vmem:[#allocation9 + $0x240] sm:$0xf]  ;;  %v5730_v55 = vld [vmem:[#allocation9 + $0x22c] sm:$0xf0]  ;;  %v4798_v62 = vld [vmem:[#allocation9 + $0xd0] sm:$0xf0] }
 0x1d2   : > { %3245 = vmatpush.bf16.msrb.mxu0 %v5293_v3  ;;  %v4973_v0 = vor.u32 %v5730_v55, %v4972_v54  ;;  %v5826_v34 = vld [vmem:[#allocation9 + $0x52c] sm:$0xf0] }
 0x1d3   : > { %v6777_v2 = vpop.f32.mrf.mxu2  ;;  %3217 = vmatpush.bf16.msra.mxu2 %v5069_v6  ;;  %v5848_v6 = vld [vmem:[#allocation9 + $0x5e4] sm:$0xf] }
 0x1d5   : > { %3285 = vmatpush.bf16.msrb.mxu3 %v4897_v22  ;;  %3211 = vmatpush.bf16.msra.mxu1 %v4829_v53 }
 0x1d6   : > { %3246 = vmatpush.bf16.msrb.mxu0 %v5277_v21  ;;  %v5846_v21 = vld [vmem:[#allocation9 + $0x5cc] sm:$0xf0] }
 0x1d7   : > { %v5437_v27 = vor.u32 %v5846_v21, %v5436_v36  ;;  %v5340_v36 = vld [vmem:[#allocation9 + $0x500] sm:$0xf] }
 0x1d9   : > { %3286 = vmatpush.bf16.msrb.mxu3 %v4881_v32  ;;  %3256 = vmatpush.bf16.msrb.mxu1 %v5453_v14  ;;  %v5020_v32 = vld [vmem:[#allocation9 + $0x280] sm:$0xf] }
 0x1da   : > { %3247 = vmatpush.bf16.msrb.mxu0 %v5261_v12  ;;  %v5421_v12 = vor.u32 %v5842_v30, %v5420_v38  ;;  %v5021_v44 = vor.u32 %v5742_v33, %v5020_v32  ;;  %v4956_v14 = vld [vmem:[#allocation9 + $0x200] sm:$0xf]  ;;  %v5457_v30 = vor.u32 %v5848_v6, %v5454_v10  ;;  %v5688_v32 = vld [vmem:[#allocation9 + $0xe4] sm:$0xf]  ;;  %v4814_v33 = vld [vmem:[#allocation9 + $0xf0] sm:$0xf0] }
 0x1db   : > { %v1860_v20 = vpop.f32.mrf.mxu2  ;;  %v5732_v10 = vld [vmem:[#allocation9 + $0x244] sm:$0xf] }
 0x1dc   : > { %v5053_v20 = vor.u32 %v5750_v18, %v5052_v15 }
 0x1dd   : > { %3287 = vmatpush.bf16.msrb.mxu3 %v4865_v9  ;;  %3257 = vmatpush.bf16.msrb.mxu1 %v5437_v27  ;;  %v5004_v9 = vld [vmem:[#allocation9 + $0x260] sm:$0xf] }
 0x1de   : > { %3248 = vmatpush.bf16.msrb.mxu0 %v5245_v41  ;;  %3218 = vmatpush.bf16.msra.mxu2 %v5053_v20  ;;  %v5822_v20 = vld [vmem:[#allocation9 + $0x50c] sm:$0xf0] }
 0x1df   : > { %v5341_v27 = vor.u32 %v5822_v20, %v5340_v36  ;;  %v4750_v36 = vld [vmem:[#allocation9 + $0x70] sm:$0xf0] }
 0x1e1   : > { %3288 = vmatpush.bf16.msrb.mxu3 %v4849_v25  ;;  %3258 = vmatpush.bf16.msrb.mxu1 %v5421_v12  ;;  %v5830_v25 = vld [vmem:[#allocation9 + $0x54c] sm:$0xf0]  ;;  %v5748_v12 = vld [vmem:[#allocation9 + $0x2c4] sm:$0xf] }
 0x1e2   : > { %3249 = vmatpush.bf16.msrb.mxu0 %v5229_v47  ;;  %3219 = vmatpush.bf16.msra.mxu2 %v5037_v61  ;;  %v4989_v47 = vor.u32 %v5734_v63, %v4988_v17  ;;  %v5422_v17 = vld [vmem:[#allocation9 + $0x5b0] sm:$0xf0]  ;;  %v4801_v63 = vor.u32 %v5684_v39, %v4798_v62 }
 0x1e4   : > { %v1871_v60 = vpop.f32.mrf.mxu3  ;;  %v1845_v4 = vpop.f32.mrf.mxu1 }
 0x1e5   : > { %3289 = vmatpush.bf16.msrb.mxu3 %v4833_v31  ;;  %3259 = vmatpush.bf16.msrb.mxu1 %v5405_v28 }
 0x1e6   : > { %v1832_v50 = vpop.f32.mrf.mxu0  ;;  %3250 = vmatpush.bf16.msrb.mxu0 %v5213_v59  ;;  %3220 = vmatpush.bf16.msra.mxu2 %v5021_v44 }
 0x1e7   : > { %v1846_v23 = vadd.f32 %v1845_v4, %v1832_v50 }
 0x1e9   : > { %v1859_v48 = vadd.f32 %v6777_v2, %v1846_v23  ;;  %v1979_v2 = vmul.f32 %v6771_v42, %v6771_v42  ;;  %3260 = vmatpush.bf16.msrb.mxu1 %v5389_v45  ;;  %v5038_v45 = vld [vmem:[#allocation9 + $0x2b0] sm:$0xf0] }
 0x1eb   : > { %v6780_v35 = vadd.f32 %v1871_v60, %v1859_v48  ;;  %v5738_v60 = vld [vmem:[#allocation9 + $0x26c] sm:$0xf0]  ;;  %v5373_v48 = vor.u32 %v5830_v25, %v5372_v46  ;;  %v5680_v25 = vld [vmem:[#allocation9 + $0xa4] sm:$0xf] }
 0x1ec   : > { %v1873_v1 = vpop.f32.mrf.mxu3  ;;  %v1847_v3 = vpop.f32.mrf.mxu1  ;;  %v5005_v50 = vor.u32 %v5738_v60, %v5004_v9 }
 0x1ed   : > { %v1982_v16 = vmul.f32 %v6780_v35, %v6780_v35  ;;  %3261 = vmatpush.bf16.msrb.mxu1 %v5373_v48  ;;  %v5070_v3 = vld [vmem:[#allocation9 + $0x2f0] sm:$0xf0] }
 0x1ee   : > { %v1834_v11 = vpop.f32.mrf.mxu0  ;;  %3221 = vmatpush.bf16.msra.mxu2 %v5005_v50  ;;  %v4782_v48 = vld [vmem:[#allocation9 + $0xb0] sm:$0xf0] }
 0x1ef   : > { %v1985_v52 = vadd.f32 %v1982_v16, %v1979_v2  ;;  %v5752_v2 = vld [vmem:[#allocation9 + $0x2e4] sm:$0xf]  ;;  %v5357_v16 = vor.u32 %v5826_v34, %v5356_v8  ;;  %v4766_v34 = vld [vmem:[#allocation9 + $0x90] sm:$0xf0] }
 0x1f0   : > { %v5073_v61 = vor.u32 %v5752_v2, %v5070_v3  ;;  %v5006_v2 = vld [vmem:[#allocation9 + $0x270] sm:$0xf0] }
 0x1f1   : > { %v1988_v22 = vmax.f32 %v1985_v52, 1e-30  ;;  %v5726_v52 = vld [vmem:[#allocation9 + $0x20c] sm:$0xf0]  ;;  %3262 = vmatpush.bf16.msrb.mxu1 %v5357_v16  ;;  %v5832_v16 = vld [vmem:[#allocation9 + $0x564] sm:$0xf] }
 0x1f2   : > { %3222 = vmatpush.bf16.msra.mxu2 %v4989_v47  ;;  %v4957_v18 = vor.u32 %v5726_v52, %v4956_v14  ;;  %v5740_v47 = vld [vmem:[#allocation9 + $0x284] sm:$0xf]  ;;  %v4990_v52 = vld [vmem:[#allocation9 + $0x250] sm:$0xf0] }
 0x1f3   : > { %v1910_v24 = vpop.f32.mrf.mxu2  ;;  %6004 = vrsqrt.f32 %v1988_v22  ;;  %vm1997_vm9 = vweird.f32 %v1988_v22 }
 0x1f5   : > { %3263 = vmatpush.bf16.msrb.mxu1 %v5341_v27 }
 0x1f6   : > { %3223 = vmatpush.bf16.msra.mxu2 %v4973_v0  ;;  %v5676_v0 = vld [vmem:[#allocation9 + $0x84] sm:$0xf] }
 0x1f7   : > { %v4769_v3 = vor.u32 %v5676_v0, %v4766_v34 }
 0x1f9   : > { %v6005_v40 = vpop.eup %6004 }
 0x1fa   : > { %v1992_v41 = vmul.f32 %v6005_v40, %v1988_v22  ;;  %vm1998_vm0 = vweird.f32 %v6005_v40  ;;  %3224 = vmatpush.bf16.msra.mxu2 %v4957_v18  ;;  %v5672_v18 = vld [vmem:[#allocation9 + $0x64] sm:$0xf] }
 0x1fb   : > { %v1912_v26 = vpop.f32.mrf.mxu2  ;;  %vm1999_vm10 = vmor %vm1997_vm9, %vm1998_vm0  ;;  %v4753_v27 = vor.u32 %v5672_v18, %v4750_v36  ;;  %v4804_v18 = vld [vmem:[#allocation9 + $0xc8] sm:$0xf]  ;;  %v5687_v36 = vld [vmem:[#allocation9 + $0xd4] sm:$0xf0] }
 0x1fc   : > { %v1993_v4 = vmul.f32 %v6005_v40, %v1992_v41  ;;  %v4817_v26 = vor.u32 %v5688_v32, %v4814_v33  ;;  %v5744_v41 = vld [vmem:[#allocation9 + $0x2a4] sm:$0xf] }
 0x1fd   : > { %v5041_v46 = vor.u32 %v5744_v41, %v5038_v45 }
 0x1fe   : > { %v1994_v23 = vmul.f32 0.5, %v1993_v4  ;;  %3269 = vmatpush.bf16.msrb.mxu2 %v4817_v26 }
 0x200   : > { %v1995_v43 = vsub.f32 1.5, %v1994_v23  ;;  %v5840_v23 = vld [vmem:[#allocation9 + $0x5a4] sm:$0xf] }
 0x202   : > { %v1996_v49 = vmul.f32 %v6005_v40, %v1995_v43  ;;  %v5425_v43 = vor.u32 %v5840_v23, %v5422_v17  ;;  %3270 = vmatpush.bf16.msrb.mxu2 %v4801_v63  ;;  %v4718_v23 = vld [vmem:[#allocation9 + $0x30] sm:$0xf0]  ;;  %v5820_v63 = vld [vmem:[#allocation9 + $0x504] sm:$0xf] }
 0x204   : > { %v1923_v13 = vpop.f32.mrf.mxu3  ;;  %v1897_v19 = vpop.f32.mrf.mxu1  ;;  %v2000_v59 = vsel %vm1999_vm10, %v6005_v40, %v1996_v49  ;;  %v5438_v40 = vld [vmem:[#allocation9 + $0x5d0] sm:$0xf0] }
 0x205   : > { %v2021_v57 = vmul.f32 1e-08, %v2000_v59  ;;  %v5441_v50 = vor.u32 %v5844_v56, %v5438_v40  ;;  %v5022_v49 = vld [vmem:[#allocation9 + $0x290] sm:$0xf0] }
 0x206   : > { %v1884_v53 = vpop.f32.mrf.mxu0  ;;  %v5025_v8 = vor.u32 %v5740_v47, %v5022_v49  ;;  %v5358_v56 = vld [vmem:[#allocation9 + $0x530] sm:$0xf0]  ;;  %v5784_v49 = vld [vmem:[#allocation9 + $0x3e4] sm:$0xf] }
 0x207   : > { %v1898_v31 = vadd.f32 %v1897_v19, %v1884_v53  ;;  %v2024_v11 = vmax.f32 %v2021_v57, 1.0  ;;  %v5406_v19 = vld [vmem:[#allocation9 + $0x590] sm:$0xf0]  ;;  %v4785_v53 = vor.u32 %v5680_v25, %v4782_v48 }
 0x209   : > { %v1911_v1 = vadd.f32 %v1910_v24, %v1898_v31  ;;  %v2030_v21 = vmul.f32 %v2024_v11, %v6780_v35  ;;  %v2027_v22 = vmul.f32 %v2024_v11, %v6771_v42  ;;  %v1980_v24 = vmul.f32 %v6773_v58, %v6773_v58  ;;  %v5054_v42 = vld [vmem:[#allocation9 + $0x2d0] sm:$0xf0]  ;;  %v5736_v31 = vld [vmem:[#allocation9 + $0x264] sm:$0xf]  ;;  %3271 = vmatpush.bf16.msrb.mxu2 %v4785_v53 }
 0x20a   : > { %v5057_v4 = vor.u32 %v5748_v12, %v5054_v42  ;;  %v5009_v11 = vor.u32 %v5736_v31, %v5006_v2  ;;  %v5824_v42 = vld [vmem:[#allocation9 + $0x524] sm:$0xf]  ;;  %v1981_v31 = vmul.f32 %v6775_v5, %v6775_v5 }
 0x20b   : > { %v6786_v15 = vadd.f32 %v1923_v13, %v1911_v1  ;;  %v6794_v37 = vpack.c.bf16 %v2030_v21, %v2030_v21  ;;  %v6796_v35 = vpack.c.bf16 %v2027_v22, %v2027_v22  ;;  %v5836_v13 = vld [vmem:[#allocation9 + $0x584] sm:$0xf]  ;;  %v5390_v1 = vld [vmem:[#allocation9 + $0x570] sm:$0xf0]  ;;  %v5361_v45 = vor.u32 %v5824_v42, %v5358_v56 }
 0x20c   : > { %v1925_v7 = vpop.f32.mrf.mxu3  ;;  %v1899_v38 = vpop.f32.mrf.mxu1  ;;  %v5409_v59 = vor.u32 %v5836_v13, %v5406_v19  ;;  %v5393_v14 = vor.u32 %v5832_v16, %v5390_v1  ;;  %v5828_v21 = vld [vmem:[#allocation9 + $0x544] sm:$0xf]  ;;  %v5374_v22 = vld [vmem:[#allocation9 + $0x550] sm:$0xf0]  ;;  %v4820_v19 = vld [vmem:[#allocation9 + $0xe8] sm:$0xf] }
 0x20d   : > { %v1983_v29 = vmul.f32 %v6786_v15, %v6786_v15  ;;  %3199 = vmatmul.bf16.vlgmr.msra.gmra.mxu0 %v6796_v35  ;;  %3238 = vmatmul.bf16.vlgmr.msra.gmra.mxu3 %v6794_v37  ;;  %v5377_v7 = vor.u32 %v5828_v21, %v5374_v22  ;;  %v5728_v38 = vld [vmem:[#allocation9 + $0x224] sm:$0xf]  ;;  %v5198_v13 = vld [vmem:[#allocation9 + $0x3f0] sm:$0xf0]  ;;  %v5783_v21 = vld [vmem:[#allocation9 + $0x3d4] sm:$0xf0] }
 0x20e   : > { %v1886_v44 = vpop.f32.mrf.mxu0  ;;  %3295 = vmatpush.bf16.msra.mxu0 %v5073_v61  ;;  %3334 = vmatpush.bf16.msra.mxu3 %v5457_v30  ;;  %v5668_v61 = vld [vmem:[#allocation9 + $0x44] sm:$0xf]  ;;  %v4734_v30 = vld [vmem:[#allocation9 + $0x50] sm:$0xf0] }
 0x20f   : > { %v1986_v28 = vadd.f32 %v1983_v29, %v1980_v24  ;;  %3272 = vmatpush.bf16.msrb.mxu2 %v4769_v3  ;;  %v4993_v29 = vor.u32 %v5732_v10, %v4990_v52  ;;  %v4974_v44 = vld [vmem:[#allocation9 + $0x230] sm:$0xf0]  ;;  %v4737_v40 = vor.u32 %v5668_v61, %v4734_v30  ;;  %v5660_v2 = vld [vmem:[#allocation9 + $0x4] sm:$0xf]  ;;  %v4788_v30 = vld [vmem:[#allocation9 + $0xa8] sm:$0xf] }
 0x210   : > { %v4977_v62 = vor.u32 %v5728_v38, %v4974_v44  ;;  %v4702_v16 = vld [vmem:[#allocation9 + $0x10] sm:$0xf0]  ;;  %v5776_v38 = vld [vmem:[#allocation9 + $0x3a4] sm:$0xf] }
 0x211   : > { %v6800_v9 = vmax.f32 %v1986_v28, 1e-30  ;;  %v5182_v52 = vld [vmem:[#allocation9 + $0x3d0] sm:$0xf0]  ;;  %v4705_v22 = vor.u32 %v5660_v2, %v4702_v16  ;;  %v5760_v16 = vld [vmem:[#allocation9 + $0x324] sm:$0xf] }
 0x212   : > { %3296 = vmatpush.bf16.msra.mxu0 %v5057_v4  ;;  %3335 = vmatpush.bf16.msra.mxu3 %v5441_v50  ;;  %v5724_v4 = vld [vmem:[#allocation9 + $0x204] sm:$0xf]  ;;  %v4958_v50 = vld [vmem:[#allocation9 + $0x210] sm:$0xf0] }
 0x213   : > { %v6802_v60 = vpop.f32.mrf.mxu2  ;;  %6006 = vrsqrt.f32 %v6800_v9  ;;  %vm2007_vm13 = vweird.f32 %v6800_v9  ;;  %3273 = vmatpush.bf16.msrb.mxu2 %v4753_v27  ;;  %v4961_v48 = vor.u32 %v5724_v4, %v4958_v50  ;;  %v5166_v61 = vld [vmem:[#allocation9 + $0x3b0] sm:$0xf0]  ;;  %v5156_v4 = vld [vmem:[#allocation9 + $0x388] sm:$0xf]  ;;  %v5775_v50 = vld [vmem:[#allocation9 + $0x394] sm:$0xf0] }
 0x214   : > { %v5169_v44 = vor.u32 %v5776_v38, %v5166_v61  ;;  %v5663_v38 = vld [vmem:[#allocation9 + $0x14] sm:$0xf0]  ;;  %v5092_v61 = vld [vmem:[#allocation9 + $0x308] sm:$0xf] }
 0x216   : > { %3297 = vmatpush.bf16.msra.mxu0 %v5041_v46  ;;  %3336 = vmatpush.bf16.msra.mxu3 %v5425_v43  ;;  %v5342_v46 = vld [vmem:[#allocation9 + $0x510] sm:$0xf0] }
 0x217   : > { %3274 = vmatpush.bf16.msrb.mxu2 %v4737_v40  ;;  %v5772_v40 = vld [vmem:[#allocation9 + $0x384] sm:$0xf] }
 0x219   : > { %v6007_v54 = vpop.eup %6006 }
 0x21a   : > { %v2002_v57 = vmul.f32 %v6007_v54, %v6800_v9  ;;  %3298 = vmatpush.bf16.msra.mxu0 %v5025_v8  ;;  %3337 = vmatpush.bf16.msra.mxu3 %v5409_v59  ;;  %vm2008_vm12 = vweird.f32 %v6007_v54  ;;  %v5664_v9 = vld [vmem:[#allocation9 + $0x24] sm:$0xf]  ;;  %v5691_v8 = vld [vmem:[#allocation9 + $0xf4] sm:$0xf0] }
 0x21b   : > { %v1964_v55 = vpop.f32.mrf.mxu2  ;;  %vm2009_vm15 = vmor %vm2007_vm13, %vm2008_vm12  ;;  %v4721_v43 = vor.u32 %v5664_v9, %v4718_v23  ;;  %v5787_v59 = vld [vmem:[#allocation9 + $0x3f4] sm:$0xf0]  ;;  %v4821_v10 = vor.u32 %v5691_v8, %v4820_v19  ;;  %v5157_v23 = vor.u32 %v5775_v50, %v5156_v4  ;;  %v5118_v8 = vld [vmem:[#allocation9 + $0x350] sm:$0xf0]  ;;  %vm7033_vm12 = vcmask 1042434  }
 0x21c   : > { %v2003_v6 = vmul.f32 %v6007_v54, %v2002_v57  ;;  %vm6868_vm13 = vcmp.lt.s32.totalorder %v500_v51, 512 }
 0x21d   : > { %3275 = vmatpush.bf16.msrb.mxu2 %v4721_v43 }
 0x21e   : > { %v2004_v20 = vmul.f32 0.5, %v2003_v6  ;;  %3299 = vmatpush.bf16.msra.mxu0 %v5009_v11  ;;  %3338 = vmatpush.bf16.msra.mxu3 %v5393_v14  ;;  %v5780_v14 = vld [vmem:[#allocation9 + $0x3c4] sm:$0xf] }
 0x220   : > { %v2005_v24 = vsub.f32 1.5, %v2004_v20  ;;  %v5188_v20 = vld [vmem:[#allocation9 + $0x3c8] sm:$0xf] }
 0x221   : > { %3276 = vmatpush.bf16.msrb.mxu2 %v4705_v22  ;;  %v5086_v22 = vld [vmem:[#allocation9 + $0x310] sm:$0xf0] }
 0x222   : > { %v2006_v12 = vmul.f32 %v6007_v54, %v2005_v24  ;;  %3300 = vmatpush.bf16.msra.mxu0 %v4993_v29  ;;  %3339 = vmatpush.bf16.msra.mxu3 %v5377_v7  ;;  %v5185_v24 = vor.u32 %v5780_v14, %v5182_v52  ;;  %v4805_v29 = vor.u32 %v5687_v36, %v4804_v18  ;;  %v5667_v14 = vld [vmem:[#allocation9 + $0x34] sm:$0xf0]  ;;  %v5108_v52 = vld [vmem:[#allocation9 + $0x328] sm:$0xf] }
 0x223   : > { %v5189_v7 = vor.u32 %v5783_v21, %v5188_v20  ;;  %v5763_v18 = vld [vmem:[#allocation9 + $0x334] sm:$0xf0]  ;;  %v5756_v21 = vld [vmem:[#allocation9 + $0x304] sm:$0xf] }
 0x224   : > { %v1975_v32 = vpop.f32.mrf.mxu3  ;;  %v1949_v33 = vpop.f32.mrf.mxu1  ;;  %v2010_v28 = vsel %vm2009_vm15, %v6007_v54, %v2006_v12  ;;  %v5345_v54 = vor.u32 %v5820_v63, %v5342_v46  ;;  %v5683_v12 = vld [vmem:[#allocation9 + $0xb4] sm:$0xf0]  ;;  %v5134_v63 = vld [vmem:[#allocation9 + $0x370] sm:$0xf0]  ;;  %v4756_v46 = vld [vmem:[#allocation9 + $0x68] sm:$0xf] }
 0x225   : > { %v2022_v39 = vmul.f32 1e-08, %v2010_v28  ;;  %v4789_v42 = vor.u32 %v5683_v12, %v4788_v30  ;;  %v4772_v28 = vld [vmem:[#allocation9 + $0x88] sm:$0xf]  ;;  %v5759_v30 = vld [vmem:[#allocation9 + $0x314] sm:$0xf0] }
 0x226   : > { %v1936_v26 = vpop.f32.mrf.mxu0  ;;  %3301 = vmatpush.bf16.msra.mxu0 %v4977_v62  ;;  %3340 = vmatpush.bf16.msra.mxu3 %v5361_v45  ;;  %v5093_v50 = vor.u32 %v5759_v30, %v5092_v61  ;;  %v5707_v30 = vld [vmem:[#allocation9 + $0x174] sm:$0xf0]  ;;  %vm3541_vm15 = vcmp.ge.s32.totalorder %v500_v51, 80 }
 0x227   : > { %v1950_v41 = vadd.f32 %v1949_v33, %v1936_v26  ;;  %v2025_v47 = vmax.f32 %v2022_v39, 1.0  ;;  %v5779_v33 = vld [vmem:[#allocation9 + $0x3b4] sm:$0xf0]  ;;  %v5150_v26 = vld [vmem:[#allocation9 + $0x390] sm:$0xf0] }
 0x228   : > { %v5153_v45 = vor.u32 %v5772_v40, %v5150_v26  ;;  %v5723_v26 = vld [vmem:[#allocation9 + $0x1f4] sm:$0xf0] }
 0x229   : > { %v1963_v17 = vadd.f32 %v6802_v60, %v1950_v41  ;;  %v2031_v53 = vmul.f32 %v2025_v47, %v6786_v15  ;;  %v2028_v55 = vmul.f32 %v2025_v47, %v6773_v58  ;;  %v5204_v60 = vld [vmem:[#allocation9 + $0x3e8] sm:$0xf]  ;;  %v5201_v58 = vor.u32 %v5784_v49, %v5198_v13  ;;  %v5679_v41 = vld [vmem:[#allocation9 + $0x94] sm:$0xf0] }
 0x22a   : > { %v5205_v11 = vor.u32 %v5787_v59, %v5204_v60  ;;  %3302 = vmatpush.bf16.msra.mxu0 %v4961_v48  ;;  %3341 = vmatpush.bf16.msra.mxu3 %v5345_v54  ;;  %v4773_v9 = vor.u32 %v5679_v41, %v4772_v28  ;;  %v5675_v47 = vld [vmem:[#allocation9 + $0x74] sm:$0xf0]  ;;  %v5140_v48 = vld [vmem:[#allocation9 + $0x368] sm:$0xf] }
 0x22b   : > { %v6809_v25 = vadd.f32 %v1975_v32, %v1963_v17  ;;  %v6817_v15 = vpack.c.bf16 %v2031_v53, %v2031_v53  ;;  %v6819_v3 = vpack.c.bf16 %v2028_v55, %v2028_v55  ;;  %v5172_v32 = vld [vmem:[#allocation9 + $0x3a8] sm:$0xf]  ;;  %v5768_v17 = vld [vmem:[#allocation9 + $0x364] sm:$0xf]  ;;  %v5771_v49 = vld [vmem:[#allocation9 + $0x374] sm:$0xf0]  ;;  %v4757_v54 = vor.u32 %v5675_v47, %v4756_v46 }
 0x22c   : > { %v1977_v34 = vpop.f32.mrf.mxu3  ;;  %v1951_v57 = vpop.f32.mrf.mxu1  ;;  %v5173_v56 = vor.u32 %v5779_v33, %v5172_v32  ;;  %v5137_v19 = vor.u32 %v5768_v17, %v5134_v63  ;;  %v5764_v53 = vld [vmem:[#allocation9 + $0x344] sm:$0xf]  ;;  %v5141_v55 = vor.u32 %v5771_v49, %v5140_v48  ;;  %v4740_v60 = vld [vmem:[#allocation9 + $0x48] sm:$0xf]  ;;  %v5671_v59 = vld [vmem:[#allocation9 + $0x54] sm:$0xf0] }
 0x22d   : > { %v1984_v0 = vmul.f32 %v6809_v25, %v6809_v25  ;;  %3212 = vmatmul.bf16.vlgmr.msra.gmra.mxu1 %v6819_v3  ;;  %3251 = vmatmul.bf16.vlgmr.msrb.gmra.mxu0 %v6817_v15  ;;  %v5767_v34 = vld [vmem:[#allocation9 + $0x354] sm:$0xf0]  ;;  %v5121_v2 = vor.u32 %v5764_v53, %v5118_v8  ;;  %v5816_v33 = vld [vmem:[#allocation9 + $0x4e4] sm:$0xf]  ;;  %v5332_v28 = vld [vmem:[#allocation9 + $0x4e8] sm:$0xf] }
 0x22e   : > { %v1938_v1 = vpop.f32.mrf.mxu0  ;;  %3290 = vmatmul.bf16.vlgmr.msrb.gmra.mxu3 %v6819_v3  ;;  %3308 = vmatpush.bf16.msra.mxu1 %v5201_v58  ;;  %v5819_v41 = vld [vmem:[#allocation9 + $0x4f4] sm:$0xf0]  ;;  %v5310_v17 = vld [vmem:[#allocation9 + $0x4d0] sm:$0xf0]  ;;  %v4932_v63 = vld [vmem:[#allocation9 + $0x1c8] sm:$0xf] }
 0x22f   : > { %v1987_v6 = vadd.f32 %v1984_v0, %v1981_v31  ;;  %3347 = vmatpush.bf16.msrb.mxu0 %v4821_v10  ;;  %3386 = vmatpush.bf16.msrb.mxu3 %v5205_v11  ;;  %v5124_v0 = vld [vmem:[#allocation9 + $0x348] sm:$0xf]  ;;  %v4741_v1 = vor.u32 %v5671_v59, %v4740_v60  ;;  %v5815_v48 = vld [vmem:[#allocation9 + $0x4d4] sm:$0xf0]  ;;  %v5717_v49 = vld [vmem:[#allocation9 + $0x1cc] sm:$0xf] }
 0x230   : > { %v5125_v58 = vor.u32 %v5767_v34, %v5124_v0  ;;  %v4724_v10 = vld [vmem:[#allocation9 + $0x28] sm:$0xf]  ;;  %v5294_v8 = vld [vmem:[#allocation9 + $0x4b0] sm:$0xf0]  ;;  %v5811_v34 = vld [vmem:[#allocation9 + $0x4b4] sm:$0xf0] }
 0x231   : > { %v6821_v27 = vmax.f32 %v1987_v6, 1e-30  ;;  %v5102_v6 = vld [vmem:[#allocation9 + $0x330] sm:$0xf0]  ;;  %v5316_v47 = vld [vmem:[#allocation9 + $0x4c8] sm:$0xf] }
 0x232   : > { %3309 = vmatpush.bf16.msra.mxu1 %v5185_v24  ;;  %v5105_v20 = vor.u32 %v5760_v16, %v5102_v6  ;;  %v4725_v24 = vor.u32 %v5667_v14, %v4724_v10  ;;  %v4916_v60 = vld [vmem:[#allocation9 + $0x1a8] sm:$0xf]  ;;  %v5804_v6 = vld [vmem:[#allocation9 + $0x484] sm:$0xf]  ;;  %v5278_v10 = vld [vmem:[#allocation9 + $0x490] sm:$0xf0] }
 0x233   : > { %6008 = vrsqrt.f32 %v6821_v27  ;;  %3348 = vmatpush.bf16.msrb.mxu0 %v4805_v29  ;;  %3387 = vmatpush.bf16.msrb.mxu3 %v5189_v7  ;;  %vm2017_vm9 = vweird.f32 %v6821_v27  ;;  %v5109_v29 = vor.u32 %v5763_v18, %v5108_v52  ;;  %v4708_v7 = vld [vmem:[#allocation9 + $0x8] sm:$0xf]  ;;  %v5711_v52 = vld [vmem:[#allocation9 + $0x194] sm:$0xf0] }
 0x234   : > { %v4709_v40 = vor.u32 %v5663_v38, %v4708_v7  ;;  %v5300_v0 = vld [vmem:[#allocation9 + $0x4a8] sm:$0xf]  ;;  %v5262_v7 = vld [vmem:[#allocation9 + $0x470] sm:$0xf0] }
 0x235   : > { %v5284_v18 = vld [vmem:[#allocation9 + $0x488] sm:$0xf] }
 0x236   : > { %3310 = vmatpush.bf16.msra.mxu1 %v5169_v44  ;;  %v5326_v44 = vld [vmem:[#allocation9 + $0x4f0] sm:$0xf0]  ;;  %v4884_v38 = vld [vmem:[#allocation9 + $0x168] sm:$0xf] }
 0x237   : > { %3349 = vmatpush.bf16.msrb.mxu0 %v4789_v42  ;;  %3388 = vmatpush.bf16.msrb.mxu3 %v5173_v56  ;;  %v4948_v42 = vld [vmem:[#allocation9 + $0x1e8] sm:$0xf]  ;;  %v5089_v56 = vor.u32 %v5756_v21, %v5086_v22  ;;  %v4902_v21 = vld [vmem:[#allocation9 + $0x198] sm:$0xf0]  ;;  %v5281_v22 = vor.u32 %v5804_v6, %v5278_v10  ;;  %v5755_v10 = vld [vmem:[#allocation9 + $0x2f4] sm:$0xf0] }
 0x238   : > { %v5076_v6 = vld [vmem:[#allocation9 + $0x2e8] sm:$0xf] }
 0x239   : > { %v6009_v39 = vpop.eup %6008 }
 0x23a   : > { %v2012_v62 = vmul.f32 %v6009_v39, %v6821_v27  ;;  %3311 = vmatpush.bf16.msra.mxu1 %v5153_v45  ;;  %vm2018_vm0 = vweird.f32 %v6009_v39  ;;  %v5329_v45 = vor.u32 %v5816_v33, %v5326_v44  ;;  %v5705_v33 = vld [vmem:[#allocation9 + $0x16c] sm:$0xf]  ;;  %v4886_v44 = vld [vmem:[#allocation9 + $0x178] sm:$0xf0] }
 0x23b   : > { %3350 = vmatpush.bf16.msrb.mxu0 %v4773_v9  ;;  %3389 = vmatpush.bf16.msrb.mxu3 %v5157_v23  ;;  %vm2019_vm10 = vmor %vm2017_vm9, %vm2018_vm0  ;;  %v5333_v9 = vor.u32 %v5819_v41, %v5332_v28  ;;  %v5812_v23 = vld [vmem:[#allocation9 + $0x4c4] sm:$0xf]  ;;  %v5246_v28 = vld [vmem:[#allocation9 + $0x450] sm:$0xf0]  ;;  %vm3542_vm0 = vcmp.lt.s32.totalorder %v500_v51, 592 }
 0x23c   : > { %v2013_v43 = vmul.f32 %v6009_v39, %v2012_v62  ;;  %v5721_v62 = vld [vmem:[#allocation9 + $0x1ec] sm:$0xf]  ;;  %v4868_v41 = vld [vmem:[#allocation9 + $0x148] sm:$0xf]  ;;  %vm3543_vm9 = vmand %vm3541_vm15, %vm3542_vm0  ;;  %vm3576_vm0 = vcmp.lt.s32.totalorder %v500_v51, 624 }
 0x23e   : > { %v2014_v13 = vmul.f32 0.5, %v2013_v43  ;;  %3312 = vmatpush.bf16.msra.mxu1 %v5137_v19  ;;  %v5719_v43 = vld [vmem:[#allocation9 + $0x1d4] sm:$0xf0]  ;;  %v5313_v19 = vor.u32 %v5812_v23, %v5310_v17 }
 0x23f   : > { %3351 = vmatpush.bf16.msrb.mxu0 %v4757_v54  ;;  %3390 = vmatpush.bf16.msrb.mxu3 %v5141_v55  ;;  %v4933_v53 = vor.u32 %v5719_v43, %v4932_v63  ;;  %v5317_v54 = vor.u32 %v5815_v48, %v5316_v47  ;;  %v5808_v55 = vld [vmem:[#allocation9 + $0x4a4] sm:$0xf]  ;;  %v5230_v43 = vld [vmem:[#allocation9 + $0x430] sm:$0xf0]  ;;  %v4852_v47 = vld [vmem:[#allocation9 + $0x128] sm:$0xf] }
 0x240   : > { %v2015_v31 = vsub.f32 1.5, %v2014_v13  ;;  %v4934_v13 = vld [vmem:[#allocation9 + $0x1d8] sm:$0xf0]  ;;  %v5297_v16 = vor.u32 %v5808_v55, %v5294_v8  ;;  %v5788_v8 = vld [vmem:[#allocation9 + $0x404] sm:$0xf] }
 0x241   : > { %v4937_v59 = vor.u32 %v5717_v49, %v4934_v13  ;;  %v5699_v49 = vld [vmem:[#allocation9 + $0x134] sm:$0xf0]  ;;  %v5236_v13 = vld [vmem:[#allocation9 + $0x428] sm:$0xf] }
 0x242   : > { %v2016_v57 = vmul.f32 %v6009_v39, %v2015_v31  ;;  %3313 = vmatpush.bf16.msra.mxu1 %v5121_v2  ;;  %v5715_v31 = vld [vmem:[#allocation9 + $0x1b4] sm:$0xf0]  ;;  %v4918_v2 = vld [vmem:[#allocation9 + $0x1b8] sm:$0xf0] }
 0x243   : > { %3352 = vmatpush.bf16.msrb.mxu0 %v4741_v1  ;;  %3391 = vmatpush.bf16.msrb.mxu3 %v5125_v58  ;;  %v4917_v1 = vor.u32 %v5715_v31, %v4916_v60  ;;  %v5301_v58 = vor.u32 %v5811_v34, %v5300_v0  ;;  %v5214_v60 = vld [vmem:[#allocation9 + $0x410] sm:$0xf0]  ;;  %v4836_v0 = vld [vmem:[#allocation9 + $0x108] sm:$0xf]  ;;  %v5695_v34 = vld [vmem:[#allocation9 + $0x114] sm:$0xf0] }
 0x244   : > { %v2020_v11 = vsel %vm2019_vm10, %v6009_v39, %v2016_v57  ;;  %v5713_v57 = vld [vmem:[#allocation9 + $0x1ac] sm:$0xf]  ;;  %vm3592_vm10 = vcmp.ge.s32.totalorder %v500_v51, 64 }
 0x245   : > { %v2023_v36 = vmul.f32 1e-08, %v2020_v11  ;;  %v4900_v11 = vld [vmem:[#allocation9 + $0x188] sm:$0xf]  ;;  %v4921_v14 = vor.u32 %v5713_v57, %v4918_v2 }
 0x246   : > { %3314 = vmatpush.bf16.msra.mxu1 %v5105_v20  ;;  %v5709_v20 = vld [vmem:[#allocation9 + $0x18c] sm:$0xf]  ;;  %v5220_v57 = vld [vmem:[#allocation9 + $0x408] sm:$0xf] }
 0x247   : > { %v2026_v27 = vmax.f32 %v2023_v36, 1.0  ;;  %3353 = vmatpush.bf16.msrb.mxu0 %v4725_v24  ;;  %3392 = vmatpush.bf16.msrb.mxu3 %v5109_v29  ;;  %v5807_v36 = vld [vmem:[#allocation9 + $0x494] sm:$0xf0]  ;;  %v5800_v29 = vld [vmem:[#allocation9 + $0x464] sm:$0xf]  ;;  %v4905_v61 = vor.u32 %v5709_v20, %v4902_v21  ;;  %v4837_v20 = vor.u32 %v5695_v34, %v4836_v0 }
 0x248   : > { %v5285_v24 = vor.u32 %v5807_v36, %v5284_v18  ;;  %v5753_v18 = vld [vmem:[#allocation9 + $0x2ec] sm:$0xf]  ;;  %v5078_v36 = vld [vmem:[#allocation9 + $0x2f8] sm:$0xf0]  ;;  %v5012_v0 = vld [vmem:[#allocation9 + $0x268] sm:$0xf] }
 0x249   : > { %v2032_v12 = vmul.f32 %v2026_v27, %v6809_v25  ;;  %v2029_v32 = vmul.f32 %v2026_v27, %v6775_v5  ;;  %v4950_v25 = vld [vmem:[#allocation9 + $0x1f8] sm:$0xf0]  ;;  %v4949_v5 = vor.u32 %v5723_v26, %v4948_v42  ;;  %v4901_v27 = vor.u32 %v5711_v52, %v4900_v11  ;;  %v5796_v26 = vld [vmem:[#allocation9 + $0x444] sm:$0xf]  ;;  %v5460_v11 = vld [vmem:[#allocation9 + $0x5e8] sm:$0xf] }
 0x24a   : > { %3315 = vmatpush.bf16.msra.mxu1 %v5089_v56  ;;  %v4953_v46 = vor.u32 %v5721_v62, %v4950_v25  ;;  %v5265_v42 = vor.u32 %v5800_v29, %v5262_v7  ;;  %v4885_v56 = vor.u32 %v5707_v30, %v4884_v38  ;;  %v5703_v62 = vld [vmem:[#allocation9 + $0x154] sm:$0xf0]  ;;  %v5252_v25 = vld [vmem:[#allocation9 + $0x448] sm:$0xf]  ;;  %v5249_v23 = vor.u32 %v5796_v26, %v5246_v28 }
 0x24b   : > { %v6831_v4 = vpack.c.bf16 %v2032_v12, %v2032_v12  ;;  %v6833_v39 = vpack.c.bf16 %v2029_v32, %v2029_v32  ;;  %3354 = vmatpush.bf16.msrb.mxu0 %v4709_v40  ;;  %3393 = vmatpush.bf16.msrb.mxu3 %v5093_v50  ;;  %v5268_v12 = vld [vmem:[#allocation9 + $0x468] sm:$0xf]  ;;  %v5803_v32 = vld [vmem:[#allocation9 + $0x474] sm:$0xf0]  ;;  %v4889_v50 = vor.u32 %v5705_v33, %v4886_v44  ;;  %v5749_v44 = vld [vmem:[#allocation9 + $0x2cc] sm:$0xf] }
 0x24c   : > { %v5269_v40 = vor.u32 %v5803_v32, %v5268_v12  ;;  %v4869_v17 = vor.u32 %v5703_v62, %v4868_v41  ;;  %v5851_v52 = vld [vmem:[#allocation9 + $0x5f4] sm:$0xf0]  ;;  %v5077_v29 = vor.u32 %v5755_v10, %v5076_v6  ;;  %v5081_v38 = vor.u32 %v5753_v18, %v5078_v36  ;;  %v5444_v12 = vld [vmem:[#allocation9 + $0x5c8] sm:$0xf]  ;;  %v5833_v6 = vld [vmem:[#allocation9 + $0x56c] sm:$0xf] }
 0x24d   : > { %3225 = vmatmul.bf16.vlgmr.msra.gmra.mxu2 %v6833_v39  ;;  %3264 = vmatmul.bf16.vlgmr.msrb.gmra.mxu1 %v6831_v4  ;;  %v5461_v7 = vor.u32 %v5851_v52, %v5460_v11  ;;  %v5751_v30 = vld [vmem:[#allocation9 + $0x2d4] sm:$0xf0]  ;;  %v5398_v10 = vld [vmem:[#allocation9 + $0x578] sm:$0xf0]  ;;  %v4996_v18 = vld [vmem:[#allocation9 + $0x248] sm:$0xf] }
 0x24e   : > { %3303 = vmatmul.bf16.vlgmr.msra.gmra.mxu0 %v6833_v39  ;;  %3321 = vmatpush.bf16.msra.mxu2 %v5329_v45  ;;  %v5799_v45 = vld [vmem:[#allocation9 + $0x454] sm:$0xf0] }
 0x24f   : > { %3342 = vmatmul.bf16.vlgmr.msra.gmra.mxu3 %v6831_v4  ;;  %3360 = vmatpush.bf16.msrb.mxu1 %v4949_v5  ;;  %v5701_v5 = vld [vmem:[#allocation9 + $0x14c] sm:$0xf]  ;;  %v5253_v63 = vor.u32 %v5799_v45, %v5252_v25  ;;  %v5847_v33 = vld [vmem:[#allocation9 + $0x5d4] sm:$0xf0]  ;;  %v5428_v25 = vld [vmem:[#allocation9 + $0x5a8] sm:$0xf] }
 0x250   : > { %3399 = vmatpush.bf16.msra.mxu0 %v5333_v9  ;;  %3438 = vmatpush.bf16.msra.mxu3 %v4953_v46  ;;  %v4870_v9 = vld [vmem:[#allocation9 + $0x158] sm:$0xf0]  ;;  %v5792_v46 = vld [vmem:[#allocation9 + $0x424] sm:$0xf]  ;;  %v5445_v28 = vor.u32 %v5847_v33, %v5444_v12  ;;  %v5747_v62 = vld [vmem:[#allocation9 + $0x2b4] sm:$0xf0] }
 0x251   : > { %v4873_v48 = vor.u32 %v5701_v5, %v4870_v9  ;;  %v5233_v55 = vor.u32 %v5792_v46, %v5230_v43  ;;  %v5843_v5 = vld [vmem:[#allocation9 + $0x5b4] sm:$0xf0]  ;;  %v5745_v9 = vld [vmem:[#allocation9 + $0x2ac] sm:$0xf]  ;;  %v4980_v12 = vld [vmem:[#allocation9 + $0x228] sm:$0xf] }
 0x252   : > { %3322 = vmatpush.bf16.msra.mxu2 %v5313_v19  ;;  %v5795_v19 = vld [vmem:[#allocation9 + $0x434] sm:$0xf0]  ;;  %v5429_v43 = vor.u32 %v5843_v5, %v5428_v25  ;;  %v5364_v33 = vld [vmem:[#allocation9 + $0x528] sm:$0xf] }
 0x253   : > { %3361 = vmatpush.bf16.msrb.mxu1 %v4933_v53  ;;  %v5697_v53 = vld [vmem:[#allocation9 + $0x12c] sm:$0xf]  ;;  %v5237_v31 = vor.u32 %v5795_v19, %v5236_v13  ;;  %v5412_v13 = vld [vmem:[#allocation9 + $0x588] sm:$0xf]  ;;  %v5739_v34 = vld [vmem:[#allocation9 + $0x274] sm:$0xf0] }
 0x254   : > { %3400 = vmatpush.bf16.msra.mxu0 %v5317_v54  ;;  %3439 = vmatpush.bf16.msra.mxu3 %v4937_v59  ;;  %v4854_v54 = vld [vmem:[#allocation9 + $0x138] sm:$0xf0]  ;;  %v4853_v59 = vor.u32 %v5699_v49, %v4852_v47  ;;  %v5743_v49 = vld [vmem:[#allocation9 + $0x294] sm:$0xf0]  ;;  %v5013_v11 = vor.u32 %v5739_v34, %v5012_v0  ;;  %v5348_v5 = vld [vmem:[#allocation9 + $0x508] sm:$0xf] }
 0x255   : > { %v4857_v2 = vor.u32 %v5697_v53, %v4854_v54  ;;  %v5839_v53 = vld [vmem:[#allocation9 + $0x594] sm:$0xf0]  ;;  %v5741_v54 = vld [vmem:[#allocation9 + $0x28c] sm:$0xf]  ;;  %v5190_v0 = vld [vmem:[#allocation9 + $0x3d8] sm:$0xf0] }
 0x256   : > { %3323 = vmatpush.bf16.msra.mxu2 %v5297_v16  ;;  %v5791_v16 = vld [vmem:[#allocation9 + $0x414] sm:$0xf0] }
 0x257   : > { %3362 = vmatpush.bf16.msrb.mxu1 %v4917_v1  ;;  %v5693_v1 = vld [vmem:[#allocation9 + $0x10c] sm:$0xf]  ;;  %v5221_v21 = vor.u32 %v5791_v16, %v5220_v57  ;;  %v5396_v57 = vld [vmem:[#allocation9 + $0x568] sm:$0xf]  ;;  %v5835_v16 = vld [vmem:[#allocation9 + $0x574] sm:$0xf0] }
 0x258   : > { %3401 = vmatpush.bf16.msra.mxu0 %v5301_v58  ;;  %3440 = vmatpush.bf16.msra.mxu3 %v4921_v14  ;;  %v4838_v58 = vld [vmem:[#allocation9 + $0x118] sm:$0xf0]  ;;  %v5217_v14 = vor.u32 %v5788_v8, %v5214_v60  ;;  %v5837_v8 = vld [vmem:[#allocation9 + $0x58c] sm:$0xf]  ;;  %v5735_v36 = vld [vmem:[#allocation9 + $0x254] sm:$0xf0] }
 0x259   : > { %v5414_v60 = vld [vmem:[#allocation9 + $0x598] sm:$0xf0] }
 0x25a   : > { %3324 = vmatpush.bf16.msra.mxu2 %v5281_v22  ;;  %v5849_v22 = vld [vmem:[#allocation9 + $0x5ec] sm:$0xf] }
 0x25b   : > { %3363 = vmatpush.bf16.msrb.mxu1 %v4901_v27  ;;  %v5462_v27 = vld [vmem:[#allocation9 + $0x5f8] sm:$0xf0] }
 0x25c   : > { %3402 = vmatpush.bf16.msra.mxu0 %v5285_v24  ;;  %3441 = vmatpush.bf16.msra.mxu3 %v4905_v61  ;;  %v4841_v24 = vor.u32 %v5693_v1, %v4838_v58  ;;  %v5060_v61 = vld [vmem:[#allocation9 + $0x2c8] sm:$0xf]  ;;  %v5465_v32 = vor.u32 %v5849_v22, %v5462_v27  ;;  %v5737_v1 = vld [vmem:[#allocation9 + $0x26c] sm:$0xf]  ;;  %v5014_v58 = vld [vmem:[#allocation9 + $0x278] sm:$0xf0] }
 0x25d   : > { %3277 = vmatmul.bf16.vlgmr.msrb.gmra.mxu2 %v6796_v35  ;;  %3316 = vmatmul.bf16.vlgmr.msra.gmra.mxu1 %v6794_v37  ;;  %v5061_v26 = vor.u32 %v5751_v30, %v5060_v61  ;;  %v5017_v52 = vor.u32 %v5737_v1, %v5014_v58  ;;  %v5831_v22 = vld [vmem:[#allocation9 + $0x554] sm:$0xf0]  ;;  %v5733_v27 = vld [vmem:[#allocation9 + $0x24c] sm:$0xf]  ;;  %v5174_v58 = vld [vmem:[#allocation9 + $0x3b8] sm:$0xf0] }
 0x25e   : > { %3355 = vmatmul.bf16.vlgmr.msrb.gmra.mxu0 %v6796_v35  ;;  %3325 = vmatpush.bf16.msra.mxu2 %v5265_v42  ;;  %v5062_v42 = vld [vmem:[#allocation9 + $0x2d8] sm:$0xf0]  ;;  %v5777_v1 = vld [vmem:[#allocation9 + $0x3ac] sm:$0xf] }
 0x25f   : > { %3394 = vmatmul.bf16.vlgmr.msrb.gmra.mxu3 %v6794_v37  ;;  %3364 = vmatpush.bf16.msrb.mxu1 %v4885_v56  ;;  %v5845_v56 = vld [vmem:[#allocation9 + $0x5cc] sm:$0xf]  ;;  %v5065_v41 = vor.u32 %v5749_v44, %v5062_v42  ;;  %v5827_v42 = vld [vmem:[#allocation9 + $0x534] sm:$0xf0] }
 0x260   : > { %3403 = vmatpush.bf16.msra.mxu0 %v5269_v40  ;;  %3442 = vmatpush.bf16.msra.mxu3 %v4889_v50  ;;  %v5446_v40 = vld [vmem:[#allocation9 + $0x5d8] sm:$0xf0]  ;;  %v5044_v50 = vld [vmem:[#allocation9 + $0x2a8] sm:$0xf] }
 0x261   : > { %v5449_v45 = vor.u32 %v5845_v56, %v5446_v40  ;;  %v5045_v46 = vor.u32 %v5747_v62, %v5044_v50  ;;  %v5729_v56 = vld [vmem:[#allocation9 + $0x22c] sm:$0xf]  ;;  %v4982_v40 = vld [vmem:[#allocation9 + $0x238] sm:$0xf0]  ;;  %v4964_v50 = vld [vmem:[#allocation9 + $0x208] sm:$0xf]  ;;  %v5365_v62 = vor.u32 %v5827_v42, %v5364_v33 }
 0x262   : > { %3326 = vmatpush.bf16.msra.mxu2 %v5249_v23  ;;  %v5046_v23 = vld [vmem:[#allocation9 + $0x2b8] sm:$0xf0]  ;;  %v4985_v25 = vor.u32 %v5729_v56, %v4982_v40  ;;  %v5665_v42 = vld [vmem:[#allocation9 + $0x2c] sm:$0xf] }
 0x263   : > { %3365 = vmatpush.bf16.msrb.mxu1 %v4869_v17  ;;  %v5841_v17 = vld [vmem:[#allocation9 + $0x5ac] sm:$0xf]  ;;  %v5049_v47 = vor.u32 %v5745_v9, %v5046_v23  ;;  %v5823_v9 = vld [vmem:[#allocation9 + $0x514] sm:$0xf0]  ;;  %v4726_v56 = vld [vmem:[#allocation9 + $0x38] sm:$0xf0] }
 0x264   : > { %3404 = vmatpush.bf16.msra.mxu0 %v5253_v63  ;;  %3443 = vmatpush.bf16.msra.mxu3 %v4873_v48  ;;  %v5430_v63 = vld [vmem:[#allocation9 + $0x5b8] sm:$0xf0]  ;;  %v5028_v48 = vld [vmem:[#allocation9 + $0x288] sm:$0xf] }
 0x265   : > { %v5433_v19 = vor.u32 %v5841_v17, %v5430_v63  ;;  %v5725_v17 = vld [vmem:[#allocation9 + $0x20c] sm:$0xf]  ;;  %v4966_v63 = vld [vmem:[#allocation9 + $0x218] sm:$0xf0] }
 0x266   : > { %3327 = vmatpush.bf16.msra.mxu2 %v5233_v55  ;;  %v5030_v55 = vld [vmem:[#allocation9 + $0x298] sm:$0xf0] }
 0x267   : > { %3366 = vmatpush.bf16.msrb.mxu1 %v4853_v59  ;;  %v5029_v59 = vor.u32 %v5743_v49, %v5028_v48  ;;  %v4822_v48 = vld [vmem:[#allocation9 + $0xf8] sm:$0xf0] }
 0x268   : > { %3405 = vmatpush.bf16.msra.mxu0 %v5237_v31  ;;  %3444 = vmatpush.bf16.msra.mxu3 %v4857_v2  ;;  %v5033_v31 = vor.u32 %v5741_v54, %v5030_v55  ;;  %v5417_v2 = vor.u32 %v5837_v8, %v5414_v60  ;;  %v4969_v54 = vor.u32 %v5725_v17, %v4966_v63 }
 0x26a   : > { %3328 = vmatpush.bf16.msra.mxu2 %v5217_v14  ;;  %v5397_v14 = vor.u32 %v5835_v16, %v5396_v57  ;;  %v4790_v16 = vld [vmem:[#allocation9 + $0xb8] sm:$0xf0] }
 0x26b   : > { %3367 = vmatpush.bf16.msrb.mxu1 %v4837_v20  ;;  %v5380_v20 = vld [vmem:[#allocation9 + $0x548] sm:$0xf] }
 0x26c   : > { %3406 = vmatpush.bf16.msra.mxu0 %v5221_v21  ;;  %3445 = vmatpush.bf16.msra.mxu3 %v4841_v24  ;;  %v5401_v21 = vor.u32 %v5833_v6, %v5398_v10  ;;  %v4998_v24 = vld [vmem:[#allocation9 + $0x258] sm:$0xf0]  ;;  %v5381_v61 = vor.u32 %v5831_v22, %v5380_v20  ;;  %v5673_v22 = vld [vmem:[#allocation9 + $0x6c] sm:$0xf] }
 0x26d   : > { %3329 = vmatmul.bf16.vlgmr.msra.gmra.mxu2 %v6817_v15  ;;  %v5001_v30 = vor.u32 %v5733_v27, %v4998_v24  ;;  %v5769_v24 = vld [vmem:[#allocation9 + $0x36c] sm:$0xf] }
 0x26e   : > { %3373 = vmatpush.bf16.msrb.mxu2 %v5077_v29  ;;  %3368 = vmatmul.bf16.vlgmr.msrb.gmra.mxu1 %v6819_v3  ;;  %v5829_v29 = vld [vmem:[#allocation9 + $0x54c] sm:$0xf] }
 0x26f   : > { %3412 = vmatpush.bf16.msra.mxu1 %v5461_v7  ;;  %3407 = vmatmul.bf16.vlgmr.msra.gmra.mxu0 %v6817_v15  ;;  %v5382_v7 = vld [vmem:[#allocation9 + $0x558] sm:$0xf0] }
 0x270   : > { %3451 = vmatpush.bf16.msrb.mxu0 %v5081_v38  ;;  %3490 = vmatpush.bf16.msrb.mxu3 %v5465_v32  ;;  %v4997_v38 = vor.u32 %v5735_v36, %v4996_v18  ;;  %v5731_v32 = vld [vmem:[#allocation9 + $0x234] sm:$0xf0]  ;;  %v5385_v44 = vor.u32 %v5829_v29, %v5382_v7  ;;  %v5773_v18 = vld [vmem:[#allocation9 + $0x38c] sm:$0xf]  ;;  %v5158_v36 = vld [vmem:[#allocation9 + $0x398] sm:$0xf0] }
 0x271   : > { %3446 = vmatmul.bf16.vlgmr.msra.gmra.mxu3 %v6819_v3  ;;  %v5413_v3 = vor.u32 %v5839_v53, %v5412_v13  ;;  %v5785_v13 = vld [vmem:[#allocation9 + $0x3ec] sm:$0xf]  ;;  %v5349_v53 = vor.u32 %v5823_v9, %v5348_v5  ;;  %v5094_v5 = vld [vmem:[#allocation9 + $0x318] sm:$0xf0] }
 0x272   : > { %3374 = vmatpush.bf16.msrb.mxu2 %v5061_v26  ;;  %v5825_v26 = vld [vmem:[#allocation9 + $0x52c] sm:$0xf] }
 0x273   : > { %3413 = vmatpush.bf16.msra.mxu1 %v5445_v28  ;;  %v5366_v28 = vld [vmem:[#allocation9 + $0x538] sm:$0xf0]  ;;  %v5817_v9 = vld [vmem:[#allocation9 + $0x4ec] sm:$0xf] }
 0x274   : > { %3452 = vmatpush.bf16.msrb.mxu0 %v5065_v41  ;;  %3491 = vmatpush.bf16.msrb.mxu3 %v5449_v45  ;;  %v4981_v41 = vor.u32 %v5731_v32, %v4980_v12  ;;  %v5727_v45 = vld [vmem:[#allocation9 + $0x214] sm:$0xf0]  ;;  %v5369_v23 = vor.u32 %v5825_v26, %v5366_v28  ;;  %v5765_v12 = vld [vmem:[#allocation9 + $0x34c] sm:$0xf]  ;;  %v5126_v32 = vld [vmem:[#allocation9 + $0x358] sm:$0xf0] }
 0x275   : > { %v4965_v49 = vor.u32 %v5727_v45, %v4964_v50  ;;  %v5761_v26 = vld [vmem:[#allocation9 + $0x32c] sm:$0xf]  ;;  %v5110_v28 = vld [vmem:[#allocation9 + $0x338] sm:$0xf0] }
 0x276   : > { %3375 = vmatpush.bf16.msrb.mxu2 %v5045_v46  ;;  %v5821_v46 = vld [vmem:[#allocation9 + $0x50c] sm:$0xf]  ;;  %v5113_v50 = vor.u32 %v5761_v26, %v5110_v28 }
 0x277   : > { %3414 = vmatpush.bf16.msra.mxu1 %v5429_v43  ;;  %v5350_v43 = vld [vmem:[#allocation9 + $0x518] sm:$0xf0]  ;;  %v5757_v45 = vld [vmem:[#allocation9 + $0x30c] sm:$0xf] }
 0x278   : > { %3453 = vmatpush.bf16.msrb.mxu0 %v5049_v47  ;;  %3492 = vmatpush.bf16.msrb.mxu3 %v5433_v19  ;;  %v5689_v47 = vld [vmem:[#allocation9 + $0xec] sm:$0xf]  ;;  %v5206_v19 = vld [vmem:[#allocation9 + $0x3f8] sm:$0xf0]  ;;  %v5353_v55 = vor.u32 %v5821_v46, %v5350_v43  ;;  %v5097_v63 = vor.u32 %v5757_v45, %v5094_v5 }
 0x279   : > { %v4825_v8 = vor.u32 %v5689_v47, %v4822_v48  ;;  %v5209_v60 = vor.u32 %v5785_v13, %v5206_v19  ;;  %v5813_v43 = vld [vmem:[#allocation9 + $0x4cc] sm:$0xf]  ;;  %v5318_v47 = vld [vmem:[#allocation9 + $0x4d8] sm:$0xf0] }
 0x27a   : > { %3376 = vmatpush.bf16.msrb.mxu2 %v5029_v59  ;;  %v5685_v59 = vld [vmem:[#allocation9 + $0xcc] sm:$0xf]  ;;  %v5321_v48 = vor.u32 %v5813_v43, %v5318_v47  ;;  %v5302_v13 = vld [vmem:[#allocation9 + $0x4b8] sm:$0xf0] }
 0x27b   : > { %3415 = vmatpush.bf16.msra.mxu1 %v5413_v3  ;;  %v4806_v3 = vld [vmem:[#allocation9 + $0xd8] sm:$0xf0] }
 0x27c   : > { %3454 = vmatpush.bf16.msrb.mxu0 %v5033_v31  ;;  %3493 = vmatpush.bf16.msrb.mxu3 %v5417_v2  ;;  %v5781_v31 = vld [vmem:[#allocation9 + $0x3cc] sm:$0xf]  ;;  %v4809_v34 = vor.u32 %v5685_v59, %v4806_v3  ;;  %v5270_v3 = vld [vmem:[#allocation9 + $0x478] sm:$0xf0] }
 0x27d   : > { %v5193_v57 = vor.u32 %v5781_v31, %v5190_v0  ;;  %v5681_v2 = vld [vmem:[#allocation9 + $0xac] sm:$0xf] }
 0x27e   : > { %3377 = vmatpush.bf16.msrb.mxu2 %v5013_v11  ;;  %v4793_v6 = vor.u32 %v5681_v2, %v4790_v16  ;;  %v5177_v11 = vor.u32 %v5777_v1, %v5174_v58  ;;  %v5801_v59 = vld [vmem:[#allocation9 + $0x46c] sm:$0xf]  ;;  %v5254_v16 = vld [vmem:[#allocation9 + $0x458] sm:$0xf0] }
 0x27f   : > { %3416 = vmatpush.bf16.msra.mxu1 %v5397_v14  ;;  %v5677_v14 = vld [vmem:[#allocation9 + $0x8c] sm:$0xf]  ;;  %v5273_v0 = vor.u32 %v5801_v59, %v5270_v3  ;;  %v5238_v1 = vld [vmem:[#allocation9 + $0x438] sm:$0xf0] }
 0x280   : > { %3455 = vmatpush.bf16.msrb.mxu0 %v5017_v52  ;;  %3494 = vmatpush.bf16.msrb.mxu3 %v5401_v21  ;;  %v4774_v52 = vld [vmem:[#allocation9 + $0x98] sm:$0xf0]  ;;  %v5161_v21 = vor.u32 %v5773_v18, %v5158_v36  ;;  %v5797_v2 = vld [vmem:[#allocation9 + $0x44c] sm:$0xf] }
 0x281   : > { %v4777_v20 = vor.u32 %v5677_v14, %v4774_v52  ;;  %v5222_v14 = vld [vmem:[#allocation9 + $0x418] sm:$0xf0] }
 0x282   : > { %3378 = vmatpush.bf16.msrb.mxu2 %v4997_v38 }
 0x283   : > { %3417 = vmatpush.bf16.msra.mxu1 %v5381_v61  ;;  %v5669_v61 = vld [vmem:[#allocation9 + $0x4c] sm:$0xf] }
 0x284   : > { %3456 = vmatpush.bf16.msrb.mxu0 %v5001_v30  ;;  %3495 = vmatpush.bf16.msrb.mxu3 %v5385_v44  ;;  %v4742_v30 = vld [vmem:[#allocation9 + $0x58] sm:$0xf0]  ;;  %v5129_v44 = vor.u32 %v5765_v12, %v5126_v32 }
 0x285   : > { %v4745_v33 = vor.u32 %v5669_v61, %v4742_v30 }
 0x286   : > { %3379 = vmatpush.bf16.msrb.mxu2 %v4981_v41  ;;  %v4729_v41 = vor.u32 %v5665_v42, %v4726_v56 }
 0x287   : > { %3418 = vmatpush.bf16.msra.mxu1 %v5365_v62  ;;  %v5661_v62 = vld [vmem:[#allocation9 + $0xc] sm:$0xf] }
 0x288   : > { %3457 = vmatpush.bf16.msrb.mxu0 %v4985_v25  ;;  %3496 = vmatpush.bf16.msrb.mxu3 %v5369_v23  ;;  %v4710_v25 = vld [vmem:[#allocation9 + $0x18] sm:$0xf0] }
 0x289   : > { %v5334_v23 = vld [vmem:[#allocation9 + $0x4f8] sm:$0xf0]  ;;  %v4713_v17 = vor.u32 %v5661_v62, %v4710_v25 }
 0x28a   : > { %3380 = vmatpush.bf16.msrb.mxu2 %v4965_v49  ;;  %v6851_v10 = vpop.f32.mrf.mxu0  ;;  %v5337_v46 = vor.u32 %v5817_v9, %v5334_v23  ;;  %v5809_v49 = vld [vmem:[#allocation9 + $0x4ac] sm:$0xf] }
 0x28b   : > { %3419 = vmatpush.bf16.msra.mxu1 %v5349_v53  ;;  %v5305_v19 = vor.u32 %v5809_v49, %v5302_v13 }
 0x28c   : > { %3458 = vmatpush.bf16.msrb.mxu0 %v4969_v54  ;;  %3497 = vmatpush.bf16.msrb.mxu3 %v5353_v55  ;;  %v5805_v55 = vld [vmem:[#allocation9 + $0x48c] sm:$0xf] }
 0x28d   : > { %3381 = vmatmul.bf16.vlgmr.msrb.gmra.mxu2 %v6833_v39 }
 0x28e   : > { %3425 = vmatpush.bf16.msra.mxu2 %v4825_v8  ;;  %3420 = vmatmul.bf16.vlgmr.msra.gmra.mxu1 %v6831_v4  ;;  %v5286_v8 = vld [vmem:[#allocation9 + $0x498] sm:$0xf0] }
 0x28f   : > { %3464 = vmatpush.bf16.msrb.mxu1 %v5209_v60  ;;  %3459 = vmatmul.bf16.vlgmr.msrb.gmra.mxu0 %v6833_v39  ;;  %v4758_v39 = vld [vmem:[#allocation9 + $0x78] sm:$0xf0]  ;;  %v5289_v60 = vor.u32 %v5805_v55, %v5286_v8 }
 0x290   : > { %3498 = vmatmul.bf16.vlgmr.msrb.gmra.mxu3 %v6831_v4  ;;  %v6853_v27 = vpop.f32.mrf.mxu3  ;;  %v5142_v4 = vld [vmem:[#allocation9 + $0x378] sm:$0xf0]  ;;  %v4761_v29 = vor.u32 %v5673_v22, %v4758_v39 }
 0x291   : > { %v5145_v38 = vor.u32 %v5769_v24, %v5142_v4 }
 0x292   : > { %3426 = vmatpush.bf16.msra.mxu2 %v4809_v34  ;;  %v3202_v7 = vpop.f32.mrf.mxu0 }
 0x293   : > { %3465 = vmatpush.bf16.msrb.mxu1 %v5193_v57 }
 0x296   : > { %3427 = vmatpush.bf16.msra.mxu2 %v4793_v6 }
 0x297   : > { %3466 = vmatpush.bf16.msrb.mxu1 %v5177_v11  ;;  %v5789_v11 = vld [vmem:[#allocation9 + $0x40c] sm:$0xf] }
 0x298   : > { %v3241_v40 = vpop.f32.mrf.mxu3  ;;  %v5225_v52 = vor.u32 %v5789_v11, %v5222_v14 }
 0x29a   : > { %3428 = vmatpush.bf16.msra.mxu2 %v4777_v20 }
 0x29b   : > { %3467 = vmatpush.bf16.msrb.mxu1 %v5161_v21 }
 0x29e   : > { %3429 = vmatpush.bf16.msra.mxu2 %v4761_v29 }
 0x29f   : > { %3468 = vmatpush.bf16.msrb.mxu1 %v5145_v38 }
 0x2a2   : > { %3430 = vmatpush.bf16.msra.mxu2 %v4745_v33 }
 0x2a3   : > { %3469 = vmatpush.bf16.msrb.mxu1 %v5129_v44 }
 0x2a6   : > { %3431 = vmatpush.bf16.msra.mxu2 %v4729_v41 }
 0x2a7   : > { %3470 = vmatpush.bf16.msrb.mxu1 %v5113_v50 }
 0x2aa   : > { %3432 = vmatpush.bf16.msra.mxu2 %v4713_v17  ;;  %v3213_v53 = vpop.f32.mrf.mxu1  ;;  %v3252_v54 = vpop.f32.mrf.mxu0 }
 0x2ab   : > { %3471 = vmatpush.bf16.msrb.mxu1 %v5097_v63  ;;  %v3214_v20 = vadd.f32 %v3213_v53, %v6851_v10 }
 0x2ad   : > { %3433 = vmatmul.bf16.vlgmr.msra.gmra.mxu2 %v6796_v35  ;;  %v5257_v35 = vor.u32 %v5797_v2, %v5254_v16 }
 0x2ae   : > { %3477 = vmatpush.bf16.msrb.mxu2 %v5337_v46  ;;  %3472 = vmatmul.bf16.vlgmr.msrb.gmra.mxu1 %v6794_v37  ;;  %v5793_v37 = vld [vmem:[#allocation9 + $0x42c] sm:$0xf] }
 0x2af   : > { %v5241_v6 = vor.u32 %v5793_v37, %v5238_v1 }
 0x2b1   : > { %v3291_v31 = vpop.f32.mrf.mxu3 }
 0x2b2   : > { %3478 = vmatpush.bf16.msrb.mxu2 %v5321_v48  ;;  %v3215_v34 = vpop.f32.mrf.mxu1  ;;  %v3254_v57 = vpop.f32.mrf.mxu0 }
 0x2b6   : > { %3479 = vmatpush.bf16.msrb.mxu2 %v5305_v19 }
 0x2b9   : > { %v3293_v58 = vpop.f32.mrf.mxu3 }
 0x2ba   : > { %3480 = vmatpush.bf16.msrb.mxu2 %v5289_v60 }
 0x2be   : > { %3481 = vmatpush.bf16.msrb.mxu2 %v5273_v0 }
 0x2c2   : > { %3482 = vmatpush.bf16.msrb.mxu2 %v5257_v35 }
 0x2c6   : > { %3483 = vmatpush.bf16.msrb.mxu2 %v5241_v6 }
 0x2ca   : > { %3484 = vmatpush.bf16.msrb.mxu2 %v5225_v52  ;;  %v3265_v18 = vpop.f32.mrf.mxu1 }
 0x2cb   : > { %v3304_v36 = vpop.f32.mrf.mxu0 }
 0x2cd   : > { %3485 = vmatmul.bf16.vlgmr.msrb.gmra.mxu2 %v6817_v15 }
 0x2d0   : > { %v3226_v21 = vpop.f32.mrf.mxu2 }
 0x2d1   : > { %v3227_v22 = vadd.f32 %v3226_v21, %v3214_v20 }
 0x2d2   : > { %v3267_v39 = vpop.f32.mrf.mxu1  ;;  %v3343_v4 = vpop.f32.mrf.mxu3 }
 0x2d3   : > { %v3240_v24 = vadd.f32 %v6853_v27, %v3227_v22  ;;  %v3306_v29 = vpop.f32.mrf.mxu0 }
 0x2d5   : > { %v3253_v7 = vadd.f32 %v3252_v54, %v3240_v24 }
 0x2d7   : > { %v6860_v38 = vadd.f32 %v3265_v18, %v3253_v7 }
 0x2d8   : > { %v3228_v61 = vpop.f32.mrf.mxu2 }
 0x2d9   : > { %3530 = vst [vmem:[#allocation1] sm:$0xff] %v6860_v38 }
 0x2da   : > { %v3345_v30 = vpop.f32.mrf.mxu3  ;;  %v3317_v12 = vpop.f32.mrf.mxu1 }
 0x2db   : > { %v3356_v15 = vpop.f32.mrf.mxu0 }
 0x2e0   : > { %v3278_v32 = vpop.f32.mrf.mxu2 }
 0x2e1   : > { %v3292_v56 = vadd.f32 %v3291_v31, %v3278_v32 }
 0x2e2   : > { %v3395_v33 = vpop.f32.mrf.mxu3  ;;  %v3319_v44 = vpop.f32.mrf.mxu1 }
 0x2e3   : > { %v3358_v10 = vpop.f32.mrf.mxu0  ;;  %v3305_v26 = vadd.f32 %v3304_v36, %v3292_v56 }
 0x2e5   : > { %v3318_v41 = vadd.f32 %v3317_v12, %v3305_v26 }
 0x2e8   : > { %v3280_v42 = vpop.f32.mrf.mxu2 }
 0x2ea   : > { %v3397_v40 = vpop.f32.mrf.mxu3 }
 0x2eb   : > { %v3369_v27 = vpop.f32.mrf.mxu1 }
 0x2ec   : > { %v3408_v28 = vpop.f32.mrf.mxu0  ;;  %v3370_v43 = vadd.f32 %v3369_v27, %v3356_v15 }
 0x2f0   : > { %v3330_v50 = vpop.f32.mrf.mxu2 }
 0x2f1   : > { %v3331_v62 = vadd.f32 %v3330_v50, %v3318_v41 }
 0x2f3   : > { %v6863_v45 = vadd.f32 %v3343_v4, %v3331_v62  ;;  %v3371_v5 = vpop.f32.mrf.mxu1 }
 0x2f4   : > { %v3447_v25 = vpop.f32.mrf.mxu3  ;;  %v3410_v9 = vpop.f32.mrf.mxu0 }
 0x2f5   : > { %3531 = vst [vmem:[#allocation1 + $0x9] sm:$0xff] %v6863_v45  ;;  %v3516_v37 = vrot.slane %v6863_v45, 7 }
 0x2f7   : > { %v3519_v14 = vsel %vm7034_vm2, %v6860_v38, %v3516_v37  ;;  %vm3594_vm2 = vmand %vm3592_vm10, %vm3593_vm6  ;;  %vm6920_vm6 = vcmp.ge.s32.totalorder %v500_v51, 16  ;;  %vm7066_vm10 = vcmask 1042434  }
 0x2f8   : > { %v3332_v23 = vpop.f32.mrf.mxu2 }
 0x2fc   : > { %v3449_v17 = vpop.f32.mrf.mxu3 }
 0x30b   : > { %v3421_v63 = vpop.f32.mrf.mxu1 }
 0x30c   : > { %v3460_v46 = vpop.f32.mrf.mxu0 }
 0x310   : > { %v3382_v47 = vpop.f32.mrf.mxu2 }
 0x311   : > { %v3383_v48 = vadd.f32 %v3382_v47, %v3370_v43 }
 0x313   : > { %v3499_v49 = vpop.f32.mrf.mxu3  ;;  %v3396_v13 = vadd.f32 %v3395_v33, %v3383_v48  ;;  %v3423_v19 = vpop.f32.mrf.mxu1 }
 0x314   : > { %v3462_v53 = vpop.f32.mrf.mxu0 }
 0x315   : > { %v3409_v54 = vadd.f32 %v3408_v28, %v3396_v13 }
 0x317   : > { %v3422_v55 = vadd.f32 %v3421_v63, %v3409_v54 }
 0x318   : > { %v3384_v8 = vpop.f32.mrf.mxu2 }
 0x319   : > { %3532 = vst [vmem:[#allocation1 + $0x12] sm:$0xff] %v3422_v55  ;;  %v3517_v58 = vrot.slane %v3422_v55, 6 }
 0x31b   : > { %v3501_v60 = vpop.f32.mrf.mxu3 }
 0x32b   : > { %v3473_v59 = vpop.f32.mrf.mxu1 }
 0x330   : > { %v3434_v3 = vpop.f32.mrf.mxu2 }
 0x331   : > { %v3448_v34 = vadd.f32 %v3447_v25, %v3434_v3 }
 0x333   : > { %v3475_v31 = vpop.f32.mrf.mxu1  ;;  %v3461_v57 = vadd.f32 %v3460_v46, %v3448_v34 }
 0x335   : > { %v3474_v2 = vadd.f32 %v3473_v59, %v3461_v57 }
 0x338   : > { %v3436_v0 = vpop.f32.mrf.mxu2 }
 0x350   : > { %v3486_v16 = vpop.f32.mrf.mxu2 }
 0x351   : > { %v3487_v35 = vadd.f32 %v3486_v16, %v3474_v2 }
 0x353   : > { %v3500_v1 = vadd.f32 %v3499_v49, %v3487_v35  ;;  %v6948_v35 = vld [vmem:[#allocation3] sm:$0xf] }
 0x355   : > { %v3518_v6 = vrot.slane %v3500_v1, 5  ;;  %3533 = vst [vmem:[#allocation1 + $0x1b] sm:$0xff] %v3500_v1 }
 0x357   : > { %v3521_v52 = vsel %vm7033_vm12, %v3517_v58, %v3518_v6  ;;  %vm3559_vm12 = vcmp.lt.s32.totalorder %v500_v51, 544 }
 0x358   : > { %v3488_v18 = vpop.f32.mrf.mxu2  ;;  %v3522_v36 = vsel %vm7032_vm4, %v3519_v14, %v3521_v52  ;;  %vm3558_vm4 = vcmp.ge.s32.totalorder %v500_v51, 32 }
 0x359   : > { %3528 = vst.msk [vmem:[#allocation2] ss:$8 sm:$0xf] %vm6868_vm13, %v3522_v36  ;;  %vm3560_vm15 = vmand %vm3558_vm4, %vm3559_vm12  ;;  %vm6910_vm4 = vcmp.ge.s32.totalorder %v500_v51, 48  ;;  %vm3627_vm12 = vcmp.lt.s32.totalorder %v500_v51, 608  ;;  %v3714_v18 = vperm.slane %v6948_v35, 0 }
 0x35a   : > { %v3715_v36 = vperm.slane %v6948_v35, 1 }
 0x35c   : > { %v3535_v20 = vld [vmem:[#allocation1 + $0x1] ss:$9 sm:$0xff] }
 0x35d   : > { %3547 = vst [vmem:[#allocation1] sm:$0xff] %v6860_v38  ;;  %3536 = vrot.lane.b32.xlu2 %v3535_v20, %s6275_s7 }
 0x35e   : > { %3548 = vst [vmem:[#allocation1 + $0x9] sm:$0xff] %v6863_v45 }
 0x35f   : > { %3549 = vst [vmem:[#allocation1 + $0x12] sm:$0xff] %v3422_v55 }
 0x360   : > { %3550 = vst [vmem:[#allocation1 + $0x1b] sm:$0xff] %v3500_v1 }
 0x367   : > { %v3552_v21 = vld [vmem:[#allocation1 + $0x2] ss:$9 sm:$0xff] }
 0x368   : > { %3564 = vst [vmem:[#allocation1] sm:$0xff] %v6860_v38  ;;  %3553 = vrot.lane.b32.xlu0 %v3552_v21, %s6274_s20 }
 0x369   : > { %3565 = vst [vmem:[#allocation1 + $0x9] sm:$0xff] %v6863_v45 }
 0x36a   : > { %3566 = vst [vmem:[#allocation1 + $0x12] sm:$0xff] %v3422_v55 }
 0x36b   : > { %3567 = vst [vmem:[#allocation1 + $0x1b] sm:$0xff] %v3500_v1 }
 0x372   : > { %v3569_v22 = vld [vmem:[#allocation1 + $0x3] ss:$9 sm:$0xff] }
 0x373   : > { %3581 = vst [vmem:[#allocation1] sm:$0xff] %v6860_v38  ;;  %3570 = vrot.lane.b32.xlu1 %v3569_v22, %s6273_s2 }
 0x374   : > { %3582 = vst [vmem:[#allocation1 + $0x9] sm:$0xff] %v6863_v45 }
 0x375   : > { %3583 = vst [vmem:[#allocation1 + $0x12] sm:$0xff] %v3422_v55 }
 0x376   : > { %3584 = vst [vmem:[#allocation1 + $0x1b] sm:$0xff] %v3500_v1 }
 0x37d   : > { %v3586_v39 = vld [vmem:[#allocation1 + $0x4] ss:$9 sm:$0xff] }
 0x37e   : > { %3601 = vst [vmem:[#allocation1 + $0x1b] sm:$0xff] %v3500_v1  ;;  %3587 = vrot.lane.b32.xlu2 %v3586_v39, %s6272_s9 }
 0x37f   : > { %3598 = vst [vmem:[#allocation1] sm:$0xff] %v6860_v38 }
 0x380   : > { %3599 = vst [vmem:[#allocation1 + $0x9] sm:$0xff] %v6863_v45 }
 0x381   : > { %3600 = vst [vmem:[#allocation1 + $0x12] sm:$0xff] %v3422_v55 }
 0x388   : > { %v3603_v24 = vld [vmem:[#allocation1 + $0x5] ss:$9 sm:$0xff] }
 0x389   : > { %3604 = vrot.lane.b32.xlu0 %v3603_v24, %s6271_s1  ;;  %3615 = vst [vmem:[#allocation1] sm:$0xff] %v6860_v38  ;;  %s6150_s1 = scalar_lea.hbm %s7024_s4, 20 }
 0x38a   : > { %3616 = vst [vmem:[#allocation1 + $0x9] sm:$0xff] %v6863_v45 }
 0x38b   : > { %3617 = vst [vmem:[#allocation1 + $0x12] sm:$0xff] %v3422_v55 }
 0x38c   : > { %3618 = vst [vmem:[#allocation1 + $0x1b] sm:$0xff] %v3500_v1 }
 0x393   : > { %v3620_v4 = vld [vmem:[#allocation1 + $0x6] ss:$9 sm:$0xff] }
 0x394   : > { %3621 = vrot.lane.b32.xlu1 %v3620_v4, %s6270_s6  ;;  %3632 = vst [vmem:[#allocation1] sm:$0xff] %v6860_v38 }
 0x395   : > { %3633 = vst [vmem:[#allocation1 + $0x9] sm:$0xff] %v6863_v45 }
 0x396   : > { %3634 = vst [vmem:[#allocation1 + $0x12] sm:$0xff] %v3422_v55 }
 0x397   : > { %3635 = vst [vmem:[#allocation1 + $0x1b] sm:$0xff] %v3500_v1 }
 0x39e   : > { %v3637_v29 = vld [vmem:[#allocation1 + $0x7] ss:$9 sm:$0xff] }
 0x39f   : > { %3638 = vrot.lane.b32.xlu2 %v3637_v29, %s6269_s27 }
 0x3b7   : > { %v3537_v7 = vpop.permute.xlu2 %3536 }
 0x3b8   : > { %v3538_v61 = vrot.slane %v3537_v7, 7 }
 0x3ba   : > { %v3539_v30 = vsel %vm455_vm14, %v3538_v61, %v3537_v7  ;;  %vm3575_vm14 = vcmp.ge.s32.totalorder %v500_v51, 112 }
 0x3bb   : > { %3545 = vst.msk [vmem:[#allocation2 + $0x1] ss:$8 sm:$0xf] %vm3543_vm9, %v3539_v30 }
 0x3bc   : > { %3546 = vst.msk [vmem:[#allocation2 + $0x1] ss:$8 sm:$0x10] %vm3543_vm9, %v3539_v30  ;;  %vm3577_vm9 = vmand %vm3575_vm14, %vm3576_vm0  ;;  %v3716_v30 = vperm.slane %v6948_v35, 2  ;;  %vm3766_vm14 = vcmask 1043459   ;;  %vm7068_vm0 = vcmask 1041408  }
 0x3c2   : > { %v3649_v45 = vld [vmem:[#allocation2] sm:$0xff] }
 0x3c3   : > { %v3658_v46 = vrot.slane %v3649_v45, 4 }
 0x3c5   : > { %v3659_v48 = vadd.f32 %v3658_v46, %v3649_v45 }
 0x3c7   : > { %v3660_v55 = vrot.slane %v3659_v48, 2 }
 0x3c9   : > { %v3661_v0 = vadd.f32 %v3660_v55, %v3659_v48 }
 0x3cb   : > { %v3662_v16 = vrot.slane %v3661_v0, 1 }
 0x3cd   : > { %v3663_v22 = vadd.f32 %v3662_v16, %v3661_v0 }
 0x3cf   : > { %v3722_v46 = vadd.f32 %v3714_v18, %v3663_v22 }
 0x3d8   : > { %v3588_v38 = vpop.permute.xlu2 %3587 }
 0x3d9   : > { %v3589_v12 = vrot.slane %v3588_v38, 7 }
 0x3da   : > { %v3554_v15 = vpop.permute.xlu0 %3553 }
 0x3db   : > { %v3590_v32 = vsel %vm395_vm7, %v3589_v12, %v3588_v38  ;;  %v3555_v33 = vrot.slane %v3554_v15, 7  ;;  %vm6925_vm7 = vcmp.lt.s32.totalorder %v500_v51, 528  ;;  %v3738_v38 = vld [vmem:[%s274_s26] sm:$0x1f]  ;;  %s6144_s26 = sshra.s32 %s3791_s30, 4  ;;  %s6145_s26 = int_to_ptr.hbm [resolvable:$true] %s6144_s26 }
 0x3dc   : > { %3596 = vst.msk [vmem:[#allocation2 + $0x14] ss:$8 sm:$0xf] %vm3594_vm2, %v3590_v32  ;;  %v3740_v28 = vperm.slane %v3738_v38, 0  ;;  %v3744_v13 = vperm.slane %v3738_v38, 4  ;;  %s6146_s11 = scalar_lea.hbm %s6145_s26, 5  ;;  %p6151_p13 = scmp.lt.s32.totalorder %s6145_s26, %s7024_s4 }
 0x3dd   : > { %3597 = vst.msk [vmem:[#allocation2 + $0x14] ss:$8 sm:$0x10] %vm3594_vm2, %v3590_v32  ;;  %v3556_v44 = vsel %vm434_vm11, %v3555_v33, %v3554_v15  ;;  %vm6915_vm2 = vcmp.lt.s32.totalorder %v500_v51, 560  ;;  %vm3611_vm11 = vmand %vm6920_vm6, %vm6925_vm7  ;;  %p6147_p1 = scmp.ne.s32.totalorder %s6145_s26, %s6146_s11  ;;  %p6152_p9 = scmp.lt.s32.totalorder %s6150_s1, %s6146_s11 }
 0x3de   : > { %3562 = vst.msk [vmem:[#allocation2 + $0xa] ss:$8 sm:$0xf] %vm3560_vm15, %v3556_v44 }
 0x3df   : > { %3563 = vst.msk [vmem:[#allocation2 + $0xa] ss:$8 sm:$0x10] %vm3560_vm15, %v3556_v44  ;;  %p6148_p8 = pnand %p6147_p1, %p6422_p4  ;;  %p6153_p7 = por %p6152_p9, %p6151_p13 }
 0x3e1   : > { %p6149_p12 = pneg %p6148_p8 }
 0x3e3   : > { %p6154_p10 = pnand %p6153_p7, %p6149_p12 }
 0x3e5   : > { %v3571_v10 = vpop.permute.xlu1 %3570 }
 0x3e6   : > { %v3572_v42 = vrot.slane %v3571_v10, 7 }
 0x3e8   : > { %v3573_v56 = vsel %vm415_vm8, %v3572_v42, %v3571_v10  ;;  %vm3645_vm8 = vmand %vm6910_vm4, %vm6915_vm2  ;;  %vm7070_vm2 = vcmask 1042432  }
 0x3e9   : > { %3579 = vst.msk [vmem:[#allocation2 + $0xb] ss:$8 sm:$0xf] %vm3577_vm9, %v3573_v56  ;;  %vm7069_vm4 = vmmov %vm7068_vm0 }
 0x3ea   : > { %3580 = vst.msk [vmem:[#allocation2 + $0xb] ss:$8 sm:$0x10] %vm3577_vm9, %v3573_v56  ;;  %v3741_v56 = vperm.slane %v3738_v38, 1  ;;  %vm3770_vm9 = vcmp.lt.s32.totalorder %v500_v51, 640 }
 0x3f0   : > { %v3650_v62 = vld [vmem:[#allocation2 + $0x8] sm:$0xff]  ;;  %v3651_v23 = vld [vmem:[#allocation2 + $0x10] sm:$0xff] }
 0x3f1   : > { %v3664_v17 = vrot.slane %v3650_v62, 4  ;;  %v3670_v43 = vrot.slane %v3651_v23, 4 }
 0x3f3   : > { %v3665_v47 = vadd.f32 %v3664_v17, %v3650_v62  ;;  %v3671_v19 = vadd.f32 %v3670_v43, %v3651_v23 }
 0x3f5   : > { %v3666_v53 = vrot.slane %v3665_v47, 2  ;;  %v3672_v59 = vrot.slane %v3671_v19, 2 }
 0x3f7   : > { %v3667_v31 = vadd.f32 %v3666_v53, %v3665_v47  ;;  %v3673_v57 = vadd.f32 %v3672_v59, %v3671_v19  ;;  %v3743_v59 = vperm.slane %v3738_v38, 3 }
 0x3f9   : > { %v3639_v27 = vpop.permute.xlu2 %3638  ;;  %v3668_v2 = vrot.slane %v3667_v31, 1  ;;  %v3674_v1 = vrot.slane %v3673_v57, 1 }
 0x3fa   : > { %v3640_v50 = vrot.slane %v3639_v27, 7 }
 0x3fb   : > { %v3605_v25 = vpop.permute.xlu0 %3604  ;;  %v3669_v52 = vadd.f32 %v3668_v2, %v3667_v31  ;;  %v3675_v12 = vadd.f32 %v3674_v1, %v3673_v57  ;;  %v3750_v2 = vmul.f32 %v3740_v28, %v3722_v46 }
 0x3fc   : > { %v3641_v5 = vsel %vm336_vm1, %v3640_v50, %v3639_v27  ;;  %v3606_v9 = vrot.slane %v3605_v25, 7  ;;  %vm6940_vm1 = vcmp.ge.s32.totalorder %v500_v51, 96 }
 0x3fd   : > { %3648 = vst.msk [vmem:[#allocation2 + $0x27] ss:$8 sm:$0x10] %vm3645_vm8, %v3641_v5  ;;  %v3723_v42 = vadd.f32 %v3715_v36, %v3669_v52  ;;  %v3724_v23 = vadd.f32 %v3716_v30, %v3675_v12 }
 0x3fe   : > { %3647 = vst.msk [vmem:[#allocation2 + $0x27] ss:$8 sm:$0xf] %vm3645_vm8, %v3641_v5  ;;  %v3607_v63 = vsel %vm375_vm5, %v3606_v9, %v3605_v25  ;;  %vm3628_vm5 = vmand %vm6940_vm1, %vm3627_vm12  ;;  %v3742_v25 = vperm.slane %v3738_v38, 2 }
 0x3ff   : > { %3613 = vst.msk [vmem:[#allocation2 + $0x1d] ss:$8 sm:$0xf] %vm3611_vm11, %v3607_v63  ;;  %v3751_v43 = vmul.f32 %v3741_v56, %v3723_v42 }
 0x400   : > { %3614 = vst.msk [vmem:[#allocation2 + $0x1d] ss:$8 sm:$0x10] %vm3611_vm11, %v3607_v63 }
 0x404   : > { %v3657_v49 = vld [vmem:[#allocation2 + $0x40] sm:$0xff] }
 0x405   : > { %v3706_v8 = vrot.slane %v3657_v49, 4 }
 0x406   : > { %v3622_v54 = vpop.permute.xlu1 %3621 }
 0x407   : > { %v3623_v60 = vrot.slane %v3622_v54, 7  ;;  %v3707_v34 = vadd.f32 %v3706_v8, %v3657_v49  ;;  %v3717_v49 = vperm.slane %v6948_v35, 3 }
 0x409   : > { %v3624_v3 = vsel %vm356_vm3, %v3623_v60, %v3622_v54  ;;  %v3708_v37 = vrot.slane %v3707_v34, 2  ;;  %vm7065_vm3 = vcmask 1040384  }
 0x40a   : > { %3630 = vst.msk [vmem:[#allocation2 + $0x1e] ss:$8 sm:$0xf] %vm3628_vm5, %v3624_v3  ;;  %vm7067_vm15 = vmmov %vm7065_vm3 }
 0x40b   : > { %3631 = vst.msk [vmem:[#allocation2 + $0x1e] ss:$8 sm:$0x10] %vm3628_vm5, %v3624_v3  ;;  %v3709_v29 = vadd.f32 %v3708_v37, %v3707_v34  ;;  %v3752_v3 = vmul.f32 %v3742_v25, %v3724_v23  ;;  %v3760_v34 = vrot.slane %v3751_v43, 7 }
 0x40d   : > { %v3710_v62 = vrot.slane %v3709_v29, 1  ;;  %v3764_v36 = vsel %vm7067_vm15, %v3750_v2, %v3760_v34 }
 0x40f   : > { %v3711_v55 = vadd.f32 %v3710_v62, %v3709_v29 }
 0x411   : > { %v3652_v58 = vld [vmem:[#allocation2 + $0x18] sm:$0xff]  ;;  %v3653_v6 = vld [vmem:[#allocation2 + $0x20] sm:$0xff]  ;;  %v3654_v14 = vld [vmem:[#allocation2 + $0x28] sm:$0xff] }
 0x412   : > { %v3656_v20 = vld [vmem:[#allocation2 + $0x38] sm:$0xff]  ;;  %v3655_v21 = vld [vmem:[#allocation2 + $0x30] sm:$0xff]  ;;  %v3676_v39 = vrot.slane %v3652_v58, 4  ;;  %v3682_v24 = vrot.slane %v3653_v6, 4  ;;  %v3688_v4 = vrot.slane %v3654_v14, 4 }
 0x413   : > { %v3700_v7 = vrot.slane %v3656_v20, 4  ;;  %v3694_v61 = vrot.slane %v3655_v21, 4 }
 0x414   : > { %v3677_v15 = vadd.f32 %v3676_v39, %v3652_v58  ;;  %v3683_v32 = vadd.f32 %v3682_v24, %v3653_v6  ;;  %v3689_v33 = vadd.f32 %v3688_v4, %v3654_v14  ;;  %v3732_v58 = vrot.slane %v3711_v55, 5 }
 0x415   : > { %v3701_v44 = vadd.f32 %v3700_v7, %v3656_v20  ;;  %v3695_v10 = vadd.f32 %v3694_v61, %v3655_v21  ;;  %v3761_v14 = vrot.slane %v3752_v3, 6 }
 0x416   : > { %v3678_v40 = vrot.slane %v3677_v15, 2  ;;  %v3684_v26 = vrot.slane %v3683_v32, 2  ;;  %v3690_v27 = vrot.slane %v3689_v33, 2 }
 0x417   : > { %v3702_v41 = vrot.slane %v3701_v44, 2  ;;  %v3696_v50 = vrot.slane %v3695_v10, 2  ;;  %v3765_v39 = vsel %vm7069_vm4, %v3764_v36, %v3761_v14 }
 0x418   : > { %v3679_v45 = vadd.f32 %v3678_v40, %v3677_v15  ;;  %v3685_v5 = vadd.f32 %v3684_v26, %v3683_v32  ;;  %v3691_v9 = vadd.f32 %v3690_v27, %v3689_v33 }
 0x419   : > { %v3703_v17 = vadd.f32 %v3702_v41, %v3701_v44  ;;  %v3697_v63 = vadd.f32 %v3696_v50, %v3695_v10 }
 0x41a   : > { %v3680_v47 = vrot.slane %v3679_v45, 1  ;;  %v3686_v48 = vrot.slane %v3685_v5, 1  ;;  %v3692_v19 = vrot.slane %v3691_v9, 1 }
 0x41b   : > { %v3698_v53 = vrot.slane %v3697_v63, 1  ;;  %v3704_v54 = vrot.slane %v3703_v17, 1 }
 0x41c   : > { %v3681_v8 = vadd.f32 %v3680_v47, %v3679_v45  ;;  %v3687_v60 = vadd.f32 %v3686_v48, %v3685_v5  ;;  %v3693_v35 = vadd.f32 %v3692_v19, %v3691_v9 }
 0x41d   : > { %v3699_v31 = vadd.f32 %v3698_v53, %v3697_v63  ;;  %v3705_v0 = vadd.f32 %v3704_v54, %v3703_v17 }
 0x41e   : > { %v3725_v57 = vadd.f32 %v3717_v49, %v3681_v8  ;;  %v3754_v16 = vmul.f32 %v3744_v13, %v3687_v60 }
 0x41f   : > { %v3730_v37 = vrot.slane %v3699_v31, 7  ;;  %v3731_v1 = vrot.slane %v3705_v0, 6 }
 0x420   : > { %v3753_v6 = vmul.f32 %v3743_v59, %v3725_v57  ;;  %v3763_v22 = vrot.slane %v3754_v16, 4 }
 0x421   : > { %v3733_v52 = vsel %vm7065_vm3, %v3693_v35, %v3730_v37  ;;  %v3734_v18 = vsel %vm7066_vm10, %v3731_v1, %v3732_v58 }
 0x422   : > { %v3735_v20 = vsel %vm7068_vm0, %v3733_v52, %v3734_v18  ;;  %v3762_v21 = vrot.slane %v3753_v6, 5 }
 0x423   : > { %3737 = vst.msk [vmem:[#allocation3] sm:$0xf] %vm6868_vm13, %v3735_v20 }
 0x424   : > { %v3767_v24 = vsel %vm3766_vm14, %v3762_v21, %v3763_v22 }
 0x425   : > { %v3768_v4 = vsel %vm7070_vm2, %v3765_v39, %v3767_v24 }
 0x426   : > { %3772 = vst.msk [vmem:[%s6495_s8] sm:$0x1f] %vm3770_vm9, %v3768_v4 }
 0x427   : > { %6157 = shalt.err (!%p6154_p10)
}
 0x428   : > { %5874 = dma.vmem_to_hbm [thread:$0]  (%p6422_p4), %s3789_s5, 80, %s3791_s30, %s3774_s10  }
 0x429 PF: > { %s7071_s29 = sld [smem:[#allocation17_spill]]  ;;  %p5899_p11 = scmp.ge.s32.totalorder %s6260_s25, 2 }
 0x42b   : > { %p5891_p0 = pnand %p5899_p11, %p6426_p6 }
 0x42d   : > { %p5892_p2 = pneg %p5891_p0 }
 0x42f   : > { %s3802_s20 = sand.u32 1, %s7071_s29  }
 0x430   : > { %s3803_s7 = scalar_lea.sflag [#allocation6], %s3802_s20 }
 0x431   : > { %6215 = dma.done.wait (%p5892_p2), %s3803_s7, 80  }
 0x432   : > { %6217 = vsyncadd (%p5892_p2), %s3803_s7, 4294967216  ;;  %s24_s25 = sadd.s32 1, %s6260_s25   ;;  %s7073_s14 = sld [smem:[#allocation18_spill]] }
 0x433   : > { %p21_p5 = scmp.ge.s32.totalorder %s24_s25, 6   ;;  %s7074_s20 = sld [smem:[#allocation23_spill]] }
 0x434   : > { %s7075_s22 = sld [smem:[#allocation19_spill]]  ;;  %s7078_s15 = smov %s6224_s16 }
 0x435   : > { %s7076_s28 = sld [smem:[#allocation20_spill]]  ;;  %s7079_s16 = smov %s6228_s17 }
 0x436   : > { %s7077_s24 = sld [smem:[#allocation21_spill]]  ;;  %s7080_s17 = smov %s6448_s18 }
 0x437   : > { %s7081_s18 = smov %s6236_s19  ;;  %s7083_s21 = smov %s6252_s23 }
 0x438   : > { %s7082_s19 = smov %s7073_s14  ;;  %23 = sbr.rel (!%p21_p5) target bundleno = 15 (0xf), region = 120 }
 0x43b   : > { %s7084_s23 = smov %s7076_s28 }
 0x43d   :  { %3809 = vsyncpa [#allocation5], 1 }
 0x43e   :  { %3811 = vsyncpa [#allocation5 + $0x1], 1 }
 0x43f   :  { %3812 = vsyncpa [#allocation8], 1 }
 0x440   :  { %3813 = vsyncpa [#allocation11], 1 }
 0x441   :  { %3815 = vsyncpa [#allocation11 + $0x1], 1 }
 0x442   :  { %3816 = vsyncpa [#allocation6], 1 }
 0x443   :  { %3818 = vsyncpa [#allocation6 + $0x1], 1 }

</bundles_post_ra>
